<compile_context>
chip_gen: v7x
topology: tpu7x:2x2x1
jax: 0.10.0
libtpu: 0.0.40
codegen_flags: <defaults>
</compile_context>

<pallas_src>
import functools

import jax
import jax.numpy as jnp
from jax.experimental import pallas as pl
from jax.experimental.pallas import tpu as pltpu

_BN_EPS = 1e-5
_VMEM_LIMIT = 32 * 1024 * 1024


def _round_up(x, m):
    return ((x + m - 1) // m) * m


def _largest_divisor_leq(n, cap):
    for d in range(min(cap, n), 0, -1):
        if n % d == 0:
            return d
    return n


# ---------------------------------------------------------------------------
# Conv layer = fused matmul: relu((patches @ w) * bn_scale + bias)
# Full (padded) K resident in VMEM -> single K step; grid = 2 blocks over M.
# ---------------------------------------------------------------------------
def _conv_matmul_kernel(a_ref, b_ref, scale_ref, bias_ref, o_ref):
    y = jnp.dot(a_ref[...], b_ref[...], preferred_element_type=jnp.float32)
    y = y * scale_ref[...] + bias_ref[...]
    y = jnp.maximum(y, 0.0)
    o_ref[...] = y.astype(o_ref.dtype)


def conv_matmul(patches, w_p, scale_p, bias_p):
    """patches: (M, Kp) bf16 (K pre-padded); w_p: (Kp, Np) bf16; scale/bias: (1, Np) f32."""
    M, Kp = patches.shape
    Kp_w, Np = w_p.shape
    assert Kp == Kp_w, (Kp, Kp_w)

    # Exactly two M blocks per layer: minimal per-grid-step overhead while
    # still giving both v7x TensorCores a block (no effect on v5e/v6e).
    if M % 2 == 0 and (M // 2) % 8 == 0:
        tm = M // 2
    else:
        tm = M
    grid_m = M // tm

    flops = 2 * M * Kp * Np
    bytes_accessed = (M * Kp + Kp * Np + M * Np) * 2 + 2 * Np * 4

    return pl.pallas_call(
        _conv_matmul_kernel,
        out_shape=jax.ShapeDtypeStruct((M, Np), jnp.bfloat16),
        grid_spec=pltpu.PrefetchScalarGridSpec(
            num_scalar_prefetch=0,
            grid=(grid_m,),
            in_specs=[
                pl.BlockSpec((tm, Kp), lambda i: (i, 0)),
                pl.BlockSpec((Kp, Np), lambda i: (0, 0)),
                pl.BlockSpec((1, Np), lambda i: (0, 0)),
                pl.BlockSpec((1, Np), lambda i: (0, 0)),
            ],
            out_specs=pl.BlockSpec((tm, Np), lambda i: (i, 0)),
        ),
        compiler_params=pltpu.CompilerParams(
            dimension_semantics=("parallel",),
            vmem_limit_bytes=_VMEM_LIMIT),
        cost_estimate=pl.CostEstimate(
            flops=flops, transcendentals=0, bytes_accessed=bytes_accessed),
    )(patches, w_p, scale_p, bias_p)


# ---------------------------------------------------------------------------
# fc1 + relu + fc2 fused into one kernel.
# Grid over the fc1 reduction dim K; in the last K step the ReLU'd hidden
# activations feed straight into the fc2 matmul (padded to 128 cols).
# ---------------------------------------------------------------------------
def _fc_fused_kernel(a_ref, w1_ref, b1_ref, w2_ref, b2_ref, o_ref, acc_ref):
    k = pl.program_id(0)

    @pl.when(k == 0)
    def _():
        acc_ref[...] = jnp.zeros_like(acc_ref)

    acc_ref[...] += jnp.dot(a_ref[...], w1_ref[...],
                            preferred_element_type=jnp.float32)

    @pl.when(k == pl.num_programs(0) - 1)
    def _():
        h = jnp.maximum(acc_ref[...] + b1_ref[...], 0.0)
        out = jnp.dot(h.astype(w2_ref.dtype), w2_ref[...],
                      preferred_element_type=jnp.float32) + b2_ref[...]
        o_ref[...] = out


def fc_forward(x_flat, w1_p, b1_p, w2_p, b2_p):
    """x_flat: (M, K) bf16; w1_p: (Kp, N1p) bf16; w2_p: (N1p, N2p) bf16."""
    M, K = x_flat.shape
    Kp, N1p = w1_p.shape
    _, N2p = w2_p.shape

    Mp = max(_round_up(M, 16), 16)
    # Largest divisor of Kp <= 2048: the fc1 weight double-buffer stays
    # <= 8 MiB even for non-power-of-two Kp (safe for v7x's smaller VMEM).
    tk = _largest_divisor_leq(Kp, 2048)
    if Mp != M or Kp != K:
        x_flat = jnp.pad(x_flat, ((0, Mp - M), (0, Kp - K)))

    flops = 2 * Mp * Kp * N1p + 2 * Mp * N1p * N2p
    bytes_accessed = ((Mp * Kp + Kp * N1p + N1p * N2p) * 2
                      + (N1p + N2p + Mp * N2p) * 4)

    return pl.pallas_call(
        _fc_fused_kernel,
        out_shape=jax.ShapeDtypeStruct((Mp, N2p), jnp.float32),
        grid_spec=pltpu.PrefetchScalarGridSpec(
            num_scalar_prefetch=0,
            grid=(Kp // tk,),
            in_specs=[
                pl.BlockSpec((Mp, tk), lambda k: (0, k)),
                pl.BlockSpec((tk, N1p), lambda k: (k, 0)),
                pl.BlockSpec((1, N1p), lambda k: (0, 0)),
                pl.BlockSpec((N1p, N2p), lambda k: (0, 0)),
                pl.BlockSpec((1, N2p), lambda k: (0, 0)),
            ],
            out_specs=pl.BlockSpec((Mp, N2p), lambda k: (0, 0)),
            scratch_shapes=[pltpu.VMEM((Mp, N1p), jnp.float32)],
        ),
        compiler_params=pltpu.CompilerParams(
            dimension_semantics=("arbitrary",),
            vmem_limit_bytes=_VMEM_LIMIT),
        cost_estimate=pl.CostEstimate(
            flops=flops, transcendentals=0, bytes_accessed=bytes_accessed),
    )(x_flat, w1_p, b1_p, w2_p, b2_p)  # padded; caller slices


# ---------------------------------------------------------------------------
# im2col glue (Conv k=5, stride=2, pad=2); feature order = (kh, kw, c_in).
# K is zero-padded to a multiple of 128 inside the same fusion (no separate
# pad of the materialized patch matrix).
# ---------------------------------------------------------------------------
def _im2col(x_nhwc, k=5, stride=2, pad=2, k_align=128):
    n, h, w, c = x_nhwc.shape
    ho = (h + 2 * pad - k) // stride + 1
    wo = (w + 2 * pad - k) // stride + 1
    xp = jnp.pad(x_nhwc, ((0, 0), (pad, pad), (pad, pad), (0, 0)))
    cols = []
    for kh in range(k):
        for kw in range(k):
            sl = xp[:,
                    kh:kh + stride * (ho - 1) + 1:stride,
                    kw:kw + stride * (wo - 1) + 1:stride, :]
            cols.append(sl)
    K = k * k * c
    patches = jnp.stack(cols, axis=3).reshape(n * ho * wo, K)
    Kp = _round_up(K, k_align)
    if Kp != K:
        patches = jnp.pad(patches, ((0, 0), (0, Kp - K)))
    return patches, (n, ho, wo)


# ---------------------------------------------------------------------------
# Parameter init (PyTorch layout, deterministic) and one-time preparation
# ---------------------------------------------------------------------------
def init_params(key):
    params = {}
    channels = [3, 16, 32, 64, 128]
    keys = jax.random.split(key, 12)
    ki = 0
    convs = []
    for cin, cout in zip(channels[:-1], channels[1:]):
        w = jax.random.normal(keys[ki], (cout, cin, 5, 5), jnp.float32) * 0.05
        b = jax.random.normal(keys[ki + 1], (cout,), jnp.float32) * 0.05
        ki += 2
        convs.append(dict(
            w=w, b=b,
            gamma=jnp.ones((cout,), jnp.float32),
            beta=jnp.zeros((cout,), jnp.float32),
            mean=jnp.zeros((cout,), jnp.float32),
            var=jnp.ones((cout,), jnp.float32),
        ))
    params["convs"] = convs
    params["fc1_w"] = jax.random.normal(keys[ki], (1000, 4 * 8 * 128),
                                        jnp.float32) * 0.02
    params["fc1_b"] = jax.random.normal(keys[ki + 1], (1000,),
                                        jnp.float32) * 0.02
    params["fc2_w"] = jax.random.normal(keys[ki + 2], (2, 1000),
                                        jnp.float32) * 0.02
    params["fc2_b"] = jax.random.normal(keys[ki + 3], (2,), jnp.float32) * 0.02
    return params


def prepare_params(params):
    """Fold BN, transpose/pad/cast weights once (outside the forward pass)."""
    conv_prepped = []
    conv_couts = []
    for layer in params["convs"]:
        w = layer["w"]                       # (cout, cin, 5, 5)
        cout = int(w.shape[0])
        w_mat = jnp.transpose(w, (2, 3, 1, 0)).reshape(-1, cout)  # rows (kh,kw,cin)
        K = w_mat.shape[0]
        Kp, Np = _round_up(K, 128), _round_up(cout, 128)
        scale = layer["gamma"] / jnp.sqrt(layer["var"] + _BN_EPS)
        bias = (layer["b"] - layer["mean"]) * scale + layer["beta"]
        w_p = jnp.zeros((Kp, Np), jnp.bfloat16).at[:K, :cout].set(
            w_mat.astype(jnp.bfloat16))
        scale_p = jnp.zeros((1, Np), jnp.float32).at[0, :cout].set(scale)
        bias_p = jnp.zeros((1, Np), jnp.float32).at[0, :cout].set(bias)
        conv_prepped.append((w_p, scale_p, bias_p))
        conv_couts.append(cout)

    # fc1: reorder columns from PyTorch CHW flatten order to our HWC flatten.
    fc1_w = params["fc1_w"]                  # (1000, 4096), cols ordered (c,h,w)
    c, h, w_sp = 128, 4, 8
    fc1_w_hwc = fc1_w.reshape(-1, c, h, w_sp).transpose(0, 2, 3, 1).reshape(
        fc1_w.shape[0], -1)                  # cols ordered (h,w,c)
    K1, N1 = fc1_w_hwc.shape[1], fc1_w_hwc.shape[0]
    K1p, N1p = _round_up(K1, 128), _round_up(N1, 128)
    w1_p = jnp.zeros((K1p, N1p), jnp.bfloat16).at[:K1, :N1].set(
        fc1_w_hwc.T.astype(jnp.bfloat16))
    b1_p = jnp.zeros((1, N1p), jnp.float32).at[0, :N1].set(params["fc1_b"])

    fc2_w = params["fc2_w"]                  # (2, 1000)
    N2 = int(fc2_w.shape[0])
    N2p = _round_up(N2, 128)
    w2_p = jnp.zeros((N1p, N2p), jnp.bfloat16).at[:N1, :N2].set(
        fc2_w.T.astype(jnp.bfloat16))
    b2_p = jnp.zeros((1, N2p), jnp.float32).at[0, :N2].set(params["fc2_b"])

    prepared = {
        "convs": tuple(conv_prepped),
        "w1": w1_p, "b1": b1_p, "w2": w2_p, "b2": b2_p,
    }
    return prepared, tuple(conv_couts), N2


# ---------------------------------------------------------------------------
# Forward pass
# ---------------------------------------------------------------------------
@functools.partial(jax.jit, static_argnums=(2, 3))
def dqn_forward(x_nchw, prepared, conv_couts, n_out):
    # NCHW (PyTorch) -> NHWC, bf16 activations throughout the conv stack.
    x = jnp.transpose(x_nchw, (0, 2, 3, 1)).astype(jnp.bfloat16)
    for (w_p, scale_p, bias_p), cout in zip(prepared["convs"], conv_couts):
        patches, (n, ho, wo) = _im2col(x)
        y = conv_matmul(patches, w_p, scale_p, bias_p)
        x = y[:, :cout].reshape(n, ho, wo, cout)
    # NHWC flatten (fc1 weight columns were pre-reordered to match); this
    # reshape is layout-trivial (row-major contiguous).
    x_flat = x.reshape(x.shape[0], -1)
    out = fc_forward(x_flat, prepared["w1"], prepared["b1"],
                     prepared["w2"], prepared["b2"])
    return out[:x_nchw.shape[0], :n_out]


if __name__ == "__main__":
    key = jax.random.PRNGKey(0)
    k_x, k_p = jax.random.split(key)
    # fc1 = Linear(4*8*128, ...) with 4 stride-2 convs => input spatial 64x128.
    x = jax.random.normal(k_x, (2, 3, 64, 128), jnp.float32)
    params = init_params(k_p)
    prepared, conv_couts, n_out = prepare_params(params)

    out = dqn_forward(x, prepared, conv_couts, n_out)
    out = jax.block_until_ready(out)
    assert out.shape == (2, 2), out.shape
    print("KERNEL_OK")
</pallas_src>

<mosaic_0001>
module attributes {stable_mosaic.version = 11 : i64} {
  func.func @_conv_matmul_kernel(%arg0: i32, %arg1: memref<2048x128xbf16, #tpu.memory_space<vmem>>, %arg2: memref<128x128xbf16, #tpu.memory_space<vmem>>, %arg3: memref<1x128xf32, #tpu.memory_space<vmem>>, %arg4: memref<1x128xf32, #tpu.memory_space<vmem>>, %arg5: memref<2048x128xbf16, #tpu.memory_space<vmem>>) attributes {dimension_semantics = [#tpu.dimension_semantics<parallel>], iteration_bounds = array<i64: 2>, scalar_prefetch = 0 : i64, scratch_operands = 0 : i64, tpu.core_type = #tpu.core_type<tc>, window_params = [{transform_indices = @transform_0, window_bounds = array<i64: 2048, 128>}, {pipeline_mode = #tpu.pipeline_mode<synchronous>, transform_indices = @transform_1, window_bounds = array<i64: 128, 128>}, {pipeline_mode = #tpu.pipeline_mode<synchronous>, transform_indices = @transform_2, window_bounds = array<i64: 1, 128>}, {pipeline_mode = #tpu.pipeline_mode<synchronous>, transform_indices = @transform_3, window_bounds = array<i64: 1, 128>}, {transform_indices = @transform_4, window_bounds = array<i64: 2048, 128>}]} {
    %c0 = arith.constant 0 : index
    %c0_0 = arith.constant 0 : index
    %0 = vector.load %arg1[%c0, %c0_0] : memref<2048x128xbf16, #tpu.memory_space<vmem>>, vector<2048x128xbf16>
    %c0_1 = arith.constant 0 : index
    %c0_2 = arith.constant 0 : index
    %1 = vector.load %arg2[%c0_1, %c0_2] : memref<128x128xbf16, #tpu.memory_space<vmem>>, vector<128x128xbf16>
    %cst = arith.constant dense<0.000000e+00> : vector<2048x128xf32>
    %2 = tpu.matmul %0, %1, %cst {dimension_numbers = #tpu.dot_dimension_numbers<[1], [0], [0], [1], [0, 0, 1, 1], [], []>} : vector<2048x128xbf16>, vector<128x128xbf16>, vector<2048x128xf32> -> vector<2048x128xf32>
    %c0_3 = arith.constant 0 : index
    %c0_4 = arith.constant 0 : index
    %3 = vector.load %arg3[%c0_3, %c0_4] : memref<1x128xf32, #tpu.memory_space<vmem>>, vector<1x128xf32>
    %4 = vector.broadcast %3 : vector<1x128xf32> to vector<2048x128xf32>
    %5 = arith.mulf %2, %4 : vector<2048x128xf32>
    %c0_5 = arith.constant 0 : index
    %c0_6 = arith.constant 0 : index
    %6 = vector.load %arg4[%c0_5, %c0_6] : memref<1x128xf32, #tpu.memory_space<vmem>>, vector<1x128xf32>
    %7 = vector.broadcast %6 : vector<1x128xf32> to vector<2048x128xf32>
    %8 = arith.addf %5, %7 : vector<2048x128xf32>
    %cst_7 = arith.constant 0.000000e+00 : f32
    %9 = vector.broadcast %cst_7 : f32 to vector<2048x128xf32>
    %10 = arith.maximumf %8, %9 : vector<2048x128xf32>
    %11 = arith.truncf %10 : vector<2048x128xf32> to vector<2048x128xbf16>
    %c0_8 = arith.constant 0 : index
    %c0_9 = arith.constant 0 : index
    %12 = vector.load %arg5[%c0_8, %c0_9] : memref<2048x128xbf16, #tpu.memory_space<vmem>>, vector<2048x128xbf16>
    tpu.vector_store %arg5[%c0_8, %c0_9], %11 {strides = array<i32>} : memref<2048x128xbf16, #tpu.memory_space<vmem>>, vector<2048x128xbf16>,
    return
  }
  func.func @transform_0(%arg0: i32) -> (i32, i32) {
    %c0_i32 = arith.constant 0 : i32
    %c0_i32_0 = arith.constant 0 : i32
    return %arg0, %c0_i32 : i32, i32
  }
  func.func @transform_1(%arg0: i32) -> (i32, i32) {
    %c0_i32 = arith.constant 0 : i32
    %c0_i32_0 = arith.constant 0 : i32
    %c0_i32_1 = arith.constant 0 : i32
    return %c0_i32, %c0_i32_0 : i32, i32
  }
  func.func @transform_2(%arg0: i32) -> (i32, i32) {
    %c0_i32 = arith.constant 0 : i32
    %c0_i32_0 = arith.constant 0 : i32
    %c0_i32_1 = arith.constant 0 : i32
    return %c0_i32, %c0_i32_0 : i32, i32
  }
  func.func @transform_3(%arg0: i32) -> (i32, i32) {
    %c0_i32 = arith.constant 0 : i32
    %c0_i32_0 = arith.constant 0 : i32
    %c0_i32_1 = arith.constant 0 : i32
    return %c0_i32, %c0_i32_0 : i32, i32
  }
  func.func @transform_4(%arg0: i32) -> (i32, i32) {
    %c0_i32 = arith.constant 0 : i32
    %c0_i32_0 = arith.constant 0 : i32
    return %arg0, %c0_i32 : i32, i32
  }
}

module attributes {stable_mosaic.version = 11 : i64} {
  func.func @_conv_matmul_kernel(%arg0: i32, %arg1: memref<512x512xbf16, #tpu.memory_space<vmem>>, %arg2: memref<512x128xbf16, #tpu.memory_space<vmem>>, %arg3: memref<1x128xf32, #tpu.memory_space<vmem>>, %arg4: memref<1x128xf32, #tpu.memory_space<vmem>>, %arg5: memref<512x128xbf16, #tpu.memory_space<vmem>>) attributes {dimension_semantics = [#tpu.dimension_semantics<parallel>], iteration_bounds = array<i64: 2>, scalar_prefetch = 0 : i64, scratch_operands = 0 : i64, tpu.core_type = #tpu.core_type<tc>, window_params = [{transform_indices = @transform_0, window_bounds = array<i64: 512, 512>}, {pipeline_mode = #tpu.pipeline_mode<synchronous>, transform_indices = @transform_1, window_bounds = array<i64: 512, 128>}, {pipeline_mode = #tpu.pipeline_mode<synchronous>, transform_indices = @transform_2, window_bounds = array<i64: 1, 128>}, {pipeline_mode = #tpu.pipeline_mode<synchronous>, transform_indices = @transform_3, window_bounds = array<i64: 1, 128>}, {transform_indices = @transform_4, window_bounds = array<i64: 512, 128>}]} {
    %c0 = arith.constant 0 : index
    %c0_0 = arith.constant 0 : index
    %0 = vector.load %arg1[%c0, %c0_0] : memref<512x512xbf16, #tpu.memory_space<vmem>>, vector<512x512xbf16>
    %c0_1 = arith.constant 0 : index
    %c0_2 = arith.constant 0 : index
    %1 = vector.load %arg2[%c0_1, %c0_2] : memref<512x128xbf16, #tpu.memory_space<vmem>>, vector<512x128xbf16>
    %cst = arith.constant dense<0.000000e+00> : vector<512x128xf32>
    %2 = tpu.matmul %0, %1, %cst {dimension_numbers = #tpu.dot_dimension_numbers<[1], [0], [0], [1], [0, 0, 1, 1], [], []>} : vector<512x512xbf16>, vector<512x128xbf16>, vector<512x128xf32> -> vector<512x128xf32>
    %c0_3 = arith.constant 0 : index
    %c0_4 = arith.constant 0 : index
    %3 = vector.load %arg3[%c0_3, %c0_4] : memref<1x128xf32, #tpu.memory_space<vmem>>, vector<1x128xf32>
    %4 = vector.broadcast %3 : vector<1x128xf32> to vector<512x128xf32>
    %5 = arith.mulf %2, %4 : vector<512x128xf32>
    %c0_5 = arith.constant 0 : index
    %c0_6 = arith.constant 0 : index
    %6 = vector.load %arg4[%c0_5, %c0_6] : memref<1x128xf32, #tpu.memory_space<vmem>>, vector<1x128xf32>
    %7 = vector.broadcast %6 : vector<1x128xf32> to vector<512x128xf32>
    %8 = arith.addf %5, %7 : vector<512x128xf32>
    %cst_7 = arith.constant 0.000000e+00 : f32
    %9 = vector.broadcast %cst_7 : f32 to vector<512x128xf32>
    %10 = arith.maximumf %8, %9 : vector<512x128xf32>
    %11 = arith.truncf %10 : vector<512x128xf32> to vector<512x128xbf16>
    %c0_8 = arith.constant 0 : index
    %c0_9 = arith.constant 0 : index
    %12 = vector.load %arg5[%c0_8, %c0_9] : memref<512x128xbf16, #tpu.memory_space<vmem>>, vector<512x128xbf16>
    tpu.vector_store %arg5[%c0_8, %c0_9], %11 {strides = array<i32>} : memref<512x128xbf16, #tpu.memory_space<vmem>>, vector<512x128xbf16>,
    return
  }
  func.func @transform_0(%arg0: i32) -> (i32, i32) {
    %c0_i32 = arith.constant 0 : i32
    %c0_i32_0 = arith.constant 0 : i32
    return %arg0, %c0_i32 : i32, i32
  }
  func.func @transform_1(%arg0: i32) -> (i32, i32) {
    %c0_i32 = arith.constant 0 : i32
    %c0_i32_0 = arith.constant 0 : i32
    %c0_i32_1 = arith.constant 0 : i32
    return %c0_i32, %c0_i32_0 : i32, i32
  }
  func.func @transform_2(%arg0: i32) -> (i32, i32) {
    %c0_i32 = arith.constant 0 : i32
    %c0_i32_0 = arith.constant 0 : i32
    %c0_i32_1 = arith.constant 0 : i32
    return %c0_i32, %c0_i32_0 : i32, i32
  }
  func.func @transform_3(%arg0: i32) -> (i32, i32) {
    %c0_i32 = arith.constant 0 : i32
    %c0_i32_0 = arith.constant 0 : i32
    %c0_i32_1 = arith.constant 0 : i32
    return %c0_i32, %c0_i32_0 : i32, i32
  }
  func.func @transform_4(%arg0: i32) -> (i32, i32) {
    %c0_i32 = arith.constant 0 : i32
    %c0_i32_0 = arith.constant 0 : i32
    return %arg0, %c0_i32 : i32, i32
  }
}

module attributes {stable_mosaic.version = 11 : i64} {
  func.func @_conv_matmul_kernel(%arg0: i32, %arg1: memref<128x896xbf16, #tpu.memory_space<vmem>>, %arg2: memref<896x128xbf16, #tpu.memory_space<vmem>>, %arg3: memref<1x128xf32, #tpu.memory_space<vmem>>, %arg4: memref<1x128xf32, #tpu.memory_space<vmem>>, %arg5: memref<128x128xbf16, #tpu.memory_space<vmem>>) attributes {dimension_semantics = [#tpu.dimension_semantics<parallel>], iteration_bounds = array<i64: 2>, scalar_prefetch = 0 : i64, scratch_operands = 0 : i64, tpu.core_type = #tpu.core_type<tc>, window_params = [{transform_indices = @transform_0, window_bounds = array<i64: 128, 896>}, {pipeline_mode = #tpu.pipeline_mode<synchronous>, transform_indices = @transform_1, window_bounds = array<i64: 896, 128>}, {pipeline_mode = #tpu.pipeline_mode<synchronous>, transform_indices = @transform_2, window_bounds = array<i64: 1, 128>}, {pipeline_mode = #tpu.pipeline_mode<synchronous>, transform_indices = @transform_3, window_bounds = array<i64: 1, 128>}, {transform_indices = @transform_4, window_bounds = array<i64: 128, 128>}]} {
    %c0 = arith.constant 0 : index
    %c0_0 = arith.constant 0 : index
    %0 = vector.load %arg1[%c0, %c0_0] : memref<128x896xbf16, #tpu.memory_space<vmem>>, vector<128x896xbf16>
    %c0_1 = arith.constant 0 : index
    %c0_2 = arith.constant 0 : index
    %1 = vector.load %arg2[%c0_1, %c0_2] : memref<896x128xbf16, #tpu.memory_space<vmem>>, vector<896x128xbf16>
    %cst = arith.constant dense<0.000000e+00> : vector<128x128xf32>
    %2 = tpu.matmul %0, %1, %cst {dimension_numbers = #tpu.dot_dimension_numbers<[1], [0], [0], [1], [0, 0, 1, 1], [], []>} : vector<128x896xbf16>, vector<896x128xbf16>, vector<128x128xf32> -> vector<128x128xf32>
    %c0_3 = arith.constant 0 : index
    %c0_4 = arith.constant 0 : index
    %3 = vector.load %arg3[%c0_3, %c0_4] : memref<1x128xf32, #tpu.memory_space<vmem>>, vector<1x128xf32>
    %4 = vector.broadcast %3 : vector<1x128xf32> to vector<128x128xf32>
    %5 = arith.mulf %2, %4 : vector<128x128xf32>
    %c0_5 = arith.constant 0 : index
    %c0_6 = arith.constant 0 : index
    %6 = vector.load %arg4[%c0_5, %c0_6] : memref<1x128xf32, #tpu.memory_space<vmem>>, vector<1x128xf32>
    %7 = vector.broadcast %6 : vector<1x128xf32> to vector<128x128xf32>
    %8 = arith.addf %5, %7 : vector<128x128xf32>
    %cst_7 = arith.constant 0.000000e+00 : f32
    %9 = vector.broadcast %cst_7 : f32 to vector<128x128xf32>
    %10 = arith.maximumf %8, %9 : vector<128x128xf32>
    %11 = arith.truncf %10 : vector<128x128xf32> to vector<128x128xbf16>
    %c0_8 = arith.constant 0 : index
    %c0_9 = arith.constant 0 : index
    %12 = vector.load %arg5[%c0_8, %c0_9] : memref<128x128xbf16, #tpu.memory_space<vmem>>, vector<128x128xbf16>
    tpu.vector_store %arg5[%c0_8, %c0_9], %11 {strides = array<i32>} : memref<128x128xbf16, #tpu.memory_space<vmem>>, vector<128x128xbf16>,
    return
  }
  func.func @transform_0(%arg0: i32) -> (i32, i32) {
    %c0_i32 = arith.constant 0 : i32
    %c0_i32_0 = arith.constant 0 : i32
    return %arg0, %c0_i32 : i32, i32
  }
  func.func @transform_1(%arg0: i32) -> (i32, i32) {
    %c0_i32 = arith.constant 0 : i32
    %c0_i32_0 = arith.constant 0 : i32
    %c0_i32_1 = arith.constant 0 : i32
    return %c0_i32, %c0_i32_0 : i32, i32
  }
  func.func @transform_2(%arg0: i32) -> (i32, i32) {
    %c0_i32 = arith.constant 0 : i32
    %c0_i32_0 = arith.constant 0 : i32
    %c0_i32_1 = arith.constant 0 : i32
    return %c0_i32, %c0_i32_0 : i32, i32
  }
  func.func @transform_3(%arg0: i32) -> (i32, i32) {
    %c0_i32 = arith.constant 0 : i32
    %c0_i32_0 = arith.constant 0 : i32
    %c0_i32_1 = arith.constant 0 : i32
    return %c0_i32, %c0_i32_0 : i32, i32
  }
  func.func @transform_4(%arg0: i32) -> (i32, i32) {
    %c0_i32 = arith.constant 0 : i32
    %c0_i32_0 = arith.constant 0 : i32
    return %arg0, %c0_i32 : i32, i32
  }
}

module attributes {stable_mosaic.version = 11 : i64} {
  func.func @_conv_matmul_kernel(%arg0: i32, %arg1: memref<32x1664xbf16, #tpu.memory_space<vmem>>, %arg2: memref<1664x128xbf16, #tpu.memory_space<vmem>>, %arg3: memref<1x128xf32, #tpu.memory_space<vmem>>, %arg4: memref<1x128xf32, #tpu.memory_space<vmem>>, %arg5: memref<32x128xbf16, #tpu.memory_space<vmem>>) attributes {dimension_semantics = [#tpu.dimension_semantics<parallel>], iteration_bounds = array<i64: 2>, scalar_prefetch = 0 : i64, scratch_operands = 0 : i64, tpu.core_type = #tpu.core_type<tc>, window_params = [{transform_indices = @transform_0, window_bounds = array<i64: 32, 1664>}, {pipeline_mode = #tpu.pipeline_mode<synchronous>, transform_indices = @transform_1, window_bounds = array<i64: 1664, 128>}, {pipeline_mode = #tpu.pipeline_mode<synchronous>, transform_indices = @transform_2, window_bounds = array<i64: 1, 128>}, {pipeline_mode = #tpu.pipeline_mode<synchronous>, transform_indices = @transform_3, window_bounds = array<i64: 1, 128>}, {transform_indices = @transform_4, window_bounds = array<i64: 32, 128>}]} {
    %c0 = arith.constant 0 : index
    %c0_0 = arith.constant 0 : index
    %0 = vector.load %arg1[%c0, %c0_0] : memref<32x1664xbf16, #tpu.memory_space<vmem>>, vector<32x1664xbf16>
    %c0_1 = arith.constant 0 : index
    %c0_2 = arith.constant 0 : index
    %1 = vector.load %arg2[%c0_1, %c0_2] : memref<1664x128xbf16, #tpu.memory_space<vmem>>, vector<1664x128xbf16>
    %cst = arith.constant dense<0.000000e+00> : vector<32x128xf32>
    %2 = tpu.matmul %0, %1, %cst {dimension_numbers = #tpu.dot_dimension_numbers<[1], [0], [0], [1], [0, 0, 1, 1], [], []>} : vector<32x1664xbf16>, vector<1664x128xbf16>, vector<32x128xf32> -> vector<32x128xf32>
    %c0_3 = arith.constant 0 : index
    %c0_4 = arith.constant 0 : index
    %3 = vector.load %arg3[%c0_3, %c0_4] : memref<1x128xf32, #tpu.memory_space<vmem>>, vector<1x128xf32>
    %4 = vector.broadcast %3 : vector<1x128xf32> to vector<32x128xf32>
    %5 = arith.mulf %2, %4 : vector<32x128xf32>
    %c0_5 = arith.constant 0 : index
    %c0_6 = arith.constant 0 : index
    %6 = vector.load %arg4[%c0_5, %c0_6] : memref<1x128xf32, #tpu.memory_space<vmem>>, vector<1x128xf32>
    %7 = vector.broadcast %6 : vector<1x128xf32> to vector<32x128xf32>
    %8 = arith.addf %5, %7 : vector<32x128xf32>
    %cst_7 = arith.constant 0.000000e+00 : f32
    %9 = vector.broadcast %cst_7 : f32 to vector<32x128xf32>
    %10 = arith.maximumf %8, %9 : vector<32x128xf32>
    %11 = arith.truncf %10 : vector<32x128xf32> to vector<32x128xbf16>
    %c0_8 = arith.constant 0 : index
    %c0_9 = arith.constant 0 : index
    %12 = vector.load %arg5[%c0_8, %c0_9] : memref<32x128xbf16, #tpu.memory_space<vmem>>, vector<32x128xbf16>
    tpu.vector_store %arg5[%c0_8, %c0_9], %11 {strides = array<i32>} : memref<32x128xbf16, #tpu.memory_space<vmem>>, vector<32x128xbf16>,
    return
  }
  func.func @transform_0(%arg0: i32) -> (i32, i32) {
    %c0_i32 = arith.constant 0 : i32
    %c0_i32_0 = arith.constant 0 : i32
    return %arg0, %c0_i32 : i32, i32
  }
  func.func @transform_1(%arg0: i32) -> (i32, i32) {
    %c0_i32 = arith.constant 0 : i32
    %c0_i32_0 = arith.constant 0 : i32
    %c0_i32_1 = arith.constant 0 : i32
    return %c0_i32, %c0_i32_0 : i32, i32
  }
  func.func @transform_2(%arg0: i32) -> (i32, i32) {
    %c0_i32 = arith.constant 0 : i32
    %c0_i32_0 = arith.constant 0 : i32
    %c0_i32_1 = arith.constant 0 : i32
    return %c0_i32, %c0_i32_0 : i32, i32
  }
  func.func @transform_3(%arg0: i32) -> (i32, i32) {
    %c0_i32 = arith.constant 0 : i32
    %c0_i32_0 = arith.constant 0 : i32
    %c0_i32_1 = arith.constant 0 : i32
    return %c0_i32, %c0_i32_0 : i32, i32
  }
  func.func @transform_4(%arg0: i32) -> (i32, i32) {
    %c0_i32 = arith.constant 0 : i32
    %c0_i32_0 = arith.constant 0 : i32
    return %arg0, %c0_i32 : i32, i32
  }
}

module attributes {stable_mosaic.version = 11 : i64} {
  func.func @_fc_fused_kernel(%arg0: i32, %arg1: memref<16x2048xbf16, #tpu.memory_space<vmem>>, %arg2: memref<2048x1024xbf16, #tpu.memory_space<vmem>>, %arg3: memref<1x1024xf32, #tpu.memory_space<vmem>>, %arg4: memref<1024x128xbf16, #tpu.memory_space<vmem>>, %arg5: memref<1x128xf32, #tpu.memory_space<vmem>>, %arg6: memref<16x128xf32, #tpu.memory_space<vmem>>, %arg7: memref<16x1024xf32, #tpu.memory_space<vmem>>) attributes {dimension_semantics = [#tpu.dimension_semantics<arbitrary>], iteration_bounds = array<i64: 2>, scalar_prefetch = 0 : i64, scratch_operands = 1 : i64, tpu.core_type = #tpu.core_type<tc>, window_params = [{transform_indices = @transform_0, window_bounds = array<i64: 16, 2048>}, {transform_indices = @transform_1, window_bounds = array<i64: 2048, 1024>}, {pipeline_mode = #tpu.pipeline_mode<synchronous>, transform_indices = @transform_2, window_bounds = array<i64: 1, 1024>}, {pipeline_mode = #tpu.pipeline_mode<synchronous>, transform_indices = @transform_3, window_bounds = array<i64: 1024, 128>}, {pipeline_mode = #tpu.pipeline_mode<synchronous>, transform_indices = @transform_4, window_bounds = array<i64: 1, 128>}, {pipeline_mode = #tpu.pipeline_mode<synchronous>, transform_indices = @transform_5, window_bounds = array<i64: 16, 128>}]} {
    %c0_i32 = arith.constant 0 : i32
    %0 = arith.cmpi eq, %arg0, %c0_i32 : i32
    %1 = arith.extui %0 : i1 to i32
    %c0_i32_0 = arith.constant 0 : i32
    %2 = arith.cmpi ne, %1, %c0_i32_0 : i32
    scf.if %2 {
      %cst_9 = arith.constant 0.000000e+00 : f32
      %12 = vector.broadcast %cst_9 : f32 to vector<16x1024xf32>
      %c0_10 = arith.constant 0 : index
      %c0_11 = arith.constant 0 : index
      %13 = vector.load %arg7[%c0_10, %c0_11] : memref<16x1024xf32, #tpu.memory_space<vmem>>, vector<16x1024xf32>
      tpu.vector_store %arg7[%c0_10, %c0_11], %12 {strides = array<i32>} : memref<16x1024xf32, #tpu.memory_space<vmem>>, vector<16x1024xf32>,
    } else {
    }
    %c0 = arith.constant 0 : index
    %c0_1 = arith.constant 0 : index
    %3 = vector.load %arg7[%c0, %c0_1] : memref<16x1024xf32, #tpu.memory_space<vmem>>, vector<16x1024xf32>
    %c0_2 = arith.constant 0 : index
    %c0_3 = arith.constant 0 : index
    %4 = vector.load %arg1[%c0_2, %c0_3] : memref<16x2048xbf16, #tpu.memory_space<vmem>>, vector<16x2048xbf16>
    %c0_4 = arith.constant 0 : index
    %c0_5 = arith.constant 0 : index
    %5 = vector.load %arg2[%c0_4, %c0_5] : memref<2048x1024xbf16, #tpu.memory_space<vmem>>, vector<2048x1024xbf16>
    %cst = arith.constant dense<0.000000e+00> : vector<16x1024xf32>
    %6 = tpu.matmul %4, %5, %cst {dimension_numbers = #tpu.dot_dimension_numbers<[1], [0], [0], [1], [0, 0, 1, 1], [], []>} : vector<16x2048xbf16>, vector<2048x1024xbf16>, vector<16x1024xf32> -> vector<16x1024xf32>
    %7 = arith.addf %3, %6 : vector<16x1024xf32>
    %c0_6 = arith.constant 0 : index
    %c0_7 = arith.constant 0 : index
    %8 = vector.load %arg7[%c0_6, %c0_7] : memref<16x1024xf32, #tpu.memory_space<vmem>>, vector<16x1024xf32>
    tpu.vector_store %arg7[%c0_6, %c0_7], %7 {strides = array<i32>} : memref<16x1024xf32, #tpu.memory_space<vmem>>, vector<16x1024xf32>,
    %c1_i32 = arith.constant 1 : i32
    %9 = arith.cmpi eq, %arg0, %c1_i32 : i32
    %10 = arith.extui %9 : i1 to i32
    %c0_i32_8 = arith.constant 0 : i32
    %11 = arith.cmpi ne, %10, %c0_i32_8 : i32
    scf.if %11 {
      %c0_9 = arith.constant 0 : index
      %c0_10 = arith.constant 0 : index
      %12 = vector.load %arg7[%c0_9, %c0_10] : memref<16x1024xf32, #tpu.memory_space<vmem>>, vector<16x1024xf32>
      %c0_11 = arith.constant 0 : index
      %c0_12 = arith.constant 0 : index
      %13 = vector.load %arg3[%c0_11, %c0_12] : memref<1x1024xf32, #tpu.memory_space<vmem>>, vector<1x1024xf32>
      %14 = vector.broadcast %13 : vector<1x1024xf32> to vector<16x1024xf32>
      %15 = arith.addf %12, %14 : vector<16x1024xf32>
      %cst_13 = arith.constant 0.000000e+00 : f32
      %16 = vector.broadcast %cst_13 : f32 to vector<16x1024xf32>
      %17 = arith.maximumf %15, %16 : vector<16x1024xf32>
      %18 = arith.truncf %17 : vector<16x1024xf32> to vector<16x1024xbf16>
      %c0_14 = arith.constant 0 : index
      %c0_15 = arith.constant 0 : index
      %19 = vector.load %arg4[%c0_14, %c0_15] : memref<1024x128xbf16, #tpu.memory_space<vmem>>, vector<1024x128xbf16>
      %cst_16 = arith.constant dense<0.000000e+00> : vector<16x128xf32>
      %20 = tpu.matmul %18, %19, %cst_16 {dimension_numbers = #tpu.dot_dimension_numbers<[1], [0], [0], [1], [0, 0, 1, 1], [], []>} : vector<16x1024xbf16>, vector<1024x128xbf16>, vector<16x128xf32> -> vector<16x128xf32>
      %c0_17 = arith.constant 0 : index
      %c0_18 = arith.constant 0 : index
      %21 = vector.load %arg5[%c0_17, %c0_18] : memref<1x128xf32, #tpu.memory_space<vmem>>, vector<1x128xf32>
      %22 = vector.broadcast %21 : vector<1x128xf32> to vector<16x128xf32>
      %23 = arith.addf %20, %22 : vector<16x128xf32>
      %c0_19 = arith.constant 0 : index
      %c0_20 = arith.constant 0 : index
      %24 = vector.load %arg6[%c0_19, %c0_20] : memref<16x128xf32, #tpu.memory_space<vmem>>, vector<16x128xf32>
      tpu.vector_store %arg6[%c0_19, %c0_20], %23 {strides = array<i32>} : memref<16x128xf32, #tpu.memory_space<vmem>>, vector<16x128xf32>,
    } else {
    }
    return
  }
  func.func @transform_0(%arg0: i32) -> (i32, i32) {
    %c0_i32 = arith.constant 0 : i32
    %c0_i32_0 = arith.constant 0 : i32
    return %c0_i32, %arg0 : i32, i32
  }
  func.func @transform_1(%arg0: i32) -> (i32, i32) {
    %c0_i32 = arith.constant 0 : i32
    %c0_i32_0 = arith.constant 0 : i32
    return %arg0, %c0_i32 : i32, i32
  }
  func.func @transform_2(%arg0: i32) -> (i32, i32) {
    %c0_i32 = arith.constant 0 : i32
    %c0_i32_0 = arith.constant 0 : i32
    %c0_i32_1 = arith.constant 0 : i32
    return %c0_i32, %c0_i32_0 : i32, i32
  }
  func.func @transform_3(%arg0: i32) -> (i32, i32) {
    %c0_i32 = arith.constant 0 : i32
    %c0_i32_0 = arith.constant 0 : i32
    %c0_i32_1 = arith.constant 0 : i32
    return %c0_i32, %c0_i32_0 : i32, i32
  }
  func.func @transform_4(%arg0: i32) -> (i32, i32) {
    %c0_i32 = arith.constant 0 : i32
    %c0_i32_0 = arith.constant 0 : i32
    %c0_i32_1 = arith.constant 0 : i32
    return %c0_i32, %c0_i32_0 : i32, i32
  }
  func.func @transform_5(%arg0: i32) -> (i32, i32) {
    %c0_i32 = arith.constant 0 : i32
    %c0_i32_0 = arith.constant 0 : i32
    %c0_i32_1 = arith.constant 0 : i32
    return %c0_i32, %c0_i32_0 : i32, i32
  }
}

</mosaic_0001>

<bundles_post_ra>
// kernel: dqn_forward.5
= control target key start
LH: loop header
LB: loop body
LE: loop exit
PB: predicated region body
PF: predicated region fallthrough
CT: control target
= control target key end

     0   :  { %s6498_s15 = smov 0   ;;  %s7348_s0 = inlined_call_operand.vmem [shape: bf16[4096,128], index: 0, kind: input, shape index: {}]   ;;  %s7349_s1 = inlined_call_operand.vmem [shape: bf16[128,128], index: 1, kind: input, shape index: {}]   ;;  %s7350_s2 = inlined_call_operand.vmem [shape: f32[1,128], index: 2, kind: input, shape index: {}]   ;;  %s7351_s3 = inlined_call_operand.vmem [shape: f32[1,128], index: 3, kind: input, shape index: {}]   ;;  %s7352_s4 = inlined_call_operand.vmem [shape: bf16[4096,128], index: 4, kind: output, shape index: {}]  }
   0x1 LB: > { %s4465_s16 = sadd.s32 4294967295, %s6471_s15   ;;  %p4469_p0 = scmp.ge.s32.totalorder %s6471_s15, 1  ;;  %s6471_s15 = sphi %s6498_s15, %s14_s15  }
   0x2   : > { %p163_p1 = scmp.lt.s32.totalorder %s6471_s15, 3 }
   0x4   : > { %p164_p2 = pnand %p4469_p0, %p163_p1 }
   0x5   : > { %v6325_v0 = vld [vmem:[%s7349_s1] sm:$0xff] (!%p164_p2)   ;;  %s4470_s19 = sshll.u32 (!%p164_p2), %s4465_s16, 8  ;;  %v6326_v1 = vld [vmem:[%s7349_s1 + $0x8] sm:$0xff] (!%p164_p2)   ;;  %v6327_v2 = vld [vmem:[%s7349_s1 + $0x10] sm:$0xff] (!%p164_p2)  }
   0x6   : > { %167 = sbr.rel (%p164_p2) target bundleno = 512 (0x200), region = 36  ;;  %p190_p3 = scmp.lt.s32.totalorder (!%p164_p2), %s4470_s19, 511  ;;  %6029 = vmatprep.subr.bf16.mxu0 (!%p164_p2), %v6325_v0  ;;  %6301 = vmatprep.subr.bf16.mxu1 (!%p164_p2), %v6325_v0  ;;  %v6328_v3 = vld [vmem:[%s7349_s1 + $0x18] sm:$0xff] (!%p164_p2)   ;;  %v6329_v6 = vld [vmem:[%s7349_s1 + $0x20] sm:$0xff] (!%p164_p2)   ;;  %v6330_v7 = vld [vmem:[%s7349_s1 + $0x28] sm:$0xff] (!%p164_p2)  }
   0x7   : > { %6030 = vmatpush3.bf16.msra.mxu0 (!%p164_p2), %v6325_v0  ;;  %6309 = vmatpush3.bf16.msra.mxu1 (!%p164_p2), %v6325_v0  ;;  %v6331_v8 = vld [vmem:[%s7349_s1 + $0x30] sm:$0xff] (!%p164_p2)   ;;  %v6332_v9 = vld [vmem:[%s7349_s1 + $0x38] sm:$0xff] (!%p164_p2)  }
   0x8   : > { %6031 = vmatprep.subr.bf16.mxu0 (!%p164_p2), %v6326_v1  ;;  %6302 = vmatprep.subr.bf16.mxu1 (!%p164_p2), %v6326_v1 }
   0xb   : > { %6032 = vmatpush3.bf16.msra.mxu0 (!%p164_p2), %v6326_v1  ;;  %6310 = vmatpush3.bf16.msra.mxu1 (!%p164_p2), %v6326_v1 }
   0xc   : > { %6033 = vmatprep.subr.bf16.mxu0 (!%p164_p2), %v6327_v2  ;;  %6303 = vmatprep.subr.bf16.mxu1 (!%p164_p2), %v6327_v2 }
   0xd   : > { %s7354_s19 = smov (!%p190_p3, %s4470_s19), 511 }
   0xe   : > { %s4471_s24 = sshll.u32 %s7354_s19, 2 }
   0xf   : > { %s6523_s27 = scalar_lea.vmem %s7348_s0, %s4471_s24  ;;  %6034 = vmatpush3.bf16.msra.mxu0 %v6327_v2  ;;  %6311 = vmatpush3.bf16.msra.mxu1 %v6327_v2  ;;  %s6685_s20 = scalar_lea.vmem %s7352_s4, %s4471_s24 }
  0x10   : > { %v6333_v4 = vld [vmem:[%s6523_s27] sm:$0xff]   ;;  %6035 = vmatprep.subr.bf16.mxu0 %v6328_v3  ;;  %6304 = vmatprep.subr.bf16.mxu1 %v6328_v3  ;;  %v6335_v10 = vld [vmem:[%s6523_s27 + $0x8] sm:$0xff]   ;;  %v6337_v12 = vld [vmem:[%s6523_s27 + $0x10] sm:$0xff]  }
  0x11   : > { %v6334_v5 = vld [vmem:[%s6523_s27 + $0x200] sm:$0xff]   ;;  %6045 = vmatprep.mubr.bf16.mxu0 %v6333_v4  ;;  %v6336_v11 = vld [vmem:[%s6523_s27 + $0x208] sm:$0xff]   ;;  %v6338_v13 = vld [vmem:[%s6523_s27 + $0x210] sm:$0xff]  }
  0x12   : > { %6173 = vmatprep.mubr.bf16.mxu1 %v6334_v5  ;;  %v6339_v14 = vld [vmem:[%s6523_s27 + $0x18] sm:$0xff]   ;;  %v6341_v16 = vld [vmem:[%s6523_s27 + $0x20] sm:$0xff]   ;;  %v6343_v18 = vld [vmem:[%s6523_s27 + $0x28] sm:$0xff]  }
  0x13   : > { %6036 = vmatpush3.bf16.msra.mxu0 %v6328_v3  ;;  %6312 = vmatpush3.bf16.msra.mxu1 %v6328_v3  ;;  %v6340_v15 = vld [vmem:[%s6523_s27 + $0x218] sm:$0xff]   ;;  %v6342_v17 = vld [vmem:[%s6523_s27 + $0x220] sm:$0xff]   ;;  %v6344_v19 = vld [vmem:[%s6523_s27 + $0x228] sm:$0xff]  }
  0x14   : > { %6037 = vmatprep.subr.bf16.mxu0 %v6329_v6  ;;  %6305 = vmatprep.subr.bf16.mxu1 %v6329_v6  ;;  %v6345_v20 = vld [vmem:[%s6523_s27 + $0x30] sm:$0xff]   ;;  %v6347_v22 = vld [vmem:[%s6523_s27 + $0x38] sm:$0xff]   ;;  %v6349_v24 = vld [vmem:[%s6523_s27 + $0x40] sm:$0xff]  }
  0x15   : > { %v6346_v21 = vld [vmem:[%s6523_s27 + $0x230] sm:$0xff]   ;;  %v6348_v23 = vld [vmem:[%s6523_s27 + $0x238] sm:$0xff]   ;;  %v6350_v25 = vld [vmem:[%s6523_s27 + $0x240] sm:$0xff]  }
  0x16   : > { %v6351_v26 = vld [vmem:[%s6523_s27 + $0x48] sm:$0xff]   ;;  %v6353_v28 = vld [vmem:[%s6523_s27 + $0x50] sm:$0xff]   ;;  %v6355_v30 = vld [vmem:[%s6523_s27 + $0x58] sm:$0xff]  }
  0x17   : > { %6038 = vmatpush3.bf16.msra.mxu0 %v6329_v6  ;;  %6313 = vmatpush3.bf16.msra.mxu1 %v6329_v6  ;;  %v6352_v27 = vld [vmem:[%s6523_s27 + $0x248] sm:$0xff]   ;;  %v6354_v29 = vld [vmem:[%s6523_s27 + $0x250] sm:$0xff]   ;;  %v6356_v31 = vld [vmem:[%s6523_s27 + $0x258] sm:$0xff]  }
  0x18   : > { %6039 = vmatprep.subr.bf16.mxu0 %v6330_v7  ;;  %6306 = vmatprep.subr.bf16.mxu1 %v6330_v7  ;;  %v6357_v32 = vld [vmem:[%s6523_s27 + $0x60] sm:$0xff]   ;;  %v6359_v34 = vld [vmem:[%s6523_s27 + $0x68] sm:$0xff]   ;;  %v6361_v36 = vld [vmem:[%s6523_s27 + $0x70] sm:$0xff]  }
  0x19   : > { %v6358_v33 = vld [vmem:[%s6523_s27 + $0x260] sm:$0xff]   ;;  %v6360_v35 = vld [vmem:[%s6523_s27 + $0x268] sm:$0xff]   ;;  %v6362_v37 = vld [vmem:[%s6523_s27 + $0x270] sm:$0xff]  }
  0x1a   : > { %v6363_v38 = vld [vmem:[%s6523_s27 + $0x78] sm:$0xff]   ;;  %v6365_v40 = vld [vmem:[%s6523_s27 + $0x80] sm:$0xff]   ;;  %v6367_v42 = vld [vmem:[%s6523_s27 + $0x88] sm:$0xff]  }
  0x1b   : > { %6040 = vmatpush3.bf16.msra.mxu0 %v6330_v7  ;;  %6314 = vmatpush3.bf16.msra.mxu1 %v6330_v7  ;;  %v6364_v39 = vld [vmem:[%s6523_s27 + $0x278] sm:$0xff]   ;;  %v6366_v41 = vld [vmem:[%s6523_s27 + $0x280] sm:$0xff]   ;;  %v6368_v43 = vld [vmem:[%s6523_s27 + $0x288] sm:$0xff]  }
  0x1c   : > { %6041 = vmatprep.subr.bf16.mxu0 %v6331_v8  ;;  %6307 = vmatprep.subr.bf16.mxu1 %v6331_v8  ;;  %v6369_v44 = vld [vmem:[%s6523_s27 + $0x90] sm:$0xff]   ;;  %v6371_v46 = vld [vmem:[%s6523_s27 + $0x98] sm:$0xff]   ;;  %v6373_v48 = vld [vmem:[%s6523_s27 + $0xa0] sm:$0xff]  }
  0x1d   : > { %v6370_v45 = vld [vmem:[%s6523_s27 + $0x290] sm:$0xff]   ;;  %v6372_v47 = vld [vmem:[%s6523_s27 + $0x298] sm:$0xff]   ;;  %v6374_v49 = vld [vmem:[%s6523_s27 + $0x2a0] sm:$0xff]  }
  0x1e   : > { %v6375_v50 = vld [vmem:[%s6523_s27 + $0xa8] sm:$0xff]   ;;  %v6377_v52 = vld [vmem:[%s6523_s27 + $0xb0] sm:$0xff]   ;;  %v6379_v54 = vld [vmem:[%s6523_s27 + $0xb8] sm:$0xff]  }
  0x1f   : > { %6042 = vmatpush3.bf16.msra.mxu0 %v6331_v8  ;;  %6315 = vmatpush3.bf16.msra.mxu1 %v6331_v8  ;;  %v6376_v51 = vld [vmem:[%s6523_s27 + $0x2a8] sm:$0xff]   ;;  %v6378_v53 = vld [vmem:[%s6523_s27 + $0x2b0] sm:$0xff]   ;;  %v6380_v55 = vld [vmem:[%s6523_s27 + $0x2b8] sm:$0xff]  }
  0x20   : > { %6043 = vmatprep.subr.bf16.mxu0 %v6332_v9  ;;  %6308 = vmatprep.subr.bf16.mxu1 %v6332_v9  ;;  %v6381_v56 = vld [vmem:[%s6523_s27 + $0xc0] sm:$0xff]   ;;  %v6383_v58 = vld [vmem:[%s6523_s27 + $0xc8] sm:$0xff]   ;;  %v6385_v60 = vld [vmem:[%s6523_s27 + $0xd0] sm:$0xff]  }
  0x21   : > { %v6382_v57 = vld [vmem:[%s6523_s27 + $0x2c0] sm:$0xff]   ;;  %v6384_v59 = vld [vmem:[%s6523_s27 + $0x2c8] sm:$0xff]   ;;  %v6386_v61 = vld [vmem:[%s6523_s27 + $0x2d0] sm:$0xff]  }
  0x22   : > { %v6387_v62 = vld [vmem:[%s6523_s27 + $0xd8] sm:$0xff]   ;;  %v6389_v0 = vld [vmem:[%s6523_s27 + $0xe0] sm:$0xff]   ;;  %v6391_v2 = vld [vmem:[%s6523_s27 + $0xe8] sm:$0xff]  }
  0x23   : > { %6044 = vmatpush3.bf16.msra.mxu0 %v6332_v9  ;;  %6316 = vmatpush3.bf16.msra.mxu1 %v6332_v9  ;;  %v6388_v63 = vld [vmem:[%s6523_s27 + $0x2d8] sm:$0xff]   ;;  %v6390_v1 = vld [vmem:[%s6523_s27 + $0x2e0] sm:$0xff]   ;;  %v6392_v3 = vld [vmem:[%s6523_s27 + $0x2e8] sm:$0xff]  }
  0x24   : > { %v6393_v4 = vld [vmem:[%s6523_s27 + $0xf0] sm:$0xff]   ;;  %v6395_v6 = vld [vmem:[%s6523_s27 + $0xf8] sm:$0xff]   ;;  %v6397_v8 = vld [vmem:[%s6523_s27 + $0x100] sm:$0xff]  }
  0x25   : > { %v6394_v5 = vld [vmem:[%s6523_s27 + $0x2f0] sm:$0xff]   ;;  %v6396_v7 = vld [vmem:[%s6523_s27 + $0x2f8] sm:$0xff]   ;;  %v6398_v9 = vld [vmem:[%s6523_s27 + $0x300] sm:$0xff]  }
  0x26   : > { %6046 = vmatmul.mubr.bf16.vlgmr.msra.gmra.mrb[0].mxu0 %v6335_v10  ;;  %6174 = vmatmul.mubr.bf16.vlgmr.msra.gmra.mrb[0].mxu1 %v6336_v11  ;;  %v6399_v10 = vld [vmem:[%s6523_s27 + $0x108] sm:$0xff]  }
  0x27   : > { %6049 = vmatprep.mubr.bf16.mxu0 %v6337_v12  ;;  %6177 = vmatprep.mubr.bf16.mxu1 %v6338_v13  ;;  %v6400_v11 = vld [vmem:[%s6523_s27 + $0x308] sm:$0xff]   ;;  %v6401_v12 = vld [vmem:[%s6523_s27 + $0x110] sm:$0xff]  }
  0x28   : > { %v6402_v13 = vld [vmem:[%s6523_s27 + $0x310] sm:$0xff]  }
  0x2e   : > { %6050 = vmatmul.mubr.bf16.gmra.mrb[4].mxu0 %v6339_v14  ;;  %6178 = vmatmul.mubr.bf16.gmra.mrb[4].mxu1 %v6340_v15  ;;  %v6403_v14 = vld [vmem:[%s6523_s27 + $0x118] sm:$0xff]  }
  0x2f   : > { %6053 = vmatprep.mubr.bf16.mxu0 %v6341_v16  ;;  %6181 = vmatprep.mubr.bf16.mxu1 %v6342_v17  ;;  %v6404_v15 = vld [vmem:[%s6523_s27 + $0x318] sm:$0xff]   ;;  %v6405_v16 = vld [vmem:[%s6523_s27 + $0x120] sm:$0xff]  }
  0x30   : > { %v6406_v17 = vld [vmem:[%s6523_s27 + $0x320] sm:$0xff]  }
  0x36   : > { %6054 = vmatmul.mubr.bf16.gmra.mrb[8].mxu0 %v6343_v18  ;;  %6182 = vmatmul.mubr.bf16.gmra.mrb[8].mxu1 %v6344_v19  ;;  %v6407_v18 = vld [vmem:[%s6523_s27 + $0x128] sm:$0xff]  }
  0x37   : > { %6057 = vmatprep.mubr.bf16.mxu0 %v6345_v20  ;;  %6185 = vmatprep.mubr.bf16.mxu1 %v6346_v21  ;;  %v6408_v19 = vld [vmem:[%s6523_s27 + $0x328] sm:$0xff]   ;;  %v6409_v20 = vld [vmem:[%s6523_s27 + $0x130] sm:$0xff]  }
  0x38   : > { %v6410_v21 = vld [vmem:[%s6523_s27 + $0x330] sm:$0xff]  }
  0x3e   : > { %6058 = vmatmul.mubr.bf16.gmra.mrb[12].mxu0 %v6347_v22  ;;  %6186 = vmatmul.mubr.bf16.gmra.mrb[12].mxu1 %v6348_v23  ;;  %v6411_v22 = vld [vmem:[%s6523_s27 + $0x138] sm:$0xff]  }
  0x3f   : > { %6061 = vmatprep.mubr.bf16.mxu0 %v6349_v24  ;;  %6189 = vmatprep.mubr.bf16.mxu1 %v6350_v25  ;;  %v6412_v23 = vld [vmem:[%s6523_s27 + $0x338] sm:$0xff]   ;;  %v6413_v24 = vld [vmem:[%s6523_s27 + $0x140] sm:$0xff]  }
  0x40   : > { %v6414_v25 = vld [vmem:[%s6523_s27 + $0x340] sm:$0xff]  }
  0x46   : > { %6062 = vmatmul.mubr.bf16.gmra.mrb[16].mxu0 %v6351_v26  ;;  %6190 = vmatmul.mubr.bf16.gmra.mrb[16].mxu1 %v6352_v27  ;;  %v6415_v26 = vld [vmem:[%s6523_s27 + $0x148] sm:$0xff]  }
  0x47   : > { %6065 = vmatprep.mubr.bf16.mxu0 %v6353_v28  ;;  %6193 = vmatprep.mubr.bf16.mxu1 %v6354_v29  ;;  %v6416_v27 = vld [vmem:[%s6523_s27 + $0x348] sm:$0xff]   ;;  %v6417_v28 = vld [vmem:[%s6523_s27 + $0x150] sm:$0xff]  }
  0x48   : > { %v6418_v29 = vld [vmem:[%s6523_s27 + $0x350] sm:$0xff]  }
  0x4e   : > { %6066 = vmatmul.mubr.bf16.gmra.mrb[20].mxu0 %v6355_v30  ;;  %6194 = vmatmul.mubr.bf16.gmra.mrb[20].mxu1 %v6356_v31  ;;  %v6419_v30 = vld [vmem:[%s6523_s27 + $0x158] sm:$0xff]  }
  0x4f   : > { %6069 = vmatprep.mubr.bf16.mxu0 %v6357_v32  ;;  %6197 = vmatprep.mubr.bf16.mxu1 %v6358_v33  ;;  %v6420_v31 = vld [vmem:[%s6523_s27 + $0x358] sm:$0xff]   ;;  %v6421_v32 = vld [vmem:[%s6523_s27 + $0x160] sm:$0xff]  }
  0x50   : > { %v6422_v33 = vld [vmem:[%s6523_s27 + $0x360] sm:$0xff]  }
  0x56   : > { %6070 = vmatmul.mubr.bf16.gmra.mrb[24].mxu0 %v6359_v34  ;;  %6198 = vmatmul.mubr.bf16.gmra.mrb[24].mxu1 %v6360_v35  ;;  %v6423_v34 = vld [vmem:[%s6523_s27 + $0x168] sm:$0xff]  }
  0x57   : > { %6073 = vmatprep.mubr.bf16.mxu0 %v6361_v36  ;;  %6201 = vmatprep.mubr.bf16.mxu1 %v6362_v37  ;;  %v6424_v35 = vld [vmem:[%s6523_s27 + $0x368] sm:$0xff]   ;;  %v6425_v36 = vld [vmem:[%s6523_s27 + $0x170] sm:$0xff]  }
  0x58   : > { %v6426_v37 = vld [vmem:[%s6523_s27 + $0x370] sm:$0xff]  }
  0x5e   : > { %6074 = vmatmul.mubr.bf16.gmra.mrb[28].mxu0 %v6363_v38  ;;  %6202 = vmatmul.mubr.bf16.gmra.mrb[28].mxu1 %v6364_v39  ;;  %v6427_v38 = vld [vmem:[%s6523_s27 + $0x178] sm:$0xff]  }
  0x5f   : > { %6077 = vmatprep.mubr.bf16.mxu0 %v6365_v40  ;;  %6205 = vmatprep.mubr.bf16.mxu1 %v6366_v41  ;;  %v6428_v39 = vld [vmem:[%s6523_s27 + $0x378] sm:$0xff]   ;;  %v6429_v40 = vld [vmem:[%s6523_s27 + $0x180] sm:$0xff]  }
  0x60   : > { %v6430_v41 = vld [vmem:[%s6523_s27 + $0x380] sm:$0xff]  }
  0x66   : > { %6078 = vmatmul.mubr.bf16.gmra.mrb[32].mxu0 %v6367_v42  ;;  %6206 = vmatmul.mubr.bf16.gmra.mrb[32].mxu1 %v6368_v43  ;;  %v6431_v42 = vld [vmem:[%s6523_s27 + $0x188] sm:$0xff]  }
  0x67   : > { %6081 = vmatprep.mubr.bf16.mxu0 %v6369_v44  ;;  %6209 = vmatprep.mubr.bf16.mxu1 %v6370_v45  ;;  %v6432_v43 = vld [vmem:[%s6523_s27 + $0x388] sm:$0xff]   ;;  %v6433_v44 = vld [vmem:[%s6523_s27 + $0x190] sm:$0xff]  }
  0x68   : > { %v6434_v45 = vld [vmem:[%s6523_s27 + $0x390] sm:$0xff]  }
  0x6e   : > { %6082 = vmatmul.mubr.bf16.gmra.mrb[36].mxu0 %v6371_v46  ;;  %6210 = vmatmul.mubr.bf16.gmra.mrb[36].mxu1 %v6372_v47  ;;  %v6435_v46 = vld [vmem:[%s6523_s27 + $0x198] sm:$0xff]  }
  0x6f   : > { %6085 = vmatprep.mubr.bf16.mxu0 %v6373_v48  ;;  %6213 = vmatprep.mubr.bf16.mxu1 %v6374_v49  ;;  %v6436_v47 = vld [vmem:[%s6523_s27 + $0x398] sm:$0xff]   ;;  %v6437_v48 = vld [vmem:[%s6523_s27 + $0x1a0] sm:$0xff]  }
  0x70   : > { %v6438_v49 = vld [vmem:[%s6523_s27 + $0x3a0] sm:$0xff]  }
  0x76   : > { %6086 = vmatmul.mubr.bf16.gmra.mrb[40].mxu0 %v6375_v50  ;;  %6214 = vmatmul.mubr.bf16.gmra.mrb[40].mxu1 %v6376_v51  ;;  %v6439_v50 = vld [vmem:[%s6523_s27 + $0x1a8] sm:$0xff]  }
  0x77   : > { %6089 = vmatprep.mubr.bf16.mxu0 %v6377_v52  ;;  %6217 = vmatprep.mubr.bf16.mxu1 %v6378_v53  ;;  %v6440_v51 = vld [vmem:[%s6523_s27 + $0x3a8] sm:$0xff]   ;;  %v6441_v52 = vld [vmem:[%s6523_s27 + $0x1b0] sm:$0xff]  }
  0x78   : > { %v6442_v53 = vld [vmem:[%s6523_s27 + $0x3b0] sm:$0xff]  }
  0x7e   : > { %6090 = vmatmul.mubr.bf16.gmra.mrb[44].mxu0 %v6379_v54  ;;  %6218 = vmatmul.mubr.bf16.gmra.mrb[44].mxu1 %v6380_v55  ;;  %v6653_v54 = vld [vmem:[%s7350_s2] ss:$0 sm:$0xff] }
  0x7f   : > { %6093 = vmatprep.mubr.bf16.mxu0 %v6381_v56  ;;  %6221 = vmatprep.mubr.bf16.mxu1 %v6382_v57  ;;  %v6658_v56 = vld [vmem:[%s7351_s3] ss:$0 sm:$0xff] }
  0x86   : > { %6094 = vmatmul.mubr.bf16.gmra.mrb[48].mxu0 %v6383_v58  ;;  %6222 = vmatmul.mubr.bf16.gmra.mrb[48].mxu1 %v6384_v59 }
  0x87   : > { %6097 = vmatprep.mubr.bf16.mxu0 %v6385_v60  ;;  %6225 = vmatprep.mubr.bf16.mxu1 %v6386_v61 }
  0x8e   : > { %6098 = vmatmul.mubr.bf16.gmra.mrb[52].mxu0 %v6387_v62  ;;  %6226 = vmatmul.mubr.bf16.gmra.mrb[52].mxu1 %v6388_v63  ;;  %v6443_v62 = vld [vmem:[%s6523_s27 + $0x1b8] sm:$0xff]  }
  0x8f   : > { %6101 = vmatprep.mubr.bf16.mxu0 %v6389_v0  ;;  %6229 = vmatprep.mubr.bf16.mxu1 %v6390_v1  ;;  %v6444_v63 = vld [vmem:[%s6523_s27 + $0x3b8] sm:$0xff]  }
  0x96   : > { %6102 = vmatmul.mubr.bf16.gmra.mrb[56].mxu0 %v6391_v2  ;;  %6230 = vmatmul.mubr.bf16.gmra.mrb[56].mxu1 %v6392_v3 }
  0x97   : > { %6105 = vmatprep.mubr.bf16.mxu0 %v6393_v4  ;;  %6233 = vmatprep.mubr.bf16.mxu1 %v6394_v5  ;;  %v6445_v4 = vld [vmem:[%s6523_s27 + $0x1c0] sm:$0xff]  }
  0x98   : > { %v6446_v5 = vld [vmem:[%s6523_s27 + $0x3c0] sm:$0xff]  }
  0x9e   : > { %6106 = vmatmul.mubr.bf16.gmra.mrb[60].mxu0 %v6395_v6  ;;  %6234 = vmatmul.mubr.bf16.gmra.mrb[60].mxu1 %v6396_v7 }
  0x9f   : > { %6109 = vmatprep.mubr.bf16.mxu0 %v6397_v8  ;;  %6237 = vmatprep.mubr.bf16.mxu1 %v6398_v9 }
  0xa6   : > { %6110 = vmatmul.mubr.bf16.gmra.mrb[64].mxu0 %v6399_v10  ;;  %6238 = vmatmul.mubr.bf16.gmra.mrb[64].mxu1 %v6400_v11 }
  0xa7   : > { %6113 = vmatprep.mubr.bf16.mxu0 %v6401_v12  ;;  %6241 = vmatprep.mubr.bf16.mxu1 %v6402_v13 }
  0xae   : > { %6114 = vmatmul.mubr.bf16.gmra.mrb[68].mxu0 %v6403_v14  ;;  %6242 = vmatmul.mubr.bf16.gmra.mrb[68].mxu1 %v6404_v15 }
  0xaf   : > { %6117 = vmatprep.mubr.bf16.mxu0 %v6405_v16  ;;  %6245 = vmatprep.mubr.bf16.mxu1 %v6406_v17 }
  0xb6   : > { %6118 = vmatmul.mubr.bf16.gmra.mrb[72].mxu0 %v6407_v18  ;;  %6246 = vmatmul.mubr.bf16.gmra.mrb[72].mxu1 %v6408_v19 }
  0xb7   : > { %6121 = vmatprep.mubr.bf16.mxu0 %v6409_v20  ;;  %6249 = vmatprep.mubr.bf16.mxu1 %v6410_v21 }
  0xbe   : > { %6122 = vmatmul.mubr.bf16.gmra.mrb[76].mxu0 %v6411_v22  ;;  %6250 = vmatmul.mubr.bf16.gmra.mrb[76].mxu1 %v6412_v23 }
  0xbf   : > { %6125 = vmatprep.mubr.bf16.mxu0 %v6413_v24  ;;  %6253 = vmatprep.mubr.bf16.mxu1 %v6414_v25 }
  0xc6   : > { %6126 = vmatmul.mubr.bf16.gmra.mrb[80].mxu0 %v6415_v26  ;;  %6254 = vmatmul.mubr.bf16.gmra.mrb[80].mxu1 %v6416_v27 }
  0xc7   : > { %6129 = vmatprep.mubr.bf16.mxu0 %v6417_v28  ;;  %6257 = vmatprep.mubr.bf16.mxu1 %v6418_v29 }
  0xce   : > { %6130 = vmatmul.mubr.bf16.gmra.mrb[84].mxu0 %v6419_v30  ;;  %6258 = vmatmul.mubr.bf16.gmra.mrb[84].mxu1 %v6420_v31 }
  0xcf   : > { %6133 = vmatprep.mubr.bf16.mxu0 %v6421_v32  ;;  %6261 = vmatprep.mubr.bf16.mxu1 %v6422_v33 }
  0xd6   : > { %6134 = vmatmul.mubr.bf16.gmra.mrb[88].mxu0 %v6423_v34  ;;  %6262 = vmatmul.mubr.bf16.gmra.mrb[88].mxu1 %v6424_v35 }
  0xd7   : > { %6137 = vmatprep.mubr.bf16.mxu0 %v6425_v36  ;;  %6265 = vmatprep.mubr.bf16.mxu1 %v6426_v37  ;;  %v6447_v36 = vld [vmem:[%s6523_s27 + $0x1c8] sm:$0xff]  }
  0xd8   : > { %v6448_v37 = vld [vmem:[%s6523_s27 + $0x3c8] sm:$0xff]  }
  0xde   : > { %6138 = vmatmul.mubr.bf16.gmra.mrb[92].mxu0 %v6427_v38  ;;  %6266 = vmatmul.mubr.bf16.gmra.mrb[92].mxu1 %v6428_v39 }
  0xdf   : > { %6141 = vmatprep.mubr.bf16.mxu0 %v6429_v40  ;;  %6269 = vmatprep.mubr.bf16.mxu1 %v6430_v41 }
  0xe6   : > { %6142 = vmatmul.mubr.bf16.gmra.mrb[96].mxu0 %v6431_v42  ;;  %6270 = vmatmul.mubr.bf16.gmra.mrb[96].mxu1 %v6432_v43 }
  0xe7   : > { %6145 = vmatprep.mubr.bf16.mxu0 %v6433_v44  ;;  %6273 = vmatprep.mubr.bf16.mxu1 %v6434_v45  ;;  %v6449_v44 = vld [vmem:[%s6523_s27 + $0x1d0] sm:$0xff]  }
  0xe8   : > { %v6450_v45 = vld [vmem:[%s6523_s27 + $0x3d0] sm:$0xff]  }
  0xee   : > { %6146 = vmatmul.mubr.bf16.gmra.mrb[100].mxu0 %v6435_v46  ;;  %6274 = vmatmul.mubr.bf16.gmra.mrb[100].mxu1 %v6436_v47 }
  0xef   : > { %6149 = vmatprep.mubr.bf16.mxu0 %v6437_v48  ;;  %6277 = vmatprep.mubr.bf16.mxu1 %v6438_v49 }
  0xf6   : > { %6150 = vmatmul.mubr.bf16.gmra.mrb[104].mxu0 %v6439_v50  ;;  %6278 = vmatmul.mubr.bf16.gmra.mrb[104].mxu1 %v6440_v51 }
  0xf7   : > { %6153 = vmatprep.mubr.bf16.mxu0 %v6441_v52  ;;  %6281 = vmatprep.mubr.bf16.mxu1 %v6442_v53 }
  0xf9   : > { %v6047_v55 = vpop.f32.mrb[0].mxu0  ;;  %v6175_v57 = vpop.f32.mrb[0].mxu1 }
  0xfa   : > { %v2356_v58 = vmul.f32 %v6047_v55, %v6653_v54  ;;  %v2484_v59 = vmul.f32 %v6175_v57, %v6653_v54  ;;  %v1324_v60 = vpop.f32.mrb[1].mxu0  ;;  %v1836_v61 = vpop.f32.mrb[1].mxu1 }
  0xfb   : > { %v2354_v0 = vmul.f32 %v6653_v54, %v1324_v60  ;;  %v2482_v1 = vmul.f32 %v6653_v54, %v1836_v61  ;;  %v6048_v2 = vpop.f32.mrb[2].mxu0  ;;  %v6176_v3 = vpop.f32.mrb[2].mxu1 }
  0xfc   : > { %v2619_v6 = vadd.f32 %v6658_v56, %v2356_v58  ;;  %v2747_v7 = vadd.f32 %v6658_v56, %v2484_v59  ;;  %v2357_v8 = vmul.f32 %v6048_v2, %v6653_v54  ;;  %v2485_v9 = vmul.f32 %v6176_v3, %v6653_v54  ;;  %v1327_v10 = vpop.f32.mrb[3].mxu0  ;;  %v1839_v11 = vpop.f32.mrb[3].mxu1 }
  0xfd   : > { %v2617_v12 = vadd.f32 %v6658_v56, %v2354_v0  ;;  %v2745_v13 = vadd.f32 %v6658_v56, %v2482_v1  ;;  %v2355_v14 = vmul.f32 %v6653_v54, %v1327_v10  ;;  %v2483_v15 = vmul.f32 %v6653_v54, %v1839_v11 }
  0xfe   : > { %v2620_v16 = vadd.f32 %v6658_v56, %v2357_v8  ;;  %v2748_v17 = vadd.f32 %v6658_v56, %v2485_v9  ;;  %6154 = vmatmul.mubr.bf16.gmra.mrb[108].mxu0 %v6443_v62  ;;  %6282 = vmatmul.mubr.bf16.gmra.mrb[108].mxu1 %v6444_v63  ;;  %v2875_v20 = vmax.f32 %v2619_v6, 0.0  ;;  %v3003_v21 = vmax.f32 %v2747_v7, 0.0 }
  0xff   : > { %v2618_v18 = vadd.f32 %v6658_v56, %v2355_v14  ;;  %v2746_v19 = vadd.f32 %v6658_v56, %v2483_v15  ;;  %6157 = vmatprep.mubr.bf16.mxu0 %v6445_v4  ;;  %6285 = vmatprep.mubr.bf16.mxu1 %v6446_v5  ;;  %v2873_v24 = vmax.f32 %v2617_v12, 0.0  ;;  %v3001_v25 = vmax.f32 %v2745_v13, 0.0  ;;  %v6451_v14 = vld [vmem:[%s6523_s27 + $0x1d8] sm:$0xff]  }
 0x100   : > { %v2876_v22 = vmax.f32 %v2620_v16, 0.0  ;;  %v3004_v23 = vmax.f32 %v2748_v17, 0.0  ;;  %v6452_v15 = vld [vmem:[%s6523_s27 + $0x3d8] sm:$0xff]  }
 0x101   : > { %v2874_v26 = vmax.f32 %v2618_v18, 0.0  ;;  %v3002_v27 = vmax.f32 %v2746_v19, 0.0  ;;  %v6051_v28 = vpop.f32.mrb[4].mxu0  ;;  %v6179_v29 = vpop.f32.mrb[4].mxu1 }
 0x102   : > { %v5134_v30 = vpack.c.bf16 %v2876_v22, %v2875_v20  ;;  %v5454_v31 = vpack.c.bf16 %v3004_v23, %v3003_v21  ;;  %v2360_v32 = vmul.f32 %v6051_v28, %v6653_v54  ;;  %v2488_v33 = vmul.f32 %v6179_v29, %v6653_v54  ;;  %v1340_v34 = vpop.f32.mrb[5].mxu0  ;;  %v1852_v35 = vpop.f32.mrb[5].mxu1  ;;  %v6453_v22 = vld [vmem:[%s6523_s27 + $0x1e0] sm:$0xff]  }
 0x103   : > { %v5129_v38 = vpack.c.bf16 %v2874_v26, %v2873_v24  ;;  %v5449_v39 = vpack.c.bf16 %v3002_v27, %v3001_v25  ;;  %v2358_v40 = vmul.f32 %v6653_v54, %v1340_v34  ;;  %v2486_v41 = vmul.f32 %v6653_v54, %v1852_v35  ;;  %v6052_v42 = vpop.f32.mrb[6].mxu0  ;;  %v6180_v43 = vpop.f32.mrb[6].mxu1  ;;  %v6454_v23 = vld [vmem:[%s6523_s27 + $0x3e0] sm:$0xff]  }
 0x104   : > { %5766 = vst [vmem:[%s6685_s20 + $0x8] sm:$0xff] %v5134_v30   ;;  %5830 = vst [vmem:[%s6685_s20 + $0x208] sm:$0xff] %v5454_v31   ;;  %v2623_v46 = vadd.f32 %v6658_v56, %v2360_v32  ;;  %v2751_v47 = vadd.f32 %v6658_v56, %v2488_v33  ;;  %v2361_v48 = vmul.f32 %v6052_v42, %v6653_v54  ;;  %v1343_v50 = vpop.f32.mrb[7].mxu0  ;;  %v1855_v51 = vpop.f32.mrb[7].mxu1 }
 0x105   : > { %v2489_v49 = vmul.f32 %v6180_v43, %v6653_v54  ;;  %5130 = vst [vmem:[%s6685_s20] sm:$0xff] %v5129_v38   ;;  %5829 = vst [vmem:[%s6685_s20 + $0x200] sm:$0xff] %v5449_v39   ;;  %v2621_v52 = vadd.f32 %v6658_v56, %v2358_v40  ;;  %v2749_v53 = vadd.f32 %v6658_v56, %v2486_v41 }
 0x106   : > { %v2359_v55 = vmul.f32 %v6653_v54, %v1343_v50  ;;  %v2487_v57 = vmul.f32 %v6653_v54, %v1855_v51  ;;  %v2624_v58 = vadd.f32 %v6658_v56, %v2361_v48  ;;  %6158 = vmatmul.mubr.bf16.gmra.mrb[112].mxu0 %v6447_v36  ;;  %6286 = vmatmul.mubr.bf16.gmra.mrb[112].mxu1 %v6448_v37  ;;  %v2879_v62 = vmax.f32 %v2623_v46, 0.0 }
 0x107   : > { %v2752_v59 = vadd.f32 %v6658_v56, %v2489_v49  ;;  %6161 = vmatprep.mubr.bf16.mxu0 %v6449_v44  ;;  %6289 = vmatprep.mubr.bf16.mxu1 %v6450_v45  ;;  %v3007_v63 = vmax.f32 %v2751_v47, 0.0  ;;  %v2877_v2 = vmax.f32 %v2621_v52, 0.0  ;;  %v3005_v3 = vmax.f32 %v2749_v53, 0.0 }
 0x108   : > { %v2622_v60 = vadd.f32 %v6658_v56, %v2359_v55  ;;  %v2750_v61 = vadd.f32 %v6658_v56, %v2487_v57  ;;  %v2880_v0 = vmax.f32 %v2624_v58, 0.0  ;;  %v6455_v55 = vld [vmem:[%s6523_s27 + $0x1e8] sm:$0xff]  }
 0x109   : > { %v3008_v1 = vmax.f32 %v2752_v59, 0.0  ;;  %v6055_v6 = vpop.f32.mrb[8].mxu0  ;;  %v6183_v7 = vpop.f32.mrb[8].mxu1  ;;  %v6456_v57 = vld [vmem:[%s6523_s27 + $0x3e8] sm:$0xff]  }
 0x10a   : > { %v2878_v4 = vmax.f32 %v2622_v60, 0.0  ;;  %v3006_v5 = vmax.f32 %v2750_v61, 0.0  ;;  %v5144_v8 = vpack.c.bf16 %v2880_v0, %v2879_v62  ;;  %v2364_v10 = vmul.f32 %v6055_v6, %v6653_v54  ;;  %v1356_v12 = vpop.f32.mrb[9].mxu0  ;;  %v1868_v13 = vpop.f32.mrb[9].mxu1  ;;  %v6457_v0 = vld [vmem:[%s6523_s27 + $0x1f0] sm:$0xff]  }
 0x10b   : > { %v5464_v9 = vpack.c.bf16 %v3008_v1, %v3007_v63  ;;  %v2492_v11 = vmul.f32 %v6183_v7, %v6653_v54  ;;  %v2362_v18 = vmul.f32 %v6653_v54, %v1356_v12  ;;  %v2490_v19 = vmul.f32 %v6653_v54, %v1868_v13  ;;  %v6056_v20 = vpop.f32.mrb[10].mxu0  ;;  %v6184_v21 = vpop.f32.mrb[10].mxu1  ;;  %v6458_v1 = vld [vmem:[%s6523_s27 + $0x3f0] sm:$0xff]  }
 0x10c   : > { %v5139_v16 = vpack.c.bf16 %v2878_v4, %v2877_v2  ;;  %v5459_v17 = vpack.c.bf16 %v3006_v5, %v3005_v3  ;;  %5768 = vst [vmem:[%s6685_s20 + $0x18] sm:$0xff] %v5144_v8   ;;  %v2627_v24 = vadd.f32 %v6658_v56, %v2364_v10  ;;  %v2365_v26 = vmul.f32 %v6056_v20, %v6653_v54  ;;  %v1359_v28 = vpop.f32.mrb[11].mxu0  ;;  %v1871_v29 = vpop.f32.mrb[11].mxu1 }
 0x10d   : > { %5832 = vst [vmem:[%s6685_s20 + $0x218] sm:$0xff] %v5464_v9   ;;  %v2755_v25 = vadd.f32 %v6658_v56, %v2492_v11  ;;  %v2493_v27 = vmul.f32 %v6184_v21, %v6653_v54  ;;  %v2625_v30 = vadd.f32 %v6658_v56, %v2362_v18  ;;  %v2753_v31 = vadd.f32 %v6658_v56, %v2490_v19 }
 0x10e   : > { %5767 = vst [vmem:[%s6685_s20 + $0x10] sm:$0xff] %v5139_v16   ;;  %5831 = vst [vmem:[%s6685_s20 + $0x210] sm:$0xff] %v5459_v17   ;;  %v2363_v32 = vmul.f32 %v6653_v54, %v1359_v28  ;;  %v2491_v33 = vmul.f32 %v6653_v54, %v1871_v29  ;;  %v2628_v34 = vadd.f32 %v6658_v56, %v2365_v26  ;;  %6162 = vmatmul.mubr.bf16.gmra.mrb[116].mxu0 %v6451_v14 }
 0x10f   : > { %v2756_v35 = vadd.f32 %v6658_v56, %v2493_v27  ;;  %6290 = vmatmul.mubr.bf16.gmra.mrb[116].mxu1 %v6452_v15  ;;  %6165 = vmatprep.mubr.bf16.mxu0 %v6453_v22  ;;  %v2883_v38 = vmax.f32 %v2627_v24, 0.0  ;;  %v3011_v39 = vmax.f32 %v2755_v25, 0.0  ;;  %v2881_v42 = vmax.f32 %v2625_v30, 0.0 }
 0x110   : > { %v2626_v36 = vadd.f32 %v6658_v56, %v2363_v32  ;;  %v2754_v37 = vadd.f32 %v6658_v56, %v2491_v33  ;;  %6293 = vmatprep.mubr.bf16.mxu1 %v6454_v23  ;;  %v2884_v40 = vmax.f32 %v2628_v34, 0.0  ;;  %v3009_v43 = vmax.f32 %v2753_v31, 0.0  ;;  %v6459_v32 = vld [vmem:[%s6523_s27 + $0x1f8] sm:$0xff]  }
 0x111   : > { %v3012_v41 = vmax.f32 %v2756_v35, 0.0  ;;  %v6059_v46 = vpop.f32.mrb[12].mxu0  ;;  %v6187_v47 = vpop.f32.mrb[12].mxu1  ;;  %v6460_v33 = vld [vmem:[%s6523_s27 + $0x3f8] sm:$0xff]  }
 0x112   : > { %v2882_v44 = vmax.f32 %v2626_v36, 0.0  ;;  %v3010_v45 = vmax.f32 %v2754_v37, 0.0  ;;  %v5154_v48 = vpack.c.bf16 %v2884_v40, %v2883_v38  ;;  %v2368_v50 = vmul.f32 %v6059_v46, %v6653_v54  ;;  %v1372_v52 = vpop.f32.mrb[13].mxu0  ;;  %v1884_v53 = vpop.f32.mrb[13].mxu1 }
 0x113   : > { %v5474_v49 = vpack.c.bf16 %v3012_v41, %v3011_v39  ;;  %v2496_v51 = vmul.f32 %v6187_v47, %v6653_v54  ;;  %v2366_v60 = vmul.f32 %v6653_v54, %v1372_v52  ;;  %v2494_v61 = vmul.f32 %v6653_v54, %v1884_v53  ;;  %v6060_v62 = vpop.f32.mrb[14].mxu0  ;;  %v6188_v63 = vpop.f32.mrb[14].mxu1 }
 0x114   : > { %v5149_v58 = vpack.c.bf16 %v2882_v44, %v2881_v42  ;;  %v5469_v59 = vpack.c.bf16 %v3010_v45, %v3009_v43  ;;  %5770 = vst [vmem:[%s6685_s20 + $0x28] sm:$0xff] %v5154_v48   ;;  %v2631_v2 = vadd.f32 %v6658_v56, %v2368_v50  ;;  %v2369_v4 = vmul.f32 %v6060_v62, %v6653_v54  ;;  %v1375_v6 = vpop.f32.mrb[15].mxu0  ;;  %v1887_v7 = vpop.f32.mrb[15].mxu1 }
 0x115   : > { %5834 = vst [vmem:[%s6685_s20 + $0x228] sm:$0xff] %v5474_v49   ;;  %v2759_v3 = vadd.f32 %v6658_v56, %v2496_v51  ;;  %v2497_v5 = vmul.f32 %v6188_v63, %v6653_v54  ;;  %v2629_v8 = vadd.f32 %v6658_v56, %v2366_v60  ;;  %v2757_v9 = vadd.f32 %v6658_v56, %v2494_v61 }
 0x116   : > { %5769 = vst [vmem:[%s6685_s20 + $0x20] sm:$0xff] %v5149_v58   ;;  %5833 = vst [vmem:[%s6685_s20 + $0x220] sm:$0xff] %v5469_v59   ;;  %v2367_v10 = vmul.f32 %v6653_v54, %v1375_v6  ;;  %v2495_v11 = vmul.f32 %v6653_v54, %v1887_v7  ;;  %v2632_v12 = vadd.f32 %v6658_v56, %v2369_v4  ;;  %6166 = vmatmul.mubr.bf16.gmra.mrb[120].mxu0 %v6455_v55 }
 0x117   : > { %v2760_v13 = vadd.f32 %v6658_v56, %v2497_v5  ;;  %6294 = vmatmul.mubr.bf16.gmra.mrb[120].mxu1 %v6456_v57  ;;  %6169 = vmatprep.mubr.bf16.mxu0 %v6457_v0  ;;  %v2887_v16 = vmax.f32 %v2631_v2, 0.0  ;;  %v3015_v17 = vmax.f32 %v2759_v3, 0.0  ;;  %v2885_v20 = vmax.f32 %v2629_v8, 0.0 }
 0x118   : > { %v2630_v14 = vadd.f32 %v6658_v56, %v2367_v10  ;;  %v2758_v15 = vadd.f32 %v6658_v56, %v2495_v11  ;;  %6297 = vmatprep.mubr.bf16.mxu1 %v6458_v1  ;;  %v2888_v18 = vmax.f32 %v2632_v12, 0.0  ;;  %v3013_v21 = vmax.f32 %v2757_v9, 0.0 }
 0x119   : > { %v3016_v19 = vmax.f32 %v2760_v13, 0.0  ;;  %v6063_v24 = vpop.f32.mrb[16].mxu0  ;;  %v6191_v25 = vpop.f32.mrb[16].mxu1 }
 0x11a   : > { %v2886_v22 = vmax.f32 %v2630_v14, 0.0  ;;  %v3014_v23 = vmax.f32 %v2758_v15, 0.0  ;;  %v5164_v26 = vpack.c.bf16 %v2888_v18, %v2887_v16  ;;  %v2372_v28 = vmul.f32 %v6063_v24, %v6653_v54  ;;  %v1388_v30 = vpop.f32.mrb[17].mxu0  ;;  %v1900_v31 = vpop.f32.mrb[17].mxu1 }
 0x11b   : > { %v5484_v27 = vpack.c.bf16 %v3016_v19, %v3015_v17  ;;  %v2500_v29 = vmul.f32 %v6191_v25, %v6653_v54  ;;  %v2370_v36 = vmul.f32 %v6653_v54, %v1388_v30  ;;  %v2498_v37 = vmul.f32 %v6653_v54, %v1900_v31  ;;  %v6064_v38 = vpop.f32.mrb[18].mxu0  ;;  %v6192_v39 = vpop.f32.mrb[18].mxu1 }
 0x11c   : > { %v5159_v34 = vpack.c.bf16 %v2886_v22, %v2885_v20  ;;  %v5479_v35 = vpack.c.bf16 %v3014_v23, %v3013_v21  ;;  %5772 = vst [vmem:[%s6685_s20 + $0x38] sm:$0xff] %v5164_v26   ;;  %v2635_v40 = vadd.f32 %v6658_v56, %v2372_v28  ;;  %v2373_v42 = vmul.f32 %v6064_v38, %v6653_v54  ;;  %v1391_v44 = vpop.f32.mrb[19].mxu0  ;;  %v1903_v45 = vpop.f32.mrb[19].mxu1 }
 0x11d   : > { %5836 = vst [vmem:[%s6685_s20 + $0x238] sm:$0xff] %v5484_v27   ;;  %v2763_v41 = vadd.f32 %v6658_v56, %v2500_v29  ;;  %v2501_v43 = vmul.f32 %v6192_v39, %v6653_v54  ;;  %v2633_v46 = vadd.f32 %v6658_v56, %v2370_v36  ;;  %v2761_v47 = vadd.f32 %v6658_v56, %v2498_v37 }
 0x11e   : > { %5771 = vst [vmem:[%s6685_s20 + $0x30] sm:$0xff] %v5159_v34   ;;  %5835 = vst [vmem:[%s6685_s20 + $0x230] sm:$0xff] %v5479_v35   ;;  %v2371_v48 = vmul.f32 %v6653_v54, %v1391_v44  ;;  %v2499_v49 = vmul.f32 %v6653_v54, %v1903_v45  ;;  %v2636_v50 = vadd.f32 %v6658_v56, %v2373_v42  ;;  %6170 = vmatmul.mubr.bf16.gmra.mrb[124].mxu0 %v6459_v32 }
 0x11f   : > { %v2764_v51 = vadd.f32 %v6658_v56, %v2501_v43  ;;  %6298 = vmatmul.mubr.bf16.gmra.mrb[124].mxu1 %v6460_v33  ;;  %v2891_v55 = vmax.f32 %v2635_v40, 0.0  ;;  %v3019_v57 = vmax.f32 %v2763_v41, 0.0  ;;  %v2889_v60 = vmax.f32 %v2633_v46, 0.0 }
 0x120   : > { %v2634_v52 = vadd.f32 %v6658_v56, %v2371_v48  ;;  %v2762_v53 = vadd.f32 %v6658_v56, %v2499_v49  ;;  %v2892_v58 = vmax.f32 %v2636_v50, 0.0  ;;  %v3017_v61 = vmax.f32 %v2761_v47, 0.0 }
 0x121   : > { %v3020_v59 = vmax.f32 %v2764_v51, 0.0  ;;  %v6067_v0 = vpop.f32.mrb[20].mxu0  ;;  %v6195_v1 = vpop.f32.mrb[20].mxu1 }
 0x122   : > { %v2890_v62 = vmax.f32 %v2634_v52, 0.0  ;;  %v3018_v63 = vmax.f32 %v2762_v53, 0.0  ;;  %v5174_v2 = vpack.c.bf16 %v2892_v58, %v2891_v55  ;;  %v2376_v4 = vmul.f32 %v6067_v0, %v6653_v54  ;;  %v1404_v6 = vpop.f32.mrb[21].mxu0  ;;  %v1916_v7 = vpop.f32.mrb[21].mxu1 }
 0x123   : > { %v5494_v3 = vpack.c.bf16 %v3020_v59, %v3019_v57  ;;  %v2504_v5 = vmul.f32 %v6195_v1, %v6653_v54  ;;  %v2374_v10 = vmul.f32 %v6653_v54, %v1404_v6  ;;  %v2502_v11 = vmul.f32 %v6653_v54, %v1916_v7  ;;  %v6068_v12 = vpop.f32.mrb[22].mxu0  ;;  %v6196_v13 = vpop.f32.mrb[22].mxu1 }
 0x124   : > { %v5169_v8 = vpack.c.bf16 %v2890_v62, %v2889_v60  ;;  %v5489_v9 = vpack.c.bf16 %v3018_v63, %v3017_v61  ;;  %5774 = vst [vmem:[%s6685_s20 + $0x48] sm:$0xff] %v5174_v2   ;;  %v2639_v14 = vadd.f32 %v6658_v56, %v2376_v4  ;;  %v2377_v16 = vmul.f32 %v6068_v12, %v6653_v54  ;;  %v1407_v18 = vpop.f32.mrb[23].mxu0  ;;  %v1919_v19 = vpop.f32.mrb[23].mxu1 }
 0x125   : > { %5838 = vst [vmem:[%s6685_s20 + $0x248] sm:$0xff] %v5494_v3   ;;  %v2767_v15 = vadd.f32 %v6658_v56, %v2504_v5  ;;  %v2505_v17 = vmul.f32 %v6196_v13, %v6653_v54  ;;  %v2637_v20 = vadd.f32 %v6658_v56, %v2374_v10  ;;  %v2765_v21 = vadd.f32 %v6658_v56, %v2502_v11 }
 0x126   : > { %5773 = vst [vmem:[%s6685_s20 + $0x40] sm:$0xff] %v5169_v8   ;;  %5837 = vst [vmem:[%s6685_s20 + $0x240] sm:$0xff] %v5489_v9   ;;  %v2375_v22 = vmul.f32 %v6653_v54, %v1407_v18  ;;  %v2503_v23 = vmul.f32 %v6653_v54, %v1919_v19  ;;  %v2640_v24 = vadd.f32 %v6658_v56, %v2377_v16  ;;  %v2895_v28 = vmax.f32 %v2639_v14, 0.0 }
 0x127   : > { %v2768_v25 = vadd.f32 %v6658_v56, %v2505_v17  ;;  %v3023_v29 = vmax.f32 %v2767_v15, 0.0  ;;  %v2893_v32 = vmax.f32 %v2637_v20, 0.0  ;;  %v3021_v33 = vmax.f32 %v2765_v21, 0.0 }
 0x128   : > { %v2638_v26 = vadd.f32 %v6658_v56, %v2375_v22  ;;  %v2766_v27 = vadd.f32 %v6658_v56, %v2503_v23  ;;  %v2896_v30 = vmax.f32 %v2640_v24, 0.0 }
 0x129   : > { %v3024_v31 = vmax.f32 %v2768_v25, 0.0  ;;  %v6071_v36 = vpop.f32.mrb[24].mxu0  ;;  %v6199_v37 = vpop.f32.mrb[24].mxu1 }
 0x12a   : > { %v2894_v34 = vmax.f32 %v2638_v26, 0.0  ;;  %v3022_v35 = vmax.f32 %v2766_v27, 0.0  ;;  %v5184_v38 = vpack.c.bf16 %v2896_v30, %v2895_v28  ;;  %v2380_v40 = vmul.f32 %v6071_v36, %v6653_v54  ;;  %v1420_v42 = vpop.f32.mrb[25].mxu0  ;;  %v1932_v43 = vpop.f32.mrb[25].mxu1 }
 0x12b   : > { %v5504_v39 = vpack.c.bf16 %v3024_v31, %v3023_v29  ;;  %v2508_v41 = vmul.f32 %v6199_v37, %v6653_v54  ;;  %v2378_v46 = vmul.f32 %v6653_v54, %v1420_v42  ;;  %v2506_v47 = vmul.f32 %v6653_v54, %v1932_v43  ;;  %v6072_v48 = vpop.f32.mrb[26].mxu0  ;;  %v6200_v49 = vpop.f32.mrb[26].mxu1 }
 0x12c   : > { %v5179_v44 = vpack.c.bf16 %v2894_v34, %v2893_v32  ;;  %v5499_v45 = vpack.c.bf16 %v3022_v35, %v3021_v33  ;;  %5776 = vst [vmem:[%s6685_s20 + $0x58] sm:$0xff] %v5184_v38   ;;  %v2643_v50 = vadd.f32 %v6658_v56, %v2380_v40  ;;  %v2381_v52 = vmul.f32 %v6072_v48, %v6653_v54  ;;  %v1423_v55 = vpop.f32.mrb[27].mxu0  ;;  %v1935_v57 = vpop.f32.mrb[27].mxu1 }
 0x12d   : > { %5840 = vst [vmem:[%s6685_s20 + $0x258] sm:$0xff] %v5504_v39   ;;  %v2771_v51 = vadd.f32 %v6658_v56, %v2508_v41  ;;  %v2509_v53 = vmul.f32 %v6200_v49, %v6653_v54  ;;  %v2641_v58 = vadd.f32 %v6658_v56, %v2378_v46  ;;  %v2769_v59 = vadd.f32 %v6658_v56, %v2506_v47 }
 0x12e   : > { %5775 = vst [vmem:[%s6685_s20 + $0x50] sm:$0xff] %v5179_v44   ;;  %5839 = vst [vmem:[%s6685_s20 + $0x250] sm:$0xff] %v5499_v45   ;;  %v2379_v60 = vmul.f32 %v6653_v54, %v1423_v55  ;;  %v2507_v61 = vmul.f32 %v6653_v54, %v1935_v57  ;;  %v2644_v62 = vadd.f32 %v6658_v56, %v2381_v52  ;;  %v2899_v2 = vmax.f32 %v2643_v50, 0.0 }
 0x12f   : > { %v2772_v63 = vadd.f32 %v6658_v56, %v2509_v53  ;;  %v3027_v3 = vmax.f32 %v2771_v51, 0.0  ;;  %v2897_v6 = vmax.f32 %v2641_v58, 0.0  ;;  %v3025_v7 = vmax.f32 %v2769_v59, 0.0 }
 0x130   : > { %v2642_v0 = vadd.f32 %v6658_v56, %v2379_v60  ;;  %v2770_v1 = vadd.f32 %v6658_v56, %v2507_v61  ;;  %v2900_v4 = vmax.f32 %v2644_v62, 0.0 }
 0x131   : > { %v3028_v5 = vmax.f32 %v2772_v63, 0.0  ;;  %v6075_v10 = vpop.f32.mrb[28].mxu0  ;;  %v6203_v11 = vpop.f32.mrb[28].mxu1 }
 0x132   : > { %v2898_v8 = vmax.f32 %v2642_v0, 0.0  ;;  %v3026_v9 = vmax.f32 %v2770_v1, 0.0  ;;  %v5194_v12 = vpack.c.bf16 %v2900_v4, %v2899_v2  ;;  %v2384_v14 = vmul.f32 %v6075_v10, %v6653_v54  ;;  %v1436_v16 = vpop.f32.mrb[29].mxu0  ;;  %v1948_v17 = vpop.f32.mrb[29].mxu1 }
 0x133   : > { %v5514_v13 = vpack.c.bf16 %v3028_v5, %v3027_v3  ;;  %v2512_v15 = vmul.f32 %v6203_v11, %v6653_v54  ;;  %v2382_v20 = vmul.f32 %v6653_v54, %v1436_v16  ;;  %v2510_v21 = vmul.f32 %v6653_v54, %v1948_v17  ;;  %v6076_v22 = vpop.f32.mrb[30].mxu0  ;;  %v6204_v23 = vpop.f32.mrb[30].mxu1 }
 0x134   : > { %v5189_v18 = vpack.c.bf16 %v2898_v8, %v2897_v6  ;;  %v5509_v19 = vpack.c.bf16 %v3026_v9, %v3025_v7  ;;  %5778 = vst [vmem:[%s6685_s20 + $0x68] sm:$0xff] %v5194_v12   ;;  %v2647_v24 = vadd.f32 %v6658_v56, %v2384_v14  ;;  %v2385_v26 = vmul.f32 %v6076_v22, %v6653_v54  ;;  %v1439_v28 = vpop.f32.mrb[31].mxu0  ;;  %v1951_v29 = vpop.f32.mrb[31].mxu1 }
 0x135   : > { %5842 = vst [vmem:[%s6685_s20 + $0x268] sm:$0xff] %v5514_v13   ;;  %v2775_v25 = vadd.f32 %v6658_v56, %v2512_v15  ;;  %v2513_v27 = vmul.f32 %v6204_v23, %v6653_v54  ;;  %v2645_v30 = vadd.f32 %v6658_v56, %v2382_v20  ;;  %v2773_v31 = vadd.f32 %v6658_v56, %v2510_v21 }
 0x136   : > { %5777 = vst [vmem:[%s6685_s20 + $0x60] sm:$0xff] %v5189_v18   ;;  %5841 = vst [vmem:[%s6685_s20 + $0x260] sm:$0xff] %v5509_v19   ;;  %v2383_v32 = vmul.f32 %v6653_v54, %v1439_v28  ;;  %v2511_v33 = vmul.f32 %v6653_v54, %v1951_v29  ;;  %v2648_v34 = vadd.f32 %v6658_v56, %v2385_v26  ;;  %v2903_v38 = vmax.f32 %v2647_v24, 0.0 }
 0x137   : > { %v2776_v35 = vadd.f32 %v6658_v56, %v2513_v27  ;;  %v3031_v39 = vmax.f32 %v2775_v25, 0.0  ;;  %v2901_v42 = vmax.f32 %v2645_v30, 0.0  ;;  %v3029_v43 = vmax.f32 %v2773_v31, 0.0 }
 0x138   : > { %v2646_v36 = vadd.f32 %v6658_v56, %v2383_v32  ;;  %v2774_v37 = vadd.f32 %v6658_v56, %v2511_v33  ;;  %v2904_v40 = vmax.f32 %v2648_v34, 0.0 }
 0x139   : > { %v3032_v41 = vmax.f32 %v2776_v35, 0.0  ;;  %v6079_v46 = vpop.f32.mrb[32].mxu0  ;;  %v6207_v47 = vpop.f32.mrb[32].mxu1 }
 0x13a   : > { %v2902_v44 = vmax.f32 %v2646_v36, 0.0  ;;  %v3030_v45 = vmax.f32 %v2774_v37, 0.0  ;;  %v5204_v48 = vpack.c.bf16 %v2904_v40, %v2903_v38  ;;  %v2388_v50 = vmul.f32 %v6079_v46, %v6653_v54  ;;  %v1452_v52 = vpop.f32.mrb[33].mxu0  ;;  %v1964_v53 = vpop.f32.mrb[33].mxu1 }
 0x13b   : > { %v5524_v49 = vpack.c.bf16 %v3032_v41, %v3031_v39  ;;  %v2516_v51 = vmul.f32 %v6207_v47, %v6653_v54  ;;  %v2386_v58 = vmul.f32 %v6653_v54, %v1452_v52  ;;  %v2514_v59 = vmul.f32 %v6653_v54, %v1964_v53  ;;  %v6080_v60 = vpop.f32.mrb[34].mxu0  ;;  %v6208_v61 = vpop.f32.mrb[34].mxu1 }
 0x13c   : > { %v5199_v55 = vpack.c.bf16 %v2902_v44, %v2901_v42  ;;  %v5519_v57 = vpack.c.bf16 %v3030_v45, %v3029_v43  ;;  %5780 = vst [vmem:[%s6685_s20 + $0x78] sm:$0xff] %v5204_v48   ;;  %v2651_v62 = vadd.f32 %v6658_v56, %v2388_v50  ;;  %v2389_v0 = vmul.f32 %v6080_v60, %v6653_v54  ;;  %v1455_v2 = vpop.f32.mrb[35].mxu0  ;;  %v1967_v3 = vpop.f32.mrb[35].mxu1 }
 0x13d   : > { %5844 = vst [vmem:[%s6685_s20 + $0x278] sm:$0xff] %v5524_v49   ;;  %v2779_v63 = vadd.f32 %v6658_v56, %v2516_v51  ;;  %v2517_v1 = vmul.f32 %v6208_v61, %v6653_v54  ;;  %v2649_v4 = vadd.f32 %v6658_v56, %v2386_v58  ;;  %v2777_v5 = vadd.f32 %v6658_v56, %v2514_v59 }
 0x13e   : > { %5779 = vst [vmem:[%s6685_s20 + $0x70] sm:$0xff] %v5199_v55   ;;  %5843 = vst [vmem:[%s6685_s20 + $0x270] sm:$0xff] %v5519_v57   ;;  %v2387_v6 = vmul.f32 %v6653_v54, %v1455_v2  ;;  %v2515_v7 = vmul.f32 %v6653_v54, %v1967_v3  ;;  %v2652_v8 = vadd.f32 %v6658_v56, %v2389_v0  ;;  %v2907_v12 = vmax.f32 %v2651_v62, 0.0 }
 0x13f   : > { %v2780_v9 = vadd.f32 %v6658_v56, %v2517_v1  ;;  %v3035_v13 = vmax.f32 %v2779_v63, 0.0  ;;  %v2905_v16 = vmax.f32 %v2649_v4, 0.0  ;;  %v3033_v17 = vmax.f32 %v2777_v5, 0.0 }
 0x140   : > { %v2650_v10 = vadd.f32 %v6658_v56, %v2387_v6  ;;  %v2778_v11 = vadd.f32 %v6658_v56, %v2515_v7  ;;  %v2908_v14 = vmax.f32 %v2652_v8, 0.0 }
 0x141   : > { %v3036_v15 = vmax.f32 %v2780_v9, 0.0  ;;  %v6083_v20 = vpop.f32.mrb[36].mxu0  ;;  %v6211_v21 = vpop.f32.mrb[36].mxu1 }
 0x142   : > { %v2906_v18 = vmax.f32 %v2650_v10, 0.0  ;;  %v3034_v19 = vmax.f32 %v2778_v11, 0.0  ;;  %v5214_v22 = vpack.c.bf16 %v2908_v14, %v2907_v12  ;;  %v2392_v24 = vmul.f32 %v6083_v20, %v6653_v54  ;;  %v1468_v26 = vpop.f32.mrb[37].mxu0  ;;  %v1980_v27 = vpop.f32.mrb[37].mxu1 }
 0x143   : > { %v5534_v23 = vpack.c.bf16 %v3036_v15, %v3035_v13  ;;  %v2520_v25 = vmul.f32 %v6211_v21, %v6653_v54  ;;  %v2390_v30 = vmul.f32 %v6653_v54, %v1468_v26  ;;  %v2518_v31 = vmul.f32 %v6653_v54, %v1980_v27  ;;  %v6084_v32 = vpop.f32.mrb[38].mxu0  ;;  %v6212_v33 = vpop.f32.mrb[38].mxu1 }
 0x144   : > { %v5209_v28 = vpack.c.bf16 %v2906_v18, %v2905_v16  ;;  %v5529_v29 = vpack.c.bf16 %v3034_v19, %v3033_v17  ;;  %5782 = vst [vmem:[%s6685_s20 + $0x88] sm:$0xff] %v5214_v22   ;;  %v2655_v34 = vadd.f32 %v6658_v56, %v2392_v24  ;;  %v2393_v36 = vmul.f32 %v6084_v32, %v6653_v54  ;;  %v1471_v38 = vpop.f32.mrb[39].mxu0  ;;  %v1983_v39 = vpop.f32.mrb[39].mxu1 }
 0x145   : > { %5846 = vst [vmem:[%s6685_s20 + $0x288] sm:$0xff] %v5534_v23   ;;  %v2783_v35 = vadd.f32 %v6658_v56, %v2520_v25  ;;  %v2521_v37 = vmul.f32 %v6212_v33, %v6653_v54  ;;  %v2653_v40 = vadd.f32 %v6658_v56, %v2390_v30  ;;  %v2781_v41 = vadd.f32 %v6658_v56, %v2518_v31 }
 0x146   : > { %5781 = vst [vmem:[%s6685_s20 + $0x80] sm:$0xff] %v5209_v28   ;;  %5845 = vst [vmem:[%s6685_s20 + $0x280] sm:$0xff] %v5529_v29   ;;  %v2391_v42 = vmul.f32 %v6653_v54, %v1471_v38  ;;  %v2519_v43 = vmul.f32 %v6653_v54, %v1983_v39  ;;  %v2656_v44 = vadd.f32 %v6658_v56, %v2393_v36  ;;  %v2911_v48 = vmax.f32 %v2655_v34, 0.0 }
 0x147   : > { %v2784_v45 = vadd.f32 %v6658_v56, %v2521_v37  ;;  %v3039_v49 = vmax.f32 %v2783_v35, 0.0  ;;  %v2909_v52 = vmax.f32 %v2653_v40, 0.0  ;;  %v3037_v53 = vmax.f32 %v2781_v41, 0.0 }
 0x148   : > { %v2654_v46 = vadd.f32 %v6658_v56, %v2391_v42  ;;  %v2782_v47 = vadd.f32 %v6658_v56, %v2519_v43  ;;  %v2912_v50 = vmax.f32 %v2656_v44, 0.0 }
 0x149   : > { %v3040_v51 = vmax.f32 %v2784_v45, 0.0  ;;  %v6087_v58 = vpop.f32.mrb[40].mxu0  ;;  %v6215_v59 = vpop.f32.mrb[40].mxu1 }
 0x14a   : > { %v2910_v55 = vmax.f32 %v2654_v46, 0.0  ;;  %v3038_v57 = vmax.f32 %v2782_v47, 0.0  ;;  %v5224_v60 = vpack.c.bf16 %v2912_v50, %v2911_v48  ;;  %v2396_v62 = vmul.f32 %v6087_v58, %v6653_v54  ;;  %v1484_v0 = vpop.f32.mrb[41].mxu0  ;;  %v1996_v1 = vpop.f32.mrb[41].mxu1 }
 0x14b   : > { %v5544_v61 = vpack.c.bf16 %v3040_v51, %v3039_v49  ;;  %v2524_v63 = vmul.f32 %v6215_v59, %v6653_v54  ;;  %v2394_v4 = vmul.f32 %v6653_v54, %v1484_v0  ;;  %v2522_v5 = vmul.f32 %v6653_v54, %v1996_v1  ;;  %v6088_v6 = vpop.f32.mrb[42].mxu0  ;;  %v6216_v7 = vpop.f32.mrb[42].mxu1 }
 0x14c   : > { %v5219_v2 = vpack.c.bf16 %v2910_v55, %v2909_v52  ;;  %v5539_v3 = vpack.c.bf16 %v3038_v57, %v3037_v53  ;;  %5784 = vst [vmem:[%s6685_s20 + $0x98] sm:$0xff] %v5224_v60   ;;  %v2659_v8 = vadd.f32 %v6658_v56, %v2396_v62  ;;  %v2397_v10 = vmul.f32 %v6088_v6, %v6653_v54  ;;  %v1487_v12 = vpop.f32.mrb[43].mxu0  ;;  %v1999_v13 = vpop.f32.mrb[43].mxu1 }
 0x14d   : > { %5848 = vst [vmem:[%s6685_s20 + $0x298] sm:$0xff] %v5544_v61   ;;  %v2787_v9 = vadd.f32 %v6658_v56, %v2524_v63  ;;  %v2525_v11 = vmul.f32 %v6216_v7, %v6653_v54  ;;  %v2657_v14 = vadd.f32 %v6658_v56, %v2394_v4  ;;  %v2785_v15 = vadd.f32 %v6658_v56, %v2522_v5  ;;  %v6924_v7 = vld [vmem:[%s7350_s2] ss:$0 sm:$0xff] }
 0x14e   : > { %5783 = vst [vmem:[%s6685_s20 + $0x90] sm:$0xff] %v5219_v2   ;;  %5847 = vst [vmem:[%s6685_s20 + $0x290] sm:$0xff] %v5539_v3   ;;  %v2395_v16 = vmul.f32 %v6653_v54, %v1487_v12  ;;  %v2523_v17 = vmul.f32 %v6653_v54, %v1999_v13  ;;  %v2660_v18 = vadd.f32 %v6658_v56, %v2397_v10  ;;  %v2915_v22 = vmax.f32 %v2659_v8, 0.0 }
 0x14f   : > { %v2788_v19 = vadd.f32 %v6658_v56, %v2525_v11  ;;  %v3043_v23 = vmax.f32 %v2787_v9, 0.0  ;;  %v2913_v26 = vmax.f32 %v2657_v14, 0.0  ;;  %v3041_v27 = vmax.f32 %v2785_v15, 0.0 }
 0x150   : > { %v2658_v20 = vadd.f32 %v6658_v56, %v2395_v16  ;;  %v2786_v21 = vadd.f32 %v6658_v56, %v2523_v17  ;;  %v2916_v24 = vmax.f32 %v2660_v18, 0.0  ;;  %v6935_v17 = vld [vmem:[%s7351_s3] ss:$0 sm:$0xff] }
 0x151   : > { %v3044_v25 = vmax.f32 %v2788_v19, 0.0  ;;  %v6091_v30 = vpop.f32.mrb[44].mxu0  ;;  %v6219_v31 = vpop.f32.mrb[44].mxu1 }
 0x152   : > { %v2914_v28 = vmax.f32 %v2658_v20, 0.0  ;;  %v3042_v29 = vmax.f32 %v2786_v21, 0.0  ;;  %v5234_v32 = vpack.c.bf16 %v2916_v24, %v2915_v22  ;;  %v2400_v34 = vmul.f32 %v6091_v30, %v6653_v54  ;;  %v1500_v36 = vpop.f32.mrb[45].mxu0  ;;  %v2012_v37 = vpop.f32.mrb[45].mxu1 }
 0x153   : > { %v5554_v33 = vpack.c.bf16 %v3044_v25, %v3043_v23  ;;  %v2528_v35 = vmul.f32 %v6219_v31, %v6653_v54  ;;  %v2398_v40 = vmul.f32 %v6653_v54, %v1500_v36  ;;  %v2526_v41 = vmul.f32 %v6653_v54, %v2012_v37  ;;  %v6092_v42 = vpop.f32.mrb[46].mxu0  ;;  %v6220_v43 = vpop.f32.mrb[46].mxu1 }
 0x154   : > { %v5229_v38 = vpack.c.bf16 %v2914_v28, %v2913_v26  ;;  %v5549_v39 = vpack.c.bf16 %v3042_v29, %v3041_v27  ;;  %5786 = vst [vmem:[%s6685_s20 + $0xa8] sm:$0xff] %v5234_v32   ;;  %v2663_v44 = vadd.f32 %v6658_v56, %v2400_v34  ;;  %v2401_v46 = vmul.f32 %v6092_v42, %v6653_v54  ;;  %v1503_v48 = vpop.f32.mrb[47].mxu0  ;;  %v2015_v49 = vpop.f32.mrb[47].mxu1 }
 0x155   : > { %5850 = vst [vmem:[%s6685_s20 + $0x2a8] sm:$0xff] %v5554_v33   ;;  %v2791_v45 = vadd.f32 %v6658_v56, %v2528_v35  ;;  %v2529_v47 = vmul.f32 %v6220_v43, %v6653_v54  ;;  %v2661_v50 = vadd.f32 %v6658_v56, %v2398_v40  ;;  %v2789_v51 = vadd.f32 %v6658_v56, %v2526_v41 }
 0x156   : > { %5785 = vst [vmem:[%s6685_s20 + $0xa0] sm:$0xff] %v5229_v38   ;;  %5849 = vst [vmem:[%s6685_s20 + $0x2a0] sm:$0xff] %v5549_v39   ;;  %v2399_v52 = vmul.f32 %v6653_v54, %v1503_v48  ;;  %v2527_v53 = vmul.f32 %v6653_v54, %v2015_v49  ;;  %v2664_v55 = vadd.f32 %v6658_v56, %v2401_v46  ;;  %v2919_v60 = vmax.f32 %v2663_v44, 0.0 }
 0x157   : > { %v2792_v57 = vadd.f32 %v6658_v56, %v2529_v47  ;;  %v3047_v61 = vmax.f32 %v2791_v45, 0.0  ;;  %v2917_v0 = vmax.f32 %v2661_v50, 0.0  ;;  %v3045_v1 = vmax.f32 %v2789_v51, 0.0 }
 0x158   : > { %v2662_v58 = vadd.f32 %v6658_v56, %v2399_v52  ;;  %v2790_v59 = vadd.f32 %v6658_v56, %v2527_v53  ;;  %v2920_v62 = vmax.f32 %v2664_v55, 0.0 }
 0x159   : > { %v3048_v63 = vmax.f32 %v2792_v57, 0.0  ;;  %v6095_v4 = vpop.f32.mrb[48].mxu0  ;;  %v6223_v54 = vpop.f32.mrb[48].mxu1 }
 0x15a   : > { %v2918_v2 = vmax.f32 %v2662_v58, 0.0  ;;  %v3046_v3 = vmax.f32 %v2790_v59, 0.0  ;;  %v5244_v5 = vpack.c.bf16 %v2920_v62, %v2919_v60  ;;  %v2404_v56 = vmul.f32 %v6924_v7, %v6095_v4  ;;  %v1516_v9 = vpop.f32.mrb[49].mxu0  ;;  %v2028_v10 = vpop.f32.mrb[49].mxu1 }
 0x15b   : > { %v5564_v6 = vpack.c.bf16 %v3048_v63, %v3047_v61  ;;  %v2532_v8 = vmul.f32 %v6924_v7, %v6223_v54  ;;  %v2402_v13 = vmul.f32 %v6924_v7, %v1516_v9  ;;  %v2530_v14 = vmul.f32 %v6924_v7, %v2028_v10  ;;  %v6096_v15 = vpop.f32.mrb[50].mxu0  ;;  %v6224_v16 = vpop.f32.mrb[50].mxu1 }
 0x15c   : > { %v5239_v11 = vpack.c.bf16 %v2918_v2, %v2917_v0  ;;  %v5559_v12 = vpack.c.bf16 %v3046_v3, %v3045_v1  ;;  %5788 = vst [vmem:[%s6685_s20 + $0xb8] sm:$0xff] %v5244_v5   ;;  %v2667_v18 = vadd.f32 %v6935_v17, %v2404_v56  ;;  %v2405_v20 = vmul.f32 %v6924_v7, %v6096_v15  ;;  %v1519_v22 = vpop.f32.mrb[51].mxu0  ;;  %v2031_v23 = vpop.f32.mrb[51].mxu1 }
 0x15d   : > { %5852 = vst [vmem:[%s6685_s20 + $0x2b8] sm:$0xff] %v5564_v6   ;;  %v2795_v19 = vadd.f32 %v6935_v17, %v2532_v8  ;;  %v2533_v21 = vmul.f32 %v6924_v7, %v6224_v16  ;;  %v2665_v24 = vadd.f32 %v6935_v17, %v2402_v13  ;;  %v2793_v25 = vadd.f32 %v6935_v17, %v2530_v14 }
 0x15e   : > { %5787 = vst [vmem:[%s6685_s20 + $0xb0] sm:$0xff] %v5239_v11   ;;  %5851 = vst [vmem:[%s6685_s20 + $0x2b0] sm:$0xff] %v5559_v12   ;;  %v2403_v26 = vmul.f32 %v6924_v7, %v1519_v22  ;;  %v2531_v27 = vmul.f32 %v6924_v7, %v2031_v23  ;;  %v2668_v28 = vadd.f32 %v6935_v17, %v2405_v20  ;;  %v2923_v32 = vmax.f32 %v2667_v18, 0.0 }
 0x15f   : > { %v2796_v29 = vadd.f32 %v6935_v17, %v2533_v21  ;;  %v3051_v33 = vmax.f32 %v2795_v19, 0.0  ;;  %v2921_v36 = vmax.f32 %v2665_v24, 0.0  ;;  %v3049_v37 = vmax.f32 %v2793_v25, 0.0 }
 0x160   : > { %v2666_v30 = vadd.f32 %v6935_v17, %v2403_v26  ;;  %v2794_v31 = vadd.f32 %v6935_v17, %v2531_v27  ;;  %v2924_v34 = vmax.f32 %v2668_v28, 0.0 }
 0x161   : > { %v3052_v35 = vmax.f32 %v2796_v29, 0.0  ;;  %v6099_v40 = vpop.f32.mrb[52].mxu0  ;;  %v6227_v41 = vpop.f32.mrb[52].mxu1 }
 0x162   : > { %v2922_v38 = vmax.f32 %v2666_v30, 0.0  ;;  %v3050_v39 = vmax.f32 %v2794_v31, 0.0  ;;  %v5254_v42 = vpack.c.bf16 %v2924_v34, %v2923_v32  ;;  %v2408_v44 = vmul.f32 %v6924_v7, %v6099_v40  ;;  %v1532_v46 = vpop.f32.mrb[53].mxu0  ;;  %v2044_v47 = vpop.f32.mrb[53].mxu1 }
 0x163   : > { %v5574_v43 = vpack.c.bf16 %v3052_v35, %v3051_v33  ;;  %v2536_v45 = vmul.f32 %v6924_v7, %v6227_v41  ;;  %v2406_v50 = vmul.f32 %v6924_v7, %v1532_v46  ;;  %v2534_v51 = vmul.f32 %v6924_v7, %v2044_v47  ;;  %v6100_v52 = vpop.f32.mrb[54].mxu0  ;;  %v6228_v53 = vpop.f32.mrb[54].mxu1 }
 0x164   : > { %v5249_v48 = vpack.c.bf16 %v2922_v38, %v2921_v36  ;;  %v5569_v49 = vpack.c.bf16 %v3050_v39, %v3049_v37  ;;  %5790 = vst [vmem:[%s6685_s20 + $0xc8] sm:$0xff] %v5254_v42   ;;  %v2671_v55 = vadd.f32 %v6935_v17, %v2408_v44  ;;  %v2409_v58 = vmul.f32 %v6924_v7, %v6100_v52  ;;  %v1535_v60 = vpop.f32.mrb[55].mxu0  ;;  %v2047_v61 = vpop.f32.mrb[55].mxu1 }
 0x165   : > { %5854 = vst [vmem:[%s6685_s20 + $0x2c8] sm:$0xff] %v5574_v43   ;;  %v2799_v57 = vadd.f32 %v6935_v17, %v2536_v45  ;;  %v2537_v59 = vmul.f32 %v6924_v7, %v6228_v53  ;;  %v2669_v62 = vadd.f32 %v6935_v17, %v2406_v50  ;;  %v2797_v63 = vadd.f32 %v6935_v17, %v2534_v51 }
 0x166   : > { %5789 = vst [vmem:[%s6685_s20 + $0xc0] sm:$0xff] %v5249_v48   ;;  %5853 = vst [vmem:[%s6685_s20 + $0x2c0] sm:$0xff] %v5569_v49   ;;  %v2407_v0 = vmul.f32 %v6924_v7, %v1535_v60  ;;  %v2535_v1 = vmul.f32 %v6924_v7, %v2047_v61  ;;  %v2672_v2 = vadd.f32 %v6935_v17, %v2409_v58  ;;  %v2927_v5 = vmax.f32 %v2671_v55, 0.0 }
 0x167   : > { %v2800_v3 = vadd.f32 %v6935_v17, %v2537_v59  ;;  %v3055_v6 = vmax.f32 %v2799_v57, 0.0  ;;  %v2925_v9 = vmax.f32 %v2669_v62, 0.0  ;;  %v3053_v10 = vmax.f32 %v2797_v63, 0.0 }
 0x168   : > { %v2670_v4 = vadd.f32 %v6935_v17, %v2407_v0  ;;  %v2798_v54 = vadd.f32 %v6935_v17, %v2535_v1  ;;  %v2928_v56 = vmax.f32 %v2672_v2, 0.0 }
 0x169   : > { %v3056_v8 = vmax.f32 %v2800_v3, 0.0  ;;  %v6103_v13 = vpop.f32.mrb[56].mxu0  ;;  %v6231_v14 = vpop.f32.mrb[56].mxu1 }
 0x16a   : > { %v2926_v11 = vmax.f32 %v2670_v4, 0.0  ;;  %v3054_v12 = vmax.f32 %v2798_v54, 0.0  ;;  %v5264_v15 = vpack.c.bf16 %v2928_v56, %v2927_v5  ;;  %v2412_v18 = vmul.f32 %v6924_v7, %v6103_v13  ;;  %v1548_v20 = vpop.f32.mrb[57].mxu0  ;;  %v2060_v21 = vpop.f32.mrb[57].mxu1 }
 0x16b   : > { %v5584_v16 = vpack.c.bf16 %v3056_v8, %v3055_v6  ;;  %v2540_v19 = vmul.f32 %v6924_v7, %v6231_v14  ;;  %v2410_v24 = vmul.f32 %v6924_v7, %v1548_v20  ;;  %v2538_v25 = vmul.f32 %v6924_v7, %v2060_v21  ;;  %v6104_v26 = vpop.f32.mrb[58].mxu0  ;;  %v6232_v27 = vpop.f32.mrb[58].mxu1 }
 0x16c   : > { %v5259_v22 = vpack.c.bf16 %v2926_v11, %v2925_v9  ;;  %v5579_v23 = vpack.c.bf16 %v3054_v12, %v3053_v10  ;;  %5792 = vst [vmem:[%s6685_s20 + $0xd8] sm:$0xff] %v5264_v15   ;;  %v2675_v28 = vadd.f32 %v6935_v17, %v2412_v18  ;;  %v2413_v30 = vmul.f32 %v6924_v7, %v6104_v26  ;;  %v1551_v32 = vpop.f32.mrb[59].mxu0  ;;  %v2063_v33 = vpop.f32.mrb[59].mxu1 }
 0x16d   : > { %5856 = vst [vmem:[%s6685_s20 + $0x2d8] sm:$0xff] %v5584_v16   ;;  %v2803_v29 = vadd.f32 %v6935_v17, %v2540_v19  ;;  %v2541_v31 = vmul.f32 %v6924_v7, %v6232_v27  ;;  %v2673_v34 = vadd.f32 %v6935_v17, %v2410_v24  ;;  %v2801_v35 = vadd.f32 %v6935_v17, %v2538_v25 }
 0x16e   : > { %5791 = vst [vmem:[%s6685_s20 + $0xd0] sm:$0xff] %v5259_v22   ;;  %5855 = vst [vmem:[%s6685_s20 + $0x2d0] sm:$0xff] %v5579_v23   ;;  %v2411_v36 = vmul.f32 %v6924_v7, %v1551_v32  ;;  %v2539_v37 = vmul.f32 %v6924_v7, %v2063_v33  ;;  %v2676_v38 = vadd.f32 %v6935_v17, %v2413_v30  ;;  %v2931_v42 = vmax.f32 %v2675_v28, 0.0 }
 0x16f   : > { %v2804_v39 = vadd.f32 %v6935_v17, %v2541_v31  ;;  %v3059_v43 = vmax.f32 %v2803_v29, 0.0  ;;  %v2929_v46 = vmax.f32 %v2673_v34, 0.0  ;;  %v3057_v47 = vmax.f32 %v2801_v35, 0.0 }
 0x170   : > { %v2674_v40 = vadd.f32 %v6935_v17, %v2411_v36  ;;  %v2802_v41 = vadd.f32 %v6935_v17, %v2539_v37  ;;  %v2932_v44 = vmax.f32 %v2676_v38, 0.0 }
 0x171   : > { %v3060_v45 = vmax.f32 %v2804_v39, 0.0  ;;  %v6107_v50 = vpop.f32.mrb[60].mxu0  ;;  %v6235_v51 = vpop.f32.mrb[60].mxu1 }
 0x172   : > { %v2930_v48 = vmax.f32 %v2674_v40, 0.0  ;;  %v3058_v49 = vmax.f32 %v2802_v41, 0.0  ;;  %v5274_v52 = vpack.c.bf16 %v2932_v44, %v2931_v42  ;;  %v2416_v55 = vmul.f32 %v6924_v7, %v6107_v50  ;;  %v1564_v58 = vpop.f32.mrb[61].mxu0  ;;  %v2076_v59 = vpop.f32.mrb[61].mxu1 }
 0x173   : > { %v5594_v53 = vpack.c.bf16 %v3060_v45, %v3059_v43  ;;  %v2544_v57 = vmul.f32 %v6924_v7, %v6235_v51  ;;  %v2414_v62 = vmul.f32 %v6924_v7, %v1564_v58  ;;  %v2542_v63 = vmul.f32 %v6924_v7, %v2076_v59  ;;  %v6108_v0 = vpop.f32.mrb[62].mxu0  ;;  %v6236_v1 = vpop.f32.mrb[62].mxu1 }
 0x174   : > { %v5269_v60 = vpack.c.bf16 %v2930_v48, %v2929_v46  ;;  %v5589_v61 = vpack.c.bf16 %v3058_v49, %v3057_v47  ;;  %5794 = vst [vmem:[%s6685_s20 + $0xe8] sm:$0xff] %v5274_v52   ;;  %v2679_v2 = vadd.f32 %v6935_v17, %v2416_v55  ;;  %v2417_v4 = vmul.f32 %v6924_v7, %v6108_v0  ;;  %v1567_v5 = vpop.f32.mrb[63].mxu0  ;;  %v2079_v6 = vpop.f32.mrb[63].mxu1 }
 0x175   : > { %5858 = vst [vmem:[%s6685_s20 + $0x2e8] sm:$0xff] %v5594_v53   ;;  %v2807_v3 = vadd.f32 %v6935_v17, %v2544_v57  ;;  %v2545_v54 = vmul.f32 %v6924_v7, %v6236_v1  ;;  %v2677_v56 = vadd.f32 %v6935_v17, %v2414_v62  ;;  %v2805_v8 = vadd.f32 %v6935_v17, %v2542_v63 }
 0x176   : > { %5793 = vst [vmem:[%s6685_s20 + $0xe0] sm:$0xff] %v5269_v60   ;;  %5857 = vst [vmem:[%s6685_s20 + $0x2e0] sm:$0xff] %v5589_v61   ;;  %v2415_v9 = vmul.f32 %v6924_v7, %v1567_v5  ;;  %v2543_v10 = vmul.f32 %v6924_v7, %v2079_v6  ;;  %v2680_v11 = vadd.f32 %v6935_v17, %v2417_v4  ;;  %v2935_v15 = vmax.f32 %v2679_v2, 0.0 }
 0x177   : > { %v2808_v12 = vadd.f32 %v6935_v17, %v2545_v54  ;;  %v3063_v16 = vmax.f32 %v2807_v3, 0.0  ;;  %v2933_v20 = vmax.f32 %v2677_v56, 0.0  ;;  %v3061_v21 = vmax.f32 %v2805_v8, 0.0 }
 0x178   : > { %v2678_v13 = vadd.f32 %v6935_v17, %v2415_v9  ;;  %v2806_v14 = vadd.f32 %v6935_v17, %v2543_v10  ;;  %v2936_v18 = vmax.f32 %v2680_v11, 0.0 }
 0x179   : > { %v3064_v19 = vmax.f32 %v2808_v12, 0.0  ;;  %v6111_v24 = vpop.f32.mrb[64].mxu0  ;;  %v6239_v25 = vpop.f32.mrb[64].mxu1 }
 0x17a   : > { %v2934_v22 = vmax.f32 %v2678_v13, 0.0  ;;  %v3062_v23 = vmax.f32 %v2806_v14, 0.0  ;;  %v5284_v26 = vpack.c.bf16 %v2936_v18, %v2935_v15  ;;  %v2420_v28 = vmul.f32 %v6924_v7, %v6111_v24  ;;  %v1580_v30 = vpop.f32.mrb[65].mxu0  ;;  %v2092_v31 = vpop.f32.mrb[65].mxu1 }
 0x17b   : > { %v5604_v27 = vpack.c.bf16 %v3064_v19, %v3063_v16  ;;  %v2548_v29 = vmul.f32 %v6924_v7, %v6239_v25  ;;  %v2418_v34 = vmul.f32 %v6924_v7, %v1580_v30  ;;  %v2546_v35 = vmul.f32 %v6924_v7, %v2092_v31  ;;  %v6112_v36 = vpop.f32.mrb[66].mxu0  ;;  %v6240_v37 = vpop.f32.mrb[66].mxu1 }
 0x17c   : > { %v5279_v32 = vpack.c.bf16 %v2934_v22, %v2933_v20  ;;  %v5599_v33 = vpack.c.bf16 %v3062_v23, %v3061_v21  ;;  %5796 = vst [vmem:[%s6685_s20 + $0xf8] sm:$0xff] %v5284_v26   ;;  %v2683_v38 = vadd.f32 %v6935_v17, %v2420_v28  ;;  %v2421_v40 = vmul.f32 %v6924_v7, %v6112_v36  ;;  %v1583_v42 = vpop.f32.mrb[67].mxu0  ;;  %v2095_v43 = vpop.f32.mrb[67].mxu1 }
 0x17d   : > { %5860 = vst [vmem:[%s6685_s20 + $0x2f8] sm:$0xff] %v5604_v27   ;;  %v2811_v39 = vadd.f32 %v6935_v17, %v2548_v29  ;;  %v2549_v41 = vmul.f32 %v6924_v7, %v6240_v37  ;;  %v2681_v44 = vadd.f32 %v6935_v17, %v2418_v34  ;;  %v2809_v45 = vadd.f32 %v6935_v17, %v2546_v35 }
 0x17e   : > { %5795 = vst [vmem:[%s6685_s20 + $0xf0] sm:$0xff] %v5279_v32   ;;  %5859 = vst [vmem:[%s6685_s20 + $0x2f0] sm:$0xff] %v5599_v33   ;;  %v2419_v46 = vmul.f32 %v6924_v7, %v1583_v42  ;;  %v2547_v47 = vmul.f32 %v6924_v7, %v2095_v43  ;;  %v2684_v48 = vadd.f32 %v6935_v17, %v2421_v40  ;;  %v2939_v52 = vmax.f32 %v2683_v38, 0.0 }
 0x17f   : > { %v2812_v49 = vadd.f32 %v6935_v17, %v2549_v41  ;;  %v3067_v53 = vmax.f32 %v2811_v39, 0.0  ;;  %v2937_v58 = vmax.f32 %v2681_v44, 0.0  ;;  %v3065_v59 = vmax.f32 %v2809_v45, 0.0 }
 0x180   : > { %v2682_v50 = vadd.f32 %v6935_v17, %v2419_v46  ;;  %v2810_v51 = vadd.f32 %v6935_v17, %v2547_v47  ;;  %v2940_v55 = vmax.f32 %v2684_v48, 0.0 }
 0x181   : > { %v3068_v57 = vmax.f32 %v2812_v49, 0.0  ;;  %v6115_v62 = vpop.f32.mrb[68].mxu0  ;;  %v6243_v63 = vpop.f32.mrb[68].mxu1 }
 0x182   : > { %v2938_v60 = vmax.f32 %v2682_v50, 0.0  ;;  %v3066_v61 = vmax.f32 %v2810_v51, 0.0  ;;  %v5294_v0 = vpack.c.bf16 %v2940_v55, %v2939_v52  ;;  %v2424_v2 = vmul.f32 %v6924_v7, %v6115_v62  ;;  %v1596_v4 = vpop.f32.mrb[69].mxu0  ;;  %v2108_v54 = vpop.f32.mrb[69].mxu1 }
 0x183   : > { %v5614_v1 = vpack.c.bf16 %v3068_v57, %v3067_v53  ;;  %v2552_v3 = vmul.f32 %v6924_v7, %v6243_v63  ;;  %v2422_v56 = vmul.f32 %v6924_v7, %v1596_v4  ;;  %v2550_v8 = vmul.f32 %v6924_v7, %v2108_v54  ;;  %v6116_v9 = vpop.f32.mrb[70].mxu0  ;;  %v6244_v10 = vpop.f32.mrb[70].mxu1 }
 0x184   : > { %v5289_v5 = vpack.c.bf16 %v2938_v60, %v2937_v58  ;;  %v5609_v6 = vpack.c.bf16 %v3066_v61, %v3065_v59  ;;  %5798 = vst [vmem:[%s6685_s20 + $0x108] sm:$0xff] %v5294_v0   ;;  %v2687_v11 = vadd.f32 %v6935_v17, %v2424_v2  ;;  %v2425_v13 = vmul.f32 %v6924_v7, %v6116_v9  ;;  %v1599_v15 = vpop.f32.mrb[71].mxu0  ;;  %v2111_v16 = vpop.f32.mrb[71].mxu1 }
 0x185   : > { %5862 = vst [vmem:[%s6685_s20 + $0x308] sm:$0xff] %v5614_v1   ;;  %v2815_v12 = vadd.f32 %v6935_v17, %v2552_v3  ;;  %v2553_v14 = vmul.f32 %v6924_v7, %v6244_v10  ;;  %v2685_v18 = vadd.f32 %v6935_v17, %v2422_v56  ;;  %v2813_v19 = vadd.f32 %v6935_v17, %v2550_v8 }
 0x186   : > { %5797 = vst [vmem:[%s6685_s20 + $0x100] sm:$0xff] %v5289_v5   ;;  %5861 = vst [vmem:[%s6685_s20 + $0x300] sm:$0xff] %v5609_v6   ;;  %v2423_v20 = vmul.f32 %v6924_v7, %v1599_v15  ;;  %v2551_v21 = vmul.f32 %v6924_v7, %v2111_v16  ;;  %v2688_v22 = vadd.f32 %v6935_v17, %v2425_v13  ;;  %v2943_v26 = vmax.f32 %v2687_v11, 0.0 }
 0x187   : > { %v2816_v23 = vadd.f32 %v6935_v17, %v2553_v14  ;;  %v3071_v27 = vmax.f32 %v2815_v12, 0.0  ;;  %v2941_v30 = vmax.f32 %v2685_v18, 0.0  ;;  %v3069_v31 = vmax.f32 %v2813_v19, 0.0 }
 0x188   : > { %v2686_v24 = vadd.f32 %v6935_v17, %v2423_v20  ;;  %v2814_v25 = vadd.f32 %v6935_v17, %v2551_v21  ;;  %v2944_v28 = vmax.f32 %v2688_v22, 0.0 }
 0x189   : > { %v3072_v29 = vmax.f32 %v2816_v23, 0.0  ;;  %v6119_v34 = vpop.f32.mrb[72].mxu0  ;;  %v6247_v35 = vpop.f32.mrb[72].mxu1 }
 0x18a   : > { %v2942_v32 = vmax.f32 %v2686_v24, 0.0  ;;  %v3070_v33 = vmax.f32 %v2814_v25, 0.0  ;;  %v5304_v36 = vpack.c.bf16 %v2944_v28, %v2943_v26  ;;  %v2428_v38 = vmul.f32 %v6924_v7, %v6119_v34  ;;  %v1612_v40 = vpop.f32.mrb[73].mxu0  ;;  %v2124_v41 = vpop.f32.mrb[73].mxu1 }
 0x18b   : > { %v5624_v37 = vpack.c.bf16 %v3072_v29, %v3071_v27  ;;  %v2556_v39 = vmul.f32 %v6924_v7, %v6247_v35  ;;  %v2426_v44 = vmul.f32 %v6924_v7, %v1612_v40  ;;  %v2554_v45 = vmul.f32 %v6924_v7, %v2124_v41  ;;  %v6120_v46 = vpop.f32.mrb[74].mxu0  ;;  %v6248_v47 = vpop.f32.mrb[74].mxu1 }
 0x18c   : > { %v5299_v42 = vpack.c.bf16 %v2942_v32, %v2941_v30  ;;  %v5619_v43 = vpack.c.bf16 %v3070_v33, %v3069_v31  ;;  %5800 = vst [vmem:[%s6685_s20 + $0x118] sm:$0xff] %v5304_v36   ;;  %v2691_v48 = vadd.f32 %v6935_v17, %v2428_v38  ;;  %v2429_v50 = vmul.f32 %v6924_v7, %v6120_v46  ;;  %v1615_v52 = vpop.f32.mrb[75].mxu0  ;;  %v2127_v53 = vpop.f32.mrb[75].mxu1 }
 0x18d   : > { %5864 = vst [vmem:[%s6685_s20 + $0x318] sm:$0xff] %v5624_v37   ;;  %v2819_v49 = vadd.f32 %v6935_v17, %v2556_v39  ;;  %v2557_v51 = vmul.f32 %v6924_v7, %v6248_v47  ;;  %v2689_v55 = vadd.f32 %v6935_v17, %v2426_v44  ;;  %v2817_v57 = vadd.f32 %v6935_v17, %v2554_v45 }
 0x18e   : > { %5799 = vst [vmem:[%s6685_s20 + $0x110] sm:$0xff] %v5299_v42   ;;  %5863 = vst [vmem:[%s6685_s20 + $0x310] sm:$0xff] %v5619_v43   ;;  %v2427_v58 = vmul.f32 %v6924_v7, %v1615_v52  ;;  %v2555_v59 = vmul.f32 %v6924_v7, %v2127_v53  ;;  %v2692_v60 = vadd.f32 %v6935_v17, %v2429_v50  ;;  %v2947_v0 = vmax.f32 %v2691_v48, 0.0 }
 0x18f   : > { %v2820_v61 = vadd.f32 %v6935_v17, %v2557_v51  ;;  %v3075_v1 = vmax.f32 %v2819_v49, 0.0  ;;  %v2945_v4 = vmax.f32 %v2689_v55, 0.0  ;;  %v3073_v54 = vmax.f32 %v2817_v57, 0.0 }
 0x190   : > { %v2690_v62 = vadd.f32 %v6935_v17, %v2427_v58  ;;  %v2818_v63 = vadd.f32 %v6935_v17, %v2555_v59  ;;  %v2948_v2 = vmax.f32 %v2692_v60, 0.0 }
 0x191   : > { %v3076_v3 = vmax.f32 %v2820_v61, 0.0  ;;  %v6123_v56 = vpop.f32.mrb[76].mxu0  ;;  %v6251_v8 = vpop.f32.mrb[76].mxu1 }
 0x192   : > { %v2946_v5 = vmax.f32 %v2690_v62, 0.0  ;;  %v3074_v6 = vmax.f32 %v2818_v63, 0.0  ;;  %v5314_v9 = vpack.c.bf16 %v2948_v2, %v2947_v0  ;;  %v2432_v11 = vmul.f32 %v6924_v7, %v6123_v56  ;;  %v1628_v13 = vpop.f32.mrb[77].mxu0  ;;  %v2140_v14 = vpop.f32.mrb[77].mxu1 }
 0x193   : > { %v5634_v10 = vpack.c.bf16 %v3076_v3, %v3075_v1  ;;  %v2560_v12 = vmul.f32 %v6924_v7, %v6251_v8  ;;  %v2430_v18 = vmul.f32 %v6924_v7, %v1628_v13  ;;  %v2558_v19 = vmul.f32 %v6924_v7, %v2140_v14  ;;  %v6124_v20 = vpop.f32.mrb[78].mxu0  ;;  %v6252_v21 = vpop.f32.mrb[78].mxu1 }
 0x194   : > { %v5309_v15 = vpack.c.bf16 %v2946_v5, %v2945_v4  ;;  %v5629_v16 = vpack.c.bf16 %v3074_v6, %v3073_v54  ;;  %5802 = vst [vmem:[%s6685_s20 + $0x128] sm:$0xff] %v5314_v9   ;;  %v2695_v22 = vadd.f32 %v6935_v17, %v2432_v11  ;;  %v2433_v24 = vmul.f32 %v6924_v7, %v6124_v20  ;;  %v1631_v26 = vpop.f32.mrb[79].mxu0  ;;  %v2143_v27 = vpop.f32.mrb[79].mxu1 }
 0x195   : > { %5866 = vst [vmem:[%s6685_s20 + $0x328] sm:$0xff] %v5634_v10   ;;  %v2823_v23 = vadd.f32 %v6935_v17, %v2560_v12  ;;  %v2561_v25 = vmul.f32 %v6924_v7, %v6252_v21  ;;  %v2693_v28 = vadd.f32 %v6935_v17, %v2430_v18  ;;  %v2821_v29 = vadd.f32 %v6935_v17, %v2558_v19 }
 0x196   : > { %5801 = vst [vmem:[%s6685_s20 + $0x120] sm:$0xff] %v5309_v15   ;;  %5865 = vst [vmem:[%s6685_s20 + $0x320] sm:$0xff] %v5629_v16   ;;  %v2431_v30 = vmul.f32 %v6924_v7, %v1631_v26  ;;  %v2559_v31 = vmul.f32 %v6924_v7, %v2143_v27  ;;  %v2696_v32 = vadd.f32 %v6935_v17, %v2433_v24  ;;  %v2951_v36 = vmax.f32 %v2695_v22, 0.0 }
 0x197   : > { %v2824_v33 = vadd.f32 %v6935_v17, %v2561_v25  ;;  %v3079_v37 = vmax.f32 %v2823_v23, 0.0  ;;  %v2949_v40 = vmax.f32 %v2693_v28, 0.0  ;;  %v3077_v41 = vmax.f32 %v2821_v29, 0.0 }
 0x198   : > { %v2694_v34 = vadd.f32 %v6935_v17, %v2431_v30  ;;  %v2822_v35 = vadd.f32 %v6935_v17, %v2559_v31  ;;  %v2952_v38 = vmax.f32 %v2696_v32, 0.0 }
 0x199   : > { %v3080_v39 = vmax.f32 %v2824_v33, 0.0  ;;  %v6127_v44 = vpop.f32.mrb[80].mxu0  ;;  %v6255_v45 = vpop.f32.mrb[80].mxu1 }
 0x19a   : > { %v2950_v42 = vmax.f32 %v2694_v34, 0.0  ;;  %v3078_v43 = vmax.f32 %v2822_v35, 0.0  ;;  %v5324_v46 = vpack.c.bf16 %v2952_v38, %v2951_v36  ;;  %v2436_v48 = vmul.f32 %v6924_v7, %v6127_v44  ;;  %v1644_v50 = vpop.f32.mrb[81].mxu0  ;;  %v2156_v51 = vpop.f32.mrb[81].mxu1 }
 0x19b   : > { %v5644_v47 = vpack.c.bf16 %v3080_v39, %v3079_v37  ;;  %v2564_v49 = vmul.f32 %v6924_v7, %v6255_v45  ;;  %v2434_v55 = vmul.f32 %v6924_v7, %v1644_v50  ;;  %v2562_v57 = vmul.f32 %v6924_v7, %v2156_v51  ;;  %v6128_v58 = vpop.f32.mrb[82].mxu0  ;;  %v6256_v59 = vpop.f32.mrb[82].mxu1 }
 0x19c   : > { %v5319_v52 = vpack.c.bf16 %v2950_v42, %v2949_v40  ;;  %v5639_v53 = vpack.c.bf16 %v3078_v43, %v3077_v41  ;;  %5804 = vst [vmem:[%s6685_s20 + $0x138] sm:$0xff] %v5324_v46   ;;  %v2699_v60 = vadd.f32 %v6935_v17, %v2436_v48  ;;  %v2437_v62 = vmul.f32 %v6924_v7, %v6128_v58  ;;  %v1647_v0 = vpop.f32.mrb[83].mxu0  ;;  %v2159_v1 = vpop.f32.mrb[83].mxu1 }
 0x19d   : > { %5868 = vst [vmem:[%s6685_s20 + $0x338] sm:$0xff] %v5644_v47   ;;  %v2827_v61 = vadd.f32 %v6935_v17, %v2564_v49  ;;  %v2565_v63 = vmul.f32 %v6924_v7, %v6256_v59  ;;  %v2697_v2 = vadd.f32 %v6935_v17, %v2434_v55  ;;  %v2825_v3 = vadd.f32 %v6935_v17, %v2562_v57 }
 0x19e   : > { %5803 = vst [vmem:[%s6685_s20 + $0x130] sm:$0xff] %v5319_v52   ;;  %5867 = vst [vmem:[%s6685_s20 + $0x330] sm:$0xff] %v5639_v53   ;;  %v2435_v4 = vmul.f32 %v6924_v7, %v1647_v0  ;;  %v2563_v54 = vmul.f32 %v6924_v7, %v2159_v1  ;;  %v2700_v5 = vadd.f32 %v6935_v17, %v2437_v62  ;;  %v2955_v9 = vmax.f32 %v2699_v60, 0.0 }
 0x19f   : > { %v2828_v6 = vadd.f32 %v6935_v17, %v2565_v63  ;;  %v3083_v10 = vmax.f32 %v2827_v61, 0.0  ;;  %v2953_v13 = vmax.f32 %v2697_v2, 0.0  ;;  %v3081_v14 = vmax.f32 %v2825_v3, 0.0 }
 0x1a0   : > { %v2698_v56 = vadd.f32 %v6935_v17, %v2435_v4  ;;  %v2826_v8 = vadd.f32 %v6935_v17, %v2563_v54  ;;  %v2956_v11 = vmax.f32 %v2700_v5, 0.0 }
 0x1a1   : > { %v3084_v12 = vmax.f32 %v2828_v6, 0.0  ;;  %v6131_v18 = vpop.f32.mrb[84].mxu0  ;;  %v6259_v19 = vpop.f32.mrb[84].mxu1 }
 0x1a2   : > { %v2954_v15 = vmax.f32 %v2698_v56, 0.0  ;;  %v3082_v16 = vmax.f32 %v2826_v8, 0.0  ;;  %v5334_v20 = vpack.c.bf16 %v2956_v11, %v2955_v9  ;;  %v2440_v22 = vmul.f32 %v6924_v7, %v6131_v18  ;;  %v1660_v24 = vpop.f32.mrb[85].mxu0  ;;  %v2172_v25 = vpop.f32.mrb[85].mxu1 }
 0x1a3   : > { %v5654_v21 = vpack.c.bf16 %v3084_v12, %v3083_v10  ;;  %v2568_v23 = vmul.f32 %v6924_v7, %v6259_v19  ;;  %v2438_v28 = vmul.f32 %v6924_v7, %v1660_v24  ;;  %v2566_v29 = vmul.f32 %v6924_v7, %v2172_v25  ;;  %v6132_v30 = vpop.f32.mrb[86].mxu0  ;;  %v6260_v31 = vpop.f32.mrb[86].mxu1 }
 0x1a4   : > { %v5329_v26 = vpack.c.bf16 %v2954_v15, %v2953_v13  ;;  %v5649_v27 = vpack.c.bf16 %v3082_v16, %v3081_v14  ;;  %5806 = vst [vmem:[%s6685_s20 + $0x148] sm:$0xff] %v5334_v20   ;;  %v2703_v32 = vadd.f32 %v6935_v17, %v2440_v22  ;;  %v2441_v34 = vmul.f32 %v6924_v7, %v6132_v30  ;;  %v1663_v36 = vpop.f32.mrb[87].mxu0  ;;  %v2175_v37 = vpop.f32.mrb[87].mxu1 }
 0x1a5   : > { %5870 = vst [vmem:[%s6685_s20 + $0x348] sm:$0xff] %v5654_v21   ;;  %v2831_v33 = vadd.f32 %v6935_v17, %v2568_v23  ;;  %v2569_v35 = vmul.f32 %v6924_v7, %v6260_v31  ;;  %v2701_v38 = vadd.f32 %v6935_v17, %v2438_v28  ;;  %v2829_v39 = vadd.f32 %v6935_v17, %v2566_v29 }
 0x1a6   : > { %5805 = vst [vmem:[%s6685_s20 + $0x140] sm:$0xff] %v5329_v26   ;;  %5869 = vst [vmem:[%s6685_s20 + $0x340] sm:$0xff] %v5649_v27   ;;  %v2439_v40 = vmul.f32 %v6924_v7, %v1663_v36  ;;  %v2567_v41 = vmul.f32 %v6924_v7, %v2175_v37  ;;  %v2704_v42 = vadd.f32 %v6935_v17, %v2441_v34  ;;  %v2959_v46 = vmax.f32 %v2703_v32, 0.0 }
 0x1a7   : > { %v2832_v43 = vadd.f32 %v6935_v17, %v2569_v35  ;;  %v3087_v47 = vmax.f32 %v2831_v33, 0.0  ;;  %v2957_v50 = vmax.f32 %v2701_v38, 0.0  ;;  %v3085_v51 = vmax.f32 %v2829_v39, 0.0 }
 0x1a8   : > { %v2702_v44 = vadd.f32 %v6935_v17, %v2439_v40  ;;  %v2830_v45 = vadd.f32 %v6935_v17, %v2567_v41  ;;  %v2960_v48 = vmax.f32 %v2704_v42, 0.0 }
 0x1a9   : > { %v3088_v49 = vmax.f32 %v2832_v43, 0.0  ;;  %v6135_v55 = vpop.f32.mrb[88].mxu0  ;;  %v6263_v57 = vpop.f32.mrb[88].mxu1 }
 0x1aa   : > { %v2958_v52 = vmax.f32 %v2702_v44, 0.0  ;;  %v3086_v53 = vmax.f32 %v2830_v45, 0.0  ;;  %v5344_v58 = vpack.c.bf16 %v2960_v48, %v2959_v46  ;;  %v2444_v60 = vmul.f32 %v6924_v7, %v6135_v55  ;;  %v1676_v62 = vpop.f32.mrb[89].mxu0  ;;  %v2188_v63 = vpop.f32.mrb[89].mxu1 }
 0x1ab   : > { %v5664_v59 = vpack.c.bf16 %v3088_v49, %v3087_v47  ;;  %v2572_v61 = vmul.f32 %v6924_v7, %v6263_v57  ;;  %v2442_v2 = vmul.f32 %v6924_v7, %v1676_v62  ;;  %v2570_v3 = vmul.f32 %v6924_v7, %v2188_v63  ;;  %v6136_v4 = vpop.f32.mrb[90].mxu0  ;;  %v6264_v54 = vpop.f32.mrb[90].mxu1 }
 0x1ac   : > { %v5339_v0 = vpack.c.bf16 %v2958_v52, %v2957_v50  ;;  %v5659_v1 = vpack.c.bf16 %v3086_v53, %v3085_v51  ;;  %5808 = vst [vmem:[%s6685_s20 + $0x158] sm:$0xff] %v5344_v58   ;;  %v2707_v5 = vadd.f32 %v6935_v17, %v2444_v60  ;;  %v2445_v56 = vmul.f32 %v6924_v7, %v6136_v4  ;;  %v1679_v9 = vpop.f32.mrb[91].mxu0  ;;  %v2191_v10 = vpop.f32.mrb[91].mxu1 }
 0x1ad   : > { %5872 = vst [vmem:[%s6685_s20 + $0x358] sm:$0xff] %v5664_v59   ;;  %v2835_v6 = vadd.f32 %v6935_v17, %v2572_v61  ;;  %v2573_v8 = vmul.f32 %v6924_v7, %v6264_v54  ;;  %v2705_v11 = vadd.f32 %v6935_v17, %v2442_v2  ;;  %v2833_v12 = vadd.f32 %v6935_v17, %v2570_v3 }
 0x1ae   : > { %5807 = vst [vmem:[%s6685_s20 + $0x150] sm:$0xff] %v5339_v0   ;;  %5871 = vst [vmem:[%s6685_s20 + $0x350] sm:$0xff] %v5659_v1   ;;  %v2443_v13 = vmul.f32 %v6924_v7, %v1679_v9  ;;  %v2571_v14 = vmul.f32 %v6924_v7, %v2191_v10  ;;  %v2708_v15 = vadd.f32 %v6935_v17, %v2445_v56  ;;  %v2963_v20 = vmax.f32 %v2707_v5, 0.0 }
 0x1af   : > { %v2836_v16 = vadd.f32 %v6935_v17, %v2573_v8  ;;  %v3091_v21 = vmax.f32 %v2835_v6, 0.0  ;;  %v2961_v24 = vmax.f32 %v2705_v11, 0.0  ;;  %v3089_v25 = vmax.f32 %v2833_v12, 0.0 }
 0x1b0   : > { %v2706_v18 = vadd.f32 %v6935_v17, %v2443_v13  ;;  %v2834_v19 = vadd.f32 %v6935_v17, %v2571_v14  ;;  %v2964_v22 = vmax.f32 %v2708_v15, 0.0 }
 0x1b1   : > { %v3092_v23 = vmax.f32 %v2836_v16, 0.0  ;;  %v6139_v28 = vpop.f32.mrb[92].mxu0  ;;  %v6267_v29 = vpop.f32.mrb[92].mxu1 }
 0x1b2   : > { %v2962_v26 = vmax.f32 %v2706_v18, 0.0  ;;  %v3090_v27 = vmax.f32 %v2834_v19, 0.0  ;;  %v5354_v30 = vpack.c.bf16 %v2964_v22, %v2963_v20  ;;  %v2448_v32 = vmul.f32 %v6924_v7, %v6139_v28  ;;  %v1692_v34 = vpop.f32.mrb[93].mxu0  ;;  %v2204_v35 = vpop.f32.mrb[93].mxu1 }
 0x1b3   : > { %v5674_v31 = vpack.c.bf16 %v3092_v23, %v3091_v21  ;;  %v2576_v33 = vmul.f32 %v6924_v7, %v6267_v29  ;;  %v2446_v38 = vmul.f32 %v6924_v7, %v1692_v34  ;;  %v2574_v39 = vmul.f32 %v6924_v7, %v2204_v35  ;;  %v6140_v40 = vpop.f32.mrb[94].mxu0  ;;  %v6268_v41 = vpop.f32.mrb[94].mxu1 }
 0x1b4   : > { %v5349_v36 = vpack.c.bf16 %v2962_v26, %v2961_v24  ;;  %v5669_v37 = vpack.c.bf16 %v3090_v27, %v3089_v25  ;;  %5810 = vst [vmem:[%s6685_s20 + $0x168] sm:$0xff] %v5354_v30   ;;  %v2711_v42 = vadd.f32 %v6935_v17, %v2448_v32  ;;  %v2449_v44 = vmul.f32 %v6924_v7, %v6140_v40  ;;  %v1695_v46 = vpop.f32.mrb[95].mxu0  ;;  %v2207_v47 = vpop.f32.mrb[95].mxu1 }
 0x1b5   : > { %5874 = vst [vmem:[%s6685_s20 + $0x368] sm:$0xff] %v5674_v31   ;;  %v2839_v43 = vadd.f32 %v6935_v17, %v2576_v33  ;;  %v2577_v45 = vmul.f32 %v6924_v7, %v6268_v41  ;;  %v2709_v48 = vadd.f32 %v6935_v17, %v2446_v38  ;;  %v2837_v49 = vadd.f32 %v6935_v17, %v2574_v39  ;;  %v7194_v41 = vld [vmem:[%s7350_s2] ss:$0 sm:$0xff] }
 0x1b6   : > { %5809 = vst [vmem:[%s6685_s20 + $0x160] sm:$0xff] %v5349_v36   ;;  %5873 = vst [vmem:[%s6685_s20 + $0x360] sm:$0xff] %v5669_v37   ;;  %v2447_v50 = vmul.f32 %v6924_v7, %v1695_v46  ;;  %v2575_v51 = vmul.f32 %v6924_v7, %v2207_v47  ;;  %v2712_v52 = vadd.f32 %v6935_v17, %v2449_v44  ;;  %v2967_v58 = vmax.f32 %v2711_v42, 0.0 }
 0x1b7   : > { %v2840_v53 = vadd.f32 %v6935_v17, %v2577_v45  ;;  %v3095_v59 = vmax.f32 %v2839_v43, 0.0  ;;  %v2965_v62 = vmax.f32 %v2709_v48, 0.0  ;;  %v3093_v63 = vmax.f32 %v2837_v49, 0.0 }
 0x1b8   : > { %v2710_v55 = vadd.f32 %v6935_v17, %v2447_v50  ;;  %v2838_v57 = vadd.f32 %v6935_v17, %v2575_v51  ;;  %v2968_v60 = vmax.f32 %v2712_v52, 0.0  ;;  %v7205_v51 = vld [vmem:[%s7351_s3] ss:$0 sm:$0xff] }
 0x1b9   : > { %v3096_v61 = vmax.f32 %v2840_v53, 0.0  ;;  %v6143_v2 = vpop.f32.mrb[96].mxu0  ;;  %v6271_v3 = vpop.f32.mrb[96].mxu1 }
 0x1ba   : > { %v2966_v0 = vmax.f32 %v2710_v55, 0.0  ;;  %v3094_v1 = vmax.f32 %v2838_v57, 0.0  ;;  %v5364_v4 = vpack.c.bf16 %v2968_v60, %v2967_v58  ;;  %v2452_v5 = vmul.f32 %v6924_v7, %v6143_v2  ;;  %v1708_v56 = vpop.f32.mrb[97].mxu0  ;;  %v2220_v8 = vpop.f32.mrb[97].mxu1 }
 0x1bb   : > { %v5684_v54 = vpack.c.bf16 %v3096_v61, %v3095_v59  ;;  %v2580_v6 = vmul.f32 %v6924_v7, %v6271_v3  ;;  %v2450_v11 = vmul.f32 %v6924_v7, %v1708_v56  ;;  %v2578_v12 = vmul.f32 %v6924_v7, %v2220_v8  ;;  %v6144_v13 = vpop.f32.mrb[98].mxu0  ;;  %v6272_v14 = vpop.f32.mrb[98].mxu1 }
 0x1bc   : > { %v5359_v9 = vpack.c.bf16 %v2966_v0, %v2965_v62  ;;  %v5679_v10 = vpack.c.bf16 %v3094_v1, %v3093_v63  ;;  %5812 = vst [vmem:[%s6685_s20 + $0x178] sm:$0xff] %v5364_v4   ;;  %v2715_v15 = vadd.f32 %v6935_v17, %v2452_v5  ;;  %v2453_v18 = vmul.f32 %v6924_v7, %v6144_v13  ;;  %v1711_v20 = vpop.f32.mrb[99].mxu0  ;;  %v2223_v21 = vpop.f32.mrb[99].mxu1 }
 0x1bd   : > { %5876 = vst [vmem:[%s6685_s20 + $0x378] sm:$0xff] %v5684_v54   ;;  %v2843_v16 = vadd.f32 %v6935_v17, %v2580_v6  ;;  %v2581_v19 = vmul.f32 %v6924_v7, %v6272_v14  ;;  %v2713_v22 = vadd.f32 %v6935_v17, %v2450_v11  ;;  %v2841_v23 = vadd.f32 %v6935_v17, %v2578_v12 }
 0x1be   : > { %5811 = vst [vmem:[%s6685_s20 + $0x170] sm:$0xff] %v5359_v9   ;;  %5875 = vst [vmem:[%s6685_s20 + $0x370] sm:$0xff] %v5679_v10   ;;  %v2451_v24 = vmul.f32 %v6924_v7, %v1711_v20  ;;  %v2579_v25 = vmul.f32 %v6924_v7, %v2223_v21  ;;  %v2716_v26 = vadd.f32 %v6935_v17, %v2453_v18  ;;  %v2971_v30 = vmax.f32 %v2715_v15, 0.0 }
 0x1bf   : > { %v2844_v27 = vadd.f32 %v6935_v17, %v2581_v19  ;;  %v3099_v31 = vmax.f32 %v2843_v16, 0.0  ;;  %v2969_v34 = vmax.f32 %v2713_v22, 0.0  ;;  %v3097_v35 = vmax.f32 %v2841_v23, 0.0 }
 0x1c0   : > { %v2714_v28 = vadd.f32 %v6935_v17, %v2451_v24  ;;  %v2842_v29 = vadd.f32 %v6935_v17, %v2579_v25  ;;  %v2972_v32 = vmax.f32 %v2716_v26, 0.0 }
 0x1c1   : > { %v3100_v33 = vmax.f32 %v2844_v27, 0.0  ;;  %v6147_v38 = vpop.f32.mrb[100].mxu0  ;;  %v6275_v7 = vpop.f32.mrb[100].mxu1 }
 0x1c2   : > { %v2970_v36 = vmax.f32 %v2714_v28, 0.0  ;;  %v3098_v37 = vmax.f32 %v2842_v29, 0.0  ;;  %v5374_v39 = vpack.c.bf16 %v2972_v32, %v2971_v30  ;;  %v2456_v17 = vmul.f32 %v7194_v41, %v6147_v38  ;;  %v1724_v43 = vpop.f32.mrb[101].mxu0  ;;  %v2236_v44 = vpop.f32.mrb[101].mxu1 }
 0x1c3   : > { %v5694_v40 = vpack.c.bf16 %v3100_v33, %v3099_v31  ;;  %v2584_v42 = vmul.f32 %v7194_v41, %v6275_v7  ;;  %v2454_v47 = vmul.f32 %v7194_v41, %v1724_v43  ;;  %v2582_v48 = vmul.f32 %v7194_v41, %v2236_v44  ;;  %v6148_v49 = vpop.f32.mrb[102].mxu0  ;;  %v6276_v50 = vpop.f32.mrb[102].mxu1 }
 0x1c4   : > { %v5369_v45 = vpack.c.bf16 %v2970_v36, %v2969_v34  ;;  %v5689_v46 = vpack.c.bf16 %v3098_v37, %v3097_v35  ;;  %5814 = vst [vmem:[%s6685_s20 + $0x188] sm:$0xff] %v5374_v39   ;;  %v2719_v52 = vadd.f32 %v7205_v51, %v2456_v17  ;;  %v2457_v55 = vmul.f32 %v7194_v41, %v6148_v49  ;;  %v1727_v58 = vpop.f32.mrb[103].mxu0  ;;  %v2239_v59 = vpop.f32.mrb[103].mxu1 }
 0x1c5   : > { %5878 = vst [vmem:[%s6685_s20 + $0x388] sm:$0xff] %v5694_v40   ;;  %v2847_v53 = vadd.f32 %v7205_v51, %v2584_v42  ;;  %v2585_v57 = vmul.f32 %v7194_v41, %v6276_v50  ;;  %v2717_v60 = vadd.f32 %v7205_v51, %v2454_v47  ;;  %v2845_v61 = vadd.f32 %v7205_v51, %v2582_v48 }
 0x1c6   : > { %5813 = vst [vmem:[%s6685_s20 + $0x180] sm:$0xff] %v5369_v45   ;;  %5877 = vst [vmem:[%s6685_s20 + $0x380] sm:$0xff] %v5689_v46   ;;  %v2455_v62 = vmul.f32 %v7194_v41, %v1727_v58  ;;  %v2583_v63 = vmul.f32 %v7194_v41, %v2239_v59  ;;  %v2720_v0 = vadd.f32 %v7205_v51, %v2457_v55  ;;  %v2975_v4 = vmax.f32 %v2719_v52, 0.0 }
 0x1c7   : > { %v2848_v1 = vadd.f32 %v7205_v51, %v2585_v57  ;;  %v3103_v54 = vmax.f32 %v2847_v53, 0.0  ;;  %v2973_v56 = vmax.f32 %v2717_v60, 0.0  ;;  %v3101_v8 = vmax.f32 %v2845_v61, 0.0 }
 0x1c8   : > { %v2718_v2 = vadd.f32 %v7205_v51, %v2455_v62  ;;  %v2846_v3 = vadd.f32 %v7205_v51, %v2583_v63  ;;  %v2976_v5 = vmax.f32 %v2720_v0, 0.0 }
 0x1c9   : > { %v3104_v6 = vmax.f32 %v2848_v1, 0.0  ;;  %v6151_v11 = vpop.f32.mrb[104].mxu0  ;;  %v6279_v12 = vpop.f32.mrb[104].mxu1 }
 0x1ca   : > { %v2974_v9 = vmax.f32 %v2718_v2, 0.0  ;;  %v3102_v10 = vmax.f32 %v2846_v3, 0.0  ;;  %v5384_v13 = vpack.c.bf16 %v2976_v5, %v2975_v4  ;;  %v2460_v15 = vmul.f32 %v7194_v41, %v6151_v11  ;;  %v1740_v18 = vpop.f32.mrb[105].mxu0  ;;  %v2252_v19 = vpop.f32.mrb[105].mxu1 }
 0x1cb   : > { %v5704_v14 = vpack.c.bf16 %v3104_v6, %v3103_v54  ;;  %v2588_v16 = vmul.f32 %v7194_v41, %v6279_v12  ;;  %v2458_v22 = vmul.f32 %v7194_v41, %v1740_v18  ;;  %v2586_v23 = vmul.f32 %v7194_v41, %v2252_v19  ;;  %v6152_v24 = vpop.f32.mrb[106].mxu0  ;;  %v6280_v25 = vpop.f32.mrb[106].mxu1 }
 0x1cc   : > { %v5379_v20 = vpack.c.bf16 %v2974_v9, %v2973_v56  ;;  %v5699_v21 = vpack.c.bf16 %v3102_v10, %v3101_v8  ;;  %5816 = vst [vmem:[%s6685_s20 + $0x198] sm:$0xff] %v5384_v13   ;;  %v2723_v26 = vadd.f32 %v7205_v51, %v2460_v15  ;;  %v2461_v28 = vmul.f32 %v7194_v41, %v6152_v24  ;;  %v1743_v30 = vpop.f32.mrb[107].mxu0  ;;  %v2255_v31 = vpop.f32.mrb[107].mxu1 }
 0x1cd   : > { %5880 = vst [vmem:[%s6685_s20 + $0x398] sm:$0xff] %v5704_v14   ;;  %v2851_v27 = vadd.f32 %v7205_v51, %v2588_v16  ;;  %v2589_v29 = vmul.f32 %v7194_v41, %v6280_v25  ;;  %v2721_v32 = vadd.f32 %v7205_v51, %v2458_v22  ;;  %v2849_v33 = vadd.f32 %v7205_v51, %v2586_v23 }
 0x1ce   : > { %5815 = vst [vmem:[%s6685_s20 + $0x190] sm:$0xff] %v5379_v20   ;;  %5879 = vst [vmem:[%s6685_s20 + $0x390] sm:$0xff] %v5699_v21   ;;  %v2459_v34 = vmul.f32 %v7194_v41, %v1743_v30  ;;  %v2587_v35 = vmul.f32 %v7194_v41, %v2255_v31  ;;  %v2724_v36 = vadd.f32 %v7205_v51, %v2461_v28  ;;  %v2979_v39 = vmax.f32 %v2723_v26, 0.0 }
 0x1cf   : > { %v2852_v37 = vadd.f32 %v7205_v51, %v2589_v29  ;;  %v3107_v40 = vmax.f32 %v2851_v27, 0.0  ;;  %v2977_v43 = vmax.f32 %v2721_v32, 0.0  ;;  %v3105_v44 = vmax.f32 %v2849_v33, 0.0 }
 0x1d0   : > { %v2722_v38 = vadd.f32 %v7205_v51, %v2459_v34  ;;  %v2850_v7 = vadd.f32 %v7205_v51, %v2587_v35  ;;  %v2980_v17 = vmax.f32 %v2724_v36, 0.0 }
 0x1d1   : > { %v3108_v42 = vmax.f32 %v2852_v37, 0.0  ;;  %v6155_v47 = vpop.f32.mrb[108].mxu0  ;;  %v6283_v48 = vpop.f32.mrb[108].mxu1 }
 0x1d2   : > { %v2978_v45 = vmax.f32 %v2722_v38, 0.0  ;;  %v3106_v46 = vmax.f32 %v2850_v7, 0.0  ;;  %v5394_v49 = vpack.c.bf16 %v2980_v17, %v2979_v39  ;;  %v2464_v52 = vmul.f32 %v7194_v41, %v6155_v47  ;;  %v1756_v55 = vpop.f32.mrb[109].mxu0  ;;  %v2268_v57 = vpop.f32.mrb[109].mxu1 }
 0x1d3   : > { %v5714_v50 = vpack.c.bf16 %v3108_v42, %v3107_v40  ;;  %v2592_v53 = vmul.f32 %v7194_v41, %v6283_v48  ;;  %v2462_v60 = vmul.f32 %v7194_v41, %v1756_v55  ;;  %v2590_v61 = vmul.f32 %v7194_v41, %v2268_v57  ;;  %v6156_v62 = vpop.f32.mrb[110].mxu0  ;;  %v6284_v63 = vpop.f32.mrb[110].mxu1 }
 0x1d4   : > { %v5389_v58 = vpack.c.bf16 %v2978_v45, %v2977_v43  ;;  %v5709_v59 = vpack.c.bf16 %v3106_v46, %v3105_v44  ;;  %5818 = vst [vmem:[%s6685_s20 + $0x1a8] sm:$0xff] %v5394_v49   ;;  %v2727_v0 = vadd.f32 %v7205_v51, %v2464_v52  ;;  %v2465_v2 = vmul.f32 %v7194_v41, %v6156_v62  ;;  %v1759_v4 = vpop.f32.mrb[111].mxu0  ;;  %v2271_v54 = vpop.f32.mrb[111].mxu1 }
 0x1d5   : > { %5882 = vst [vmem:[%s6685_s20 + $0x3a8] sm:$0xff] %v5714_v50   ;;  %v2855_v1 = vadd.f32 %v7205_v51, %v2592_v53  ;;  %v2593_v3 = vmul.f32 %v7194_v41, %v6284_v63  ;;  %v2725_v5 = vadd.f32 %v7205_v51, %v2462_v60  ;;  %v2853_v6 = vadd.f32 %v7205_v51, %v2590_v61 }
 0x1d6   : > { %5817 = vst [vmem:[%s6685_s20 + $0x1a0] sm:$0xff] %v5389_v58   ;;  %5881 = vst [vmem:[%s6685_s20 + $0x3a0] sm:$0xff] %v5709_v59   ;;  %v2463_v56 = vmul.f32 %v7194_v41, %v1759_v4  ;;  %v2591_v8 = vmul.f32 %v7194_v41, %v2271_v54  ;;  %v2728_v9 = vadd.f32 %v7205_v51, %v2465_v2  ;;  %v2983_v13 = vmax.f32 %v2727_v0, 0.0 }
 0x1d7   : > { %v2856_v10 = vadd.f32 %v7205_v51, %v2593_v3  ;;  %v3111_v14 = vmax.f32 %v2855_v1, 0.0  ;;  %v2981_v18 = vmax.f32 %v2725_v5, 0.0  ;;  %v3109_v19 = vmax.f32 %v2853_v6, 0.0 }
 0x1d8   : > { %v2726_v11 = vadd.f32 %v7205_v51, %v2463_v56  ;;  %v2854_v12 = vadd.f32 %v7205_v51, %v2591_v8  ;;  %v2984_v15 = vmax.f32 %v2728_v9, 0.0 }
 0x1d9   : > { %v3112_v16 = vmax.f32 %v2856_v10, 0.0  ;;  %v6159_v22 = vpop.f32.mrb[112].mxu0  ;;  %v6287_v23 = vpop.f32.mrb[112].mxu1 }
 0x1da   : > { %v2982_v20 = vmax.f32 %v2726_v11, 0.0  ;;  %v3110_v21 = vmax.f32 %v2854_v12, 0.0  ;;  %v5404_v24 = vpack.c.bf16 %v2984_v15, %v2983_v13  ;;  %v2468_v26 = vmul.f32 %v7194_v41, %v6159_v22  ;;  %v1772_v28 = vpop.f32.mrb[113].mxu0  ;;  %v2284_v29 = vpop.f32.mrb[113].mxu1 }
 0x1db   : > { %v5724_v25 = vpack.c.bf16 %v3112_v16, %v3111_v14  ;;  %v2596_v27 = vmul.f32 %v7194_v41, %v6287_v23  ;;  %v2466_v32 = vmul.f32 %v7194_v41, %v1772_v28  ;;  %v2594_v33 = vmul.f32 %v7194_v41, %v2284_v29  ;;  %v6160_v34 = vpop.f32.mrb[114].mxu0  ;;  %v6288_v35 = vpop.f32.mrb[114].mxu1 }
 0x1dc   : > { %v5399_v30 = vpack.c.bf16 %v2982_v20, %v2981_v18  ;;  %v5719_v31 = vpack.c.bf16 %v3110_v21, %v3109_v19  ;;  %5820 = vst [vmem:[%s6685_s20 + $0x1b8] sm:$0xff] %v5404_v24   ;;  %v2731_v36 = vadd.f32 %v7205_v51, %v2468_v26  ;;  %v2469_v38 = vmul.f32 %v7194_v41, %v6160_v34  ;;  %v1775_v39 = vpop.f32.mrb[115].mxu0  ;;  %v2287_v40 = vpop.f32.mrb[115].mxu1 }
 0x1dd   : > { %5884 = vst [vmem:[%s6685_s20 + $0x3b8] sm:$0xff] %v5724_v25   ;;  %v2859_v37 = vadd.f32 %v7205_v51, %v2596_v27  ;;  %v2597_v7 = vmul.f32 %v7194_v41, %v6288_v35  ;;  %v2729_v17 = vadd.f32 %v7205_v51, %v2466_v32  ;;  %v2857_v42 = vadd.f32 %v7205_v51, %v2594_v33 }
 0x1de   : > { %5819 = vst [vmem:[%s6685_s20 + $0x1b0] sm:$0xff] %v5399_v30   ;;  %5883 = vst [vmem:[%s6685_s20 + $0x3b0] sm:$0xff] %v5719_v31   ;;  %v2467_v43 = vmul.f32 %v7194_v41, %v1775_v39  ;;  %v2595_v44 = vmul.f32 %v7194_v41, %v2287_v40  ;;  %v2732_v45 = vadd.f32 %v7205_v51, %v2469_v38  ;;  %v2987_v49 = vmax.f32 %v2731_v36, 0.0 }
 0x1df   : > { %v2860_v46 = vadd.f32 %v7205_v51, %v2597_v7  ;;  %v3115_v50 = vmax.f32 %v2859_v37, 0.0  ;;  %v2985_v55 = vmax.f32 %v2729_v17, 0.0  ;;  %v3113_v57 = vmax.f32 %v2857_v42, 0.0 }
 0x1e0   : > { %v2730_v47 = vadd.f32 %v7205_v51, %v2467_v43  ;;  %v2858_v48 = vadd.f32 %v7205_v51, %v2595_v44  ;;  %v2988_v52 = vmax.f32 %v2732_v45, 0.0 }
 0x1e1   : > { %v3116_v53 = vmax.f32 %v2860_v46, 0.0  ;;  %v6163_v60 = vpop.f32.mrb[116].mxu0 }
 0x1e2   : > { %v2986_v58 = vmax.f32 %v2730_v47, 0.0  ;;  %v3114_v59 = vmax.f32 %v2858_v48, 0.0  ;;  %v6291_v61 = vpop.f32.mrb[116].mxu1  ;;  %v5414_v62 = vpack.c.bf16 %v2988_v52, %v2987_v49  ;;  %v2472_v0 = vmul.f32 %v7194_v41, %v6163_v60  ;;  %v1788_v2 = vpop.f32.mrb[117].mxu0 }
 0x1e3   : > { %v5734_v63 = vpack.c.bf16 %v3116_v53, %v3115_v50  ;;  %v2600_v1 = vmul.f32 %v7194_v41, %v6291_v61  ;;  %v2300_v3 = vpop.f32.mrb[117].mxu1  ;;  %v2470_v5 = vmul.f32 %v7194_v41, %v1788_v2  ;;  %v6164_v56 = vpop.f32.mrb[118].mxu0 }
 0x1e4   : > { %v5409_v4 = vpack.c.bf16 %v2986_v58, %v2985_v55  ;;  %v5729_v54 = vpack.c.bf16 %v3114_v59, %v3113_v57  ;;  %v2598_v6 = vmul.f32 %v7194_v41, %v2300_v3  ;;  %v6292_v8 = vpop.f32.mrb[118].mxu1  ;;  %5822 = vst [vmem:[%s6685_s20 + $0x1c8] sm:$0xff] %v5414_v62   ;;  %v2735_v9 = vadd.f32 %v7205_v51, %v2472_v0  ;;  %v1791_v13 = vpop.f32.mrb[119].mxu0 }
 0x1e5   : > { %5886 = vst [vmem:[%s6685_s20 + $0x3c8] sm:$0xff] %v5734_v63   ;;  %v2863_v10 = vadd.f32 %v7205_v51, %v2600_v1  ;;  %v2473_v11 = vmul.f32 %v7194_v41, %v6164_v56  ;;  %v2601_v12 = vmul.f32 %v7194_v41, %v6292_v8  ;;  %v2303_v14 = vpop.f32.mrb[119].mxu1  ;;  %v2733_v15 = vadd.f32 %v7205_v51, %v2470_v5 }
 0x1e6   : > { %5821 = vst [vmem:[%s6685_s20 + $0x1c0] sm:$0xff] %v5409_v4   ;;  %5885 = vst [vmem:[%s6685_s20 + $0x3c0] sm:$0xff] %v5729_v54   ;;  %v2861_v16 = vadd.f32 %v7205_v51, %v2598_v6  ;;  %v2471_v18 = vmul.f32 %v7194_v41, %v1791_v13  ;;  %v2599_v19 = vmul.f32 %v7194_v41, %v2303_v14  ;;  %v2991_v24 = vmax.f32 %v2735_v9, 0.0 }
 0x1e7   : > { %v2736_v20 = vadd.f32 %v7205_v51, %v2473_v11  ;;  %v2864_v21 = vadd.f32 %v7205_v51, %v2601_v12  ;;  %v3119_v25 = vmax.f32 %v2863_v10, 0.0  ;;  %v2989_v28 = vmax.f32 %v2733_v15, 0.0 }
 0x1e8   : > { %v2734_v22 = vadd.f32 %v7205_v51, %v2471_v18  ;;  %v2862_v23 = vadd.f32 %v7205_v51, %v2599_v19  ;;  %v3117_v29 = vmax.f32 %v2861_v16, 0.0 }
 0x1e9   : > { %v2992_v26 = vmax.f32 %v2736_v20, 0.0  ;;  %v3120_v27 = vmax.f32 %v2864_v21, 0.0  ;;  %v6167_v32 = vpop.f32.mrb[120].mxu0 }
 0x1ea   : > { %v2990_v30 = vmax.f32 %v2734_v22, 0.0  ;;  %v3118_v31 = vmax.f32 %v2862_v23, 0.0  ;;  %v6295_v33 = vpop.f32.mrb[120].mxu1  ;;  %v2476_v36 = vmul.f32 %v7194_v41, %v6167_v32  ;;  %v1804_v38 = vpop.f32.mrb[121].mxu0 }
 0x1eb   : > { %v5424_v34 = vpack.c.bf16 %v2992_v26, %v2991_v24  ;;  %v5744_v35 = vpack.c.bf16 %v3120_v27, %v3119_v25  ;;  %v2604_v37 = vmul.f32 %v7194_v41, %v6295_v33  ;;  %v2316_v7 = vpop.f32.mrb[121].mxu1  ;;  %v2474_v17 = vmul.f32 %v7194_v41, %v1804_v38  ;;  %v6168_v43 = vpop.f32.mrb[122].mxu0 }
 0x1ec   : > { %v5419_v39 = vpack.c.bf16 %v2990_v30, %v2989_v28  ;;  %v5739_v40 = vpack.c.bf16 %v3118_v31, %v3117_v29  ;;  %v2602_v42 = vmul.f32 %v7194_v41, %v2316_v7  ;;  %v6296_v44 = vpop.f32.mrb[122].mxu1  ;;  %v2739_v45 = vadd.f32 %v7205_v51, %v2476_v36  ;;  %v1807_v49 = vpop.f32.mrb[123].mxu0 }
 0x1ed   : > { %5824 = vst [vmem:[%s6685_s20 + $0x1d8] sm:$0xff] %v5424_v34   ;;  %5888 = vst [vmem:[%s6685_s20 + $0x3d8] sm:$0xff] %v5744_v35   ;;  %v2867_v46 = vadd.f32 %v7205_v51, %v2604_v37  ;;  %v2477_v47 = vmul.f32 %v7194_v41, %v6168_v43  ;;  %v2605_v48 = vmul.f32 %v7194_v41, %v6296_v44  ;;  %v2319_v50 = vpop.f32.mrb[123].mxu1 }
 0x1ee   : > { %5823 = vst [vmem:[%s6685_s20 + $0x1d0] sm:$0xff] %v5419_v39   ;;  %5887 = vst [vmem:[%s6685_s20 + $0x3d0] sm:$0xff] %v5739_v40   ;;  %v2737_v52 = vadd.f32 %v7205_v51, %v2474_v17  ;;  %v2865_v53 = vadd.f32 %v7205_v51, %v2602_v42  ;;  %v2475_v55 = vmul.f32 %v7194_v41, %v1807_v49  ;;  %v2995_v62 = vmax.f32 %v2739_v45, 0.0 }
 0x1ef   : > { %v2603_v57 = vmul.f32 %v7194_v41, %v2319_v50  ;;  %v2740_v58 = vadd.f32 %v7205_v51, %v2477_v47  ;;  %v2868_v59 = vadd.f32 %v7205_v51, %v2605_v48  ;;  %v3123_v63 = vmax.f32 %v2867_v46, 0.0 }
 0x1f0   : > { %v2738_v60 = vadd.f32 %v7205_v51, %v2475_v55  ;;  %v2993_v2 = vmax.f32 %v2737_v52, 0.0  ;;  %v3121_v3 = vmax.f32 %v2865_v53, 0.0 }
 0x1f1   : > { %v2866_v61 = vadd.f32 %v7205_v51, %v2603_v57  ;;  %v2996_v0 = vmax.f32 %v2740_v58, 0.0  ;;  %v3124_v1 = vmax.f32 %v2868_v59, 0.0  ;;  %v6171_v5 = vpop.f32.mrb[124].mxu0 }
 0x1f2   : > { %v2994_v4 = vmax.f32 %v2738_v60, 0.0  ;;  %v6299_v6 = vpop.f32.mrb[124].mxu1  ;;  %v2480_v9 = vmul.f32 %v7194_v41, %v6171_v5  ;;  %v1820_v11 = vpop.f32.mrb[125].mxu0 }
 0x1f3   : > { %v3122_v54 = vmax.f32 %v2866_v61, 0.0  ;;  %v5434_v56 = vpack.c.bf16 %v2996_v0, %v2995_v62  ;;  %v5754_v8 = vpack.c.bf16 %v3124_v1, %v3123_v63  ;;  %v2608_v10 = vmul.f32 %v7194_v41, %v6299_v6  ;;  %v2332_v12 = vpop.f32.mrb[125].mxu1  ;;  %v6172_v18 = vpop.f32.mrb[126].mxu0 }
 0x1f4   : > { %v5429_v13 = vpack.c.bf16 %v2994_v4, %v2993_v2  ;;  %v2478_v15 = vmul.f32 %v7194_v41, %v1820_v11  ;;  %v2606_v16 = vmul.f32 %v7194_v41, %v2332_v12  ;;  %v6300_v19 = vpop.f32.mrb[126].mxu1  ;;  %v2743_v20 = vadd.f32 %v7205_v51, %v2480_v9  ;;  %v1823_v24 = vpop.f32.mrb[127].mxu0 }
 0x1f5   : > { %v5749_v14 = vpack.c.bf16 %v3122_v54, %v3121_v3  ;;  %5826 = vst [vmem:[%s6685_s20 + $0x1e8] sm:$0xff] %v5434_v56   ;;  %5890 = vst [vmem:[%s6685_s20 + $0x3e8] sm:$0xff] %v5754_v8   ;;  %v2871_v21 = vadd.f32 %v7205_v51, %v2608_v10  ;;  %v2481_v22 = vmul.f32 %v7194_v41, %v6172_v18  ;;  %v2335_v25 = vpop.f32.mrb[127].mxu1 }
 0x1f6   : > { %v2609_v23 = vmul.f32 %v7194_v41, %v6300_v19  ;;  %5825 = vst [vmem:[%s6685_s20 + $0x1e0] sm:$0xff] %v5429_v13   ;;  %v2741_v26 = vadd.f32 %v7205_v51, %v2478_v15  ;;  %v2869_v27 = vadd.f32 %v7205_v51, %v2606_v16  ;;  %v2479_v28 = vmul.f32 %v7194_v41, %v1823_v24 }
 0x1f7   : > { %5889 = vst [vmem:[%s6685_s20 + $0x3e0] sm:$0xff] %v5749_v14   ;;  %v2607_v29 = vmul.f32 %v7194_v41, %v2335_v25  ;;  %v2744_v30 = vadd.f32 %v7205_v51, %v2481_v22  ;;  %v2999_v34 = vmax.f32 %v2743_v20, 0.0  ;;  %v3127_v35 = vmax.f32 %v2871_v21, 0.0 }
 0x1f8   : > { %v2872_v31 = vadd.f32 %v7205_v51, %v2609_v23  ;;  %v2742_v32 = vadd.f32 %v7205_v51, %v2479_v28  ;;  %v2997_v38 = vmax.f32 %v2741_v26, 0.0  ;;  %v3125_v7 = vmax.f32 %v2869_v27, 0.0 }
 0x1f9   : > { %v2870_v33 = vadd.f32 %v7205_v51, %v2607_v29  ;;  %v3000_v36 = vmax.f32 %v2744_v30, 0.0 }
 0x1fa   : > { %v3128_v37 = vmax.f32 %v2872_v31, 0.0  ;;  %v2998_v39 = vmax.f32 %v2742_v32, 0.0 }
 0x1fb   : > { %v3126_v41 = vmax.f32 %v2870_v33, 0.0  ;;  %v5444_v40 = vpack.c.bf16 %v3000_v36, %v2999_v34 }
 0x1fc   : > { %v5764_v17 = vpack.c.bf16 %v3128_v37, %v3127_v35  ;;  %v5439_v42 = vpack.c.bf16 %v2998_v39, %v2997_v38 }
 0x1fd   : > { %v5759_v43 = vpack.c.bf16 %v3126_v41, %v3125_v7  ;;  %5828 = vst [vmem:[%s6685_s20 + $0x1f8] sm:$0xff] %v5444_v40  }
 0x1fe   : > { %5892 = vst [vmem:[%s6685_s20 + $0x3f8] sm:$0xff] %v5764_v17   ;;  %5827 = vst [vmem:[%s6685_s20 + $0x1f0] sm:$0xff] %v5439_v42  }
 0x1ff   : > { %5891 = vst [vmem:[%s6685_s20 + $0x3f0] sm:$0xff] %v5759_v43  }
 0x200 PF: > { %s14_s15 = sadd.s32 1, %s6471_s15  }
 0x201   : > { %p11_p4 = scmp.ge.s32.totalorder %s14_s15, 4  }
 0x203   :  { %13 = sbr.rel (!%p11_p4) target bundleno = 1 (0x1), region = 66 }

// kernel: dqn_forward.6
= control target key start
LH: loop header
LB: loop body
LE: loop exit
PB: predicated region body
PF: predicated region fallthrough
CT: control target
= control target key end

     0   :  { %s3216_s15 = smov 0   ;;  %s3679_s0 = inlined_call_operand.vmem [shape: bf16[1024,512], index: 0, kind: input, shape index: {}]   ;;  %s3680_s1 = inlined_call_operand.vmem [shape: bf16[512,128], index: 1, kind: input, shape index: {}]   ;;  %s3681_s2 = inlined_call_operand.vmem [shape: f32[1,128], index: 2, kind: input, shape index: {}]   ;;  %s3682_s3 = inlined_call_operand.vmem [shape: f32[1,128], index: 3, kind: input, shape index: {}]   ;;  %s3683_s4 = inlined_call_operand.vmem [shape: bf16[1024,128], index: 4, kind: output, shape index: {}]  }
   0x1 LB: > { %s2389_s16 = sadd.s32 4294967295, %s3188_s15   ;;  %p2393_p0 = scmp.ge.s32.totalorder %s3188_s15, 1  ;;  %s3188_s15 = sphi %s3216_s15, %s14_s15  }
   0x2   : > { %p164_p1 = scmp.lt.s32.totalorder %s3188_s15, 3 }
   0x4   : > { %p165_p2 = pnand %p2393_p0, %p164_p1 }
   0x5   : > { %v2956_v0 = vld [vmem:[%s3680_s1] sm:$0xff] (!%p165_p2)   ;;  %v3190_v1 = vmov (!%p165_p2), 0   ;;  %v2958_v3 = vld [vmem:[%s3680_s1 + $0x8] sm:$0xff] (!%p165_p2)   ;;  %v2960_v5 = vld [vmem:[%s3680_s1 + $0x10] sm:$0xff] (!%p165_p2)   ;;  %s2394_s11 = sshll.u32 (!%p165_p2), %s2389_s16, 6 }
   0x6   : > { %168 = sbr.rel (%p165_p2) target bundleno = 543 (0x21f), region = 36  ;;  %1229 = vmatprep.subr.bf16.mxu1 (!%p165_p2), %v3190_v1  ;;  %1518 = vmatprep.subr.bf16.mxu0 (!%p165_p2), %v3190_v1  ;;  %v2957_v2 = vld [vmem:[%s3680_s1 + $0x80] sm:$0xff] (!%p165_p2)   ;;  %v2959_v4 = vld [vmem:[%s3680_s1 + $0x88] sm:$0xff] (!%p165_p2)   ;;  %v2961_v6 = vld [vmem:[%s3680_s1 + $0x90] sm:$0xff] (!%p165_p2)   ;;  %p192_p3 = scmp.lt.s32.totalorder (!%p165_p2), %s2394_s11, 127 }
   0x7   : > { %1230 = vmatpush1.bf16.msra.mxu1 (!%p165_p2), %v2956_v0  ;;  %1519 = vmatpush1.bf16.msra.mxu0 (!%p165_p2), %v2957_v2  ;;  %v2962_v7 = vld [vmem:[%s3680_s1 + $0x18] sm:$0xff] (!%p165_p2)   ;;  %v2964_v9 = vld [vmem:[%s3680_s1 + $0x20] sm:$0xff] (!%p165_p2)   ;;  %v2966_v11 = vld [vmem:[%s3680_s1 + $0x28] sm:$0xff] (!%p165_p2)  }
   0x8   : > { %1231 = vmatprep.subr.bf16.mxu1 (!%p165_p2), %v3190_v1  ;;  %1520 = vmatprep.subr.bf16.mxu0 (!%p165_p2), %v3190_v1  ;;  %v2963_v8 = vld [vmem:[%s3680_s1 + $0x98] sm:$0xff] (!%p165_p2)   ;;  %v2965_v10 = vld [vmem:[%s3680_s1 + $0xa0] sm:$0xff] (!%p165_p2)   ;;  %v2967_v12 = vld [vmem:[%s3680_s1 + $0xa8] sm:$0xff] (!%p165_p2)  }
   0x9   : > { %v2968_v13 = vld [vmem:[%s3680_s1 + $0x30] sm:$0xff] (!%p165_p2)   ;;  %v2970_v15 = vld [vmem:[%s3680_s1 + $0x38] sm:$0xff] (!%p165_p2)   ;;  %v2972_v17 = vld [vmem:[%s3680_s1 + $0x40] sm:$0xff] (!%p165_p2)  }
   0xa   : > { %v2969_v14 = vld [vmem:[%s3680_s1 + $0xb0] sm:$0xff] (!%p165_p2)   ;;  %v2971_v16 = vld [vmem:[%s3680_s1 + $0xb8] sm:$0xff] (!%p165_p2)   ;;  %v2973_v18 = vld [vmem:[%s3680_s1 + $0xc0] sm:$0xff] (!%p165_p2)  }
   0xb   : > { %1232 = vmatpush1.bf16.msra.mxu1 (!%p165_p2), %v2958_v3  ;;  %1521 = vmatpush1.bf16.msra.mxu0 (!%p165_p2), %v2959_v4  ;;  %v2974_v20 = vld [vmem:[%s3680_s1 + $0x48] sm:$0xff] (!%p165_p2)   ;;  %v2976_v23 = vld [vmem:[%s3680_s1 + $0x50] sm:$0xff] (!%p165_p2)   ;;  %v2978_v25 = vld [vmem:[%s3680_s1 + $0x58] sm:$0xff] (!%p165_p2)  }
   0xc   : > { %1233 = vmatprep.subr.bf16.mxu1 (!%p165_p2), %v3190_v1  ;;  %1522 = vmatprep.subr.bf16.mxu0 (!%p165_p2), %v3190_v1  ;;  %v2975_v22 = vld [vmem:[%s3680_s1 + $0xc8] sm:$0xff] (!%p165_p2)   ;;  %v2977_v24 = vld [vmem:[%s3680_s1 + $0xd0] sm:$0xff] (!%p165_p2)   ;;  %v2979_v26 = vld [vmem:[%s3680_s1 + $0xd8] sm:$0xff] (!%p165_p2)  }
   0xd   : > { %s3685_s11 = smov (!%p192_p3, %s2394_s11), 127  ;;  %v2980_v27 = vld [vmem:[%s3680_s1 + $0x60] sm:$0xff]   ;;  %v2982_v29 = vld [vmem:[%s3680_s1 + $0x68] sm:$0xff]   ;;  %v2984_v31 = vld [vmem:[%s3680_s1 + $0x70] sm:$0xff]  }
   0xe   : > { %s2627_s25 = sshll.u32 %s3685_s11, 4  ;;  %v2981_v28 = vld [vmem:[%s3680_s1 + $0xe0] sm:$0xff]   ;;  %v2983_v30 = vld [vmem:[%s3680_s1 + $0xe8] sm:$0xff]   ;;  %v2985_v32 = vld [vmem:[%s3680_s1 + $0xf0] sm:$0xff]   ;;  %s2398_s19 = sshll.u32 %s3685_s11, 2 }
   0xf   : > { %1234 = vmatpush1.bf16.msra.mxu1 %v2960_v5  ;;  %1523 = vmatpush1.bf16.msra.mxu0 %v2961_v6  ;;  %s3299_s30 = scalar_lea.vmem %s3679_s0, %s2627_s25  ;;  %v2986_v33 = vld [vmem:[%s3680_s1 + $0x78] sm:$0xff]   ;;  %s3497_s21 = scalar_lea.vmem %s3683_s4, %s2398_s19 }
  0x10   : > { %1235 = vmatprep.subr.bf16.mxu1 %v3190_v1  ;;  %1524 = vmatprep.subr.bf16.mxu0 %v3190_v1  ;;  %v2990_v19 = vld [vmem:[%s3299_s30 + $0x4] ss:$16 sps:$4 sm:$0xff]   ;;  %v2993_v21 = vld [vmem:[%s3299_s30 + $0xc] ss:$16 sps:$4 sm:$0xff]   ;;  %v2988_v35 = vld [vmem:[%s3299_s30] ss:$16 sps:$4 sm:$0xff]  }
  0x11   : > { %1261 = vmatprep.mubr.bf16.mxu1 %v2990_v19  ;;  %1550 = vmatprep.mubr.bf16.mxu0 %v2993_v21  ;;  %v2987_v34 = vld [vmem:[%s3680_s1 + $0xf8] sm:$0xff]   ;;  %v2994_v37 = vld [vmem:[%s3299_s30 + $0x24] ss:$16 sps:$4 sm:$0xff]   ;;  %v2998_v39 = vld [vmem:[%s3299_s30 + $0x20] ss:$16 sps:$4 sm:$0xff]  }
  0x12   : > { %v2991_v36 = vld [vmem:[%s3299_s30 + $0x8] ss:$16 sps:$4 sm:$0xff]   ;;  %v2996_v38 = vld [vmem:[%s3299_s30 + $0x2c] ss:$16 sps:$4 sm:$0xff]   ;;  %v3000_v41 = vld [vmem:[%s3299_s30 + $0x44] ss:$16 sps:$4 sm:$0xff]  }
  0x13   : > { %1236 = vmatpush1.bf16.msra.mxu1 %v2962_v7  ;;  %1525 = vmatpush1.bf16.msra.mxu0 %v2963_v8  ;;  %v2999_v40 = vld [vmem:[%s3299_s30 + $0x28] ss:$16 sps:$4 sm:$0xff]   ;;  %v3002_v42 = vld [vmem:[%s3299_s30 + $0x4c] ss:$16 sps:$4 sm:$0xff]   ;;  %v3004_v43 = vld [vmem:[%s3299_s30 + $0x40] ss:$16 sps:$4 sm:$0xff]  }
  0x14   : > { %1237 = vmatprep.subr.bf16.mxu1 %v3190_v1  ;;  %1526 = vmatprep.subr.bf16.mxu0 %v3190_v1  ;;  %v3005_v44 = vld [vmem:[%s3299_s30 + $0x48] ss:$16 sps:$4 sm:$0xff]   ;;  %v3006_v45 = vld [vmem:[%s3299_s30 + $0x64] ss:$16 sps:$4 sm:$0xff]   ;;  %v3008_v46 = vld [vmem:[%s3299_s30 + $0x6c] ss:$16 sps:$4 sm:$0xff]  }
  0x15   : > { %v3010_v47 = vld [vmem:[%s3299_s30 + $0x60] ss:$16 sps:$4 sm:$0xff]   ;;  %v3011_v48 = vld [vmem:[%s3299_s30 + $0x68] ss:$16 sps:$4 sm:$0xff]   ;;  %v3012_v49 = vld [vmem:[%s3299_s30 + $0x84] ss:$16 sps:$4 sm:$0xff]  }
  0x16   : > { %v3014_v50 = vld [vmem:[%s3299_s30 + $0x8c] ss:$16 sps:$4 sm:$0xff]   ;;  %v3016_v51 = vld [vmem:[%s3299_s30 + $0x80] ss:$16 sps:$4 sm:$0xff]   ;;  %v3017_v52 = vld [vmem:[%s3299_s30 + $0x88] ss:$16 sps:$4 sm:$0xff]  }
  0x17   : > { %1238 = vmatpush1.bf16.msra.mxu1 %v2964_v9  ;;  %1527 = vmatpush1.bf16.msra.mxu0 %v2965_v10  ;;  %v3018_v53 = vld [vmem:[%s3299_s30 + $0xa4] ss:$16 sps:$4 sm:$0xff]   ;;  %v3020_v54 = vld [vmem:[%s3299_s30 + $0xac] ss:$16 sps:$4 sm:$0xff]   ;;  %v3022_v55 = vld [vmem:[%s3299_s30 + $0xa0] ss:$16 sps:$4 sm:$0xff]  }
  0x18   : > { %1239 = vmatprep.subr.bf16.mxu1 %v3190_v1  ;;  %1528 = vmatprep.subr.bf16.mxu0 %v3190_v1  ;;  %v3023_v56 = vld [vmem:[%s3299_s30 + $0xa8] ss:$16 sps:$4 sm:$0xff]   ;;  %v3024_v57 = vld [vmem:[%s3299_s30 + $0xc4] ss:$16 sps:$4 sm:$0xff]   ;;  %v3026_v58 = vld [vmem:[%s3299_s30 + $0xcc] ss:$16 sps:$4 sm:$0xff]  }
  0x19   : > { %v3028_v59 = vld [vmem:[%s3299_s30 + $0xc0] ss:$16 sps:$4 sm:$0xff]   ;;  %v3029_v60 = vld [vmem:[%s3299_s30 + $0xc8] ss:$16 sps:$4 sm:$0xff]   ;;  %v3030_v61 = vld [vmem:[%s3299_s30 + $0xe4] ss:$16 sps:$4 sm:$0xff]  }
  0x1a   : > { %v3032_v62 = vld [vmem:[%s3299_s30 + $0xec] ss:$16 sps:$4 sm:$0xff]   ;;  %v3034_v63 = vld [vmem:[%s3299_s30 + $0xe0] ss:$16 sps:$4 sm:$0xff]   ;;  %v3035_v0 = vld [vmem:[%s3299_s30 + $0xe8] ss:$16 sps:$4 sm:$0xff]  }
  0x1b   : > { %1240 = vmatpush1.bf16.msra.mxu1 %v2966_v11  ;;  %1529 = vmatpush1.bf16.msra.mxu0 %v2967_v12  ;;  %v3038_v2 = vld [vmem:[%s3299_s30 + $0x10c] ss:$16 sps:$4 sm:$0xff]   ;;  %v3040_v3 = vld [vmem:[%s3299_s30 + $0x100] ss:$16 sps:$4 sm:$0xff]   ;;  %v3041_v4 = vld [vmem:[%s3299_s30 + $0x108] ss:$16 sps:$4 sm:$0xff]  }
  0x1c   : > { %1241 = vmatprep.subr.bf16.mxu1 %v3190_v1  ;;  %1530 = vmatprep.subr.bf16.mxu0 %v3190_v1  ;;  %v3042_v5 = vld [vmem:[%s3299_s30 + $0x124] ss:$16 sps:$4 sm:$0xff]   ;;  %v3044_v6 = vld [vmem:[%s3299_s30 + $0x12c] ss:$16 sps:$4 sm:$0xff]   ;;  %v3046_v7 = vld [vmem:[%s3299_s30 + $0x120] ss:$16 sps:$4 sm:$0xff]  }
  0x1d   : > { %v3047_v8 = vld [vmem:[%s3299_s30 + $0x128] ss:$16 sps:$4 sm:$0xff]   ;;  %v3048_v9 = vld [vmem:[%s3299_s30 + $0x144] ss:$16 sps:$4 sm:$0xff]   ;;  %v3050_v10 = vld [vmem:[%s3299_s30 + $0x14c] ss:$16 sps:$4 sm:$0xff]  }
  0x1e   : > { %v3052_v11 = vld [vmem:[%s3299_s30 + $0x140] ss:$16 sps:$4 sm:$0xff]   ;;  %v3053_v12 = vld [vmem:[%s3299_s30 + $0x148] ss:$16 sps:$4 sm:$0xff]   ;;  %v3066_v21 = vld [vmem:[%s3299_s30 + $0x1a4] ss:$16 sps:$4 sm:$0xff]  }
  0x1f   : > { %1242 = vmatpush1.bf16.msra.mxu1 %v2968_v13  ;;  %1531 = vmatpush1.bf16.msra.mxu0 %v2969_v14  ;;  %v3054_v13 = vld [vmem:[%s3299_s30 + $0x164] ss:$16 sps:$4 sm:$0xff]   ;;  %v3056_v14 = vld [vmem:[%s3299_s30 + $0x16c] ss:$16 sps:$4 sm:$0xff]   ;;  %v3064_v19 = vld [vmem:[%s3299_s30 + $0x180] ss:$16 sps:$4 sm:$0xff]  }
  0x20   : > { %1243 = vmatprep.subr.bf16.mxu1 %v3190_v1  ;;  %1532 = vmatprep.subr.bf16.mxu0 %v3190_v1 }
  0x23   : > { %1244 = vmatpush1.bf16.msra.mxu1 %v2970_v15  ;;  %1533 = vmatpush1.bf16.msra.mxu0 %v2971_v16  ;;  %v3058_v15 = vld [vmem:[%s3299_s30 + $0x160] ss:$16 sps:$4 sm:$0xff]   ;;  %v3059_v16 = vld [vmem:[%s3299_s30 + $0x168] ss:$16 sps:$4 sm:$0xff]  }
  0x24   : > { %1245 = vmatprep.subr.bf16.mxu1 %v3190_v1  ;;  %1534 = vmatprep.subr.bf16.mxu0 %v3190_v1 }
  0x27   : > { %1246 = vmatpush1.bf16.msra.mxu1 %v2972_v17  ;;  %1535 = vmatpush1.bf16.msra.mxu0 %v2973_v18  ;;  %v3060_v17 = vld [vmem:[%s3299_s30 + $0x184] ss:$16 sps:$4 sm:$0xff]   ;;  %v3062_v18 = vld [vmem:[%s3299_s30 + $0x18c] ss:$16 sps:$4 sm:$0xff]  }
  0x28   : > { %1247 = vmatprep.subr.bf16.mxu1 %v3190_v1  ;;  %1536 = vmatprep.subr.bf16.mxu0 %v3190_v1 }
  0x2b   : > { %1248 = vmatpush1.bf16.msra.mxu1 %v2974_v20  ;;  %1537 = vmatpush1.bf16.msra.mxu0 %v2975_v22  ;;  %v3065_v20 = vld [vmem:[%s3299_s30 + $0x188] ss:$16 sps:$4 sm:$0xff]   ;;  %v3068_v22 = vld [vmem:[%s3299_s30 + $0x1ac] ss:$16 sps:$4 sm:$0xff]  }
  0x2c   : > { %1249 = vmatprep.subr.bf16.mxu1 %v3190_v1  ;;  %1538 = vmatprep.subr.bf16.mxu0 %v3190_v1 }
  0x2f   : > { %1250 = vmatpush1.bf16.msra.mxu1 %v2976_v23  ;;  %1539 = vmatpush1.bf16.msra.mxu0 %v2977_v24  ;;  %v3070_v23 = vld [vmem:[%s3299_s30 + $0x1a0] ss:$16 sps:$4 sm:$0xff]   ;;  %v3071_v24 = vld [vmem:[%s3299_s30 + $0x1a8] ss:$16 sps:$4 sm:$0xff]  }
  0x30   : > { %1251 = vmatprep.subr.bf16.mxu1 %v3190_v1  ;;  %1540 = vmatprep.subr.bf16.mxu0 %v3190_v1 }
  0x33   : > { %1252 = vmatpush1.bf16.msra.mxu1 %v2978_v25  ;;  %1541 = vmatpush1.bf16.msra.mxu0 %v2979_v26  ;;  %v3072_v25 = vld [vmem:[%s3299_s30 + $0x1c4] ss:$16 sps:$4 sm:$0xff]   ;;  %v3074_v26 = vld [vmem:[%s3299_s30 + $0x1cc] ss:$16 sps:$4 sm:$0xff]  }
  0x34   : > { %1253 = vmatprep.subr.bf16.mxu1 %v3190_v1  ;;  %1542 = vmatprep.subr.bf16.mxu0 %v3190_v1 }
  0x37   : > { %1254 = vmatpush1.bf16.msra.mxu1 %v2980_v27  ;;  %1543 = vmatpush1.bf16.msra.mxu0 %v2981_v28  ;;  %v3076_v27 = vld [vmem:[%s3299_s30 + $0x1c0] ss:$16 sps:$4 sm:$0xff]   ;;  %v3077_v28 = vld [vmem:[%s3299_s30 + $0x1c8] ss:$16 sps:$4 sm:$0xff]  }
  0x38   : > { %1255 = vmatprep.subr.bf16.mxu1 %v3190_v1  ;;  %1544 = vmatprep.subr.bf16.mxu0 %v3190_v1 }
  0x3b   : > { %1256 = vmatpush1.bf16.msra.mxu1 %v2982_v29  ;;  %1545 = vmatpush1.bf16.msra.mxu0 %v2983_v30  ;;  %v3078_v29 = vld [vmem:[%s3299_s30 + $0x1e4] ss:$16 sps:$4 sm:$0xff]   ;;  %v3080_v30 = vld [vmem:[%s3299_s30 + $0x1ec] ss:$16 sps:$4 sm:$0xff]  }
  0x3c   : > { %1257 = vmatprep.subr.bf16.mxu1 %v3190_v1  ;;  %1546 = vmatprep.subr.bf16.mxu0 %v3190_v1 }
  0x3f   : > { %1258 = vmatpush1.bf16.msra.mxu1 %v2984_v31  ;;  %1547 = vmatpush1.bf16.msra.mxu0 %v2985_v32  ;;  %v3082_v31 = vld [vmem:[%s3299_s30 + $0x1e0] ss:$16 sps:$4 sm:$0xff]   ;;  %v3083_v32 = vld [vmem:[%s3299_s30 + $0x1e8] ss:$16 sps:$4 sm:$0xff]  }
  0x40   : > { %1259 = vmatprep.subr.bf16.mxu1 %v3190_v1  ;;  %1548 = vmatprep.subr.bf16.mxu0 %v3190_v1  ;;  %v3036_v1 = vld [vmem:[%s3299_s30 + $0x104] ss:$16 sps:$4 sm:$0xff]  }
  0x43   : > { %1260 = vmatpush1.bf16.msra.mxu1 %v2986_v33  ;;  %1549 = vmatpush1.bf16.msra.mxu0 %v2987_v34  ;;  %v3084_v33 = vld [vmem:[%s3299_s30 + $0x204] ss:$16 sps:$4 sm:$0xff]   ;;  %v3086_v34 = vld [vmem:[%s3299_s30 + $0x20c] ss:$16 sps:$4 sm:$0xff]  }
  0x46   : > { %1262 = vmatmul.mubr.bf16.vlgmr.msra.gmra.mrb[0].mxu1 %v2988_v35  ;;  %1551 = vmatmul.mubr.bf16.vlgmr.msra.gmra.mrb[0].mxu0 %v2991_v36  ;;  %v3088_v35 = vld [vmem:[%s3299_s30 + $0x200] ss:$16 sps:$4 sm:$0xff]   ;;  %v3089_v36 = vld [vmem:[%s3299_s30 + $0x208] ss:$16 sps:$4 sm:$0xff]  }
  0x47   : > { %1269 = vmatprep.mubr.bf16.mxu1 %v2994_v37  ;;  %1558 = vmatprep.mubr.bf16.mxu0 %v2996_v38  ;;  %v3090_v37 = vld [vmem:[%s3299_s30 + $0x224] ss:$16 sps:$4 sm:$0xff]   ;;  %v3092_v38 = vld [vmem:[%s3299_s30 + $0x22c] ss:$16 sps:$4 sm:$0xff]  }
  0x4e   : > { %1270 = vmatmul.mubr.bf16.gmra.mrb[4].mxu1 %v2998_v39  ;;  %1559 = vmatmul.mubr.bf16.gmra.mrb[4].mxu0 %v2999_v40  ;;  %v3094_v39 = vld [vmem:[%s3299_s30 + $0x220] ss:$16 sps:$4 sm:$0xff]   ;;  %v3095_v40 = vld [vmem:[%s3299_s30 + $0x228] ss:$16 sps:$4 sm:$0xff]  }
  0x4f   : > { %1277 = vmatprep.mubr.bf16.mxu1 %v3000_v41  ;;  %1566 = vmatprep.mubr.bf16.mxu0 %v3002_v42  ;;  %v3096_v41 = vld [vmem:[%s3299_s30 + $0x244] ss:$16 sps:$4 sm:$0xff]   ;;  %v3098_v42 = vld [vmem:[%s3299_s30 + $0x24c] ss:$16 sps:$4 sm:$0xff]  }
  0x56   : > { %1278 = vmatmul.mubr.bf16.gmra.mrb[8].mxu1 %v3004_v43  ;;  %1567 = vmatmul.mubr.bf16.gmra.mrb[8].mxu0 %v3005_v44  ;;  %v3100_v43 = vld [vmem:[%s3299_s30 + $0x240] ss:$16 sps:$4 sm:$0xff]   ;;  %v3101_v44 = vld [vmem:[%s3299_s30 + $0x248] ss:$16 sps:$4 sm:$0xff]  }
  0x57   : > { %1285 = vmatprep.mubr.bf16.mxu1 %v3006_v45  ;;  %1574 = vmatprep.mubr.bf16.mxu0 %v3008_v46  ;;  %v3102_v45 = vld [vmem:[%s3299_s30 + $0x264] ss:$16 sps:$4 sm:$0xff]   ;;  %v3104_v46 = vld [vmem:[%s3299_s30 + $0x26c] ss:$16 sps:$4 sm:$0xff]  }
  0x5e   : > { %1286 = vmatmul.mubr.bf16.gmra.mrb[12].mxu1 %v3010_v47  ;;  %1575 = vmatmul.mubr.bf16.gmra.mrb[12].mxu0 %v3011_v48  ;;  %v3106_v47 = vld [vmem:[%s3299_s30 + $0x260] ss:$16 sps:$4 sm:$0xff]   ;;  %v3107_v48 = vld [vmem:[%s3299_s30 + $0x268] ss:$16 sps:$4 sm:$0xff]  }
  0x5f   : > { %1293 = vmatprep.mubr.bf16.mxu1 %v3012_v49  ;;  %1582 = vmatprep.mubr.bf16.mxu0 %v3014_v50  ;;  %v3108_v49 = vld [vmem:[%s3299_s30 + $0x284] ss:$16 sps:$4 sm:$0xff]   ;;  %v3110_v50 = vld [vmem:[%s3299_s30 + $0x28c] ss:$16 sps:$4 sm:$0xff]  }
  0x66   : > { %1294 = vmatmul.mubr.bf16.gmra.mrb[16].mxu1 %v3016_v51  ;;  %1583 = vmatmul.mubr.bf16.gmra.mrb[16].mxu0 %v3017_v52  ;;  %v3112_v51 = vld [vmem:[%s3299_s30 + $0x280] ss:$16 sps:$4 sm:$0xff]   ;;  %v3113_v52 = vld [vmem:[%s3299_s30 + $0x288] ss:$16 sps:$4 sm:$0xff]  }
  0x67   : > { %1301 = vmatprep.mubr.bf16.mxu1 %v3018_v53  ;;  %1590 = vmatprep.mubr.bf16.mxu0 %v3020_v54  ;;  %v3114_v53 = vld [vmem:[%s3299_s30 + $0x2a4] ss:$16 sps:$4 sm:$0xff]   ;;  %v3116_v54 = vld [vmem:[%s3299_s30 + $0x2ac] ss:$16 sps:$4 sm:$0xff]  }
  0x6e   : > { %1302 = vmatmul.mubr.bf16.gmra.mrb[20].mxu1 %v3022_v55  ;;  %1591 = vmatmul.mubr.bf16.gmra.mrb[20].mxu0 %v3023_v56  ;;  %v3118_v55 = vld [vmem:[%s3299_s30 + $0x2a0] ss:$16 sps:$4 sm:$0xff]   ;;  %v3119_v56 = vld [vmem:[%s3299_s30 + $0x2a8] ss:$16 sps:$4 sm:$0xff]  }
  0x6f   : > { %1309 = vmatprep.mubr.bf16.mxu1 %v3024_v57  ;;  %1598 = vmatprep.mubr.bf16.mxu0 %v3026_v58  ;;  %v3120_v57 = vld [vmem:[%s3299_s30 + $0x2c4] ss:$16 sps:$4 sm:$0xff]   ;;  %v3122_v58 = vld [vmem:[%s3299_s30 + $0x2cc] ss:$16 sps:$4 sm:$0xff]  }
  0x76   : > { %1310 = vmatmul.mubr.bf16.gmra.mrb[24].mxu1 %v3028_v59  ;;  %1599 = vmatmul.mubr.bf16.gmra.mrb[24].mxu0 %v3029_v60  ;;  %v3124_v59 = vld [vmem:[%s3299_s30 + $0x2c0] ss:$16 sps:$4 sm:$0xff]   ;;  %v3125_v60 = vld [vmem:[%s3299_s30 + $0x2c8] ss:$16 sps:$4 sm:$0xff]  }
  0x77   : > { %1317 = vmatprep.mubr.bf16.mxu1 %v3030_v61  ;;  %1606 = vmatprep.mubr.bf16.mxu0 %v3032_v62  ;;  %v3126_v61 = vld [vmem:[%s3299_s30 + $0x2e4] ss:$16 sps:$4 sm:$0xff]   ;;  %v3128_v62 = vld [vmem:[%s3299_s30 + $0x2ec] ss:$16 sps:$4 sm:$0xff]  }
  0x7e   : > { %1318 = vmatmul.mubr.bf16.gmra.mrb[28].mxu1 %v3034_v63  ;;  %1607 = vmatmul.mubr.bf16.gmra.mrb[28].mxu0 %v3035_v0  ;;  %v3130_v63 = vld [vmem:[%s3299_s30 + $0x2e0] ss:$16 sps:$4 sm:$0xff]   ;;  %v3131_v0 = vld [vmem:[%s3299_s30 + $0x2e8] ss:$16 sps:$4 sm:$0xff]  }
  0x7f   : > { %1325 = vmatprep.mubr.bf16.mxu1 %v3036_v1  ;;  %1614 = vmatprep.mubr.bf16.mxu0 %v3038_v2  ;;  %v3132_v1 = vld [vmem:[%s3299_s30 + $0x304] ss:$16 sps:$4 sm:$0xff]   ;;  %v3134_v2 = vld [vmem:[%s3299_s30 + $0x30c] ss:$16 sps:$4 sm:$0xff]  }
  0x86   : > { %1326 = vmatmul.mubr.bf16.gmra.mrb[32].mxu1 %v3040_v3  ;;  %1615 = vmatmul.mubr.bf16.gmra.mrb[32].mxu0 %v3041_v4  ;;  %v3136_v3 = vld [vmem:[%s3299_s30 + $0x300] ss:$16 sps:$4 sm:$0xff]   ;;  %v3137_v4 = vld [vmem:[%s3299_s30 + $0x308] ss:$16 sps:$4 sm:$0xff]  }
  0x87   : > { %1333 = vmatprep.mubr.bf16.mxu1 %v3042_v5  ;;  %1622 = vmatprep.mubr.bf16.mxu0 %v3044_v6  ;;  %v3138_v5 = vld [vmem:[%s3299_s30 + $0x324] ss:$16 sps:$4 sm:$0xff]   ;;  %v3140_v6 = vld [vmem:[%s3299_s30 + $0x32c] ss:$16 sps:$4 sm:$0xff]  }
  0x8e   : > { %1334 = vmatmul.mubr.bf16.gmra.mrb[36].mxu1 %v3046_v7  ;;  %1623 = vmatmul.mubr.bf16.gmra.mrb[36].mxu0 %v3047_v8  ;;  %v3142_v7 = vld [vmem:[%s3299_s30 + $0x320] ss:$16 sps:$4 sm:$0xff]   ;;  %v3143_v8 = vld [vmem:[%s3299_s30 + $0x328] ss:$16 sps:$4 sm:$0xff]  }
  0x8f   : > { %1341 = vmatprep.mubr.bf16.mxu1 %v3048_v9  ;;  %1630 = vmatprep.mubr.bf16.mxu0 %v3050_v10  ;;  %v3144_v9 = vld [vmem:[%s3299_s30 + $0x344] ss:$16 sps:$4 sm:$0xff]   ;;  %v3146_v10 = vld [vmem:[%s3299_s30 + $0x34c] ss:$16 sps:$4 sm:$0xff]  }
  0x96   : > { %1342 = vmatmul.mubr.bf16.gmra.mrb[40].mxu1 %v3052_v11  ;;  %1631 = vmatmul.mubr.bf16.gmra.mrb[40].mxu0 %v3053_v12  ;;  %v3148_v11 = vld [vmem:[%s3299_s30 + $0x340] ss:$16 sps:$4 sm:$0xff]   ;;  %v3149_v12 = vld [vmem:[%s3299_s30 + $0x348] ss:$16 sps:$4 sm:$0xff]  }
  0x97   : > { %1349 = vmatprep.mubr.bf16.mxu1 %v3054_v13  ;;  %1638 = vmatprep.mubr.bf16.mxu0 %v3056_v14  ;;  %v3150_v13 = vld [vmem:[%s3299_s30 + $0x364] ss:$16 sps:$4 sm:$0xff]   ;;  %v3152_v14 = vld [vmem:[%s3299_s30 + $0x36c] ss:$16 sps:$4 sm:$0xff]  }
  0x9e   : > { %1350 = vmatmul.mubr.bf16.gmra.mrb[44].mxu1 %v3058_v15  ;;  %1639 = vmatmul.mubr.bf16.gmra.mrb[44].mxu0 %v3059_v16 }
  0x9f   : > { %1357 = vmatprep.mubr.bf16.mxu1 %v3060_v17  ;;  %1646 = vmatprep.mubr.bf16.mxu0 %v3062_v18  ;;  %v3475_v17 = vld [vmem:[%s3681_s2] ss:$0 sm:$0xff] }
  0xa6   : > { %1358 = vmatmul.mubr.bf16.gmra.mrb[48].mxu1 %v3064_v19  ;;  %1647 = vmatmul.mubr.bf16.gmra.mrb[48].mxu0 %v3065_v20  ;;  %v3154_v19 = vld [vmem:[%s3299_s30 + $0x360] ss:$16 sps:$4 sm:$0xff]  }
  0xa7   : > { %1365 = vmatprep.mubr.bf16.mxu1 %v3066_v21  ;;  %1654 = vmatprep.mubr.bf16.mxu0 %v3068_v22 }
  0xae   : > { %1366 = vmatmul.mubr.bf16.gmra.mrb[52].mxu1 %v3070_v23  ;;  %1655 = vmatmul.mubr.bf16.gmra.mrb[52].mxu0 %v3071_v24  ;;  %v3155_v23 = vld [vmem:[%s3299_s30 + $0x368] ss:$16 sps:$4 sm:$0xff]   ;;  %v3156_v24 = vld [vmem:[%s3299_s30 + $0x384] ss:$16 sps:$4 sm:$0xff]  }
  0xaf   : > { %1373 = vmatprep.mubr.bf16.mxu1 %v3072_v25  ;;  %1662 = vmatprep.mubr.bf16.mxu0 %v3074_v26  ;;  %v3483_v25 = vld [vmem:[%s3682_s3] ss:$0 sm:$0xff] }
  0xb6   : > { %1374 = vmatmul.mubr.bf16.gmra.mrb[56].mxu1 %v3076_v27  ;;  %1663 = vmatmul.mubr.bf16.gmra.mrb[56].mxu0 %v3077_v28  ;;  %v3158_v28 = vld [vmem:[%s3299_s30 + $0x38c] ss:$16 sps:$4 sm:$0xff]  }
  0xb7   : > { %1381 = vmatprep.mubr.bf16.mxu1 %v3078_v29  ;;  %1670 = vmatprep.mubr.bf16.mxu0 %v3080_v30 }
  0xbe   : > { %1382 = vmatmul.mubr.bf16.gmra.mrb[60].mxu1 %v3082_v31  ;;  %1671 = vmatmul.mubr.bf16.gmra.mrb[60].mxu0 %v3083_v32 }
  0xbf   : > { %1389 = vmatprep.mubr.bf16.mxu1 %v3084_v33  ;;  %1678 = vmatprep.mubr.bf16.mxu0 %v3086_v34 }
  0xc6   : > { %1390 = vmatmul.mubr.bf16.gmra.mrb[64].mxu1 %v3088_v35  ;;  %1679 = vmatmul.mubr.bf16.gmra.mrb[64].mxu0 %v3089_v36 }
  0xc7   : > { %1397 = vmatprep.mubr.bf16.mxu1 %v3090_v37  ;;  %1686 = vmatprep.mubr.bf16.mxu0 %v3092_v38  ;;  %v3160_v38 = vld [vmem:[%s3299_s30 + $0x380] ss:$16 sps:$4 sm:$0xff]  }
  0xce   : > { %1398 = vmatmul.mubr.bf16.gmra.mrb[68].mxu1 %v3094_v39  ;;  %1687 = vmatmul.mubr.bf16.gmra.mrb[68].mxu0 %v3095_v40  ;;  %v3161_v39 = vld [vmem:[%s3299_s30 + $0x388] ss:$16 sps:$4 sm:$0xff]  }
  0xcf   : > { %1405 = vmatprep.mubr.bf16.mxu1 %v3096_v41  ;;  %1694 = vmatprep.mubr.bf16.mxu0 %v3098_v42 }
  0xd6   : > { %1406 = vmatmul.mubr.bf16.gmra.mrb[72].mxu1 %v3100_v43  ;;  %1695 = vmatmul.mubr.bf16.gmra.mrb[72].mxu0 %v3101_v44 }
  0xd7   : > { %1413 = vmatprep.mubr.bf16.mxu1 %v3102_v45  ;;  %1702 = vmatprep.mubr.bf16.mxu0 %v3104_v46  ;;  %v3162_v45 = vld [vmem:[%s3299_s30 + $0x3a4] ss:$16 sps:$4 sm:$0xff]  }
  0xde   : > { %1414 = vmatmul.mubr.bf16.gmra.mrb[76].mxu1 %v3106_v47  ;;  %1703 = vmatmul.mubr.bf16.gmra.mrb[76].mxu0 %v3107_v48  ;;  %v3164_v48 = vld [vmem:[%s3299_s30 + $0x3ac] ss:$16 sps:$4 sm:$0xff]  }
  0xdf   : > { %1421 = vmatprep.mubr.bf16.mxu1 %v3108_v49  ;;  %1710 = vmatprep.mubr.bf16.mxu0 %v3110_v50 }
  0xe6   : > { %1422 = vmatmul.mubr.bf16.gmra.mrb[80].mxu1 %v3112_v51  ;;  %1711 = vmatmul.mubr.bf16.gmra.mrb[80].mxu0 %v3113_v52 }
  0xe7   : > { %1429 = vmatprep.mubr.bf16.mxu1 %v3114_v53  ;;  %1718 = vmatprep.mubr.bf16.mxu0 %v3116_v54 }
  0xee   : > { %1430 = vmatmul.mubr.bf16.gmra.mrb[84].mxu1 %v3118_v55  ;;  %1719 = vmatmul.mubr.bf16.gmra.mrb[84].mxu0 %v3119_v56 }
  0xef   : > { %1437 = vmatprep.mubr.bf16.mxu1 %v3120_v57  ;;  %1726 = vmatprep.mubr.bf16.mxu0 %v3122_v58 }
  0xf6   : > { %1438 = vmatmul.mubr.bf16.gmra.mrb[88].mxu1 %v3124_v59  ;;  %1727 = vmatmul.mubr.bf16.gmra.mrb[88].mxu0 %v3125_v60  ;;  %v3166_v59 = vld [vmem:[%s3299_s30 + $0x3a0] ss:$16 sps:$4 sm:$0xff]   ;;  %v3167_v60 = vld [vmem:[%s3299_s30 + $0x3a8] ss:$16 sps:$4 sm:$0xff]  }
  0xf7   : > { %1445 = vmatprep.mubr.bf16.mxu1 %v3126_v61  ;;  %1734 = vmatprep.mubr.bf16.mxu0 %v3128_v62 }
  0xfe   : > { %1446 = vmatmul.mubr.bf16.gmra.mrb[92].mxu1 %v3130_v63  ;;  %1735 = vmatmul.mubr.bf16.gmra.mrb[92].mxu0 %v3131_v0 }
  0xff   : > { %1453 = vmatprep.mubr.bf16.mxu1 %v3132_v1  ;;  %1742 = vmatprep.mubr.bf16.mxu0 %v3134_v2  ;;  %v3168_v2 = vld [vmem:[%s3299_s30 + $0x3c4] ss:$16 sps:$4 sm:$0xff]  }
 0x106   : > { %1454 = vmatmul.mubr.bf16.gmra.mrb[96].mxu1 %v3136_v3  ;;  %1743 = vmatmul.mubr.bf16.gmra.mrb[96].mxu0 %v3137_v4 }
 0x107   : > { %1461 = vmatprep.mubr.bf16.mxu1 %v3138_v5  ;;  %1750 = vmatprep.mubr.bf16.mxu0 %v3140_v6  ;;  %v3170_v5 = vld [vmem:[%s3299_s30 + $0x3cc] ss:$16 sps:$4 sm:$0xff]  }
 0x10e   : > { %1462 = vmatmul.mubr.bf16.gmra.mrb[100].mxu1 %v3142_v7  ;;  %1751 = vmatmul.mubr.bf16.gmra.mrb[100].mxu0 %v3143_v8 }
 0x10f   : > { %1469 = vmatprep.mubr.bf16.mxu1 %v3144_v9  ;;  %1758 = vmatprep.mubr.bf16.mxu0 %v3146_v10 }
 0x116   : > { %1470 = vmatmul.mubr.bf16.gmra.mrb[104].mxu1 %v3148_v11  ;;  %1759 = vmatmul.mubr.bf16.gmra.mrb[104].mxu0 %v3149_v12 }
 0x117   : > { %1477 = vmatprep.mubr.bf16.mxu1 %v3150_v13  ;;  %1766 = vmatprep.mubr.bf16.mxu0 %v3152_v14 }
 0x119   : > { %v1263_v15 = vpop.f32.mrb[0].mxu1  ;;  %v1552_v16 = vpop.f32.mrb[0].mxu0 }
 0x11a   : > { %v1265_v18 = vpop.f32.mrb[1].mxu1  ;;  %v1553_v20 = vadd.f32 %v1552_v16, %v1263_v15  ;;  %v1554_v21 = vpop.f32.mrb[1].mxu0  ;;  %v3172_v16 = vld [vmem:[%s3299_s30 + $0x3c0] ss:$16 sps:$4 sm:$0xff]  }
 0x11b   : > { %v1266_v22 = vpop.f32.mrb[2].mxu1  ;;  %v1555_v26 = vpop.f32.mrb[2].mxu0  ;;  %v3173_v18 = vld [vmem:[%s3299_s30 + $0x3c8] ss:$16 sps:$4 sm:$0xff]  }
 0x11c   : > { %v1268_v27 = vpop.f32.mrb[3].mxu1  ;;  %v1814_v29 = vmul.f32 %v3475_v17, %v1553_v20  ;;  %v1556_v30 = vadd.f32 %v1555_v26, %v1266_v22  ;;  %v1557_v31 = vpop.f32.mrb[3].mxu0 }
 0x11e   : > { %1478 = vmatmul.mubr.bf16.gmra.mrb[108].mxu1 %v3154_v19  ;;  %v1885_v32 = vadd.f32 %v3483_v25, %v1814_v29  ;;  %v1815_v33 = vmul.f32 %v3475_v17, %v1556_v30  ;;  %1767 = vmatmul.mubr.bf16.gmra.mrb[108].mxu0 %v3155_v23 }
 0x11f   : > { %1485 = vmatprep.mubr.bf16.mxu1 %v3156_v24  ;;  %1774 = vmatprep.mubr.bf16.mxu0 %v3158_v28  ;;  %v3174_v24 = vld [vmem:[%s3299_s30 + $0x3e4] ss:$16 sps:$4 sm:$0xff]   ;;  %v3176_v28 = vld [vmem:[%s3299_s30 + $0x3ec] ss:$16 sps:$4 sm:$0xff]  }
 0x120   : > { %v1886_v34 = vadd.f32 %v3483_v25, %v1815_v33  ;;  %v1949_v40 = vmax.f32 %v1885_v32, 0.0 }
 0x121   : > { %v1271_v35 = vpop.f32.mrb[4].mxu1  ;;  %v1560_v36 = vpop.f32.mrb[4].mxu0 }
 0x122   : > { %v1273_v37 = vpop.f32.mrb[5].mxu1  ;;  %v1950_v41 = vmax.f32 %v1886_v34, 0.0  ;;  %v1561_v42 = vadd.f32 %v1560_v36, %v1271_v35  ;;  %v1562_v43 = vpop.f32.mrb[5].mxu0 }
 0x123   : > { %v1274_v44 = vpop.f32.mrb[6].mxu1  ;;  %v1563_v46 = vpop.f32.mrb[6].mxu0 }
 0x124   : > { %v1276_v47 = vpop.f32.mrb[7].mxu1  ;;  %v2695_v49 = vpack.c.bf16 %v1950_v41, %v1949_v40  ;;  %v1816_v50 = vmul.f32 %v3475_v17, %v1561_v42  ;;  %v1564_v51 = vadd.f32 %v1563_v46, %v1274_v44  ;;  %v1565_v52 = vpop.f32.mrb[7].mxu0 }
 0x126   : > { %1486 = vmatmul.mubr.bf16.gmra.mrb[112].mxu1 %v3160_v38  ;;  %2696 = vst [vmem:[%s3497_s21] sm:$0xff] %v2695_v49   ;;  %v1887_v53 = vadd.f32 %v3483_v25, %v1816_v50  ;;  %v1817_v54 = vmul.f32 %v3475_v17, %v1564_v51  ;;  %1775 = vmatmul.mubr.bf16.gmra.mrb[112].mxu0 %v3161_v39  ;;  %v3178_v39 = vld [vmem:[%s3299_s30 + $0x3e0] ss:$16 sps:$4 sm:$0xff]  }
 0x127   : > { %1493 = vmatprep.mubr.bf16.mxu1 %v3162_v45  ;;  %1782 = vmatprep.mubr.bf16.mxu0 %v3164_v48  ;;  %v3179_v45 = vld [vmem:[%s3299_s30 + $0x3e8] ss:$16 sps:$4 sm:$0xff]  }
 0x128   : > { %v1888_v55 = vadd.f32 %v3483_v25, %v1817_v54  ;;  %v1951_v61 = vmax.f32 %v1887_v53, 0.0 }
 0x129   : > { %v1279_v56 = vpop.f32.mrb[8].mxu1  ;;  %v1568_v57 = vpop.f32.mrb[8].mxu0 }
 0x12a   : > { %v1281_v58 = vpop.f32.mrb[9].mxu1  ;;  %v1952_v62 = vmax.f32 %v1888_v55, 0.0  ;;  %v1569_v63 = vadd.f32 %v1568_v57, %v1279_v56  ;;  %v1570_v0 = vpop.f32.mrb[9].mxu0 }
 0x12b   : > { %v1282_v1 = vpop.f32.mrb[10].mxu1  ;;  %v1571_v3 = vpop.f32.mrb[10].mxu0 }
 0x12c   : > { %v1284_v4 = vpop.f32.mrb[11].mxu1  ;;  %v2700_v6 = vpack.c.bf16 %v1952_v62, %v1951_v61  ;;  %v1818_v7 = vmul.f32 %v3475_v17, %v1569_v63  ;;  %v1572_v8 = vadd.f32 %v1571_v3, %v1282_v1  ;;  %v1573_v9 = vpop.f32.mrb[11].mxu0 }
 0x12e   : > { %1494 = vmatmul.mubr.bf16.gmra.mrb[116].mxu1 %v3166_v59  ;;  %2852 = vst [vmem:[%s3497_s21 + $0x8] sm:$0xff] %v2700_v6   ;;  %v1889_v10 = vadd.f32 %v3483_v25, %v1818_v7  ;;  %v1819_v11 = vmul.f32 %v3475_v17, %v1572_v8  ;;  %1783 = vmatmul.mubr.bf16.gmra.mrb[116].mxu0 %v3167_v60 }
 0x12f   : > { %1501 = vmatprep.mubr.bf16.mxu1 %v3168_v2  ;;  %1790 = vmatprep.mubr.bf16.mxu0 %v3170_v5 }
 0x130   : > { %v1890_v12 = vadd.f32 %v3483_v25, %v1819_v11  ;;  %v1953_v19 = vmax.f32 %v1889_v10, 0.0 }
 0x131   : > { %v1287_v13 = vpop.f32.mrb[12].mxu1  ;;  %v1576_v14 = vpop.f32.mrb[12].mxu0 }
 0x132   : > { %v1289_v15 = vpop.f32.mrb[13].mxu1  ;;  %v1954_v20 = vmax.f32 %v1890_v12, 0.0  ;;  %v1577_v21 = vadd.f32 %v1576_v14, %v1287_v13  ;;  %v1578_v22 = vpop.f32.mrb[13].mxu0 }
 0x133   : > { %v1290_v23 = vpop.f32.mrb[14].mxu1  ;;  %v1579_v26 = vpop.f32.mrb[14].mxu0 }
 0x134   : > { %v1292_v27 = vpop.f32.mrb[15].mxu1  ;;  %v2705_v29 = vpack.c.bf16 %v1954_v20, %v1953_v19  ;;  %v1820_v30 = vmul.f32 %v3475_v17, %v1577_v21  ;;  %v1580_v31 = vadd.f32 %v1579_v26, %v1290_v23  ;;  %v1581_v32 = vpop.f32.mrb[15].mxu0 }
 0x136   : > { %1502 = vmatmul.mubr.bf16.gmra.mrb[120].mxu1 %v3172_v16  ;;  %2853 = vst [vmem:[%s3497_s21 + $0x10] sm:$0xff] %v2705_v29   ;;  %v1891_v33 = vadd.f32 %v3483_v25, %v1820_v30  ;;  %v1821_v34 = vmul.f32 %v3475_v17, %v1580_v31  ;;  %1791 = vmatmul.mubr.bf16.gmra.mrb[120].mxu0 %v3173_v18 }
 0x137   : > { %1509 = vmatprep.mubr.bf16.mxu1 %v3174_v24  ;;  %1798 = vmatprep.mubr.bf16.mxu0 %v3176_v28 }
 0x138   : > { %v1892_v35 = vadd.f32 %v3483_v25, %v1821_v34  ;;  %v1955_v40 = vmax.f32 %v1891_v33, 0.0 }
 0x139   : > { %v1295_v36 = vpop.f32.mrb[16].mxu1  ;;  %v1584_v37 = vpop.f32.mrb[16].mxu0 }
 0x13a   : > { %v1297_v38 = vpop.f32.mrb[17].mxu1  ;;  %v1956_v41 = vmax.f32 %v1892_v35, 0.0  ;;  %v1585_v42 = vadd.f32 %v1584_v37, %v1295_v36  ;;  %v1586_v43 = vpop.f32.mrb[17].mxu0 }
 0x13b   : > { %v1298_v44 = vpop.f32.mrb[18].mxu1  ;;  %v1587_v46 = vpop.f32.mrb[18].mxu0 }
 0x13c   : > { %v1300_v47 = vpop.f32.mrb[19].mxu1  ;;  %v2710_v48 = vpack.c.bf16 %v1956_v41, %v1955_v40  ;;  %v1822_v49 = vmul.f32 %v3475_v17, %v1585_v42  ;;  %v1588_v50 = vadd.f32 %v1587_v46, %v1298_v44  ;;  %v1589_v51 = vpop.f32.mrb[19].mxu0 }
 0x13e   : > { %1510 = vmatmul.mubr.bf16.gmra.mrb[124].mxu1 %v3178_v39  ;;  %2854 = vst [vmem:[%s3497_s21 + $0x18] sm:$0xff] %v2710_v48   ;;  %v1893_v52 = vadd.f32 %v3483_v25, %v1822_v49  ;;  %v1823_v53 = vmul.f32 %v3475_v17, %v1588_v50  ;;  %1799 = vmatmul.mubr.bf16.gmra.mrb[124].mxu0 %v3179_v45 }
 0x140   : > { %v1894_v54 = vadd.f32 %v3483_v25, %v1823_v53  ;;  %v1957_v58 = vmax.f32 %v1893_v52, 0.0 }
 0x141   : > { %v1303_v55 = vpop.f32.mrb[20].mxu1  ;;  %v1592_v56 = vpop.f32.mrb[20].mxu0 }
 0x142   : > { %v1305_v57 = vpop.f32.mrb[21].mxu1  ;;  %v1958_v59 = vmax.f32 %v1894_v54, 0.0  ;;  %v1593_v60 = vadd.f32 %v1592_v56, %v1303_v55  ;;  %v1594_v61 = vpop.f32.mrb[21].mxu0 }
 0x143   : > { %v1306_v62 = vpop.f32.mrb[22].mxu1  ;;  %v1595_v63 = vpop.f32.mrb[22].mxu0 }
 0x144   : > { %v1308_v0 = vpop.f32.mrb[23].mxu1  ;;  %v2715_v1 = vpack.c.bf16 %v1958_v59, %v1957_v58  ;;  %v1824_v2 = vmul.f32 %v3475_v17, %v1593_v60  ;;  %v1596_v3 = vadd.f32 %v1595_v63, %v1306_v62  ;;  %v1597_v4 = vpop.f32.mrb[23].mxu0 }
 0x146   : > { %2855 = vst [vmem:[%s3497_s21 + $0x20] sm:$0xff] %v2715_v1   ;;  %v1895_v5 = vadd.f32 %v3483_v25, %v1824_v2  ;;  %v1825_v6 = vmul.f32 %v3475_v17, %v1596_v3 }
 0x148   : > { %v1896_v7 = vadd.f32 %v3483_v25, %v1825_v6  ;;  %v1959_v11 = vmax.f32 %v1895_v5, 0.0 }
 0x149   : > { %v1311_v8 = vpop.f32.mrb[24].mxu1  ;;  %v1600_v9 = vpop.f32.mrb[24].mxu0 }
 0x14a   : > { %v1313_v10 = vpop.f32.mrb[25].mxu1  ;;  %v1960_v12 = vmax.f32 %v1896_v7, 0.0  ;;  %v1601_v13 = vadd.f32 %v1600_v9, %v1311_v8  ;;  %v1602_v14 = vpop.f32.mrb[25].mxu0 }
 0x14b   : > { %v1314_v15 = vpop.f32.mrb[26].mxu1  ;;  %v1603_v16 = vpop.f32.mrb[26].mxu0 }
 0x14c   : > { %v1316_v18 = vpop.f32.mrb[27].mxu1  ;;  %v2720_v19 = vpack.c.bf16 %v1960_v12, %v1959_v11  ;;  %v1826_v20 = vmul.f32 %v3475_v17, %v1601_v13  ;;  %v1604_v21 = vadd.f32 %v1603_v16, %v1314_v15  ;;  %v1605_v22 = vpop.f32.mrb[27].mxu0 }
 0x14e   : > { %2856 = vst [vmem:[%s3497_s21 + $0x28] sm:$0xff] %v2720_v19   ;;  %v1897_v23 = vadd.f32 %v3483_v25, %v1826_v20  ;;  %v1827_v24 = vmul.f32 %v3475_v17, %v1604_v21 }
 0x150   : > { %v1898_v26 = vadd.f32 %v3483_v25, %v1827_v24  ;;  %v1961_v30 = vmax.f32 %v1897_v23, 0.0 }
 0x151   : > { %v1319_v27 = vpop.f32.mrb[28].mxu1  ;;  %v1608_v28 = vpop.f32.mrb[28].mxu0 }
 0x152   : > { %v1321_v29 = vpop.f32.mrb[29].mxu1  ;;  %v1962_v31 = vmax.f32 %v1898_v26, 0.0  ;;  %v1609_v32 = vadd.f32 %v1608_v28, %v1319_v27  ;;  %v1610_v33 = vpop.f32.mrb[29].mxu0 }
 0x153   : > { %v1322_v34 = vpop.f32.mrb[30].mxu1  ;;  %v1611_v35 = vpop.f32.mrb[30].mxu0 }
 0x154   : > { %v1324_v36 = vpop.f32.mrb[31].mxu1  ;;  %v2725_v37 = vpack.c.bf16 %v1962_v31, %v1961_v30  ;;  %v1828_v38 = vmul.f32 %v3475_v17, %v1609_v32  ;;  %v1612_v39 = vadd.f32 %v1611_v35, %v1322_v34  ;;  %v1613_v40 = vpop.f32.mrb[31].mxu0 }
 0x156   : > { %2857 = vst [vmem:[%s3497_s21 + $0x30] sm:$0xff] %v2725_v37   ;;  %v1899_v41 = vadd.f32 %v3483_v25, %v1828_v38  ;;  %v1829_v42 = vmul.f32 %v3475_v17, %v1612_v39 }
 0x158   : > { %v1900_v43 = vadd.f32 %v3483_v25, %v1829_v42  ;;  %v1963_v47 = vmax.f32 %v1899_v41, 0.0 }
 0x159   : > { %v1327_v44 = vpop.f32.mrb[32].mxu1  ;;  %v1616_v45 = vpop.f32.mrb[32].mxu0 }
 0x15a   : > { %v1329_v46 = vpop.f32.mrb[33].mxu1  ;;  %v1964_v48 = vmax.f32 %v1900_v43, 0.0  ;;  %v1617_v49 = vadd.f32 %v1616_v45, %v1327_v44  ;;  %v1618_v50 = vpop.f32.mrb[33].mxu0 }
 0x15b   : > { %v1330_v51 = vpop.f32.mrb[34].mxu1  ;;  %v1619_v52 = vpop.f32.mrb[34].mxu0 }
 0x15c   : > { %v1332_v53 = vpop.f32.mrb[35].mxu1  ;;  %v2730_v54 = vpack.c.bf16 %v1964_v48, %v1963_v47  ;;  %v1830_v55 = vmul.f32 %v3475_v17, %v1617_v49  ;;  %v1620_v56 = vadd.f32 %v1619_v52, %v1330_v51  ;;  %v1621_v57 = vpop.f32.mrb[35].mxu0 }
 0x15e   : > { %2858 = vst [vmem:[%s3497_s21 + $0x38] sm:$0xff] %v2730_v54   ;;  %v1901_v58 = vadd.f32 %v3483_v25, %v1830_v55  ;;  %v1831_v59 = vmul.f32 %v3475_v17, %v1620_v56 }
 0x160   : > { %v1902_v60 = vadd.f32 %v3483_v25, %v1831_v59  ;;  %v1965_v0 = vmax.f32 %v1901_v58, 0.0 }
 0x161   : > { %v1335_v61 = vpop.f32.mrb[36].mxu1  ;;  %v1624_v62 = vpop.f32.mrb[36].mxu0 }
 0x162   : > { %v1337_v63 = vpop.f32.mrb[37].mxu1  ;;  %v1966_v1 = vmax.f32 %v1902_v60, 0.0  ;;  %v1625_v2 = vadd.f32 %v1624_v62, %v1335_v61  ;;  %v1626_v3 = vpop.f32.mrb[37].mxu0 }
 0x163   : > { %v1338_v4 = vpop.f32.mrb[38].mxu1  ;;  %v1627_v5 = vpop.f32.mrb[38].mxu0 }
 0x164   : > { %v1340_v6 = vpop.f32.mrb[39].mxu1  ;;  %v2735_v7 = vpack.c.bf16 %v1966_v1, %v1965_v0  ;;  %v1832_v8 = vmul.f32 %v3475_v17, %v1625_v2  ;;  %v1628_v9 = vadd.f32 %v1627_v5, %v1338_v4  ;;  %v1629_v10 = vpop.f32.mrb[39].mxu0 }
 0x166   : > { %2859 = vst [vmem:[%s3497_s21 + $0x40] sm:$0xff] %v2735_v7   ;;  %v1903_v11 = vadd.f32 %v3483_v25, %v1832_v8  ;;  %v1833_v12 = vmul.f32 %v3475_v17, %v1628_v9 }
 0x168   : > { %v1904_v13 = vadd.f32 %v3483_v25, %v1833_v12  ;;  %v1967_v18 = vmax.f32 %v1903_v11, 0.0 }
 0x169   : > { %v1343_v14 = vpop.f32.mrb[40].mxu1  ;;  %v1632_v15 = vpop.f32.mrb[40].mxu0 }
 0x16a   : > { %v1345_v16 = vpop.f32.mrb[41].mxu1  ;;  %v1968_v19 = vmax.f32 %v1904_v13, 0.0  ;;  %v1633_v20 = vadd.f32 %v1632_v15, %v1343_v14  ;;  %v1634_v21 = vpop.f32.mrb[41].mxu0 }
 0x16b   : > { %v1346_v22 = vpop.f32.mrb[42].mxu1  ;;  %v1635_v23 = vpop.f32.mrb[42].mxu0 }
 0x16c   : > { %v1348_v24 = vpop.f32.mrb[43].mxu1  ;;  %v2740_v26 = vpack.c.bf16 %v1968_v19, %v1967_v18  ;;  %v1834_v27 = vmul.f32 %v3475_v17, %v1633_v20  ;;  %v1636_v28 = vadd.f32 %v1635_v23, %v1346_v22  ;;  %v1637_v29 = vpop.f32.mrb[43].mxu0 }
 0x16e   : > { %2860 = vst [vmem:[%s3497_s21 + $0x48] sm:$0xff] %v2740_v26   ;;  %v1905_v30 = vadd.f32 %v3483_v25, %v1834_v27  ;;  %v1835_v31 = vmul.f32 %v3475_v17, %v1636_v28 }
 0x170   : > { %v1906_v32 = vadd.f32 %v3483_v25, %v1835_v31  ;;  %v1969_v36 = vmax.f32 %v1905_v30, 0.0 }
 0x171   : > { %v1351_v33 = vpop.f32.mrb[44].mxu1  ;;  %v1640_v34 = vpop.f32.mrb[44].mxu0 }
 0x172   : > { %v1353_v35 = vpop.f32.mrb[45].mxu1  ;;  %v1970_v37 = vmax.f32 %v1906_v32, 0.0  ;;  %v1641_v38 = vadd.f32 %v1640_v34, %v1351_v33  ;;  %v1642_v39 = vpop.f32.mrb[45].mxu0 }
 0x173   : > { %v1354_v40 = vpop.f32.mrb[46].mxu1  ;;  %v1643_v41 = vpop.f32.mrb[46].mxu0 }
 0x174   : > { %v1356_v42 = vpop.f32.mrb[47].mxu1  ;;  %v2745_v43 = vpack.c.bf16 %v1970_v37, %v1969_v36  ;;  %v1836_v44 = vmul.f32 %v3475_v17, %v1641_v38  ;;  %v1644_v45 = vadd.f32 %v1643_v41, %v1354_v40  ;;  %v1645_v46 = vpop.f32.mrb[47].mxu0 }
 0x176   : > { %2861 = vst [vmem:[%s3497_s21 + $0x50] sm:$0xff] %v2745_v43   ;;  %v1907_v47 = vadd.f32 %v3483_v25, %v1836_v44  ;;  %v1837_v48 = vmul.f32 %v3475_v17, %v1644_v45 }
 0x178   : > { %v1908_v49 = vadd.f32 %v3483_v25, %v1837_v48  ;;  %v1971_v53 = vmax.f32 %v1907_v47, 0.0 }
 0x179   : > { %v1359_v50 = vpop.f32.mrb[48].mxu1  ;;  %v1648_v51 = vpop.f32.mrb[48].mxu0 }
 0x17a   : > { %v1361_v52 = vpop.f32.mrb[49].mxu1  ;;  %v1972_v54 = vmax.f32 %v1908_v49, 0.0  ;;  %v1649_v55 = vadd.f32 %v1648_v51, %v1359_v50  ;;  %v1650_v56 = vpop.f32.mrb[49].mxu0 }
 0x17b   : > { %v1362_v57 = vpop.f32.mrb[50].mxu1  ;;  %v1651_v58 = vpop.f32.mrb[50].mxu0 }
 0x17c   : > { %v1364_v59 = vpop.f32.mrb[51].mxu1  ;;  %v2750_v60 = vpack.c.bf16 %v1972_v54, %v1971_v53  ;;  %v1838_v61 = vmul.f32 %v3475_v17, %v1649_v55  ;;  %v1652_v62 = vadd.f32 %v1651_v58, %v1362_v57  ;;  %v1653_v63 = vpop.f32.mrb[51].mxu0 }
 0x17e   : > { %2862 = vst [vmem:[%s3497_s21 + $0x58] sm:$0xff] %v2750_v60   ;;  %v1909_v0 = vadd.f32 %v3483_v25, %v1838_v61  ;;  %v1839_v1 = vmul.f32 %v3475_v17, %v1652_v62 }
 0x180   : > { %v1910_v2 = vadd.f32 %v3483_v25, %v1839_v1  ;;  %v1973_v6 = vmax.f32 %v1909_v0, 0.0 }
 0x181   : > { %v1367_v3 = vpop.f32.mrb[52].mxu1  ;;  %v1656_v4 = vpop.f32.mrb[52].mxu0 }
 0x182   : > { %v1369_v5 = vpop.f32.mrb[53].mxu1  ;;  %v1974_v7 = vmax.f32 %v1910_v2, 0.0  ;;  %v1657_v8 = vadd.f32 %v1656_v4, %v1367_v3  ;;  %v1658_v9 = vpop.f32.mrb[53].mxu0 }
 0x183   : > { %v1370_v10 = vpop.f32.mrb[54].mxu1  ;;  %v1659_v11 = vpop.f32.mrb[54].mxu0 }
 0x184   : > { %v1372_v12 = vpop.f32.mrb[55].mxu1  ;;  %v2755_v13 = vpack.c.bf16 %v1974_v7, %v1973_v6  ;;  %v1840_v14 = vmul.f32 %v3475_v17, %v1657_v8  ;;  %v1660_v15 = vadd.f32 %v1659_v11, %v1370_v10  ;;  %v1661_v16 = vpop.f32.mrb[55].mxu0 }
 0x186   : > { %2863 = vst [vmem:[%s3497_s21 + $0x60] sm:$0xff] %v2755_v13   ;;  %v1911_v18 = vadd.f32 %v3483_v25, %v1840_v14  ;;  %v1841_v19 = vmul.f32 %v3475_v17, %v1660_v15 }
 0x188   : > { %v1912_v20 = vadd.f32 %v3483_v25, %v1841_v19  ;;  %v1975_v24 = vmax.f32 %v1911_v18, 0.0 }
 0x189   : > { %v1375_v21 = vpop.f32.mrb[56].mxu1  ;;  %v1664_v22 = vpop.f32.mrb[56].mxu0 }
 0x18a   : > { %v1377_v23 = vpop.f32.mrb[57].mxu1  ;;  %v1976_v26 = vmax.f32 %v1912_v20, 0.0  ;;  %v1665_v27 = vadd.f32 %v1664_v22, %v1375_v21  ;;  %v1666_v28 = vpop.f32.mrb[57].mxu0 }
 0x18b   : > { %v1378_v29 = vpop.f32.mrb[58].mxu1  ;;  %v1667_v30 = vpop.f32.mrb[58].mxu0 }
 0x18c   : > { %v1380_v31 = vpop.f32.mrb[59].mxu1  ;;  %v2760_v32 = vpack.c.bf16 %v1976_v26, %v1975_v24  ;;  %v1842_v33 = vmul.f32 %v3475_v17, %v1665_v27  ;;  %v1668_v34 = vadd.f32 %v1667_v30, %v1378_v29  ;;  %v1669_v35 = vpop.f32.mrb[59].mxu0 }
 0x18e   : > { %2864 = vst [vmem:[%s3497_s21 + $0x68] sm:$0xff] %v2760_v32   ;;  %v1913_v36 = vadd.f32 %v3483_v25, %v1842_v33  ;;  %v1843_v37 = vmul.f32 %v3475_v17, %v1668_v34 }
 0x190   : > { %v1914_v38 = vadd.f32 %v3483_v25, %v1843_v37  ;;  %v1977_v42 = vmax.f32 %v1913_v36, 0.0 }
 0x191   : > { %v1383_v39 = vpop.f32.mrb[60].mxu1  ;;  %v1672_v40 = vpop.f32.mrb[60].mxu0 }
 0x192   : > { %v1385_v41 = vpop.f32.mrb[61].mxu1  ;;  %v1978_v43 = vmax.f32 %v1914_v38, 0.0  ;;  %v1673_v44 = vadd.f32 %v1672_v40, %v1383_v39  ;;  %v1674_v45 = vpop.f32.mrb[61].mxu0 }
 0x193   : > { %v1386_v46 = vpop.f32.mrb[62].mxu1  ;;  %v1675_v47 = vpop.f32.mrb[62].mxu0 }
 0x194   : > { %v1388_v48 = vpop.f32.mrb[63].mxu1  ;;  %v2765_v49 = vpack.c.bf16 %v1978_v43, %v1977_v42  ;;  %v1844_v50 = vmul.f32 %v3475_v17, %v1673_v44  ;;  %v1676_v51 = vadd.f32 %v1675_v47, %v1386_v46  ;;  %v1677_v52 = vpop.f32.mrb[63].mxu0 }
 0x196   : > { %2865 = vst [vmem:[%s3497_s21 + $0x70] sm:$0xff] %v2765_v49   ;;  %v1915_v53 = vadd.f32 %v3483_v25, %v1844_v50  ;;  %v1845_v54 = vmul.f32 %v3475_v17, %v1676_v51 }
 0x198   : > { %v1916_v55 = vadd.f32 %v3483_v25, %v1845_v54  ;;  %v1979_v59 = vmax.f32 %v1915_v53, 0.0 }
 0x199   : > { %v1391_v56 = vpop.f32.mrb[64].mxu1  ;;  %v1680_v57 = vpop.f32.mrb[64].mxu0 }
 0x19a   : > { %v1393_v58 = vpop.f32.mrb[65].mxu1  ;;  %v1980_v60 = vmax.f32 %v1916_v55, 0.0  ;;  %v1681_v61 = vadd.f32 %v1680_v57, %v1391_v56  ;;  %v1682_v62 = vpop.f32.mrb[65].mxu0 }
 0x19b   : > { %v1394_v63 = vpop.f32.mrb[66].mxu1  ;;  %v1683_v0 = vpop.f32.mrb[66].mxu0 }
 0x19c   : > { %v1396_v1 = vpop.f32.mrb[67].mxu1  ;;  %v2770_v2 = vpack.c.bf16 %v1980_v60, %v1979_v59  ;;  %v1846_v3 = vmul.f32 %v3475_v17, %v1681_v61  ;;  %v1684_v4 = vadd.f32 %v1683_v0, %v1394_v63  ;;  %v1685_v5 = vpop.f32.mrb[67].mxu0 }
 0x19e   : > { %2866 = vst [vmem:[%s3497_s21 + $0x78] sm:$0xff] %v2770_v2   ;;  %v1917_v6 = vadd.f32 %v3483_v25, %v1846_v3  ;;  %v1847_v7 = vmul.f32 %v3475_v17, %v1684_v4 }
 0x1a0   : > { %v1918_v8 = vadd.f32 %v3483_v25, %v1847_v7  ;;  %v1981_v12 = vmax.f32 %v1917_v6, 0.0 }
 0x1a1   : > { %v1399_v9 = vpop.f32.mrb[68].mxu1  ;;  %v1688_v10 = vpop.f32.mrb[68].mxu0 }
 0x1a2   : > { %v1401_v11 = vpop.f32.mrb[69].mxu1  ;;  %v1982_v13 = vmax.f32 %v1918_v8, 0.0  ;;  %v1689_v14 = vadd.f32 %v1688_v10, %v1399_v9  ;;  %v1690_v15 = vpop.f32.mrb[69].mxu0 }
 0x1a3   : > { %v1402_v16 = vpop.f32.mrb[70].mxu1  ;;  %v1691_v18 = vpop.f32.mrb[70].mxu0 }
 0x1a4   : > { %v1404_v19 = vpop.f32.mrb[71].mxu1  ;;  %v2775_v20 = vpack.c.bf16 %v1982_v13, %v1981_v12  ;;  %v1848_v21 = vmul.f32 %v3475_v17, %v1689_v14  ;;  %v1692_v22 = vadd.f32 %v1691_v18, %v1402_v16  ;;  %v1693_v23 = vpop.f32.mrb[71].mxu0 }
 0x1a6   : > { %2867 = vst [vmem:[%s3497_s21 + $0x80] sm:$0xff] %v2775_v20   ;;  %v1919_v24 = vadd.f32 %v3483_v25, %v1848_v21  ;;  %v1849_v26 = vmul.f32 %v3475_v17, %v1692_v22 }
 0x1a8   : > { %v1920_v27 = vadd.f32 %v3483_v25, %v1849_v26  ;;  %v1983_v31 = vmax.f32 %v1919_v24, 0.0 }
 0x1a9   : > { %v1407_v28 = vpop.f32.mrb[72].mxu1  ;;  %v1696_v29 = vpop.f32.mrb[72].mxu0 }
 0x1aa   : > { %v1409_v30 = vpop.f32.mrb[73].mxu1  ;;  %v1984_v32 = vmax.f32 %v1920_v27, 0.0  ;;  %v1697_v33 = vadd.f32 %v1696_v29, %v1407_v28  ;;  %v1698_v34 = vpop.f32.mrb[73].mxu0 }
 0x1ab   : > { %v1410_v35 = vpop.f32.mrb[74].mxu1  ;;  %v1699_v36 = vpop.f32.mrb[74].mxu0 }
 0x1ac   : > { %v1412_v37 = vpop.f32.mrb[75].mxu1  ;;  %v2780_v38 = vpack.c.bf16 %v1984_v32, %v1983_v31  ;;  %v1850_v39 = vmul.f32 %v3475_v17, %v1697_v33  ;;  %v1700_v40 = vadd.f32 %v1699_v36, %v1410_v35  ;;  %v1701_v41 = vpop.f32.mrb[75].mxu0 }
 0x1ae   : > { %2868 = vst [vmem:[%s3497_s21 + $0x88] sm:$0xff] %v2780_v38   ;;  %v1921_v42 = vadd.f32 %v3483_v25, %v1850_v39  ;;  %v1851_v43 = vmul.f32 %v3475_v17, %v1700_v40 }
 0x1b0   : > { %v1922_v44 = vadd.f32 %v3483_v25, %v1851_v43  ;;  %v1985_v48 = vmax.f32 %v1921_v42, 0.0 }
 0x1b1   : > { %v1415_v45 = vpop.f32.mrb[76].mxu1  ;;  %v1704_v46 = vpop.f32.mrb[76].mxu0 }
 0x1b2   : > { %v1417_v47 = vpop.f32.mrb[77].mxu1  ;;  %v1986_v49 = vmax.f32 %v1922_v44, 0.0  ;;  %v1705_v50 = vadd.f32 %v1704_v46, %v1415_v45  ;;  %v1706_v51 = vpop.f32.mrb[77].mxu0 }
 0x1b3   : > { %v1418_v52 = vpop.f32.mrb[78].mxu1  ;;  %v1707_v53 = vpop.f32.mrb[78].mxu0 }
 0x1b4   : > { %v1420_v54 = vpop.f32.mrb[79].mxu1  ;;  %v2785_v55 = vpack.c.bf16 %v1986_v49, %v1985_v48  ;;  %v1852_v56 = vmul.f32 %v3475_v17, %v1705_v50  ;;  %v1708_v57 = vadd.f32 %v1707_v53, %v1418_v52  ;;  %v1709_v58 = vpop.f32.mrb[79].mxu0 }
 0x1b6   : > { %2869 = vst [vmem:[%s3497_s21 + $0x90] sm:$0xff] %v2785_v55   ;;  %v1923_v59 = vadd.f32 %v3483_v25, %v1852_v56  ;;  %v1853_v60 = vmul.f32 %v3475_v17, %v1708_v57 }
 0x1b8   : > { %v1924_v61 = vadd.f32 %v3483_v25, %v1853_v60  ;;  %v1987_v1 = vmax.f32 %v1923_v59, 0.0 }
 0x1b9   : > { %v1423_v62 = vpop.f32.mrb[80].mxu1  ;;  %v1712_v63 = vpop.f32.mrb[80].mxu0 }
 0x1ba   : > { %v1425_v0 = vpop.f32.mrb[81].mxu1  ;;  %v1988_v2 = vmax.f32 %v1924_v61, 0.0  ;;  %v1713_v3 = vadd.f32 %v1712_v63, %v1423_v62  ;;  %v1714_v4 = vpop.f32.mrb[81].mxu0 }
 0x1bb   : > { %v1426_v5 = vpop.f32.mrb[82].mxu1  ;;  %v1715_v6 = vpop.f32.mrb[82].mxu0 }
 0x1bc   : > { %v1428_v7 = vpop.f32.mrb[83].mxu1  ;;  %v2790_v8 = vpack.c.bf16 %v1988_v2, %v1987_v1  ;;  %v1854_v9 = vmul.f32 %v3475_v17, %v1713_v3  ;;  %v1716_v10 = vadd.f32 %v1715_v6, %v1426_v5  ;;  %v1717_v11 = vpop.f32.mrb[83].mxu0 }
 0x1be   : > { %2870 = vst [vmem:[%s3497_s21 + $0x98] sm:$0xff] %v2790_v8   ;;  %v1925_v12 = vadd.f32 %v3483_v25, %v1854_v9  ;;  %v1855_v13 = vmul.f32 %v3475_v17, %v1716_v10 }
 0x1c0   : > { %v1926_v14 = vadd.f32 %v3483_v25, %v1855_v13  ;;  %v1989_v19 = vmax.f32 %v1925_v12, 0.0 }
 0x1c1   : > { %v1431_v15 = vpop.f32.mrb[84].mxu1  ;;  %v1720_v16 = vpop.f32.mrb[84].mxu0 }
 0x1c2   : > { %v1433_v18 = vpop.f32.mrb[85].mxu1  ;;  %v1990_v20 = vmax.f32 %v1926_v14, 0.0  ;;  %v1721_v21 = vadd.f32 %v1720_v16, %v1431_v15  ;;  %v1722_v22 = vpop.f32.mrb[85].mxu0 }
 0x1c3   : > { %v1434_v23 = vpop.f32.mrb[86].mxu1  ;;  %v1723_v24 = vpop.f32.mrb[86].mxu0 }
 0x1c4   : > { %v1436_v26 = vpop.f32.mrb[87].mxu1  ;;  %v2795_v27 = vpack.c.bf16 %v1990_v20, %v1989_v19  ;;  %v1856_v28 = vmul.f32 %v3475_v17, %v1721_v21  ;;  %v1724_v29 = vadd.f32 %v1723_v24, %v1434_v23  ;;  %v1725_v30 = vpop.f32.mrb[87].mxu0 }
 0x1c6   : > { %2871 = vst [vmem:[%s3497_s21 + $0xa0] sm:$0xff] %v2795_v27   ;;  %v1927_v31 = vadd.f32 %v3483_v25, %v1856_v28  ;;  %v1857_v32 = vmul.f32 %v3475_v17, %v1724_v29 }
 0x1c8   : > { %v1928_v33 = vadd.f32 %v3483_v25, %v1857_v32  ;;  %v1991_v37 = vmax.f32 %v1927_v31, 0.0 }
 0x1c9   : > { %v1439_v34 = vpop.f32.mrb[88].mxu1  ;;  %v1728_v35 = vpop.f32.mrb[88].mxu0 }
 0x1ca   : > { %v1441_v36 = vpop.f32.mrb[89].mxu1  ;;  %v1992_v38 = vmax.f32 %v1928_v33, 0.0  ;;  %v1729_v39 = vadd.f32 %v1728_v35, %v1439_v34  ;;  %v1730_v40 = vpop.f32.mrb[89].mxu0 }
 0x1cb   : > { %v1442_v41 = vpop.f32.mrb[90].mxu1  ;;  %v1731_v42 = vpop.f32.mrb[90].mxu0 }
 0x1cc   : > { %v1444_v43 = vpop.f32.mrb[91].mxu1  ;;  %v2800_v44 = vpack.c.bf16 %v1992_v38, %v1991_v37  ;;  %v1858_v45 = vmul.f32 %v3475_v17, %v1729_v39  ;;  %v1732_v46 = vadd.f32 %v1731_v42, %v1442_v41  ;;  %v1733_v47 = vpop.f32.mrb[91].mxu0 }
 0x1ce   : > { %2872 = vst [vmem:[%s3497_s21 + $0xa8] sm:$0xff] %v2800_v44   ;;  %v1929_v48 = vadd.f32 %v3483_v25, %v1858_v45  ;;  %v1859_v49 = vmul.f32 %v3475_v17, %v1732_v46 }
 0x1d0   : > { %v1930_v50 = vadd.f32 %v3483_v25, %v1859_v49  ;;  %v1993_v54 = vmax.f32 %v1929_v48, 0.0 }
 0x1d1   : > { %v1447_v51 = vpop.f32.mrb[92].mxu1  ;;  %v1736_v52 = vpop.f32.mrb[92].mxu0 }
 0x1d2   : > { %v1449_v53 = vpop.f32.mrb[93].mxu1  ;;  %v1994_v55 = vmax.f32 %v1930_v50, 0.0  ;;  %v1737_v56 = vadd.f32 %v1736_v52, %v1447_v51  ;;  %v1738_v57 = vpop.f32.mrb[93].mxu0  ;;  %v3638_v51 = vld [vmem:[%s3681_s2] ss:$0 sm:$0xff] }
 0x1d3   : > { %v1450_v58 = vpop.f32.mrb[94].mxu1  ;;  %v1739_v59 = vpop.f32.mrb[94].mxu0 }
 0x1d4   : > { %v1452_v60 = vpop.f32.mrb[95].mxu1  ;;  %v2805_v61 = vpack.c.bf16 %v1994_v55, %v1993_v54  ;;  %v1860_v62 = vmul.f32 %v3475_v17, %v1737_v56  ;;  %v1740_v63 = vadd.f32 %v1739_v59, %v1450_v58  ;;  %v1741_v0 = vpop.f32.mrb[95].mxu0 }
 0x1d6   : > { %2873 = vst [vmem:[%s3497_s21 + $0xb0] sm:$0xff] %v2805_v61   ;;  %v1931_v1 = vadd.f32 %v3483_v25, %v1860_v62  ;;  %v1861_v2 = vmul.f32 %v3475_v17, %v1740_v63 }
 0x1d8   : > { %v1932_v3 = vadd.f32 %v3483_v25, %v1861_v2  ;;  %v1995_v7 = vmax.f32 %v1931_v1, 0.0 }
 0x1d9   : > { %v1455_v4 = vpop.f32.mrb[96].mxu1  ;;  %v1744_v5 = vpop.f32.mrb[96].mxu0 }
 0x1da   : > { %v1457_v6 = vpop.f32.mrb[97].mxu1  ;;  %v1996_v8 = vmax.f32 %v1932_v3, 0.0  ;;  %v1745_v9 = vadd.f32 %v1744_v5, %v1455_v4  ;;  %v1746_v10 = vpop.f32.mrb[97].mxu0 }
 0x1db   : > { %v1458_v11 = vpop.f32.mrb[98].mxu1  ;;  %v1747_v12 = vpop.f32.mrb[98].mxu0 }
 0x1dc   : > { %v1460_v13 = vpop.f32.mrb[99].mxu1  ;;  %v2810_v14 = vpack.c.bf16 %v1996_v8, %v1995_v7  ;;  %v1862_v15 = vmul.f32 %v3475_v17, %v1745_v9  ;;  %v1748_v16 = vadd.f32 %v1747_v12, %v1458_v11  ;;  %v1749_v18 = vpop.f32.mrb[99].mxu0 }
 0x1de   : > { %2874 = vst [vmem:[%s3497_s21 + $0xb8] sm:$0xff] %v2810_v14   ;;  %v1933_v19 = vadd.f32 %v3483_v25, %v1862_v15  ;;  %v1863_v20 = vmul.f32 %v3475_v17, %v1748_v16 }
 0x1e0   : > { %v1934_v21 = vadd.f32 %v3483_v25, %v1863_v20  ;;  %v1997_v26 = vmax.f32 %v1933_v19, 0.0 }
 0x1e1   : > { %v1463_v22 = vpop.f32.mrb[100].mxu1  ;;  %v1752_v23 = vpop.f32.mrb[100].mxu0 }
 0x1e2   : > { %v1465_v24 = vpop.f32.mrb[101].mxu1  ;;  %v1998_v27 = vmax.f32 %v1934_v21, 0.0  ;;  %v1753_v28 = vadd.f32 %v1752_v23, %v1463_v22  ;;  %v1754_v29 = vpop.f32.mrb[101].mxu0 }
 0x1e3   : > { %v1466_v30 = vpop.f32.mrb[102].mxu1  ;;  %v1755_v31 = vpop.f32.mrb[102].mxu0 }
 0x1e4   : > { %v1468_v32 = vpop.f32.mrb[103].mxu1  ;;  %v2815_v33 = vpack.c.bf16 %v1998_v27, %v1997_v26  ;;  %v1864_v34 = vmul.f32 %v3475_v17, %v1753_v28  ;;  %v1756_v35 = vadd.f32 %v1755_v31, %v1466_v30  ;;  %v1757_v36 = vpop.f32.mrb[103].mxu0 }
 0x1e6   : > { %2875 = vst [vmem:[%s3497_s21 + $0xc0] sm:$0xff] %v2815_v33   ;;  %v1935_v37 = vadd.f32 %v3483_v25, %v1864_v34  ;;  %v1865_v38 = vmul.f32 %v3475_v17, %v1756_v35 }
 0x1e8   : > { %v1936_v39 = vadd.f32 %v3483_v25, %v1865_v38  ;;  %v1999_v43 = vmax.f32 %v1935_v37, 0.0 }
 0x1e9   : > { %v1471_v40 = vpop.f32.mrb[104].mxu1  ;;  %v1760_v41 = vpop.f32.mrb[104].mxu0 }
 0x1ea   : > { %v1473_v42 = vpop.f32.mrb[105].mxu1  ;;  %v2000_v44 = vmax.f32 %v1936_v39, 0.0  ;;  %v1761_v45 = vadd.f32 %v1760_v41, %v1471_v40  ;;  %v1762_v46 = vpop.f32.mrb[105].mxu0 }
 0x1eb   : > { %v1474_v47 = vpop.f32.mrb[106].mxu1  ;;  %v1763_v48 = vpop.f32.mrb[106].mxu0 }
 0x1ec   : > { %v1476_v49 = vpop.f32.mrb[107].mxu1  ;;  %v2820_v50 = vpack.c.bf16 %v2000_v44, %v1999_v43  ;;  %v1866_v17 = vmul.f32 %v3638_v51, %v1761_v45  ;;  %v1764_v52 = vadd.f32 %v1763_v48, %v1474_v47  ;;  %v1765_v53 = vpop.f32.mrb[107].mxu0 }
 0x1ee   : > { %2876 = vst [vmem:[%s3497_s21 + $0xc8] sm:$0xff] %v2820_v50   ;;  %v1937_v54 = vadd.f32 %v3483_v25, %v1866_v17  ;;  %v1867_v55 = vmul.f32 %v3638_v51, %v1764_v52 }
 0x1f0   : > { %v1938_v56 = vadd.f32 %v3483_v25, %v1867_v55  ;;  %v2001_v60 = vmax.f32 %v1937_v54, 0.0  ;;  %v3650_v25 = vld [vmem:[%s3682_s3] ss:$0 sm:$0xff] }
 0x1f1   : > { %v1479_v57 = vpop.f32.mrb[108].mxu1  ;;  %v1768_v58 = vpop.f32.mrb[108].mxu0 }
 0x1f2   : > { %v1481_v59 = vpop.f32.mrb[109].mxu1  ;;  %v2002_v61 = vmax.f32 %v1938_v56, 0.0  ;;  %v1769_v62 = vadd.f32 %v1768_v58, %v1479_v57  ;;  %v1770_v63 = vpop.f32.mrb[109].mxu0 }
 0x1f3   : > { %v1482_v0 = vpop.f32.mrb[110].mxu1  ;;  %v1771_v1 = vpop.f32.mrb[110].mxu0 }
 0x1f4   : > { %v1484_v2 = vpop.f32.mrb[111].mxu1  ;;  %v2825_v3 = vpack.c.bf16 %v2002_v61, %v2001_v60  ;;  %v1868_v4 = vmul.f32 %v3638_v51, %v1769_v62  ;;  %v1772_v5 = vadd.f32 %v1771_v1, %v1482_v0  ;;  %v1773_v6 = vpop.f32.mrb[111].mxu0 }
 0x1f6   : > { %2877 = vst [vmem:[%s3497_s21 + $0xd0] sm:$0xff] %v2825_v3   ;;  %v1939_v7 = vadd.f32 %v3650_v25, %v1868_v4  ;;  %v1869_v8 = vmul.f32 %v3638_v51, %v1772_v5 }
 0x1f8   : > { %v1940_v9 = vadd.f32 %v3650_v25, %v1869_v8  ;;  %v2003_v13 = vmax.f32 %v1939_v7, 0.0 }
 0x1f9   : > { %v1487_v10 = vpop.f32.mrb[112].mxu1  ;;  %v1776_v11 = vpop.f32.mrb[112].mxu0 }
 0x1fa   : > { %v1489_v12 = vpop.f32.mrb[113].mxu1  ;;  %v2004_v14 = vmax.f32 %v1940_v9, 0.0  ;;  %v1777_v15 = vadd.f32 %v1776_v11, %v1487_v10  ;;  %v1778_v16 = vpop.f32.mrb[113].mxu0 }
 0x1fb   : > { %v1490_v18 = vpop.f32.mrb[114].mxu1  ;;  %v1779_v19 = vpop.f32.mrb[114].mxu0 }
 0x1fc   : > { %v1492_v20 = vpop.f32.mrb[115].mxu1  ;;  %v2830_v21 = vpack.c.bf16 %v2004_v14, %v2003_v13  ;;  %v1870_v22 = vmul.f32 %v3638_v51, %v1777_v15  ;;  %v1780_v23 = vadd.f32 %v1779_v19, %v1490_v18  ;;  %v1781_v24 = vpop.f32.mrb[115].mxu0 }
 0x1fe   : > { %2878 = vst [vmem:[%s3497_s21 + $0xd8] sm:$0xff] %v2830_v21   ;;  %v1941_v26 = vadd.f32 %v3650_v25, %v1870_v22  ;;  %v1871_v27 = vmul.f32 %v3638_v51, %v1780_v23 }
 0x200   : > { %v1942_v28 = vadd.f32 %v3650_v25, %v1871_v27  ;;  %v2005_v32 = vmax.f32 %v1941_v26, 0.0 }
 0x201   : > { %v1495_v29 = vpop.f32.mrb[116].mxu1  ;;  %v1784_v30 = vpop.f32.mrb[116].mxu0 }
 0x202   : > { %v1497_v31 = vpop.f32.mrb[117].mxu1  ;;  %v2006_v33 = vmax.f32 %v1942_v28, 0.0  ;;  %v1785_v34 = vadd.f32 %v1784_v30, %v1495_v29  ;;  %v1786_v35 = vpop.f32.mrb[117].mxu0 }
 0x203   : > { %v1498_v36 = vpop.f32.mrb[118].mxu1  ;;  %v1787_v37 = vpop.f32.mrb[118].mxu0 }
 0x204   : > { %v1500_v38 = vpop.f32.mrb[119].mxu1  ;;  %v2835_v39 = vpack.c.bf16 %v2006_v33, %v2005_v32  ;;  %v1872_v40 = vmul.f32 %v3638_v51, %v1785_v34  ;;  %v1788_v41 = vadd.f32 %v1787_v37, %v1498_v36  ;;  %v1789_v42 = vpop.f32.mrb[119].mxu0 }
 0x206   : > { %2879 = vst [vmem:[%s3497_s21 + $0xe0] sm:$0xff] %v2835_v39   ;;  %v1943_v43 = vadd.f32 %v3650_v25, %v1872_v40  ;;  %v1873_v44 = vmul.f32 %v3638_v51, %v1788_v41 }
 0x208   : > { %v1944_v45 = vadd.f32 %v3650_v25, %v1873_v44  ;;  %v2007_v49 = vmax.f32 %v1943_v43, 0.0 }
 0x209   : > { %v1503_v46 = vpop.f32.mrb[120].mxu1  ;;  %v1792_v47 = vpop.f32.mrb[120].mxu0 }
 0x20a   : > { %v1505_v48 = vpop.f32.mrb[121].mxu1  ;;  %v2008_v50 = vmax.f32 %v1944_v45, 0.0  ;;  %v1793_v17 = vadd.f32 %v1792_v47, %v1503_v46  ;;  %v1794_v52 = vpop.f32.mrb[121].mxu0 }
 0x20b   : > { %v1506_v53 = vpop.f32.mrb[122].mxu1  ;;  %v1795_v54 = vpop.f32.mrb[122].mxu0 }
 0x20c   : > { %v1508_v55 = vpop.f32.mrb[123].mxu1  ;;  %v2840_v56 = vpack.c.bf16 %v2008_v50, %v2007_v49  ;;  %v1874_v57 = vmul.f32 %v3638_v51, %v1793_v17  ;;  %v1796_v58 = vadd.f32 %v1795_v54, %v1506_v53  ;;  %v1797_v59 = vpop.f32.mrb[123].mxu0 }
 0x20e   : > { %2880 = vst [vmem:[%s3497_s21 + $0xe8] sm:$0xff] %v2840_v56   ;;  %v1945_v60 = vadd.f32 %v3650_v25, %v1874_v57  ;;  %v1875_v61 = vmul.f32 %v3638_v51, %v1796_v58 }
 0x210   : > { %v1946_v62 = vadd.f32 %v3650_v25, %v1875_v61  ;;  %v2009_v2 = vmax.f32 %v1945_v60, 0.0 }
 0x211   : > { %v1511_v63 = vpop.f32.mrb[124].mxu1  ;;  %v1800_v0 = vpop.f32.mrb[124].mxu0 }
 0x212   : > { %v1513_v1 = vpop.f32.mrb[125].mxu1  ;;  %v2010_v3 = vmax.f32 %v1946_v62, 0.0  ;;  %v1801_v4 = vadd.f32 %v1800_v0, %v1511_v63  ;;  %v1802_v5 = vpop.f32.mrb[125].mxu0 }
 0x213   : > { %v1514_v6 = vpop.f32.mrb[126].mxu1  ;;  %v1803_v7 = vpop.f32.mrb[126].mxu0 }
 0x214   : > { %v1516_v8 = vpop.f32.mrb[127].mxu1  ;;  %v2845_v9 = vpack.c.bf16 %v2010_v3, %v2009_v2  ;;  %v1876_v10 = vmul.f32 %v3638_v51, %v1801_v4  ;;  %v1804_v11 = vadd.f32 %v1803_v7, %v1514_v6  ;;  %v1805_v12 = vpop.f32.mrb[127].mxu0 }
 0x216   : > { %2881 = vst [vmem:[%s3497_s21 + $0xf0] sm:$0xff] %v2845_v9   ;;  %v1947_v13 = vadd.f32 %v3650_v25, %v1876_v10  ;;  %v1877_v14 = vmul.f32 %v3638_v51, %v1804_v11 }
 0x218   : > { %v1948_v15 = vadd.f32 %v3650_v25, %v1877_v14  ;;  %v2011_v16 = vmax.f32 %v1947_v13, 0.0 }
 0x21a   : > { %v2012_v18 = vmax.f32 %v1948_v15, 0.0 }
 0x21c   : > { %v2850_v19 = vpack.c.bf16 %v2012_v18, %v2011_v16 }
 0x21e   : > { %2882 = vst [vmem:[%s3497_s21 + $0xf8] sm:$0xff] %v2850_v19  }
 0x21f PF: > { %s14_s15 = sadd.s32 1, %s3188_s15  }
 0x220   : > { %p11_p4 = scmp.ge.s32.totalorder %s14_s15, 4  }
 0x222   :  { %13 = sbr.rel (!%p11_p4) target bundleno = 1 (0x1), region = 66 }

// kernel: dqn_forward.7
= control target key start
LH: loop header
LB: loop body
LE: loop exit
PB: predicated region body
PF: predicated region fallthrough
CT: control target
= control target key end

     0   :  { %s2213_s15 = smov 0   ;;  %s2577_s0 = inlined_call_operand.vmem [shape: bf16[256,896], index: 0, kind: input, shape index: {}]   ;;  %s2578_s1 = inlined_call_operand.vmem [shape: bf16[896,128], index: 1, kind: input, shape index: {}]   ;;  %s2579_s2 = inlined_call_operand.vmem [shape: f32[1,128], index: 2, kind: input, shape index: {}]   ;;  %s2580_s3 = inlined_call_operand.vmem [shape: f32[1,128], index: 3, kind: input, shape index: {}]   ;;  %s2581_s4 = inlined_call_operand.vmem [shape: bf16[256,128], index: 4, kind: output, shape index: {}]  }
   0x1 LB: > { %s1591_s16 = sadd.s32 4294967295, %s2186_s15   ;;  %p1595_p0 = scmp.ge.s32.totalorder %s2186_s15, 1  ;;  %s2186_s15 = sphi %s2213_s15, %s14_s15  }
   0x2   : > { %p164_p1 = scmp.lt.s32.totalorder %s2186_s15, 3 }
   0x4   : > { %p165_p2 = pnand %p1595_p0, %p164_p1 }
   0x5   : > { %v2044_v0 = vld [vmem:[%s2578_s1 + $0x40] sm:$0xff] (!%p165_p2)   ;;  %v2048_v4 = vld [vmem:[%s2578_s1 + $0x48] sm:$0xff] (!%p165_p2)   ;;  %v2052_v8 = vld [vmem:[%s2578_s1 + $0x50] sm:$0xff] (!%p165_p2)   ;;  %s1596_s23 = sshll.u32 (!%p165_p2), %s1591_s16, 4 }
   0x6   : > { %168 = sbr.rel (%p165_p2) target bundleno = 389 (0x185), region = 36  ;;  %v2045_v1 = vld [vmem:[%s2578_s1 + $0xc0] sm:$0xff] (!%p165_p2)   ;;  %1795 = vmatprep.subr.bf16.mxu0 (!%p165_p2), %v2044_v0  ;;  %v2049_v5 = vld [vmem:[%s2578_s1 + $0xc8] sm:$0xff] (!%p165_p2)   ;;  %v2053_v9 = vld [vmem:[%s2578_s1 + $0xd0] sm:$0xff] (!%p165_p2)   ;;  %p192_p3 = scmp.lt.s32.totalorder (!%p165_p2), %s1596_s23, 31 }
   0x7   : > { %v2046_v2 = vld [vmem:[%s2578_s1] sm:$0xff] (!%p165_p2)   ;;  %1859 = vmatprep.subr.bf16.mxu1 (!%p165_p2), %v2045_v1  ;;  %v2050_v6 = vld [vmem:[%s2578_s1 + $0x8] sm:$0xff] (!%p165_p2)   ;;  %v2054_v10 = vld [vmem:[%s2578_s1 + $0x10] sm:$0xff] (!%p165_p2)  }
   0x8   : > { %v2047_v3 = vld [vmem:[%s2578_s1 + $0x80] sm:$0xff] (!%p165_p2)   ;;  %1796 = vmatpush3.bf16.msra.mxu0 (!%p165_p2), %v2046_v2  ;;  %v2051_v7 = vld [vmem:[%s2578_s1 + $0x88] sm:$0xff] (!%p165_p2)   ;;  %v2055_v11 = vld [vmem:[%s2578_s1 + $0x90] sm:$0xff] (!%p165_p2)  }
   0x9   : > { %1860 = vmatpush3.bf16.msra.mxu1 (!%p165_p2), %v2047_v3  ;;  %1797 = vmatprep.subr.bf16.mxu0 (!%p165_p2), %v2048_v4  ;;  %v2056_v12 = vld [vmem:[%s2578_s1 + $0x58] sm:$0xff] (!%p165_p2)   ;;  %v2060_v16 = vld [vmem:[%s2578_s1 + $0x60] sm:$0xff] (!%p165_p2)   ;;  %v2064_v20 = vld [vmem:[%s2578_s1 + $0x68] sm:$0xff] (!%p165_p2)  }
   0xa   : > { %1861 = vmatprep.subr.bf16.mxu1 (!%p165_p2), %v2049_v5  ;;  %v2057_v13 = vld [vmem:[%s2578_s1 + $0xd8] sm:$0xff] (!%p165_p2)   ;;  %v2061_v17 = vld [vmem:[%s2578_s1 + $0xe0] sm:$0xff] (!%p165_p2)   ;;  %v2065_v21 = vld [vmem:[%s2578_s1 + $0xe8] sm:$0xff] (!%p165_p2)  }
   0xb   : > { %v2058_v14 = vld [vmem:[%s2578_s1 + $0x18] sm:$0xff] (!%p165_p2)   ;;  %v2062_v18 = vld [vmem:[%s2578_s1 + $0x20] sm:$0xff] (!%p165_p2)   ;;  %v2066_v22 = vld [vmem:[%s2578_s1 + $0x28] sm:$0xff] (!%p165_p2)  }
   0xc   : > { %1798 = vmatpush3.bf16.msra.mxu0 (!%p165_p2), %v2050_v6  ;;  %v2059_v15 = vld [vmem:[%s2578_s1 + $0x98] sm:$0xff] (!%p165_p2)   ;;  %v2063_v19 = vld [vmem:[%s2578_s1 + $0xa0] sm:$0xff] (!%p165_p2)   ;;  %v2067_v23 = vld [vmem:[%s2578_s1 + $0xa8] sm:$0xff] (!%p165_p2)  }
   0xd   : > { %1862 = vmatpush3.bf16.msra.mxu1 %v2051_v7  ;;  %1799 = vmatprep.subr.bf16.mxu0 %v2052_v8  ;;  %s2583_s23 = smov (!%p192_p3, %s1596_s23), 31  ;;  %v2068_v24 = vld [vmem:[%s2578_s1 + $0x70] sm:$0xff]   ;;  %v2072_v28 = vld [vmem:[%s2578_s1 + $0x78] sm:$0xff]   ;;  %v2082_v36 = vld [vmem:[%s2578_s1 + $0x140] sm:$0xff]  }
   0xe   : > { %1863 = vmatprep.subr.bf16.mxu1 %v2053_v9  ;;  %v2069_v25 = vld [vmem:[%s2578_s1 + $0xf0] sm:$0xff]   ;;  %s2035_s21 = smul.u32 28, %s2583_s23  ;;  %v2073_v29 = vld [vmem:[%s2578_s1 + $0xf8] sm:$0xff]   ;;  %v2083_v37 = vld [vmem:[%s2578_s1 + $0x100] sm:$0xff]   ;;  %s1599_s18 = sshll.u32 %s2583_s23, 2 }
   0xf   : > { %v2070_v26 = vld [vmem:[%s2578_s1 + $0x30] sm:$0xff]   ;;  %v2074_v30 = vld [vmem:[%s2578_s1 + $0x38] sm:$0xff]   ;;  %v2090_v42 = vld [vmem:[%s2578_s1 + $0x148] sm:$0xff]  }
  0x10   : > { %1800 = vmatpush3.bf16.msra.mxu0 %v2054_v10  ;;  %v2071_v27 = vld [vmem:[%s2578_s1 + $0xb0] sm:$0xff]   ;;  %s2319_s6 = scalar_lea.vmem %s2577_s0, %s2035_s21  ;;  %v2075_v31 = vld [vmem:[%s2578_s1 + $0xb8] sm:$0xff]   ;;  %v2091_v43 = vld [vmem:[%s2578_s1 + $0x108] sm:$0xff]   ;;  %s2509_s21 = scalar_lea.vmem %s2581_s4, %s1599_s18 }
  0x11   : > { %1864 = vmatpush3.bf16.msra.mxu1 %v2055_v11  ;;  %1801 = vmatprep.subr.bf16.mxu0 %v2056_v12  ;;  %v2076_v32 = vld [vmem:[%s2319_s6] ss:$28 sps:$4 sm:$0xff]   ;;  %v2079_v34 = vld [vmem:[%s2319_s6 + $0x8] ss:$28 sps:$4 sm:$0xff]   ;;  %v2088_v40 = vld [vmem:[%s2319_s6 + $0x38] ss:$28 sps:$4 sm:$0xff]  }
  0x12   : > { %1865 = vmatprep.subr.bf16.mxu1 %v2057_v13  ;;  %v2078_v33 = vld [vmem:[%s2319_s6 + $0x4] ss:$28 sps:$4 sm:$0xff]   ;;  %v2081_v35 = vld [vmem:[%s2319_s6 + $0xc] ss:$28 sps:$4 sm:$0xff]   ;;  %v2084_v38 = vld [vmem:[%s2319_s6 + $0x3c] ss:$28 sps:$4 sm:$0xff]  }
  0x13   : > { %1037 = vmatprep.mubr.bf16.mxu0 %v2078_v33  ;;  %1134 = vmatprep.mubr.bf16.mxu1 %v2081_v35  ;;  %v2086_v39 = vld [vmem:[%s2319_s6 + $0x44] ss:$28 sps:$4 sm:$0xff]   ;;  %v2092_v44 = vld [vmem:[%s2319_s6 + $0x74] ss:$28 sps:$4 sm:$0xff]   ;;  %v2094_v45 = vld [vmem:[%s2319_s6 + $0x7c] ss:$28 sps:$4 sm:$0xff]  }
  0x14   : > { %1802 = vmatpush3.bf16.msra.mxu0 %v2058_v14  ;;  %v2089_v41 = vld [vmem:[%s2319_s6 + $0x40] ss:$28 sps:$4 sm:$0xff]   ;;  %v2098_v46 = vld [vmem:[%s2578_s1 + $0x150] sm:$0xff]   ;;  %v2100_v50 = vld [vmem:[%s2319_s6 + $0xac] ss:$28 sps:$4 sm:$0xff]  }
  0x15   : > { %1866 = vmatpush3.bf16.msra.mxu1 %v2059_v15  ;;  %1803 = vmatprep.subr.bf16.mxu0 %v2060_v16  ;;  %v2099_v47 = vld [vmem:[%s2578_s1 + $0x110] sm:$0xff]   ;;  %v2106_v52 = vld [vmem:[%s2578_s1 + $0x158] sm:$0xff]   ;;  %v2104_v54 = vld [vmem:[%s2319_s6 + $0xa8] ss:$28 sps:$4 sm:$0xff]  }
  0x16   : > { %1867 = vmatprep.subr.bf16.mxu1 %v2061_v17  ;;  %v2096_v48 = vld [vmem:[%s2319_s6 + $0x70] ss:$28 sps:$4 sm:$0xff]   ;;  %v2097_v49 = vld [vmem:[%s2319_s6 + $0x78] ss:$28 sps:$4 sm:$0xff]   ;;  %v2114_v55 = vld [vmem:[%s2578_s1 + $0x160] sm:$0xff]  }
  0x17   : > { %v2102_v51 = vld [vmem:[%s2319_s6 + $0xb4] ss:$28 sps:$4 sm:$0xff]   ;;  %v2107_v53 = vld [vmem:[%s2578_s1 + $0x118] sm:$0xff]   ;;  %v2115_v57 = vld [vmem:[%s2578_s1 + $0x120] sm:$0xff]  }
  0x18   : > { %1804 = vmatpush3.bf16.msra.mxu0 %v2062_v18  ;;  %v2105_v56 = vld [vmem:[%s2319_s6 + $0xb0] ss:$28 sps:$4 sm:$0xff]   ;;  %v2116_v58 = vld [vmem:[%s2578_s1 + $0x180] sm:$0xff]   ;;  %v2117_v3 = vld [vmem:[%s2319_s6 + $0x11c] ss:$28 sps:$4 sm:$0xff]  }
  0x19   : > { %1868 = vmatpush3.bf16.msra.mxu1 %v2063_v19  ;;  %1805 = vmatprep.subr.bf16.mxu0 %v2064_v20  ;;  %v2108_v59 = vld [vmem:[%s2319_s6 + $0xe4] ss:$28 sps:$4 sm:$0xff]   ;;  %v2110_v60 = vld [vmem:[%s2319_s6 + $0xec] ss:$28 sps:$4 sm:$0xff]   ;;  %v2126_v0 = vld [vmem:[%s2578_s1 + $0x190] sm:$0xff]  }
  0x1a   : > { %1869 = vmatprep.subr.bf16.mxu1 %v2065_v21  ;;  %v2123_v61 = vld [vmem:[%s2578_s1 + $0x168] sm:$0xff]   ;;  %v2112_v1 = vld [vmem:[%s2319_s6 + $0xe0] ss:$28 sps:$4 sm:$0xff]   ;;  %v2133_v5 = vld [vmem:[%s2578_s1 + $0x170] sm:$0xff]  }
  0x1b   : > { %v2124_v62 = vld [vmem:[%s2578_s1 + $0x188] sm:$0xff]   ;;  %v2119_v4 = vld [vmem:[%s2319_s6 + $0x124] ss:$28 sps:$4 sm:$0xff]   ;;  %v2134_v6 = vld [vmem:[%s2578_s1 + $0x198] sm:$0xff]  }
  0x1c   : > { %1806 = vmatpush3.bf16.msra.mxu0 %v2066_v22  ;;  %v2125_v63 = vld [vmem:[%s2578_s1 + $0x128] sm:$0xff]   ;;  %v2135_v7 = vld [vmem:[%s2578_s1 + $0x130] sm:$0xff]   ;;  %v2136_v8 = vld [vmem:[%s2578_s1 + $0x1a0] sm:$0xff]  }
  0x1d   : > { %1870 = vmatpush3.bf16.msra.mxu1 %v2067_v23  ;;  %1807 = vmatprep.subr.bf16.mxu0 %v2068_v24  ;;  %v2113_v2 = vld [vmem:[%s2319_s6 + $0xe8] ss:$28 sps:$4 sm:$0xff]   ;;  %v2121_v9 = vld [vmem:[%s2319_s6 + $0x118] ss:$28 sps:$4 sm:$0xff]   ;;  %v2122_v10 = vld [vmem:[%s2319_s6 + $0x120] ss:$28 sps:$4 sm:$0xff]  }
  0x1e   : > { %1871 = vmatprep.subr.bf16.mxu1 %v2069_v25  ;;  %v2127_v11 = vld [vmem:[%s2319_s6 + $0x154] ss:$28 sps:$4 sm:$0xff]   ;;  %v2129_v12 = vld [vmem:[%s2319_s6 + $0x15c] ss:$28 sps:$4 sm:$0xff]   ;;  %v2144_v14 = vld [vmem:[%s2578_s1 + $0x1a8] sm:$0xff]  }
  0x1f   : > { %v2143_v13 = vld [vmem:[%s2578_s1 + $0x178] sm:$0xff]   ;;  %v2146_v16 = vld [vmem:[%s2578_s1 + $0x1b0] sm:$0xff]   ;;  %v2137_v19 = vld [vmem:[%s2319_s6 + $0x18c] ss:$28 sps:$4 sm:$0xff]  }
  0x20   : > { %1808 = vmatpush3.bf16.msra.mxu0 %v2070_v26  ;;  %v2145_v15 = vld [vmem:[%s2578_s1 + $0x138] sm:$0xff]   ;;  %v2131_v17 = vld [vmem:[%s2319_s6 + $0x150] ss:$28 sps:$4 sm:$0xff]   ;;  %v2141_v22 = vld [vmem:[%s2319_s6 + $0x188] ss:$28 sps:$4 sm:$0xff]  }
  0x21   : > { %1872 = vmatpush3.bf16.msra.mxu1 %v2071_v27  ;;  %1809 = vmatprep.subr.bf16.mxu0 %v2072_v28  ;;  %v2132_v18 = vld [vmem:[%s2319_s6 + $0x158] ss:$28 sps:$4 sm:$0xff]   ;;  %v2142_v23 = vld [vmem:[%s2319_s6 + $0x190] ss:$28 sps:$4 sm:$0xff]  }
  0x22   : > { %1873 = vmatprep.subr.bf16.mxu1 %v2073_v29  ;;  %v2139_v20 = vld [vmem:[%s2319_s6 + $0x194] ss:$28 sps:$4 sm:$0xff]   ;;  %v2150_v21 = vld [vmem:[%s2578_s1 + $0x1b8] sm:$0xff]   ;;  %v2153_v28 = vld [vmem:[%s2319_s6 + $0x4c] ss:$28 sps:$4 sm:$0xff]  }
  0x23   : > { %v2149_v24 = vld [vmem:[%s2319_s6 + $0x14] ss:$28 sps:$4 sm:$0xff]   ;;  %v2159_v29 = vld [vmem:[%s2319_s6 + $0x88] ss:$28 sps:$4 sm:$0xff]   ;;  %v2161_v35 = vld [vmem:[%s2319_s6 + $0xbc] ss:$28 sps:$4 sm:$0xff]  }
  0x24   : > { %1810 = vmatpush3.bf16.msra.mxu0 %v2074_v30  ;;  %v2151_v25 = vld [vmem:[%s2319_s6 + $0x18] ss:$28 sps:$4 sm:$0xff]   ;;  %v2147_v26 = vld [vmem:[%s2319_s6 + $0x10] ss:$28 sps:$4 sm:$0xff]   ;;  %v2155_v30 = vld [vmem:[%s2319_s6 + $0x48] ss:$28 sps:$4 sm:$0xff]  }
  0x25   : > { %1874 = vmatpush3.bf16.msra.mxu1 %v2075_v31  ;;  %1923 = vmatprep.subr.bf16.mxu0 %v2082_v36  ;;  %v2152_v27 = vld [vmem:[%s2319_s6 + $0x50] ss:$28 sps:$4 sm:$0xff]   ;;  %v2156_v31 = vld [vmem:[%s2319_s6 + $0x84] ss:$28 sps:$4 sm:$0xff]   ;;  %v2167_v33 = vld [vmem:[%s2319_s6 + $0xf8] ss:$28 sps:$4 sm:$0xff]  }
  0x26   : > { %2003 = vmatprep.subr.bf16.mxu1 %v2116_v58  ;;  %v2168_v36 = vld [vmem:[%s2319_s6 + $0x130] ss:$28 sps:$4 sm:$0xff]  }
  0x27   : > { %1038 = vmatmul.mubr.bf16.vlgmr.msra.gmra.mrb[0].mxu0 %v2076_v32  ;;  %v2160_v32 = vld [vmem:[%s2319_s6 + $0xc0] ss:$28 sps:$4 sm:$0xff]  }
  0x28   : > { %1135 = vmatmul.mubr.bf16.vlgmr.msra.gmra.mrb[0].mxu1 %v2079_v34  ;;  %1924 = vmatpush3.bf16.msra.mxu0 %v2083_v37  ;;  %v2158_v34 = vld [vmem:[%s2319_s6 + $0x80] ss:$28 sps:$4 sm:$0xff]   ;;  %v2175_v37 = vld [vmem:[%s2319_s6 + $0x168] ss:$28 sps:$4 sm:$0xff]  }
  0x29   : > { %1045 = vmatprep.mubr.bf16.mxu0 %v2084_v38  ;;  %1142 = vmatprep.mubr.bf16.mxu1 %v2086_v39  ;;  %v2163_v38 = vld [vmem:[%s2319_s6 + $0xb8] ss:$28 sps:$4 sm:$0xff]  }
  0x2a   : > { %1925 = vmatprep.subr.bf16.mxu0 %v2090_v42  ;;  %2004 = vmatpush3.bf16.msra.mxu1 %v2116_v58  ;;  %v2164_v39 = vld [vmem:[%s2319_s6 + $0xf4] ss:$28 sps:$4 sm:$0xff]   ;;  %v2169_v42 = vld [vmem:[%s2319_s6 + $0x12c] ss:$28 sps:$4 sm:$0xff]  }
  0x2b   : > { %2005 = vmatprep.subr.bf16.mxu1 %v2124_v62 }
  0x2c   : > { %1926 = vmatpush3.bf16.msra.mxu0 %v2091_v43  ;;  %v2171_v43 = vld [vmem:[%s2319_s6 + $0x128] ss:$28 sps:$4 sm:$0xff]  }
  0x2d   : > { %1927 = vmatprep.subr.bf16.mxu0 %v2098_v46  ;;  %v2177_v46 = vld [vmem:[%s2319_s6 + $0x19c] ss:$28 sps:$4 sm:$0xff]  }
  0x2e   : > { %2006 = vmatpush3.bf16.msra.mxu1 %v2124_v62 }
  0x2f   : > { %1046 = vmatmul.mubr.bf16.gmra.mrb[4].mxu0 %v2088_v40  ;;  %2007 = vmatprep.subr.bf16.mxu1 %v2126_v0  ;;  %v2176_v40 = vld [vmem:[%s2319_s6 + $0x1a0] ss:$28 sps:$4 sm:$0xff]  }
  0x30   : > { %1143 = vmatmul.mubr.bf16.gmra.mrb[4].mxu1 %v2089_v41  ;;  %1053 = vmatprep.mubr.bf16.mxu0 %v2092_v44  ;;  %v2166_v41 = vld [vmem:[%s2319_s6 + $0xf0] ss:$28 sps:$4 sm:$0xff]   ;;  %v2172_v44 = vld [vmem:[%s2319_s6 + $0x164] ss:$28 sps:$4 sm:$0xff]  }
  0x31   : > { %1150 = vmatprep.mubr.bf16.mxu1 %v2094_v45  ;;  %1928 = vmatpush3.bf16.msra.mxu0 %v2099_v47  ;;  %v2174_v45 = vld [vmem:[%s2319_s6 + $0x160] ss:$28 sps:$4 sm:$0xff]   ;;  %v2179_v47 = vld [vmem:[%s2319_s6 + $0x198] ss:$28 sps:$4 sm:$0xff]  }
  0x32   : > { %1929 = vmatprep.subr.bf16.mxu0 %v2106_v52  ;;  %2008 = vmatpush3.bf16.msra.mxu1 %v2126_v0 }
  0x33   : > { %2009 = vmatprep.subr.bf16.mxu1 %v2134_v6 }
  0x35   : > { %1930 = vmatpush3.bf16.msra.mxu0 %v2107_v53 }
  0x36   : > { %1931 = vmatprep.subr.bf16.mxu0 %v2114_v55  ;;  %2010 = vmatpush3.bf16.msra.mxu1 %v2134_v6 }
  0x37   : > { %1054 = vmatmul.mubr.bf16.gmra.mrb[8].mxu0 %v2096_v48  ;;  %2011 = vmatprep.subr.bf16.mxu1 %v2136_v8 }
  0x38   : > { %1151 = vmatmul.mubr.bf16.gmra.mrb[8].mxu1 %v2097_v49  ;;  %1061 = vmatprep.mubr.bf16.mxu0 %v2100_v50 }
  0x39   : > { %1158 = vmatprep.mubr.bf16.mxu1 %v2102_v51  ;;  %1932 = vmatpush3.bf16.msra.mxu0 %v2115_v57 }
  0x3a   : > { %1933 = vmatprep.subr.bf16.mxu0 %v2123_v61  ;;  %2012 = vmatpush3.bf16.msra.mxu1 %v2136_v8 }
  0x3b   : > { %2013 = vmatprep.subr.bf16.mxu1 %v2144_v14 }
  0x3d   : > { %1934 = vmatpush3.bf16.msra.mxu0 %v2125_v63 }
  0x3e   : > { %1935 = vmatprep.subr.bf16.mxu0 %v2133_v5  ;;  %2014 = vmatpush3.bf16.msra.mxu1 %v2144_v14 }
  0x3f   : > { %1062 = vmatmul.mubr.bf16.gmra.mrb[12].mxu0 %v2104_v54  ;;  %2015 = vmatprep.subr.bf16.mxu1 %v2146_v16 }
  0x40   : > { %1159 = vmatmul.mubr.bf16.gmra.mrb[12].mxu1 %v2105_v56  ;;  %1069 = vmatprep.mubr.bf16.mxu0 %v2108_v59 }
  0x41   : > { %1166 = vmatprep.mubr.bf16.mxu1 %v2110_v60  ;;  %1936 = vmatpush3.bf16.msra.mxu0 %v2135_v7 }
  0x42   : > { %1937 = vmatprep.subr.bf16.mxu0 %v2143_v13  ;;  %2016 = vmatpush3.bf16.msra.mxu1 %v2146_v16 }
  0x43   : > { %2017 = vmatprep.subr.bf16.mxu1 %v2150_v21 }
  0x45   : > { %1938 = vmatpush3.bf16.msra.mxu0 %v2145_v15 }
  0x46   : > { %2018 = vmatpush3.bf16.msra.mxu1 %v2150_v21 }
  0x47   : > { %1070 = vmatmul.mubr.bf16.gmra.mrb[16].mxu0 %v2112_v1 }
  0x48   : > { %1167 = vmatmul.mubr.bf16.gmra.mrb[16].mxu1 %v2113_v2  ;;  %1077 = vmatprep.mubr.bf16.mxu0 %v2117_v3 }
  0x49   : > { %1174 = vmatprep.mubr.bf16.mxu1 %v2119_v4 }
  0x4f   : > { %1078 = vmatmul.mubr.bf16.gmra.mrb[20].mxu0 %v2121_v9 }
  0x50   : > { %1175 = vmatmul.mubr.bf16.gmra.mrb[20].mxu1 %v2122_v10  ;;  %1085 = vmatprep.mubr.bf16.mxu0 %v2127_v11 }
  0x51   : > { %1182 = vmatprep.mubr.bf16.mxu1 %v2129_v12 }
  0x57   : > { %1086 = vmatmul.mubr.bf16.gmra.mrb[24].mxu0 %v2131_v17 }
  0x58   : > { %1183 = vmatmul.mubr.bf16.gmra.mrb[24].mxu1 %v2132_v18  ;;  %1093 = vmatprep.mubr.bf16.mxu0 %v2137_v19 }
  0x59   : > { %1190 = vmatprep.mubr.bf16.mxu1 %v2139_v20 }
  0x5f   : > { %1094 = vmatmul.mubr.bf16.gmra.mrb[28].mxu0 %v2141_v22 }
  0x60   : > { %1191 = vmatmul.mubr.bf16.gmra.mrb[28].mxu1 %v2142_v23  ;;  %1231 = vmatprep.mubr.bf16.mxu0 %v2149_v24 }
  0x61   : > { %2019 = vmatprep.mubr.bf16.mxu1 %v2151_v25 }
  0x67   : > { %1232 = vmatmul.mubr.bf16.vlgmr.msra.gmra.mrb[32].mxu0 %v2147_v26 }
  0x68   : > { %2020 = vmatmul.mubr.bf16.vlgmr.msra.gmra.mrb[32].mxu1 %v2152_v27  ;;  %1239 = vmatprep.mubr.bf16.mxu0 %v2153_v28 }
  0x69   : > { %2023 = vmatprep.mubr.bf16.mxu1 %v2159_v29 }
  0x6f   : > { %1240 = vmatmul.mubr.bf16.gmra.mrb[36].mxu0 %v2155_v30 }
  0x70   : > { %1247 = vmatprep.mubr.bf16.mxu0 %v2156_v31  ;;  %2024 = vmatmul.mubr.bf16.gmra.mrb[36].mxu1 %v2160_v32 }
  0x71   : > { %2027 = vmatprep.mubr.bf16.mxu1 %v2167_v33 }
  0x77   : > { %1248 = vmatmul.mubr.bf16.gmra.mrb[40].mxu0 %v2158_v34 }
  0x78   : > { %1255 = vmatprep.mubr.bf16.mxu0 %v2161_v35  ;;  %2028 = vmatmul.mubr.bf16.gmra.mrb[40].mxu1 %v2168_v36 }
  0x79   : > { %2031 = vmatprep.mubr.bf16.mxu1 %v2175_v37 }
  0x7f   : > { %1256 = vmatmul.mubr.bf16.gmra.mrb[44].mxu0 %v2163_v38 }
  0x80   : > { %1263 = vmatprep.mubr.bf16.mxu0 %v2164_v39  ;;  %2032 = vmatmul.mubr.bf16.gmra.mrb[44].mxu1 %v2176_v40 }
  0x87   : > { %1264 = vmatmul.mubr.bf16.gmra.mrb[48].mxu0 %v2166_v41 }
  0x88   : > { %1271 = vmatprep.mubr.bf16.mxu0 %v2169_v42 }
  0x8f   : > { %1272 = vmatmul.mubr.bf16.gmra.mrb[52].mxu0 %v2171_v43 }
  0x90   : > { %1279 = vmatprep.mubr.bf16.mxu0 %v2172_v44 }
  0x97   : > { %1280 = vmatmul.mubr.bf16.gmra.mrb[56].mxu0 %v2174_v45 }
  0x98   : > { %1287 = vmatprep.mubr.bf16.mxu0 %v2177_v46 }
  0x9f   : > { %1288 = vmatmul.mubr.bf16.gmra.mrb[60].mxu0 %v2179_v47 }
  0xfa   : > { %v1811_v48 = vpop.f32.mrb[0].mxu0 }
  0xfb   : > { %v1875_v49 = vpop.f32.mrb[0].mxu1  ;;  %v1812_v50 = vpop.f32.mrb[1].mxu0 }
  0xfc   : > { %v1813_v51 = vadd.f32 %v1812_v50, %v1811_v48  ;;  %v1876_v52 = vpop.f32.mrb[1].mxu1  ;;  %v1814_v53 = vpop.f32.mrb[2].mxu0 }
  0xfd   : > { %v1877_v54 = vadd.f32 %v1876_v52, %v1875_v49  ;;  %v1878_v55 = vpop.f32.mrb[2].mxu1  ;;  %v1815_v56 = vpop.f32.mrb[3].mxu0 }
  0xfe   : > { %v1816_v57 = vadd.f32 %v1815_v56, %v1814_v53  ;;  %v1879_v58 = vpop.f32.mrb[3].mxu1 }
  0xff   : > { %v2455_v59 = vadd.f32 %v1877_v54, %v1813_v51  ;;  %v1880_v60 = vadd.f32 %v1879_v58, %v1878_v55 }
 0x101   : > { %v2457_v61 = vadd.f32 %v1880_v60, %v1816_v57 }
 0x102   : > { %v1817_v62 = vpop.f32.mrb[4].mxu0 }
 0x103   : > { %v1881_v63 = vpop.f32.mrb[4].mxu1  ;;  %v1818_v0 = vpop.f32.mrb[5].mxu0 }
 0x104   : > { %v1819_v1 = vadd.f32 %v1818_v0, %v1817_v62  ;;  %v1882_v2 = vpop.f32.mrb[5].mxu1  ;;  %v1820_v3 = vpop.f32.mrb[6].mxu0 }
 0x105   : > { %v1883_v4 = vadd.f32 %v1882_v2, %v1881_v63  ;;  %v1884_v5 = vpop.f32.mrb[6].mxu1  ;;  %v1821_v6 = vpop.f32.mrb[7].mxu0 }
 0x106   : > { %v1822_v7 = vadd.f32 %v1821_v6, %v1820_v3  ;;  %v1885_v8 = vpop.f32.mrb[7].mxu1 }
 0x107   : > { %v2459_v9 = vadd.f32 %v1883_v4, %v1819_v1  ;;  %v1886_v10 = vadd.f32 %v1885_v8, %v1884_v5 }
 0x109   : > { %v2461_v11 = vadd.f32 %v1886_v10, %v1822_v7 }
 0x10a   : > { %v1823_v12 = vpop.f32.mrb[8].mxu0 }
 0x10b   : > { %v1887_v13 = vpop.f32.mrb[8].mxu1  ;;  %v1824_v14 = vpop.f32.mrb[9].mxu0 }
 0x10c   : > { %v1825_v15 = vadd.f32 %v1824_v14, %v1823_v12  ;;  %v1888_v16 = vpop.f32.mrb[9].mxu1  ;;  %v1826_v17 = vpop.f32.mrb[10].mxu0 }
 0x10d   : > { %v1889_v18 = vadd.f32 %v1888_v16, %v1887_v13  ;;  %v1890_v19 = vpop.f32.mrb[10].mxu1  ;;  %v1827_v20 = vpop.f32.mrb[11].mxu0 }
 0x10e   : > { %v1828_v21 = vadd.f32 %v1827_v20, %v1826_v17  ;;  %v1891_v22 = vpop.f32.mrb[11].mxu1 }
 0x10f   : > { %v2463_v23 = vadd.f32 %v1889_v18, %v1825_v15  ;;  %v1892_v24 = vadd.f32 %v1891_v22, %v1890_v19 }
 0x111   : > { %v2465_v25 = vadd.f32 %v1892_v24, %v1828_v21 }
 0x112   : > { %v1829_v26 = vpop.f32.mrb[12].mxu0 }
 0x113   : > { %v1893_v27 = vpop.f32.mrb[12].mxu1  ;;  %v1830_v28 = vpop.f32.mrb[13].mxu0 }
 0x114   : > { %v1831_v29 = vadd.f32 %v1830_v28, %v1829_v26  ;;  %v1894_v30 = vpop.f32.mrb[13].mxu1  ;;  %v1832_v31 = vpop.f32.mrb[14].mxu0 }
 0x115   : > { %v1895_v32 = vadd.f32 %v1894_v30, %v1893_v27  ;;  %v1896_v33 = vpop.f32.mrb[14].mxu1  ;;  %v1833_v34 = vpop.f32.mrb[15].mxu0 }
 0x116   : > { %v1834_v35 = vadd.f32 %v1833_v34, %v1832_v31  ;;  %v1897_v36 = vpop.f32.mrb[15].mxu1 }
 0x117   : > { %v2467_v37 = vadd.f32 %v1895_v32, %v1831_v29  ;;  %v1898_v38 = vadd.f32 %v1897_v36, %v1896_v33 }
 0x119   : > { %v2469_v39 = vadd.f32 %v1898_v38, %v1834_v35 }
 0x11a   : > { %v1835_v40 = vpop.f32.mrb[16].mxu0 }
 0x11b   : > { %v1899_v41 = vpop.f32.mrb[16].mxu1  ;;  %v1836_v42 = vpop.f32.mrb[17].mxu0 }
 0x11c   : > { %v1837_v43 = vadd.f32 %v1836_v42, %v1835_v40  ;;  %v1900_v44 = vpop.f32.mrb[17].mxu1  ;;  %v1838_v45 = vpop.f32.mrb[18].mxu0 }
 0x11d   : > { %v1901_v46 = vadd.f32 %v1900_v44, %v1899_v41  ;;  %v1902_v47 = vpop.f32.mrb[18].mxu1  ;;  %v1839_v48 = vpop.f32.mrb[19].mxu0 }
 0x11e   : > { %v1840_v49 = vadd.f32 %v1839_v48, %v1838_v45  ;;  %v1903_v50 = vpop.f32.mrb[19].mxu1 }
 0x11f   : > { %v2471_v51 = vadd.f32 %v1901_v46, %v1837_v43  ;;  %v1904_v52 = vadd.f32 %v1903_v50, %v1902_v47 }
 0x121   : > { %v2473_v53 = vadd.f32 %v1904_v52, %v1840_v49  ;;  %v2491_v52 = vld [vmem:[%s2579_s2] ss:$0 sm:$0xff] }
 0x122   : > { %v1841_v54 = vpop.f32.mrb[20].mxu0 }
 0x123   : > { %v1905_v55 = vpop.f32.mrb[20].mxu1  ;;  %v1842_v56 = vpop.f32.mrb[21].mxu0 }
 0x124   : > { %v1843_v57 = vadd.f32 %v1842_v56, %v1841_v54  ;;  %v1906_v58 = vpop.f32.mrb[21].mxu1  ;;  %v1844_v60 = vpop.f32.mrb[22].mxu0  ;;  %v2497_v56 = vld [vmem:[%s2580_s3] ss:$0 sm:$0xff] }
 0x125   : > { %v1907_v62 = vadd.f32 %v1906_v58, %v1905_v55  ;;  %v1908_v63 = vpop.f32.mrb[22].mxu1  ;;  %v1845_v0 = vpop.f32.mrb[23].mxu0 }
 0x126   : > { %v1846_v1 = vadd.f32 %v1845_v0, %v1844_v60  ;;  %v1909_v2 = vpop.f32.mrb[23].mxu1 }
 0x127   : > { %v2475_v3 = vadd.f32 %v1907_v62, %v1843_v57  ;;  %v1910_v4 = vadd.f32 %v1909_v2, %v1908_v63 }
 0x129   : > { %v2477_v5 = vadd.f32 %v1910_v4, %v1846_v1 }
 0x12a   : > { %v1847_v6 = vpop.f32.mrb[24].mxu0 }
 0x12b   : > { %v1911_v7 = vpop.f32.mrb[24].mxu1  ;;  %v1848_v8 = vpop.f32.mrb[25].mxu0 }
 0x12c   : > { %v1849_v10 = vadd.f32 %v1848_v8, %v1847_v6  ;;  %v1912_v12 = vpop.f32.mrb[25].mxu1  ;;  %v1850_v13 = vpop.f32.mrb[26].mxu0 }
 0x12d   : > { %v1913_v14 = vadd.f32 %v1912_v12, %v1911_v7  ;;  %v1914_v15 = vpop.f32.mrb[26].mxu1  ;;  %v1851_v16 = vpop.f32.mrb[27].mxu0 }
 0x12e   : > { %v1852_v17 = vadd.f32 %v1851_v16, %v1850_v13  ;;  %v1915_v18 = vpop.f32.mrb[27].mxu1 }
 0x12f   : > { %v2479_v19 = vadd.f32 %v1913_v14, %v1849_v10  ;;  %v1916_v20 = vadd.f32 %v1915_v18, %v1914_v15 }
 0x131   : > { %v2481_v21 = vadd.f32 %v1916_v20, %v1852_v17 }
 0x132   : > { %v1853_v22 = vpop.f32.mrb[28].mxu0 }
 0x133   : > { %v1917_v24 = vpop.f32.mrb[28].mxu1  ;;  %v1854_v26 = vpop.f32.mrb[29].mxu0 }
 0x134   : > { %v1855_v27 = vadd.f32 %v1854_v26, %v1853_v22  ;;  %v1918_v28 = vpop.f32.mrb[29].mxu1  ;;  %v1856_v29 = vpop.f32.mrb[30].mxu0 }
 0x135   : > { %v1919_v30 = vadd.f32 %v1918_v28, %v1917_v24  ;;  %v1920_v31 = vpop.f32.mrb[30].mxu1  ;;  %v1857_v32 = vpop.f32.mrb[31].mxu0 }
 0x136   : > { %v1858_v33 = vadd.f32 %v1857_v32, %v1856_v29  ;;  %v1921_v34 = vpop.f32.mrb[31].mxu1 }
 0x137   : > { %v2483_v35 = vadd.f32 %v1919_v30, %v1855_v27  ;;  %v1922_v36 = vadd.f32 %v1921_v34, %v1920_v31 }
 0x139   : > { %v2485_v38 = vadd.f32 %v1922_v36, %v1858_v33 }
 0x13a   : > { %v1939_v40 = vpop.f32.mrb[32].mxu0 }
 0x13b   : > { %v1940_v41 = vpop.f32.mrb[33].mxu0  ;;  %v2021_v42 = vpop.f32.mrb[32].mxu1 }
 0x13c   : > { %v1941_v43 = vadd.f32 %v1940_v41, %v1939_v40  ;;  %v1942_v44 = vpop.f32.mrb[34].mxu0  ;;  %v1330_v45 = vpop.f32.mrb[33].mxu1 }
 0x13d   : > { %v1943_v46 = vpop.f32.mrb[35].mxu0  ;;  %v2022_v47 = vpop.f32.mrb[34].mxu1 }
 0x13e   : > { %v1944_v48 = vadd.f32 %v1943_v46, %v1942_v44  ;;  %v1234_v49 = vadd.f32 %v1941_v43, %v2455_v59  ;;  %v1333_v50 = vpop.f32.mrb[35].mxu1 }
 0x140   : > { %v1331_v54 = vadd.f32 %v1330_v45, %v1234_v49  ;;  %v1237_v55 = vadd.f32 %v1944_v48, %v2457_v61 }
 0x142   : > { %v1400_v57 = vmul.f32 %v2491_v52, %v1331_v54  ;;  %v1334_v58 = vadd.f32 %v1333_v50, %v1237_v55  ;;  %v1945_v60 = vpop.f32.mrb[36].mxu0 }
 0x143   : > { %v1946_v59 = vpop.f32.mrb[37].mxu0  ;;  %v2025_v62 = vpop.f32.mrb[36].mxu1 }
 0x144   : > { %v1423_v63 = vadd.f32 %v2497_v56, %v1400_v57  ;;  %v1401_v0 = vmul.f32 %v2491_v52, %v1334_v58  ;;  %v1947_v1 = vadd.f32 %v1946_v59, %v1945_v60  ;;  %v1948_v2 = vpop.f32.mrb[38].mxu0  ;;  %v1346_v4 = vpop.f32.mrb[37].mxu1 }
 0x145   : > { %v1949_v6 = vpop.f32.mrb[39].mxu0  ;;  %v2026_v61 = vpop.f32.mrb[38].mxu1 }
 0x146   : > { %v1424_v7 = vadd.f32 %v2497_v56, %v1401_v0  ;;  %v1242_v8 = vadd.f32 %v1947_v1, %v2459_v9  ;;  %v1950_v10 = vadd.f32 %v1949_v6, %v1948_v2  ;;  %v1349_v12 = vpop.f32.mrb[39].mxu1  ;;  %v1439_v13 = vmax.f32 %v1423_v63, 0.0 }
 0x148   : > { %v1440_v14 = vmax.f32 %v1424_v7, 0.0  ;;  %v1339_v15 = vadd.f32 %v2021_v42, %v1242_v8  ;;  %v1245_v16 = vadd.f32 %v1950_v10, %v2461_v11 }
 0x14a   : > { %v1751_v17 = vpack.c.bf16 %v1440_v14, %v1439_v13  ;;  %v1402_v18 = vmul.f32 %v2491_v52, %v1339_v15  ;;  %v1342_v20 = vadd.f32 %v2022_v47, %v1245_v16  ;;  %v1951_v22 = vpop.f32.mrb[40].mxu0 }
 0x14b   : > { %v1952_v24 = vpop.f32.mrb[41].mxu0  ;;  %v2512_v9 = vpop.f32.mrb[40].mxu1 }
 0x14c   : > { %1752 = vst [vmem:[%s2509_s21] sm:$0xff] %v1751_v17   ;;  %v1425_v26 = vadd.f32 %v2497_v56, %v1402_v18  ;;  %v1403_v27 = vmul.f32 %v2491_v52, %v1342_v20  ;;  %v1953_v11 = vadd.f32 %v1952_v24, %v1951_v22  ;;  %v1954_v28 = vpop.f32.mrb[42].mxu0  ;;  %v1362_v29 = vpop.f32.mrb[41].mxu1 }
 0x14d   : > { %v1955_v30 = vpop.f32.mrb[43].mxu0  ;;  %v2517_v31 = vpop.f32.mrb[42].mxu1 }
 0x14e   : > { %v1426_v32 = vadd.f32 %v2497_v56, %v1403_v27  ;;  %v1956_v33 = vadd.f32 %v1955_v30, %v1954_v28  ;;  %v1250_v34 = vadd.f32 %v1953_v11, %v2463_v23  ;;  %v1365_v36 = vpop.f32.mrb[43].mxu1  ;;  %v1441_v40 = vmax.f32 %v1425_v26, 0.0 }
 0x150   : > { %v1442_v41 = vmax.f32 %v1426_v32, 0.0  ;;  %v1347_v42 = vadd.f32 %v1346_v4, %v1250_v34  ;;  %v1253_v43 = vadd.f32 %v1956_v33, %v2465_v25 }
 0x152   : > { %v1756_v44 = vpack.c.bf16 %v1442_v41, %v1441_v40  ;;  %v1404_v45 = vmul.f32 %v2491_v52, %v1347_v42  ;;  %v1350_v46 = vadd.f32 %v1349_v12, %v1253_v43  ;;  %v1957_v47 = vpop.f32.mrb[44].mxu0 }
 0x153   : > { %v1958_v48 = vpop.f32.mrb[45].mxu0  ;;  %v2523_v49 = vpop.f32.mrb[44].mxu1 }
 0x154   : > { %1788 = vst [vmem:[%s2509_s21 + $0x8] sm:$0xff] %v1756_v44   ;;  %v1427_v50 = vadd.f32 %v2497_v56, %v1404_v45  ;;  %v1405_v54 = vmul.f32 %v2491_v52, %v1350_v46  ;;  %v1959_v23 = vadd.f32 %v1958_v48, %v1957_v47  ;;  %v1960_v55 = vpop.f32.mrb[46].mxu0  ;;  %v2528_v57 = vpop.f32.mrb[45].mxu1 }
 0x155   : > { %v1961_v58 = vpop.f32.mrb[47].mxu0  ;;  %v2530_v25 = vpop.f32.mrb[46].mxu1 }
 0x156   : > { %v1428_v60 = vadd.f32 %v2497_v56, %v1405_v54  ;;  %v1258_v59 = vadd.f32 %v1959_v23, %v2467_v37  ;;  %v1962_v63 = vadd.f32 %v1961_v58, %v1960_v55  ;;  %v1381_v0 = vpop.f32.mrb[47].mxu1  ;;  %v1443_v1 = vmax.f32 %v1427_v50, 0.0 }
 0x158   : > { %v1444_v2 = vmax.f32 %v1428_v60, 0.0  ;;  %v1355_v4 = vadd.f32 %v2025_v62, %v1258_v59  ;;  %v1261_v6 = vadd.f32 %v1962_v63, %v2469_v39 }
 0x15a   : > { %v1761_v7 = vpack.c.bf16 %v1444_v2, %v1443_v1  ;;  %v1406_v8 = vmul.f32 %v2491_v52, %v1355_v4  ;;  %v1358_v10 = vadd.f32 %v2026_v61, %v1261_v6  ;;  %v1963_v12 = vpop.f32.mrb[48].mxu0 }
 0x15b   : > { %v1964_v13 = vpop.f32.mrb[49].mxu0 }
 0x15c   : > { %1789 = vst [vmem:[%s2509_s21 + $0x10] sm:$0xff] %v1761_v7   ;;  %v1429_v14 = vadd.f32 %v2497_v56, %v1406_v8  ;;  %v1407_v15 = vmul.f32 %v2491_v52, %v1358_v10  ;;  %v1965_v37 = vadd.f32 %v1964_v13, %v1963_v12  ;;  %v1966_v16 = vpop.f32.mrb[50].mxu0 }
 0x15d   : > { %v1967_v17 = vpop.f32.mrb[51].mxu0 }
 0x15e   : > { %v1430_v18 = vadd.f32 %v2497_v56, %v1407_v15  ;;  %v1968_v62 = vadd.f32 %v1967_v17, %v1966_v16  ;;  %v1266_v39 = vadd.f32 %v1965_v37, %v2471_v51  ;;  %v1445_v20 = vmax.f32 %v1429_v14, 0.0 }
 0x160   : > { %v1446_v22 = vmax.f32 %v1430_v18, 0.0  ;;  %v1363_v24 = vadd.f32 %v1362_v29, %v1266_v39  ;;  %v1269_v61 = vadd.f32 %v1968_v62, %v2473_v53 }
 0x162   : > { %v1766_v26 = vpack.c.bf16 %v1446_v22, %v1445_v20  ;;  %v1408_v27 = vmul.f32 %v2491_v52, %v1363_v24  ;;  %v1366_v11 = vadd.f32 %v1365_v36, %v1269_v61  ;;  %v1969_v28 = vpop.f32.mrb[52].mxu0 }
 0x163   : > { %v1970_v30 = vpop.f32.mrb[53].mxu0 }
 0x164   : > { %1790 = vst [vmem:[%s2509_s21 + $0x18] sm:$0xff] %v1766_v26   ;;  %v1431_v32 = vadd.f32 %v2497_v56, %v1408_v27  ;;  %v1409_v33 = vmul.f32 %v2491_v52, %v1366_v11  ;;  %v1971_v34 = vadd.f32 %v1970_v30, %v1969_v28  ;;  %v1972_v40 = vpop.f32.mrb[54].mxu0 }
 0x165   : > { %v1973_v51 = vpop.f32.mrb[55].mxu0 }
 0x166   : > { %v1432_v41 = vadd.f32 %v2497_v56, %v1409_v33  ;;  %v1274_v29 = vadd.f32 %v1971_v34, %v2475_v3  ;;  %v1974_v53 = vadd.f32 %v1973_v51, %v1972_v40  ;;  %v1447_v42 = vmax.f32 %v1431_v32, 0.0 }
 0x168   : > { %v1448_v43 = vmax.f32 %v1432_v41, 0.0  ;;  %v1371_v36 = vadd.f32 %v2512_v9, %v1274_v29  ;;  %v1277_v44 = vadd.f32 %v1974_v53, %v2477_v5 }
 0x16a   : > { %v1771_v45 = vpack.c.bf16 %v1448_v43, %v1447_v42  ;;  %v1410_v46 = vmul.f32 %v2491_v52, %v1371_v36  ;;  %v1374_v47 = vadd.f32 %v2517_v31, %v1277_v44  ;;  %v1975_v48 = vpop.f32.mrb[56].mxu0 }
 0x16b   : > { %v1976_v50 = vpop.f32.mrb[57].mxu0 }
 0x16c   : > { %1791 = vst [vmem:[%s2509_s21 + $0x20] sm:$0xff] %v1771_v45   ;;  %v1433_v54 = vadd.f32 %v2497_v56, %v1410_v46  ;;  %v1411_v23 = vmul.f32 %v2491_v52, %v1374_v47  ;;  %v1977_v3 = vadd.f32 %v1976_v50, %v1975_v48  ;;  %v1978_v55 = vpop.f32.mrb[58].mxu0 }
 0x16d   : > { %v1979_v58 = vpop.f32.mrb[59].mxu0 }
 0x16e   : > { %v1434_v9 = vadd.f32 %v2497_v56, %v1411_v23  ;;  %v1980_v60 = vadd.f32 %v1979_v58, %v1978_v55  ;;  %v1282_v5 = vadd.f32 %v1977_v3, %v2479_v19  ;;  %v1449_v59 = vmax.f32 %v1433_v54, 0.0 }
 0x170   : > { %v1450_v63 = vmax.f32 %v1434_v9, 0.0  ;;  %v1379_v31 = vadd.f32 %v2528_v57, %v1282_v5  ;;  %v1285_v1 = vadd.f32 %v1980_v60, %v2481_v21 }
 0x172   : > { %v1776_v2 = vpack.c.bf16 %v1450_v63, %v1449_v59  ;;  %v1412_v4 = vmul.f32 %v2491_v52, %v1379_v31  ;;  %v1382_v6 = vadd.f32 %v1381_v0, %v1285_v1  ;;  %v1981_v7 = vpop.f32.mrb[60].mxu0 }
 0x173   : > { %v1982_v8 = vpop.f32.mrb[61].mxu0 }
 0x174   : > { %1792 = vst [vmem:[%s2509_s21 + $0x28] sm:$0xff] %v1776_v2   ;;  %v1435_v10 = vadd.f32 %v2497_v56, %v1412_v4  ;;  %v1413_v12 = vmul.f32 %v2491_v52, %v1382_v6  ;;  %v1983_v13 = vadd.f32 %v1982_v8, %v1981_v7  ;;  %v1984_v19 = vpop.f32.mrb[62].mxu0 }
 0x175   : > { %v1985_v14 = vpop.f32.mrb[63].mxu0 }
 0x176   : > { %v1436_v15 = vadd.f32 %v2497_v56, %v1413_v12  ;;  %v1290_v57 = vadd.f32 %v1983_v13, %v2483_v35  ;;  %v1986_v21 = vadd.f32 %v1985_v14, %v1984_v19  ;;  %v1451_v37 = vmax.f32 %v1435_v10, 0.0 }
 0x178   : > { %v1452_v16 = vmax.f32 %v1436_v15, 0.0  ;;  %v1387_v0 = vadd.f32 %v2523_v49, %v1290_v57  ;;  %v1293_v17 = vadd.f32 %v1986_v21, %v2485_v38 }
 0x17a   : > { %v1781_v18 = vpack.c.bf16 %v1452_v16, %v1451_v37  ;;  %v1414_v62 = vmul.f32 %v2491_v52, %v1387_v0  ;;  %v1390_v39 = vadd.f32 %v2530_v25, %v1293_v17 }
 0x17c   : > { %1793 = vst [vmem:[%s2509_s21 + $0x30] sm:$0xff] %v1781_v18   ;;  %v1437_v20 = vadd.f32 %v2497_v56, %v1414_v62  ;;  %v1415_v22 = vmul.f32 %v2491_v52, %v1390_v39 }
 0x17e   : > { %v1438_v35 = vadd.f32 %v2497_v56, %v1415_v22  ;;  %v1453_v24 = vmax.f32 %v1437_v20, 0.0 }
 0x180   : > { %v1454_v61 = vmax.f32 %v1438_v35, 0.0 }
 0x182   : > { %v1786_v26 = vpack.c.bf16 %v1454_v61, %v1453_v24 }
 0x184   : > { %1794 = vst [vmem:[%s2509_s21 + $0x38] sm:$0xff] %v1786_v26  }
 0x185 PF: > { %s14_s15 = sadd.s32 1, %s2186_s15  }
 0x186   : > { %p11_p4 = scmp.ge.s32.totalorder %s14_s15, 4  }
 0x188   :  { %13 = sbr.rel (!%p11_p4) target bundleno = 1 (0x1), region = 66 }

// kernel: dqn_forward.8
= control target key start
LH: loop header
LB: loop body
LE: loop exit
PB: predicated region body
PF: predicated region fallthrough
CT: control target
= control target key end

     0   :  { %s2186_s15 = smov 0   ;;  %s2555_s0 = inlined_call_operand.vmem [shape: bf16[64,1664], index: 0, kind: input, shape index: {}]   ;;  %s2556_s1 = inlined_call_operand.vmem [shape: bf16[1664,128], index: 1, kind: input, shape index: {}]   ;;  %s2557_s2 = inlined_call_operand.vmem [shape: f32[1,128], index: 2, kind: input, shape index: {}]   ;;  %s2558_s3 = inlined_call_operand.vmem [shape: f32[1,128], index: 3, kind: input, shape index: {}]   ;;  %s2559_s4 = inlined_call_operand.vmem [shape: bf16[64,128], index: 4, kind: output, shape index: {}]  }
   0x1 LB: > { %s1642_s16 = sadd.s32 4294967295, %s2159_s15   ;;  %p1646_p0 = scmp.ge.s32.totalorder %s2159_s15, 1  ;;  %s2159_s15 = sphi %s2186_s15, %s14_s15  }
   0x2   : > { %p164_p1 = scmp.lt.s32.totalorder %s2159_s15, 3 }
   0x4   : > { %p165_p2 = pnand %p1646_p0, %p164_p1 }
   0x5   : > { %v2011_v0 = vld [vmem:[%s2556_s1 + $0x40] sm:$0xff] (!%p165_p2)   ;;  %v2015_v4 = vld [vmem:[%s2556_s1 + $0x48] sm:$0xff] (!%p165_p2)   ;;  %v2019_v8 = vld [vmem:[%s2556_s1 + $0x50] sm:$0xff] (!%p165_p2)   ;;  %s1647_s23 = sshll.u32 (!%p165_p2), %s1642_s16, 2 }
   0x6   : > { %168 = sbr.rel (%p165_p2) target bundleno = 361 (0x169), region = 36  ;;  %v2012_v1 = vld [vmem:[%s2556_s1 + $0xc0] sm:$0xff] (!%p165_p2)   ;;  %1804 = vmatprep.subr.bf16.mxu0 (!%p165_p2), %v2011_v0  ;;  %v2016_v5 = vld [vmem:[%s2556_s1 + $0xc8] sm:$0xff] (!%p165_p2)   ;;  %v2020_v9 = vld [vmem:[%s2556_s1 + $0xd0] sm:$0xff] (!%p165_p2)   ;;  %p192_p3 = scmp.lt.s32.totalorder (!%p165_p2), %s1647_s23, 7 }
   0x7   : > { %v2013_v2 = vld [vmem:[%s2556_s1] sm:$0xff] (!%p165_p2)   ;;  %1832 = vmatprep.subr.bf16.mxu1 (!%p165_p2), %v2012_v1  ;;  %v2017_v6 = vld [vmem:[%s2556_s1 + $0x8] sm:$0xff] (!%p165_p2)   ;;  %v2021_v10 = vld [vmem:[%s2556_s1 + $0x10] sm:$0xff] (!%p165_p2)  }
   0x8   : > { %v2014_v3 = vld [vmem:[%s2556_s1 + $0x80] sm:$0xff] (!%p165_p2)   ;;  %1805 = vmatpush3.bf16.msra.mxu0 (!%p165_p2), %v2013_v2  ;;  %v2018_v7 = vld [vmem:[%s2556_s1 + $0x88] sm:$0xff] (!%p165_p2)   ;;  %v2022_v11 = vld [vmem:[%s2556_s1 + $0x90] sm:$0xff] (!%p165_p2)  }
   0x9   : > { %1833 = vmatpush3.bf16.msra.mxu1 (!%p165_p2), %v2014_v3  ;;  %1806 = vmatprep.subr.bf16.mxu0 (!%p165_p2), %v2015_v4  ;;  %v2023_v12 = vld [vmem:[%s2556_s1 + $0x58] sm:$0xff] (!%p165_p2)   ;;  %v2027_v16 = vld [vmem:[%s2556_s1 + $0x60] sm:$0xff] (!%p165_p2)   ;;  %v2031_v20 = vld [vmem:[%s2556_s1 + $0x68] sm:$0xff] (!%p165_p2)  }
   0xa   : > { %1834 = vmatprep.subr.bf16.mxu1 (!%p165_p2), %v2016_v5  ;;  %v2024_v13 = vld [vmem:[%s2556_s1 + $0xd8] sm:$0xff] (!%p165_p2)   ;;  %v2028_v17 = vld [vmem:[%s2556_s1 + $0xe0] sm:$0xff] (!%p165_p2)   ;;  %v2032_v21 = vld [vmem:[%s2556_s1 + $0xe8] sm:$0xff] (!%p165_p2)  }
   0xb   : > { %v2025_v14 = vld [vmem:[%s2556_s1 + $0x18] sm:$0xff] (!%p165_p2)   ;;  %v2029_v18 = vld [vmem:[%s2556_s1 + $0x20] sm:$0xff] (!%p165_p2)   ;;  %v2033_v22 = vld [vmem:[%s2556_s1 + $0x28] sm:$0xff] (!%p165_p2)  }
   0xc   : > { %1807 = vmatpush3.bf16.msra.mxu0 (!%p165_p2), %v2017_v6  ;;  %v2026_v15 = vld [vmem:[%s2556_s1 + $0x98] sm:$0xff] (!%p165_p2)   ;;  %v2030_v19 = vld [vmem:[%s2556_s1 + $0xa0] sm:$0xff] (!%p165_p2)   ;;  %v2034_v23 = vld [vmem:[%s2556_s1 + $0xa8] sm:$0xff] (!%p165_p2)  }
   0xd   : > { %1835 = vmatpush3.bf16.msra.mxu1 %v2018_v7  ;;  %1808 = vmatprep.subr.bf16.mxu0 %v2019_v8  ;;  %s2561_s23 = smov (!%p192_p3, %s1647_s23), 7  ;;  %v2035_v24 = vld [vmem:[%s2556_s1 + $0x70] sm:$0xff]   ;;  %v2039_v28 = vld [vmem:[%s2556_s1 + $0x78] sm:$0xff]   ;;  %v2049_v36 = vld [vmem:[%s2556_s1 + $0x140] sm:$0xff]  }
   0xe   : > { %1836 = vmatprep.subr.bf16.mxu1 %v2020_v9  ;;  %v2036_v25 = vld [vmem:[%s2556_s1 + $0xf0] sm:$0xff]   ;;  %s2002_s21 = smul.u32 52, %s2561_s23  ;;  %v2040_v29 = vld [vmem:[%s2556_s1 + $0xf8] sm:$0xff]   ;;  %v2050_v37 = vld [vmem:[%s2556_s1 + $0x100] sm:$0xff]   ;;  %s1650_s22 = sshll.u32 %s2561_s23, 2 }
   0xf   : > { %v2037_v26 = vld [vmem:[%s2556_s1 + $0x30] sm:$0xff]   ;;  %v2041_v30 = vld [vmem:[%s2556_s1 + $0x38] sm:$0xff]   ;;  %v2051_v38 = vld [vmem:[%s2556_s1 + $0x1c0] sm:$0xff]   ;;  %s202_s26 = scalar_lea.vmem %s2559_s4, %s1650_s22 }
  0x10   : > { %1809 = vmatpush3.bf16.msra.mxu0 %v2021_v10  ;;  %v2038_v27 = vld [vmem:[%s2556_s1 + $0xb0] sm:$0xff]   ;;  %s2292_s6 = scalar_lea.vmem %s2555_s0, %s2002_s21  ;;  %v2042_v31 = vld [vmem:[%s2556_s1 + $0xb8] sm:$0xff]   ;;  %v2052_v39 = vld [vmem:[%s2556_s1 + $0x180] sm:$0xff]  }
  0x11   : > { %1837 = vmatpush3.bf16.msra.mxu1 %v2022_v11  ;;  %1810 = vmatprep.subr.bf16.mxu0 %v2023_v12  ;;  %v2043_v32 = vld [vmem:[%s2292_s6] ss:$52 sps:$4 sm:$0xff]   ;;  %v2045_v33 = vld [vmem:[%s2292_s6 + $0x4] ss:$52 sps:$4 sm:$0xff]   ;;  %v2046_v34 = vld [vmem:[%s2292_s6 + $0x8] ss:$52 sps:$4 sm:$0xff]  }
  0x12   : > { %1838 = vmatprep.subr.bf16.mxu1 %v2024_v13  ;;  %v2048_v35 = vld [vmem:[%s2292_s6 + $0xc] ss:$52 sps:$4 sm:$0xff]   ;;  %1229 = vmatprep.mubr.bf16.mxu0 %v2045_v33  ;;  %v2057_v44 = vld [vmem:[%s2556_s1 + $0x150] sm:$0xff]   ;;  %v2061_v48 = vld [vmem:[%s2556_s1 + $0x158] sm:$0xff]  }
  0x13   : > { %1278 = vmatprep.mubr.bf16.mxu1 %v2048_v35  ;;  %v2053_v40 = vld [vmem:[%s2556_s1 + $0x148] sm:$0xff]   ;;  %v2058_v45 = vld [vmem:[%s2556_s1 + $0x110] sm:$0xff]   ;;  %v2062_v49 = vld [vmem:[%s2556_s1 + $0x118] sm:$0xff]  }
  0x14   : > { %1811 = vmatpush3.bf16.msra.mxu0 %v2025_v14  ;;  %v2054_v41 = vld [vmem:[%s2556_s1 + $0x108] sm:$0xff]   ;;  %v2059_v46 = vld [vmem:[%s2556_s1 + $0x1d0] sm:$0xff]   ;;  %v2063_v50 = vld [vmem:[%s2556_s1 + $0x1d8] sm:$0xff]  }
  0x15   : > { %1839 = vmatpush3.bf16.msra.mxu1 %v2026_v15  ;;  %1812 = vmatprep.subr.bf16.mxu0 %v2027_v16  ;;  %v2055_v42 = vld [vmem:[%s2556_s1 + $0x1c8] sm:$0xff]   ;;  %v2060_v47 = vld [vmem:[%s2556_s1 + $0x190] sm:$0xff]   ;;  %v2064_v51 = vld [vmem:[%s2556_s1 + $0x198] sm:$0xff]  }
  0x16   : > { %1840 = vmatprep.subr.bf16.mxu1 %v2028_v17  ;;  %v2056_v43 = vld [vmem:[%s2556_s1 + $0x188] sm:$0xff]   ;;  %v2065_v52 = vld [vmem:[%s2556_s1 + $0x160] sm:$0xff]   ;;  %v2079_v0 = vld [vmem:[%s2556_s1 + $0x170] sm:$0xff]  }
  0x17   : > { %v2066_v53 = vld [vmem:[%s2556_s1 + $0x120] sm:$0xff]   ;;  %v2069_v56 = vld [vmem:[%s2556_s1 + $0x168] sm:$0xff]   ;;  %v2080_v1 = vld [vmem:[%s2556_s1 + $0x130] sm:$0xff]  }
  0x18   : > { %1813 = vmatpush3.bf16.msra.mxu0 %v2029_v18  ;;  %v2067_v54 = vld [vmem:[%s2556_s1 + $0x1e0] sm:$0xff]   ;;  %v2072_v58 = vld [vmem:[%s2292_s6 + $0x74] ss:$52 sps:$4 sm:$0xff]   ;;  %v2083_v4 = vld [vmem:[%s2556_s1 + $0x178] sm:$0xff]  }
  0x19   : > { %1841 = vmatpush3.bf16.msra.mxu1 %v2030_v19  ;;  %1814 = vmatprep.subr.bf16.mxu0 %v2031_v20  ;;  %v2068_v55 = vld [vmem:[%s2556_s1 + $0x1a0] sm:$0xff]   ;;  %v2074_v59 = vld [vmem:[%s2556_s1 + $0x128] sm:$0xff]   ;;  %v2081_v2 = vld [vmem:[%s2556_s1 + $0x1f0] sm:$0xff]  }
  0x1a   : > { %1842 = vmatprep.subr.bf16.mxu1 %v2032_v21  ;;  %v2070_v57 = vld [vmem:[%s2292_s6 + $0x6c] ss:$52 sps:$4 sm:$0xff]   ;;  %v2075_v60 = vld [vmem:[%s2292_s6 + $0x68] ss:$52 sps:$4 sm:$0xff]   ;;  %v2076_v61 = vld [vmem:[%s2292_s6 + $0x70] ss:$52 sps:$4 sm:$0xff]  }
  0x1b   : > { %v2077_v62 = vld [vmem:[%s2556_s1 + $0x1e8] sm:$0xff]   ;;  %v2082_v3 = vld [vmem:[%s2556_s1 + $0x1b0] sm:$0xff]   ;;  %v2084_v5 = vld [vmem:[%s2556_s1 + $0x138] sm:$0xff]  }
  0x1c   : > { %1815 = vmatpush3.bf16.msra.mxu0 %v2033_v22  ;;  %v2078_v63 = vld [vmem:[%s2556_s1 + $0x1a8] sm:$0xff]   ;;  %v2085_v6 = vld [vmem:[%s2556_s1 + $0x1f8] sm:$0xff]   ;;  %v2086_v7 = vld [vmem:[%s2292_s6 + $0x10] ss:$52 sps:$4 sm:$0xff]  }
  0x1d   : > { %1843 = vmatpush3.bf16.msra.mxu1 %v2034_v23  ;;  %1816 = vmatprep.subr.bf16.mxu0 %v2035_v24  ;;  %v2088_v8 = vld [vmem:[%s2292_s6 + $0x14] ss:$52 sps:$4 sm:$0xff]   ;;  %v2089_v9 = vld [vmem:[%s2556_s1 + $0x1b8] sm:$0xff]   ;;  %v2090_v10 = vld [vmem:[%s2556_s1 + $0x240] sm:$0xff]  }
  0x1e   : > { %1844 = vmatprep.subr.bf16.mxu1 %v2036_v25  ;;  %v2091_v11 = vld [vmem:[%s2292_s6 + $0x18] ss:$52 sps:$4 sm:$0xff]   ;;  %v2093_v12 = vld [vmem:[%s2292_s6 + $0x1c] ss:$52 sps:$4 sm:$0xff]   ;;  %v2094_v13 = vld [vmem:[%s2556_s1 + $0x200] sm:$0xff]  }
  0x1f   : > { %v2095_v14 = vld [vmem:[%s2556_s1 + $0x2c0] sm:$0xff]   ;;  %v2097_v16 = vld [vmem:[%s2556_s1 + $0x248] sm:$0xff]   ;;  %v2100_v19 = vld [vmem:[%s2292_s6 + $0x7c] ss:$52 sps:$4 sm:$0xff]  }
  0x20   : > { %1817 = vmatpush3.bf16.msra.mxu0 %v2037_v26  ;;  %v2096_v15 = vld [vmem:[%s2556_s1 + $0x280] sm:$0xff]   ;;  %v2098_v17 = vld [vmem:[%s2556_s1 + $0x208] sm:$0xff]   ;;  %v2104_v22 = vld [vmem:[%s2556_s1 + $0x250] sm:$0xff]  }
  0x21   : > { %1845 = vmatpush3.bf16.msra.mxu1 %v2038_v27  ;;  %1818 = vmatprep.subr.bf16.mxu0 %v2039_v28  ;;  %v2099_v18 = vld [vmem:[%s2556_s1 + $0x2c8] sm:$0xff]   ;;  %v2105_v23 = vld [vmem:[%s2292_s6 + $0x84] ss:$52 sps:$4 sm:$0xff]   ;;  %v2107_v24 = vld [vmem:[%s2556_s1 + $0x210] sm:$0xff]  }
  0x22   : > { %1846 = vmatprep.subr.bf16.mxu1 %v2040_v29  ;;  %v2102_v20 = vld [vmem:[%s2556_s1 + $0x288] sm:$0xff]   ;;  %v2108_v25 = vld [vmem:[%s2292_s6 + $0x80] ss:$52 sps:$4 sm:$0xff]   ;;  %v2111_v28 = vld [vmem:[%s2556_s1 + $0x258] sm:$0xff]  }
  0x23   : > { %v2103_v21 = vld [vmem:[%s2292_s6 + $0x78] ss:$52 sps:$4 sm:$0xff]   ;;  %v2109_v26 = vld [vmem:[%s2556_s1 + $0x2d0] sm:$0xff]   ;;  %v2116_v33 = vld [vmem:[%s2556_s1 + $0x220] sm:$0xff]  }
  0x24   : > { %1819 = vmatpush3.bf16.msra.mxu0 %v2041_v30  ;;  %v2110_v27 = vld [vmem:[%s2556_s1 + $0x290] sm:$0xff]   ;;  %v2112_v29 = vld [vmem:[%s2556_s1 + $0x218] sm:$0xff]   ;;  %v2118_v35 = vld [vmem:[%s2556_s1 + $0x2a0] sm:$0xff]  }
  0x25   : > { %1847 = vmatpush3.bf16.msra.mxu1 %v2042_v31  ;;  %1860 = vmatprep.subr.bf16.mxu0 %v2049_v36  ;;  %v2113_v30 = vld [vmem:[%s2556_s1 + $0x2d8] sm:$0xff]   ;;  %v2119_v36 = vld [vmem:[%s2556_s1 + $0x268] sm:$0xff]  }
  0x26   : > { %1888 = vmatprep.subr.bf16.mxu1 %v2051_v38  ;;  %v2114_v31 = vld [vmem:[%s2556_s1 + $0x298] sm:$0xff]   ;;  %v2121_v38 = vld [vmem:[%s2556_s1 + $0x2e8] sm:$0xff]  }
  0x27   : > { %1230 = vmatmul.mubr.bf16.vlgmr.msra.gmra.mrb[0].mxu0 %v2043_v32  ;;  %v2115_v32 = vld [vmem:[%s2556_s1 + $0x260] sm:$0xff]  }
  0x28   : > { %1279 = vmatmul.mubr.bf16.vlgmr.msra.gmra.mrb[0].mxu1 %v2046_v34  ;;  %1861 = vmatpush3.bf16.msra.mxu0 %v2050_v37  ;;  %v2117_v34 = vld [vmem:[%s2556_s1 + $0x2e0] sm:$0xff]   ;;  %v2120_v37 = vld [vmem:[%s2556_s1 + $0x228] sm:$0xff]  }
  0x29   : > { %1889 = vmatpush3.bf16.msra.mxu1 %v2052_v39  ;;  %1862 = vmatprep.subr.bf16.mxu0 %v2053_v40  ;;  %v2122_v39 = vld [vmem:[%s2556_s1 + $0x2a8] sm:$0xff]   ;;  %v2123_v40 = vld [vmem:[%s2556_s1 + $0x270] sm:$0xff]  }
  0x2a   : > { %1890 = vmatprep.subr.bf16.mxu1 %v2055_v42  ;;  %1237 = vmatprep.mubr.bf16.mxu0 %v2070_v57  ;;  %v2125_v42 = vld [vmem:[%s2556_s1 + $0x2f0] sm:$0xff]  }
  0x2b   : > { %1286 = vmatprep.mubr.bf16.mxu1 %v2072_v58  ;;  %v2143_v57 = vld [vmem:[%s2292_s6 + $0x94] ss:$52 sps:$4 sm:$0xff]   ;;  %v2146_v58 = vld [vmem:[%s2556_s1 + $0x318] sm:$0xff]  }
  0x2c   : > { %1863 = vmatpush3.bf16.msra.mxu0 %v2054_v41  ;;  %v2124_v41 = vld [vmem:[%s2556_s1 + $0x230] sm:$0xff]  }
  0x2d   : > { %1891 = vmatpush3.bf16.msra.mxu1 %v2056_v43  ;;  %1864 = vmatprep.subr.bf16.mxu0 %v2057_v44  ;;  %v2126_v43 = vld [vmem:[%s2556_s1 + $0x2b0] sm:$0xff]   ;;  %v2127_v44 = vld [vmem:[%s2556_s1 + $0x278] sm:$0xff]  }
  0x2e   : > { %1892 = vmatprep.subr.bf16.mxu1 %v2059_v46  ;;  %v2129_v46 = vld [vmem:[%s2556_s1 + $0x2f8] sm:$0xff]  }
  0x2f   : > { %1238 = vmatmul.mubr.bf16.gmra.mrb[4].mxu0 %v2075_v60  ;;  %v2147_v60 = vld [vmem:[%s2556_s1 + $0x320] sm:$0xff]  }
  0x30   : > { %1865 = vmatpush3.bf16.msra.mxu0 %v2058_v45  ;;  %1287 = vmatmul.mubr.bf16.gmra.mrb[4].mxu1 %v2076_v61  ;;  %v2128_v45 = vld [vmem:[%s2556_s1 + $0x238] sm:$0xff]   ;;  %v2151_v61 = vld [vmem:[%s2292_s6 + $0x30] ss:$52 sps:$4 sm:$0xff]  }
  0x31   : > { %1893 = vmatpush3.bf16.msra.mxu1 %v2060_v47  ;;  %1866 = vmatprep.subr.bf16.mxu0 %v2061_v48  ;;  %v2130_v47 = vld [vmem:[%s2292_s6 + $0x20] ss:$52 sps:$4 sm:$0xff]   ;;  %v2132_v48 = vld [vmem:[%s2292_s6 + $0x24] ss:$52 sps:$4 sm:$0xff]  }
  0x32   : > { %1894 = vmatprep.subr.bf16.mxu1 %v2063_v50  ;;  %1327 = vmatprep.mubr.bf16.mxu0 %v2088_v8  ;;  %v2134_v50 = vld [vmem:[%s2556_s1 + $0x300] sm:$0xff]  }
  0x33   : > { %1376 = vmatprep.mubr.bf16.mxu1 %v2093_v12 }
  0x34   : > { %1867 = vmatpush3.bf16.msra.mxu0 %v2062_v49  ;;  %v2133_v49 = vld [vmem:[%s2556_s1 + $0x2b8] sm:$0xff]  }
  0x35   : > { %1895 = vmatpush3.bf16.msra.mxu1 %v2064_v51  ;;  %1868 = vmatprep.subr.bf16.mxu0 %v2065_v52  ;;  %v2135_v51 = vld [vmem:[%s2292_s6 + $0x28] ss:$52 sps:$4 sm:$0xff]   ;;  %v2137_v52 = vld [vmem:[%s2292_s6 + $0x2c] ss:$52 sps:$4 sm:$0xff]  }
  0x36   : > { %1896 = vmatprep.subr.bf16.mxu1 %v2067_v54  ;;  %v2139_v54 = vld [vmem:[%s2292_s6 + $0x8c] ss:$52 sps:$4 sm:$0xff]  }
  0x38   : > { %1869 = vmatpush3.bf16.msra.mxu0 %v2066_v53  ;;  %v2138_v53 = vld [vmem:[%s2556_s1 + $0x308] sm:$0xff]  }
  0x39   : > { %1897 = vmatpush3.bf16.msra.mxu1 %v2068_v55  ;;  %1870 = vmatprep.subr.bf16.mxu0 %v2069_v56  ;;  %v2141_v55 = vld [vmem:[%s2292_s6 + $0x88] ss:$52 sps:$4 sm:$0xff]   ;;  %v2142_v56 = vld [vmem:[%s2556_s1 + $0x310] sm:$0xff]  }
  0x3a   : > { %1898 = vmatprep.subr.bf16.mxu1 %v2077_v62  ;;  %v2148_v62 = vld [vmem:[%s2556_s1 + $0x328] sm:$0xff]  }
  0x3c   : > { %1871 = vmatpush3.bf16.msra.mxu0 %v2074_v59  ;;  %v2145_v59 = vld [vmem:[%s2292_s6 + $0x90] ss:$52 sps:$4 sm:$0xff]  }
  0x3d   : > { %1899 = vmatpush3.bf16.msra.mxu1 %v2078_v63  ;;  %1872 = vmatprep.subr.bf16.mxu0 %v2079_v0  ;;  %v2149_v63 = vld [vmem:[%s2556_s1 + $0x330] sm:$0xff]   ;;  %v2150_v0 = vld [vmem:[%s2556_s1 + $0x338] sm:$0xff]  }
  0x3e   : > { %1900 = vmatprep.subr.bf16.mxu1 %v2081_v2 }
  0x40   : > { %1873 = vmatpush3.bf16.msra.mxu0 %v2080_v1  ;;  %v2152_v1 = vld [vmem:[%s2292_s6 + $0x98] ss:$52 sps:$4 sm:$0xff]  }
  0x41   : > { %1901 = vmatpush3.bf16.msra.mxu1 %v2082_v3  ;;  %1874 = vmatprep.subr.bf16.mxu0 %v2083_v4 }
  0x42   : > { %1902 = vmatprep.subr.bf16.mxu1 %v2085_v6 }
  0x44   : > { %1875 = vmatpush3.bf16.msra.mxu0 %v2084_v5 }
  0x45   : > { %1903 = vmatpush3.bf16.msra.mxu1 %v2089_v9  ;;  %1916 = vmatprep.subr.bf16.mxu0 %v2090_v10 }
  0x46   : > { %1944 = vmatprep.subr.bf16.mxu1 %v2095_v14 }
  0x47   : > { %1328 = vmatmul.mubr.bf16.vlgmr.msra.gmra.mrb[8].mxu0 %v2086_v7 }
  0x48   : > { %1917 = vmatpush3.bf16.msra.mxu0 %v2094_v13  ;;  %1377 = vmatmul.mubr.bf16.vlgmr.msra.gmra.mrb[8].mxu1 %v2091_v11 }
  0x49   : > { %1945 = vmatpush3.bf16.msra.mxu1 %v2096_v15  ;;  %1918 = vmatprep.subr.bf16.mxu0 %v2097_v16 }
  0x4a   : > { %1946 = vmatprep.subr.bf16.mxu1 %v2099_v18  ;;  %1335 = vmatprep.mubr.bf16.mxu0 %v2100_v19 }
  0x4b   : > { %1384 = vmatprep.mubr.bf16.mxu1 %v2105_v23 }
  0x4c   : > { %1919 = vmatpush3.bf16.msra.mxu0 %v2098_v17 }
  0x4d   : > { %1947 = vmatpush3.bf16.msra.mxu1 %v2102_v20  ;;  %1920 = vmatprep.subr.bf16.mxu0 %v2104_v22 }
  0x4e   : > { %1948 = vmatprep.subr.bf16.mxu1 %v2109_v26 }
  0x4f   : > { %1336 = vmatmul.mubr.bf16.gmra.mrb[12].mxu0 %v2103_v21 }
  0x50   : > { %1921 = vmatpush3.bf16.msra.mxu0 %v2107_v24  ;;  %1385 = vmatmul.mubr.bf16.gmra.mrb[12].mxu1 %v2108_v25 }
  0x51   : > { %1949 = vmatpush3.bf16.msra.mxu1 %v2110_v27  ;;  %1922 = vmatprep.subr.bf16.mxu0 %v2111_v28 }
  0x52   : > { %1950 = vmatprep.subr.bf16.mxu1 %v2113_v30  ;;  %1425 = vmatprep.mubr.bf16.mxu0 %v2132_v48 }
  0x53   : > { %1474 = vmatprep.mubr.bf16.mxu1 %v2137_v52 }
  0x54   : > { %1923 = vmatpush3.bf16.msra.mxu0 %v2112_v29 }
  0x55   : > { %1951 = vmatpush3.bf16.msra.mxu1 %v2114_v31  ;;  %1924 = vmatprep.subr.bf16.mxu0 %v2115_v32 }
  0x56   : > { %1952 = vmatprep.subr.bf16.mxu1 %v2117_v34 }
  0x58   : > { %1925 = vmatpush3.bf16.msra.mxu0 %v2116_v33 }
  0x59   : > { %1953 = vmatpush3.bf16.msra.mxu1 %v2118_v35  ;;  %1926 = vmatprep.subr.bf16.mxu0 %v2119_v36 }
  0x5a   : > { %1954 = vmatprep.subr.bf16.mxu1 %v2121_v38 }
  0x5c   : > { %1927 = vmatpush3.bf16.msra.mxu0 %v2120_v37 }
  0x5d   : > { %1955 = vmatpush3.bf16.msra.mxu1 %v2122_v39  ;;  %1928 = vmatprep.subr.bf16.mxu0 %v2123_v40 }
  0x5e   : > { %1956 = vmatprep.subr.bf16.mxu1 %v2125_v42 }
  0x60   : > { %1929 = vmatpush3.bf16.msra.mxu0 %v2124_v41 }
  0x61   : > { %1957 = vmatpush3.bf16.msra.mxu1 %v2126_v43  ;;  %1930 = vmatprep.subr.bf16.mxu0 %v2127_v44 }
  0x62   : > { %1958 = vmatprep.subr.bf16.mxu1 %v2129_v46 }
  0x64   : > { %1931 = vmatpush3.bf16.msra.mxu0 %v2128_v45 }
  0x65   : > { %1959 = vmatpush3.bf16.msra.mxu1 %v2133_v49  ;;  %1982 = vmatprep.subr.bf16.mxu0 %v2134_v50 }
  0x67   : > { %1426 = vmatmul.mubr.bf16.vlgmr.msra.gmra.mrb[16].mxu0 %v2130_v47 }
  0x68   : > { %1983 = vmatpush3.bf16.msra.mxu0 %v2134_v50  ;;  %1475 = vmatmul.mubr.bf16.vlgmr.msra.gmra.mrb[16].mxu1 %v2135_v51 }
  0x69   : > { %1984 = vmatprep.subr.bf16.mxu0 %v2138_v53  ;;  %1433 = vmatprep.mubr.bf16.mxu0 %v2139_v54 }
  0x6a   : > { %1482 = vmatprep.mubr.bf16.mxu1 %v2143_v57 }
  0x6c   : > { %1985 = vmatpush3.bf16.msra.mxu0 %v2138_v53 }
  0x6d   : > { %1986 = vmatprep.subr.bf16.mxu0 %v2142_v56 }
  0x6f   : > { %1434 = vmatmul.mubr.bf16.gmra.mrb[20].mxu0 %v2141_v55 }
  0x70   : > { %1987 = vmatpush3.bf16.msra.mxu0 %v2142_v56  ;;  %1483 = vmatmul.mubr.bf16.gmra.mrb[20].mxu1 %v2145_v59 }
  0x71   : > { %1988 = vmatprep.subr.bf16.mxu0 %v2146_v58  ;;  %1998 = vmatprep.mubr.bf16.mxu0 %v2151_v61 }
  0x74   : > { %1989 = vmatpush3.bf16.msra.mxu0 %v2146_v58 }
  0x75   : > { %1990 = vmatprep.subr.bf16.mxu0 %v2147_v60 }
  0x78   : > { %1991 = vmatpush3.bf16.msra.mxu0 %v2147_v60 }
  0x79   : > { %1992 = vmatprep.subr.bf16.mxu0 %v2148_v62 }
  0x7c   : > { %1993 = vmatpush3.bf16.msra.mxu0 %v2148_v62 }
  0x7d   : > { %1994 = vmatprep.subr.bf16.mxu0 %v2149_v63 }
  0x80   : > { %1995 = vmatpush3.bf16.msra.mxu0 %v2149_v63 }
  0x81   : > { %1996 = vmatprep.subr.bf16.mxu0 %v2150_v0 }
  0x84   : > { %1997 = vmatpush3.bf16.msra.mxu0 %v2150_v0 }
  0x87   : > { %1999 = vmatmul.mubr.bf16.vlgmr.msra.gmra.mrb[24].mxu0 %v2152_v1 }
  0xfa   : > { %v1820_v2 = vpop.f32.mrb[0].mxu0 }
  0xfb   : > { %v1848_v3 = vpop.f32.mrb[0].mxu1  ;;  %v1821_v4 = vpop.f32.mrb[1].mxu0 }
  0xfc   : > { %v1822_v5 = vadd.f32 %v1821_v4, %v1820_v2  ;;  %v1849_v6 = vpop.f32.mrb[1].mxu1  ;;  %v1823_v7 = vpop.f32.mrb[2].mxu0 }
  0xfd   : > { %v1850_v8 = vadd.f32 %v1849_v6, %v1848_v3  ;;  %v1851_v9 = vpop.f32.mrb[2].mxu1  ;;  %v1824_v10 = vpop.f32.mrb[3].mxu0 }
  0xfe   : > { %v1825_v11 = vadd.f32 %v1824_v10, %v1823_v7  ;;  %v1852_v12 = vpop.f32.mrb[3].mxu1 }
  0xff   : > { %v1281_v13 = vadd.f32 %v1850_v8, %v1822_v5  ;;  %v1853_v14 = vadd.f32 %v1852_v12, %v1851_v9 }
 0x101   : > { %v1284_v15 = vadd.f32 %v1853_v14, %v1825_v11 }
 0x102   : > { %v1826_v16 = vpop.f32.mrb[4].mxu0 }
 0x103   : > { %v1854_v17 = vpop.f32.mrb[4].mxu1  ;;  %v1827_v18 = vpop.f32.mrb[5].mxu0 }
 0x104   : > { %v1855_v19 = vpop.f32.mrb[5].mxu1  ;;  %v1828_v20 = vadd.f32 %v1827_v18, %v1826_v16  ;;  %v1829_v22 = vpop.f32.mrb[6].mxu0 }
 0x105   : > { %v1856_v21 = vadd.f32 %v1855_v19, %v1854_v17  ;;  %v1857_v23 = vpop.f32.mrb[6].mxu1  ;;  %v1830_v24 = vpop.f32.mrb[7].mxu0 }
 0x106   : > { %v1858_v25 = vpop.f32.mrb[7].mxu1  ;;  %v1831_v27 = vadd.f32 %v1830_v24, %v1829_v22 }
 0x107   : > { %v1289_v26 = vadd.f32 %v1856_v21, %v1828_v20  ;;  %v1859_v28 = vadd.f32 %v1858_v25, %v1857_v23 }
 0x109   : > { %v1292_v29 = vadd.f32 %v1859_v28, %v1831_v27 }
 0x11a   : > { %v1876_v30 = vpop.f32.mrb[8].mxu0 }
 0x11b   : > { %v1877_v31 = vpop.f32.mrb[9].mxu0  ;;  %v1904_v34 = vpop.f32.mrb[8].mxu1 }
 0x11c   : > { %v1878_v32 = vadd.f32 %v1877_v31, %v1876_v30  ;;  %v1879_v33 = vpop.f32.mrb[10].mxu0  ;;  %v1905_v38 = vpop.f32.mrb[9].mxu1  ;;  %v1781_v31 = vld [vmem:[%s2557_s2] ss:$0 sm:$0xff] }
 0x11d   : > { %v1880_v35 = vpop.f32.mrb[11].mxu0  ;;  %v1906_v39 = vadd.f32 %v1905_v38, %v1904_v34  ;;  %v1907_v40 = vpop.f32.mrb[10].mxu1  ;;  %v1782_v34 = vld [vmem:[%s2558_s3] ss:$0 sm:$0xff] }
 0x11e   : > { %v1330_v36 = vadd.f32 %v1878_v32, %v1281_v13  ;;  %v1881_v37 = vadd.f32 %v1880_v35, %v1879_v33  ;;  %v1908_v42 = vpop.f32.mrb[11].mxu1 }
 0x11f   : > { %v1909_v44 = vadd.f32 %v1908_v42, %v1907_v40 }
 0x120   : > { %v1333_v41 = vadd.f32 %v1881_v37, %v1284_v15  ;;  %v1379_v43 = vadd.f32 %v1906_v39, %v1330_v36 }
 0x122   : > { %v1382_v45 = vadd.f32 %v1909_v44, %v1333_v41  ;;  %v1882_v46 = vpop.f32.mrb[12].mxu0 }
 0x123   : > { %v1883_v47 = vpop.f32.mrb[13].mxu0  ;;  %v1910_v50 = vpop.f32.mrb[12].mxu1 }
 0x124   : > { %v1884_v48 = vadd.f32 %v1883_v47, %v1882_v46  ;;  %v1885_v49 = vpop.f32.mrb[14].mxu0  ;;  %v1911_v54 = vpop.f32.mrb[13].mxu1 }
 0x125   : > { %v1886_v51 = vpop.f32.mrb[15].mxu0  ;;  %v1912_v55 = vadd.f32 %v1911_v54, %v1910_v50  ;;  %v1913_v56 = vpop.f32.mrb[14].mxu1 }
 0x126   : > { %v1338_v52 = vadd.f32 %v1884_v48, %v1289_v26  ;;  %v1887_v53 = vadd.f32 %v1886_v51, %v1885_v49  ;;  %v1914_v58 = vpop.f32.mrb[15].mxu1 }
 0x127   : > { %v1915_v60 = vadd.f32 %v1914_v58, %v1913_v56 }
 0x128   : > { %v1341_v57 = vadd.f32 %v1887_v53, %v1292_v29  ;;  %v1387_v59 = vadd.f32 %v1912_v55, %v1338_v52 }
 0x12a   : > { %v1390_v61 = vadd.f32 %v1915_v60, %v1341_v57 }
 0x13a   : > { %v1932_v62 = vpop.f32.mrb[16].mxu0 }
 0x13b   : > { %v1933_v63 = vpop.f32.mrb[17].mxu0  ;;  %v1960_v4 = vpop.f32.mrb[16].mxu1 }
 0x13c   : > { %v1934_v0 = vadd.f32 %v1933_v63, %v1932_v62  ;;  %v1935_v1 = vpop.f32.mrb[18].mxu0  ;;  %v1961_v6 = vpop.f32.mrb[17].mxu1 }
 0x13d   : > { %v1936_v2 = vpop.f32.mrb[19].mxu0  ;;  %v1962_v8 = vadd.f32 %v1961_v6, %v1960_v4  ;;  %v1963_v9 = vpop.f32.mrb[18].mxu1 }
 0x13e   : > { %v1428_v3 = vadd.f32 %v1934_v0, %v1379_v43  ;;  %v1937_v5 = vadd.f32 %v1936_v2, %v1935_v1  ;;  %v1964_v10 = vpop.f32.mrb[19].mxu1 }
 0x13f   : > { %v1965_v11 = vadd.f32 %v1964_v10, %v1963_v9 }
 0x140   : > { %v1431_v7 = vadd.f32 %v1937_v5, %v1382_v45  ;;  %v1477_v13 = vadd.f32 %v1962_v8, %v1428_v3 }
 0x142   : > { %v1938_v12 = vpop.f32.mrb[20].mxu0  ;;  %v1480_v17 = vadd.f32 %v1965_v11, %v1431_v7 }
 0x143   : > { %v1939_v14 = vpop.f32.mrb[21].mxu0  ;;  %v1966_v20 = vpop.f32.mrb[20].mxu1 }
 0x144   : > { %v1940_v15 = vadd.f32 %v1939_v14, %v1938_v12  ;;  %v1941_v16 = vpop.f32.mrb[22].mxu0  ;;  %v1967_v22 = vpop.f32.mrb[21].mxu1 }
 0x145   : > { %v1942_v18 = vpop.f32.mrb[23].mxu0  ;;  %v1968_v24 = vadd.f32 %v1967_v22, %v1966_v20  ;;  %v1969_v25 = vpop.f32.mrb[22].mxu1 }
 0x146   : > { %v1436_v19 = vadd.f32 %v1940_v15, %v1387_v59  ;;  %v1943_v21 = vadd.f32 %v1942_v18, %v1941_v16  ;;  %v1970_v26 = vpop.f32.mrb[23].mxu1 }
 0x147   : > { %v1971_v27 = vadd.f32 %v1970_v26, %v1969_v25 }
 0x148   : > { %v1439_v23 = vadd.f32 %v1943_v21, %v1390_v61  ;;  %v1485_v28 = vadd.f32 %v1968_v24, %v1436_v19 }
 0x14a   : > { %v1488_v29 = vadd.f32 %v1971_v27, %v1439_v23 }
 0x15a   : > { %v2000_v30 = vpop.f32.mrb[24].mxu0 }
 0x15b   : > { %v1534_v32 = vadd.f32 %v2000_v30, %v1485_v28  ;;  %v1525_v33 = vpop.f32.mrb[25].mxu0 }
 0x15c   : > { %v1526_v35 = vadd.f32 %v1525_v33, %v1477_v13  ;;  %v2001_v36 = vpop.f32.mrb[26].mxu0 }
 0x15d   : > { %v1549_v37 = vmul.f32 %v1781_v31, %v1534_v32  ;;  %v1537_v38 = vadd.f32 %v2001_v36, %v1488_v29  ;;  %v1528_v39 = vpop.f32.mrb[27].mxu0 }
 0x15e   : > { %v1547_v40 = vmul.f32 %v1781_v31, %v1526_v35  ;;  %v1529_v41 = vadd.f32 %v1528_v39, %v1480_v17 }
 0x15f   : > { %v1560_v42 = vadd.f32 %v1782_v34, %v1549_v37  ;;  %v1550_v43 = vmul.f32 %v1781_v31, %v1537_v38 }
 0x160   : > { %v1558_v44 = vadd.f32 %v1782_v34, %v1547_v40  ;;  %v1548_v45 = vmul.f32 %v1781_v31, %v1529_v41 }
 0x161   : > { %v1561_v46 = vadd.f32 %v1782_v34, %v1550_v43  ;;  %v1564_v48 = vmax.f32 %v1560_v42, 0.0 }
 0x162   : > { %v1559_v47 = vadd.f32 %v1782_v34, %v1548_v45  ;;  %v1562_v50 = vmax.f32 %v1558_v44, 0.0 }
 0x163   : > { %v1565_v49 = vmax.f32 %v1561_v46, 0.0 }
 0x164   : > { %v1563_v51 = vmax.f32 %v1559_v47, 0.0 }
 0x165   : > { %v1801_v52 = vpack.c.bf16 %v1565_v49, %v1564_v48 }
 0x166   : > { %v1796_v53 = vpack.c.bf16 %v1563_v51, %v1562_v50 }
 0x167   : > { %1803 = vst [vmem:[%s202_s26 + $0x8] sm:$0xff] %v1801_v52  }
 0x168   : > { %1797 = vst [vmem:[%s202_s26] sm:$0xff] %v1796_v53  }
 0x169 PF: > { %s14_s15 = sadd.s32 1, %s2159_s15  }
 0x16a   : > { %p11_p4 = scmp.ge.s32.totalorder %s14_s15, 4  }
 0x16c   :  { %13 = sbr.rel (!%p11_p4) target bundleno = 1 (0x1), region = 66 }

// kernel: dqn_forward.9
= control target key start
LH: loop header
LB: loop body
LE: loop exit
PB: predicated region body
PF: predicated region fallthrough
CT: control target
= control target key end

     0   :  { %s10270_s18 = smov 0   ;;  %s10272_s19 = smov 0   ;;  %s11771_s0 = inlined_call_operand.vmem [shape: bf16[16,4096], index: 0, kind: input, shape index: {}]   ;;  %s11772_s1 = inlined_call_operand.vmem [shape: bf16[4096,1024], index: 1, kind: input, shape index: {}]   ;;  %s11773_s2 = inlined_call_operand.vmem [shape: f32[1,1024], index: 2, kind: input, shape index: {}]   ;;  %s11774_s3 = inlined_call_operand.vmem [shape: bf16[1024,128], index: 3, kind: input, shape index: {}]   ;;  %s11775_s4 = inlined_call_operand.vmem [shape: f32[1,128], index: 4, kind: input, shape index: {}]   ;;  %s11776_s5 = inlined_call_operand.vmem [shape: f32[16,128], index: 5, kind: output, shape index: {}]  }
   0x1   :  { %s10274_s20 = smov 0  }
   0x2 LB: > { %s10286_s21 = sadd.s32 4294967295, %s10237_s20   ;;  %s10289_s22 = sadd.s32 1, %s10237_s20   ;;  %s10237_s20 = sphi %s10274_s20, %s11779_s20   ;;  %s10233_s19 = sphi %s10272_s19, %s11778_s19   ;;  %s10229_s18 = sphi %s10270_s18, %s11777_s18  }
   0x3   : > { %s19_s23 = ssub.s32 %s10237_s20, %s10289_s22  ;;  %s22_s24 = sadd.s32 1, %s10233_s19 }
   0x4   : > { %p20_p0 = scmp.eq.s32.totalorder %s19_s23, 0  ;;  %p29_p1 = scmp.ne.s32.totalorder %s10233_s19, %s10229_s18 }
   0x5   : > { %p30_p2 = scmp.eq.s32.totalorder %s10237_s20, 0  ;;  %p8806_p4 = scmp.ge.s32.totalorder %s10237_s20, 2 }
   0x6   : > { %s10298_s25 = scalar_select %p20_p0, %s10233_s19, %s22_s24  }
   0x7   : > { %p31_p3 = por %p30_p2, %p29_p1  ;;  %174 = sbr.rel (%p8806_p4) target bundleno = 26 (0x1a), region = 28 }
   0xe   : > { %177 = sbr.rel (!%p31_p3) target bundleno = 26 (0x1a), region = 32  ;;  %s179_s26 = sand.u32 (%p31_p3), 1, %s10233_s19  }
   0xf   : > { %s9924_s27 = sshll.u32 (%p31_p3), %s10237_s20, 6  ;;  %s8807_s28 = sshll.u32 (%p31_p3), %s179_s26, 7 }
  0x10   : > { %s10306_s6 = scalar_lea.vmem (%p31_p3), %s11771_s0, %s9924_s27  ;;  %s181_s7 = scalar_lea.vmem (%p31_p3), [#allocation3], %s8807_s28 }
  0x11   : > { %v197_v0 = vld [vmem:[%s10306_s6] sm:$0xff] (%p31_p3)  ;;  %v199_v1 = vld [vmem:[%s10306_s6 + $0x8] sm:$0xff] (%p31_p3)  ;;  %v201_v2 = vld [vmem:[%s10306_s6 + $0x10] sm:$0xff] (%p31_p3) }
  0x12   : > { %198 = vst [vmem:[%s181_s7] sm:$0xff] (%p31_p3), %v197_v0  ;;  %200 = vst [vmem:[%s181_s7 + $0x8] sm:$0xff] (%p31_p3), %v199_v1  ;;  %v203_v3 = vld [vmem:[%s10306_s6 + $0x18] sm:$0xff] (%p31_p3)  ;;  %v205_v4 = vld [vmem:[%s10306_s6 + $0x20] sm:$0xff] (%p31_p3) }
  0x13   : > { %202 = vst [vmem:[%s181_s7 + $0x10] sm:$0xff] (%p31_p3), %v201_v2  ;;  %v207_v5 = vld [vmem:[%s10306_s6 + $0x28] sm:$0xff] (%p31_p3)  ;;  %204 = vst [vmem:[%s181_s7 + $0x18] sm:$0xff] (%p31_p3), %v203_v3  ;;  %v209_v6 = vld [vmem:[%s10306_s6 + $0x30] sm:$0xff] (%p31_p3) }
  0x14   : > { %206 = vst [vmem:[%s181_s7 + $0x20] sm:$0xff] (%p31_p3), %v205_v4  ;;  %208 = vst [vmem:[%s181_s7 + $0x28] sm:$0xff] (%p31_p3), %v207_v5  ;;  %v211_v7 = vld [vmem:[%s10306_s6 + $0x38] sm:$0xff] (%p31_p3)  ;;  %v213_v8 = vld [vmem:[%s10306_s6 + $0x80] sm:$0xff] (%p31_p3) }
  0x15   : > { %210 = vst [vmem:[%s181_s7 + $0x30] sm:$0xff] %v209_v6  ;;  %212 = vst [vmem:[%s181_s7 + $0x38] sm:$0xff] %v211_v7  ;;  %v215_v9 = vld [vmem:[%s10306_s6 + $0x88] sm:$0xff]  ;;  %v217_v10 = vld [vmem:[%s10306_s6 + $0x90] sm:$0xff] }
  0x16   : > { %214 = vst [vmem:[%s181_s7 + $0x40] sm:$0xff] %v213_v8  ;;  %v219_v11 = vld [vmem:[%s10306_s6 + $0x98] sm:$0xff]  ;;  %216 = vst [vmem:[%s181_s7 + $0x48] sm:$0xff] %v215_v9  ;;  %v221_v12 = vld [vmem:[%s10306_s6 + $0xa0] sm:$0xff] }
  0x17   : > { %218 = vst [vmem:[%s181_s7 + $0x50] sm:$0xff] %v217_v10  ;;  %220 = vst [vmem:[%s181_s7 + $0x58] sm:$0xff] %v219_v11  ;;  %v223_v13 = vld [vmem:[%s10306_s6 + $0xa8] sm:$0xff]  ;;  %v225_v14 = vld [vmem:[%s10306_s6 + $0xb0] sm:$0xff] }
  0x18   : > { %222 = vst [vmem:[%s181_s7 + $0x60] sm:$0xff] %v221_v12  ;;  %224 = vst [vmem:[%s181_s7 + $0x68] sm:$0xff] %v223_v13  ;;  %v227_v15 = vld [vmem:[%s10306_s6 + $0xb8] sm:$0xff] }
  0x19   : > { %226 = vst [vmem:[%s181_s7 + $0x70] sm:$0xff] %v225_v14  ;;  %228 = vst [vmem:[%s181_s7 + $0x78] sm:$0xff] %v227_v15 }
  0x1a PF: > { %p8810_p5 = scmp.ge.s32.totalorder %s10237_s20, 1  ;;  %p243_p6 = scmp.lt.s32.totalorder %s10237_s20, 3 }
  0x1c   : > { %p244_p7 = pnand %p8810_p5, %p243_p6 }
  0x1d   : > { %s250_s8 = sand.u32 (!%p244_p7), 1, %s10229_s18   ;;  %s8812_s9 = sshll.u32 (!%p244_p7), %s10286_s21, 8 }
  0x1e   : > { %247 = sbr.rel (%p244_p7) target bundleno = 1552 (0x610), region = 59  ;;  %s8811_s10 = sshll.u32 (!%p244_p7), %s250_s8, 7 }
  0x1f   : > { %p280_p8 = scmp.lt.s32.totalorder (!%p244_p7), %s8812_s9, 511  ;;  %s10333_s15 = scalar_lea.vmem (!%p244_p7), [#allocation3], %s8811_s10 }
  0x20   : > { %p8815_p9 = scmp.ne.s32.totalorder (!%p244_p7), %s10286_s21, 0 }
  0x25   : > { %s11781_s9 = smov (!%p280_p8, %s8812_s9), 511  ;;  %290 = sbr.rel (%p8815_p9) target bundleno = 47 (0x2f), region = 67 }
  0x26   : > { %s9925_s11 = sshll.u32 %s11781_s9, 5  ;;  %v10239_v16 = vmov (!%p8815_p9), 0.0  }
  0x27   : > { %s10331_s14 = scalar_lea.vmem %s11772_s1, %s9925_s11  ;;  %291 = vst [vmem:[#allocation2] sm:$0xff] (!%p8815_p9), %v10239_v16  ;;  %292 = vst [vmem:[#allocation2 + $0x8] sm:$0xff] (!%p8815_p9), %v10239_v16 }
  0x28   : > { %293 = vst [vmem:[#allocation2 + $0x10] sm:$0xff] (!%p8815_p9), %v10239_v16  ;;  %294 = vst [vmem:[#allocation2 + $0x18] sm:$0xff] (!%p8815_p9), %v10239_v16 }
  0x29   : > { %295 = vst [vmem:[#allocation2 + $0x20] sm:$0xff] (!%p8815_p9), %v10239_v16  ;;  %296 = vst [vmem:[#allocation2 + $0x28] sm:$0xff] (!%p8815_p9), %v10239_v16 }
  0x2a   : > { %297 = vst [vmem:[#allocation2 + $0x30] sm:$0xff] (!%p8815_p9), %v10239_v16  ;;  %298 = vst [vmem:[#allocation2 + $0x38] sm:$0xff] (!%p8815_p9), %v10239_v16 }
  0x2b   : > { %299 = vst [vmem:[#allocation2 + $0x40] sm:$0xff] (!%p8815_p9), %v10239_v16  ;;  %300 = vst [vmem:[#allocation2 + $0x48] sm:$0xff] (!%p8815_p9), %v10239_v16 }
  0x2c   : > { %301 = vst [vmem:[#allocation2 + $0x50] sm:$0xff] %v10239_v16  ;;  %302 = vst [vmem:[#allocation2 + $0x58] sm:$0xff] %v10239_v16 }
  0x2d   : > { %303 = vst [vmem:[#allocation2 + $0x60] sm:$0xff] %v10239_v16  ;;  %304 = vst [vmem:[#allocation2 + $0x68] sm:$0xff] %v10239_v16 }
  0x2e   : > { %305 = vst [vmem:[#allocation2 + $0x70] sm:$0xff] %v10239_v16  ;;  %306 = vst [vmem:[#allocation2 + $0x78] sm:$0xff] %v10239_v16 }
  0x2f PF: > { %v339_v17 = vld [vmem:[%s10331_s14] sm:$0xff]  ;;  %v340_v19 = vld [vmem:[%s10331_s14 + $0x8] sm:$0xff]  ;;  %p9856_p10 = scmp.ne.s32.totalorder %s10286_s21, 1 }
  0x30   : > { %v343_v18 = vld [vmem:[%s10331_s14 + $0x20] sm:$0xff]  ;;  %v344_v21 = vld [vmem:[%s10331_s14 + $0x28] sm:$0xff] }
  0x31   : > { %v8833_v20 = vcombine.high %v339_v17, %v343_v18  ;;  %v8832_v22 = vcombine.low %v339_v17, %v343_v18  ;;  %v347_v23 = vld [vmem:[%s10331_s14 + $0x40] sm:$0xff]  ;;  %v8835_v25 = vcombine.high %v340_v19, %v344_v21  ;;  %v8834_v26 = vcombine.low %v340_v19, %v344_v21  ;;  %v348_v28 = vld [vmem:[%s10331_s14 + $0x48] sm:$0xff] }
  0x32   : > { %v351_v24 = vld [vmem:[%s10331_s14 + $0x60] sm:$0xff]  ;;  %v352_v29 = vld [vmem:[%s10331_s14 + $0x68] sm:$0xff] }
  0x33   : > { %v8841_v27 = vcombine.high %v347_v23, %v351_v24  ;;  %v355_v30 = vld [vmem:[%s10331_s14 + $0x80] sm:$0xff]  ;;  %6563 = vmatprep.subr.bf16.mxu0 %v8833_v20  ;;  %v8843_v31 = vcombine.high %v348_v28, %v352_v29  ;;  %v356_v33 = vld [vmem:[%s10331_s14 + $0x88] sm:$0xff]  ;;  %6907 = vmatprep.subr.bf16.mxu1 %v8835_v25  ;;  %v8840_v35 = vcombine.low %v347_v23, %v351_v24 }
  0x34   : > { %v359_v32 = vld [vmem:[%s10331_s14 + $0xa0] sm:$0xff]  ;;  %v360_v34 = vld [vmem:[%s10331_s14 + $0xa8] sm:$0xff]  ;;  %6564 = vmatpush1.bf16.msra.mxu0 %v8832_v22  ;;  %6908 = vmatpush1.bf16.msra.mxu1 %v8834_v26  ;;  %v8842_v36 = vcombine.low %v348_v28, %v352_v29 }
  0x35   : > { %6565 = vmatprep.subr.bf16.mxu0 %v8841_v27  ;;  %v8849_v37 = vcombine.high %v355_v30, %v359_v32  ;;  %6909 = vmatprep.subr.bf16.mxu1 %v8843_v31  ;;  %v8851_v38 = vcombine.high %v356_v33, %v360_v34  ;;  %v363_v39 = vld [vmem:[%s10331_s14 + $0xc0] sm:$0xff]  ;;  %v364_v41 = vld [vmem:[%s10331_s14 + $0xc8] sm:$0xff]  ;;  %v8848_v43 = vcombine.low %v355_v30, %v359_v32 }
  0x36   : > { %v367_v40 = vld [vmem:[%s10331_s14 + $0xe0] sm:$0xff]  ;;  %v368_v42 = vld [vmem:[%s10331_s14 + $0xe8] sm:$0xff]  ;;  %v8850_v44 = vcombine.low %v356_v33, %v360_v34 }
  0x37   : > { %v8857_v45 = vcombine.high %v363_v39, %v367_v40  ;;  %v8859_v46 = vcombine.high %v364_v41, %v368_v42  ;;  %v371_v47 = vld [vmem:[%s10331_s14 + $0x100] sm:$0xff]  ;;  %v372_v49 = vld [vmem:[%s10331_s14 + $0x108] sm:$0xff]  ;;  %v8856_v51 = vcombine.low %v363_v39, %v367_v40  ;;  %v8858_v52 = vcombine.low %v364_v41, %v368_v42 }
  0x38   : > { %6566 = vmatpush1.bf16.msra.mxu0 %v8840_v35  ;;  %6910 = vmatpush1.bf16.msra.mxu1 %v8842_v36  ;;  %v375_v48 = vld [vmem:[%s10331_s14 + $0x120] sm:$0xff]  ;;  %v376_v50 = vld [vmem:[%s10331_s14 + $0x128] sm:$0xff] }
  0x39   : > { %6567 = vmatprep.subr.bf16.mxu0 %v8849_v37  ;;  %6911 = vmatprep.subr.bf16.mxu1 %v8851_v38  ;;  %v8865_v53 = vcombine.high %v371_v47, %v375_v48  ;;  %v8867_v54 = vcombine.high %v372_v49, %v376_v50  ;;  %v379_v55 = vld [vmem:[%s10331_s14 + $0x140] sm:$0xff]  ;;  %v380_v57 = vld [vmem:[%s10331_s14 + $0x148] sm:$0xff]  ;;  %v8864_v59 = vcombine.low %v371_v47, %v375_v48 }
  0x3a   : > { %v383_v56 = vld [vmem:[%s10331_s14 + $0x160] sm:$0xff]  ;;  %v384_v58 = vld [vmem:[%s10331_s14 + $0x168] sm:$0xff]  ;;  %v8866_v60 = vcombine.low %v372_v49, %v376_v50 }
  0x3b   : > { %v8873_v61 = vcombine.high %v379_v55, %v383_v56  ;;  %v8875_v62 = vcombine.high %v380_v57, %v384_v58  ;;  %v387_v63 = vld [vmem:[%s10331_s14 + $0x180] sm:$0xff]  ;;  %v388_v1 = vld [vmem:[%s10331_s14 + $0x188] sm:$0xff]  ;;  %v8872_v3 = vcombine.low %v379_v55, %v383_v56  ;;  %v8874_v4 = vcombine.low %v380_v57, %v384_v58 }
  0x3c   : > { %6568 = vmatpush1.bf16.msra.mxu0 %v8848_v43  ;;  %6912 = vmatpush1.bf16.msra.mxu1 %v8850_v44  ;;  %v391_v0 = vld [vmem:[%s10331_s14 + $0x1a0] sm:$0xff]  ;;  %v392_v2 = vld [vmem:[%s10331_s14 + $0x1a8] sm:$0xff] }
  0x3d   : > { %6569 = vmatprep.subr.bf16.mxu0 %v8857_v45  ;;  %6913 = vmatprep.subr.bf16.mxu1 %v8859_v46  ;;  %v8881_v5 = vcombine.high %v387_v63, %v391_v0  ;;  %v10365_v6 = vld [vmem:[%s10333_s15] sm:$0xff]  ;;  %v8883_v8 = vcombine.high %v388_v1, %v392_v2  ;;  %v396_v12 = vld [vmem:[%s10331_s14 + $0x1c8] sm:$0xff]  ;;  %v8880_v14 = vcombine.low %v387_v63, %v391_v0 }
  0x3e   : > { %v10368_v7 = vld [vmem:[%s10333_s15 + $0x40] sm:$0xff]  ;;  %v400_v13 = vld [vmem:[%s10331_s14 + $0x1e8] sm:$0xff]  ;;  %v8882_v15 = vcombine.low %v388_v1, %v392_v2 }
  0x3f   : > { %v395_v9 = vld [vmem:[%s10331_s14 + $0x1c0] sm:$0xff]  ;;  %v10374_v11 = vcombine.high %v10365_v6, %v10368_v7  ;;  %v8891_v17 = vcombine.high %v396_v12, %v400_v13  ;;  %v404_v20 = vld [vmem:[%s10331_s14 + $0x208] sm:$0xff]  ;;  %v8890_v23 = vcombine.low %v396_v12, %v400_v13 }
  0x40   : > { %6570 = vmatpush1.bf16.msra.mxu0 %v8856_v51  ;;  %6914 = vmatpush1.bf16.msra.mxu1 %v8858_v52  ;;  %v399_v10 = vld [vmem:[%s10331_s14 + $0x1e0] sm:$0xff]  ;;  %v408_v21 = vld [vmem:[%s10331_s14 + $0x228] sm:$0xff] }
  0x41   : > { %6571 = vmatprep.subr.bf16.mxu0 %v8865_v53  ;;  %6915 = vmatprep.subr.bf16.mxu1 %v8867_v54  ;;  %v8889_v16 = vcombine.high %v395_v9, %v399_v10  ;;  %v403_v18 = vld [vmem:[%s10331_s14 + $0x200] sm:$0xff]  ;;  %v8888_v22 = vcombine.low %v395_v9, %v399_v10  ;;  %v8899_v25 = vcombine.high %v404_v20, %v408_v21  ;;  %v412_v28 = vld [vmem:[%s10331_s14 + $0x248] sm:$0xff] }
  0x42   : > { %6595 = vmatprep.mubr.bf16.mxu0 %v10374_v11  ;;  %v407_v19 = vld [vmem:[%s10331_s14 + $0x220] sm:$0xff]  ;;  %6939 = vmatprep.mubr.bf16.mxu1 %v10374_v11  ;;  %v416_v29 = vld [vmem:[%s10331_s14 + $0x268] sm:$0xff]  ;;  %v8898_v31 = vcombine.low %v404_v20, %v408_v21 }
  0x43   : > { %v8897_v24 = vcombine.high %v403_v18, %v407_v19  ;;  %v411_v26 = vld [vmem:[%s10331_s14 + $0x240] sm:$0xff]  ;;  %v8896_v30 = vcombine.low %v403_v18, %v407_v19  ;;  %v8907_v33 = vcombine.high %v412_v28, %v416_v29  ;;  %v420_v36 = vld [vmem:[%s10331_s14 + $0x288] sm:$0xff]  ;;  %v8906_v39 = vcombine.low %v412_v28, %v416_v29 }
  0x44   : > { %6572 = vmatpush1.bf16.msra.mxu0 %v8864_v59  ;;  %6916 = vmatpush1.bf16.msra.mxu1 %v8866_v60  ;;  %v415_v27 = vld [vmem:[%s10331_s14 + $0x260] sm:$0xff]  ;;  %v424_v37 = vld [vmem:[%s10331_s14 + $0x2a8] sm:$0xff] }
  0x45   : > { %6573 = vmatprep.subr.bf16.mxu0 %v8873_v61  ;;  %6917 = vmatprep.subr.bf16.mxu1 %v8875_v62  ;;  %v8905_v32 = vcombine.high %v411_v26, %v415_v27  ;;  %v419_v34 = vld [vmem:[%s10331_s14 + $0x280] sm:$0xff]  ;;  %v8904_v38 = vcombine.low %v411_v26, %v415_v27  ;;  %v8915_v41 = vcombine.high %v420_v36, %v424_v37  ;;  %v428_v44 = vld [vmem:[%s10331_s14 + $0x2c8] sm:$0xff] }
  0x46   : > { %v423_v35 = vld [vmem:[%s10331_s14 + $0x2a0] sm:$0xff]  ;;  %v432_v45 = vld [vmem:[%s10331_s14 + $0x2e8] sm:$0xff]  ;;  %v8914_v47 = vcombine.low %v420_v36, %v424_v37 }
  0x47   : > { %v8913_v40 = vcombine.high %v419_v34, %v423_v35  ;;  %v427_v42 = vld [vmem:[%s10331_s14 + $0x2c0] sm:$0xff]  ;;  %v8912_v46 = vcombine.low %v419_v34, %v423_v35  ;;  %v8923_v49 = vcombine.high %v428_v44, %v432_v45  ;;  %v436_v52 = vld [vmem:[%s10331_s14 + $0x308] sm:$0xff]  ;;  %v8922_v55 = vcombine.low %v428_v44, %v432_v45 }
  0x48   : > { %6574 = vmatpush1.bf16.msra.mxu0 %v8872_v3  ;;  %6918 = vmatpush1.bf16.msra.mxu1 %v8874_v4  ;;  %v431_v43 = vld [vmem:[%s10331_s14 + $0x2e0] sm:$0xff]  ;;  %v440_v53 = vld [vmem:[%s10331_s14 + $0x328] sm:$0xff] }
  0x49   : > { %6575 = vmatprep.subr.bf16.mxu0 %v8881_v5  ;;  %6919 = vmatprep.subr.bf16.mxu1 %v8883_v8  ;;  %v8921_v48 = vcombine.high %v427_v42, %v431_v43  ;;  %v435_v50 = vld [vmem:[%s10331_s14 + $0x300] sm:$0xff]  ;;  %v8920_v54 = vcombine.low %v427_v42, %v431_v43  ;;  %v8931_v57 = vcombine.high %v436_v52, %v440_v53  ;;  %v444_v60 = vld [vmem:[%s10331_s14 + $0x348] sm:$0xff] }
  0x4a   : > { %v439_v51 = vld [vmem:[%s10331_s14 + $0x320] sm:$0xff]  ;;  %v448_v61 = vld [vmem:[%s10331_s14 + $0x368] sm:$0xff]  ;;  %v8930_v63 = vcombine.low %v436_v52, %v440_v53 }
  0x4b   : > { %v8929_v56 = vcombine.high %v435_v50, %v439_v51  ;;  %v443_v58 = vld [vmem:[%s10331_s14 + $0x340] sm:$0xff]  ;;  %v8928_v62 = vcombine.low %v435_v50, %v439_v51  ;;  %v8939_v1 = vcombine.high %v444_v60, %v448_v61  ;;  %v452_v4 = vld [vmem:[%s10331_s14 + $0x388] sm:$0xff]  ;;  %v8938_v9 = vcombine.low %v444_v60, %v448_v61 }
  0x4c   : > { %6576 = vmatpush1.bf16.msra.mxu0 %v8880_v14  ;;  %6920 = vmatpush1.bf16.msra.mxu1 %v8882_v15  ;;  %v447_v59 = vld [vmem:[%s10331_s14 + $0x360] sm:$0xff]  ;;  %v456_v5 = vld [vmem:[%s10331_s14 + $0x3a8] sm:$0xff] }
  0x4d   : > { %6577 = vmatprep.subr.bf16.mxu0 %v8889_v16  ;;  %6921 = vmatprep.subr.bf16.mxu1 %v8891_v17  ;;  %v8937_v0 = vcombine.high %v443_v58, %v447_v59  ;;  %v451_v2 = vld [vmem:[%s10331_s14 + $0x380] sm:$0xff]  ;;  %v8936_v8 = vcombine.low %v443_v58, %v447_v59  ;;  %v8947_v12 = vcombine.high %v452_v4, %v456_v5  ;;  %v460_v15 = vld [vmem:[%s10331_s14 + $0x3c8] sm:$0xff] }
  0x4e   : > { %v455_v3 = vld [vmem:[%s10331_s14 + $0x3a0] sm:$0xff]  ;;  %v464_v16 = vld [vmem:[%s10331_s14 + $0x3e8] sm:$0xff]  ;;  %v8946_v18 = vcombine.low %v452_v4, %v456_v5 }
  0x4f   : > { %v8945_v10 = vcombine.high %v451_v2, %v455_v3  ;;  %v459_v13 = vld [vmem:[%s10331_s14 + $0x3c0] sm:$0xff]  ;;  %v8944_v17 = vcombine.low %v451_v2, %v455_v3  ;;  %v8955_v20 = vcombine.high %v460_v15, %v464_v16  ;;  %v8954_v26 = vcombine.low %v460_v15, %v464_v16  ;;  %v10425_v34 = vld [vmem:[%s10333_s15 + $0x8] sm:$0xff] }
  0x50   : > { %6578 = vmatpush1.bf16.msra.mxu0 %v8888_v22  ;;  %6922 = vmatpush1.bf16.msra.mxu1 %v8890_v23  ;;  %v463_v14 = vld [vmem:[%s10331_s14 + $0x3e0] sm:$0xff]  ;;  %v468_v23 = vld [vmem:[%s10331_s14 + $0x408] sm:$0xff] }
  0x51   : > { %6579 = vmatprep.subr.bf16.mxu0 %v8897_v24  ;;  %6923 = vmatprep.subr.bf16.mxu1 %v8899_v25  ;;  %v8953_v19 = vcombine.high %v459_v13, %v463_v14  ;;  %v467_v21 = vld [vmem:[%s10331_s14 + $0x400] sm:$0xff]  ;;  %v472_v24 = vld [vmem:[%s10331_s14 + $0x428] sm:$0xff]  ;;  %v8952_v25 = vcombine.low %v459_v13, %v463_v14 }
  0x52   : > { %v471_v22 = vld [vmem:[%s10331_s14 + $0x420] sm:$0xff]  ;;  %v8963_v28 = vcombine.high %v468_v23, %v472_v24  ;;  %v10428_v35 = vld [vmem:[%s10333_s15 + $0x48] sm:$0xff]  ;;  %v8962_v37 = vcombine.low %v468_v23, %v472_v24 }
  0x53   : > { %v8961_v27 = vcombine.high %v467_v21, %v471_v22  ;;  %v475_v29 = vld [vmem:[%s10331_s14 + $0x440] sm:$0xff]  ;;  %v8960_v36 = vcombine.low %v467_v21, %v471_v22  ;;  %v488_v42 = vld [vmem:[%s10331_s14 + $0x4a8] sm:$0xff] }
  0x54   : > { %6580 = vmatpush1.bf16.msra.mxu0 %v8896_v30  ;;  %6924 = vmatpush1.bf16.msra.mxu1 %v8898_v31  ;;  %v479_v30 = vld [vmem:[%s10331_s14 + $0x460] sm:$0xff]  ;;  %v476_v31 = vld [vmem:[%s10331_s14 + $0x448] sm:$0xff] }
  0x55   : > { %6581 = vmatprep.subr.bf16.mxu0 %v8905_v32  ;;  %6925 = vmatprep.subr.bf16.mxu1 %v8907_v33  ;;  %v10421_v32 = vcombine.low %v10365_v6, %v10368_v7  ;;  %v480_v33 = vld [vmem:[%s10331_s14 + $0x468] sm:$0xff]  ;;  %v487_v6 = vld [vmem:[%s10331_s14 + $0x4a0] sm:$0xff]  ;;  %v10434_v7 = vcombine.high %v10425_v34, %v10428_v35  ;;  %v8968_v43 = vcombine.low %v475_v29, %v479_v30 }
  0x56   : > { %v8970_v44 = vcombine.low %v476_v31, %v480_v33  ;;  %v496_v50 = vld [vmem:[%s10331_s14 + $0x4e8] sm:$0xff] }
  0x57   : > { %v504_v58 = vld [vmem:[%s10331_s14 + $0x528] sm:$0xff] }
  0x58   : > { %6582 = vmatpush1.bf16.msra.mxu0 %v8904_v38  ;;  %6926 = vmatpush1.bf16.msra.mxu1 %v8906_v39  ;;  %v8969_v38 = vcombine.high %v475_v29, %v479_v30  ;;  %v8971_v39 = vcombine.high %v476_v31, %v480_v33  ;;  %v512_v2 = vld [vmem:[%s10331_s14 + $0x568] sm:$0xff] }
  0x59   : > { %6583 = vmatprep.subr.bf16.mxu0 %v8913_v40  ;;  %6927 = vmatprep.subr.bf16.mxu1 %v8915_v41  ;;  %v483_v40 = vld [vmem:[%s10331_s14 + $0x480] sm:$0xff]  ;;  %v484_v41 = vld [vmem:[%s10331_s14 + $0x488] sm:$0xff] }
  0x5a   : > { %v8977_v45 = vcombine.high %v483_v40, %v487_v6  ;;  %v8976_v51 = vcombine.low %v483_v40, %v487_v6  ;;  %v8978_v52 = vcombine.low %v484_v41, %v488_v42  ;;  %v520_v13 = vld [vmem:[%s10331_s14 + $0x5a8] sm:$0xff] }
  0x5b   : > { %v528_v21 = vld [vmem:[%s10331_s14 + $0x5e8] sm:$0xff] }
  0x5c   : > { %6584 = vmatpush1.bf16.msra.mxu0 %v8912_v46  ;;  %6928 = vmatpush1.bf16.msra.mxu1 %v8914_v47  ;;  %v8979_v46 = vcombine.high %v484_v41, %v488_v42  ;;  %v491_v47 = vld [vmem:[%s10331_s14 + $0x4c0] sm:$0xff]  ;;  %v536_v29 = vld [vmem:[%s10331_s14 + $0x628] sm:$0xff] }
  0x5d   : > { %6585 = vmatprep.subr.bf16.mxu0 %v8921_v48  ;;  %6929 = vmatprep.subr.bf16.mxu1 %v8923_v49  ;;  %v495_v48 = vld [vmem:[%s10331_s14 + $0x4e0] sm:$0xff]  ;;  %v492_v49 = vld [vmem:[%s10331_s14 + $0x4c8] sm:$0xff] }
  0x5e   : > { %v8985_v53 = vcombine.high %v491_v47, %v495_v48  ;;  %v8984_v59 = vcombine.low %v491_v47, %v495_v48  ;;  %v8986_v60 = vcombine.low %v492_v49, %v496_v50  ;;  %v544_v40 = vld [vmem:[%s10331_s14 + $0x668] sm:$0xff] }
  0x5f   : > { %v552_v47 = vld [vmem:[%s10331_s14 + $0x6a8] sm:$0xff] }
  0x60   : > { %6586 = vmatpush1.bf16.msra.mxu0 %v8920_v54  ;;  %6930 = vmatpush1.bf16.msra.mxu1 %v8922_v55  ;;  %v8987_v54 = vcombine.high %v492_v49, %v496_v50  ;;  %v499_v55 = vld [vmem:[%s10331_s14 + $0x500] sm:$0xff] }
  0x61   : > { %6587 = vmatprep.subr.bf16.mxu0 %v8929_v56  ;;  %6931 = vmatprep.subr.bf16.mxu1 %v8931_v57  ;;  %v503_v56 = vld [vmem:[%s10331_s14 + $0x520] sm:$0xff]  ;;  %v500_v57 = vld [vmem:[%s10331_s14 + $0x508] sm:$0xff] }
  0x62   : > { %v8993_v61 = vcombine.high %v499_v55, %v503_v56  ;;  %v8992_v3 = vcombine.low %v499_v55, %v503_v56  ;;  %v8994_v4 = vcombine.low %v500_v57, %v504_v58  ;;  %v560_v55 = vld [vmem:[%s10331_s14 + $0x6e8] sm:$0xff] }
  0x64   : > { %6588 = vmatpush1.bf16.msra.mxu0 %v8928_v62  ;;  %6932 = vmatpush1.bf16.msra.mxu1 %v8930_v63  ;;  %v8995_v62 = vcombine.high %v500_v57, %v504_v58  ;;  %v507_v63 = vld [vmem:[%s10331_s14 + $0x540] sm:$0xff] }
  0x65   : > { %6589 = vmatprep.subr.bf16.mxu0 %v8937_v0  ;;  %6933 = vmatprep.subr.bf16.mxu1 %v8939_v1  ;;  %v511_v0 = vld [vmem:[%s10331_s14 + $0x560] sm:$0xff]  ;;  %v508_v1 = vld [vmem:[%s10331_s14 + $0x548] sm:$0xff] }
  0x66   : > { %v9001_v5 = vcombine.high %v507_v63, %v511_v0  ;;  %v9000_v14 = vcombine.low %v507_v63, %v511_v0  ;;  %v9002_v15 = vcombine.low %v508_v1, %v512_v2  ;;  %v568_v63 = vld [vmem:[%s10331_s14 + $0x728] sm:$0xff] }
  0x68   : > { %6590 = vmatpush1.bf16.msra.mxu0 %v8936_v8  ;;  %6934 = vmatpush1.bf16.msra.mxu1 %v8938_v9  ;;  %v9003_v8 = vcombine.high %v508_v1, %v512_v2  ;;  %v515_v9 = vld [vmem:[%s10331_s14 + $0x580] sm:$0xff] }
  0x69   : > { %6591 = vmatprep.subr.bf16.mxu0 %v8945_v10  ;;  %6935 = vmatprep.subr.bf16.mxu1 %v8947_v12  ;;  %v519_v10 = vld [vmem:[%s10331_s14 + $0x5a0] sm:$0xff]  ;;  %v516_v12 = vld [vmem:[%s10331_s14 + $0x588] sm:$0xff] }
  0x6a   : > { %v9009_v16 = vcombine.high %v515_v9, %v519_v10  ;;  %v9008_v22 = vcombine.low %v515_v9, %v519_v10  ;;  %v9010_v23 = vcombine.low %v516_v12, %v520_v13  ;;  %v576_v9 = vld [vmem:[%s10331_s14 + $0x768] sm:$0xff] }
  0x6c   : > { %6592 = vmatpush1.bf16.msra.mxu0 %v8944_v17  ;;  %6936 = vmatpush1.bf16.msra.mxu1 %v8946_v18  ;;  %v9011_v17 = vcombine.high %v516_v12, %v520_v13  ;;  %v523_v18 = vld [vmem:[%s10331_s14 + $0x5c0] sm:$0xff] }
  0x6d   : > { %6593 = vmatprep.subr.bf16.mxu0 %v8953_v19  ;;  %6937 = vmatprep.subr.bf16.mxu1 %v8955_v20  ;;  %v527_v19 = vld [vmem:[%s10331_s14 + $0x5e0] sm:$0xff]  ;;  %v524_v20 = vld [vmem:[%s10331_s14 + $0x5c8] sm:$0xff] }
  0x6e   : > { %v9017_v24 = vcombine.high %v523_v18, %v527_v19  ;;  %v9016_v30 = vcombine.low %v523_v18, %v527_v19  ;;  %v9018_v31 = vcombine.low %v524_v20, %v528_v21  ;;  %v584_v18 = vld [vmem:[%s10331_s14 + $0x7a8] sm:$0xff] }
  0x70   : > { %6594 = vmatpush1.bf16.msra.mxu0 %v8952_v25  ;;  %6938 = vmatpush1.bf16.msra.mxu1 %v8954_v26  ;;  %v9019_v25 = vcombine.high %v524_v20, %v528_v21  ;;  %v531_v26 = vld [vmem:[%s10331_s14 + $0x600] sm:$0xff] }
  0x71   : > { %6606 = vmatprep.subr.bf16.mxu0 %v8961_v27  ;;  %6950 = vmatprep.subr.bf16.mxu1 %v8963_v28  ;;  %v535_v27 = vld [vmem:[%s10331_s14 + $0x620] sm:$0xff]  ;;  %v532_v28 = vld [vmem:[%s10331_s14 + $0x608] sm:$0xff] }
  0x72   : > { %v9025_v33 = vcombine.high %v531_v26, %v535_v27  ;;  %v9024_v6 = vcombine.low %v531_v26, %v535_v27  ;;  %v9026_v41 = vcombine.low %v532_v28, %v536_v29  ;;  %v592_v26 = vld [vmem:[%s10331_s14 + $0x7e8] sm:$0xff] }
  0x73   : > { %6596 = vmatmul.mubr.bf16.vlgmr.msra.gmra.mrb[0].mxu0 %v10421_v32  ;;  %6940 = vmatmul.mubr.bf16.vlgmr.msra.gmra.mrb[0].mxu1 %v10421_v32 }
  0x74   : > { %6607 = vmatpush1.bf16.msra.mxu0 %v8960_v36  ;;  %6951 = vmatpush1.bf16.msra.mxu1 %v8962_v37  ;;  %v9027_v36 = vcombine.high %v532_v28, %v536_v29  ;;  %v539_v37 = vld [vmem:[%s10331_s14 + $0x640] sm:$0xff] }
  0x75   : > { %6608 = vmatprep.subr.bf16.mxu0 %v8969_v38  ;;  %6952 = vmatprep.subr.bf16.mxu1 %v8971_v39  ;;  %v543_v38 = vld [vmem:[%s10331_s14 + $0x660] sm:$0xff]  ;;  %v540_v39 = vld [vmem:[%s10331_s14 + $0x648] sm:$0xff] }
  0x76   : > { %6638 = vmatprep.mubr.bf16.mxu0 %v10434_v7  ;;  %6982 = vmatprep.mubr.bf16.mxu1 %v10434_v7  ;;  %v9033_v42 = vcombine.high %v539_v37, %v543_v38  ;;  %v9032_v48 = vcombine.low %v539_v37, %v543_v38  ;;  %v9034_v49 = vcombine.low %v540_v39, %v544_v40  ;;  %v600_v37 = vld [vmem:[%s10331_s14 + $0x828] sm:$0xff] }
  0x78   : > { %6609 = vmatpush1.bf16.msra.mxu0 %v8968_v43  ;;  %6953 = vmatpush1.bf16.msra.mxu1 %v8970_v44  ;;  %v9035_v43 = vcombine.high %v540_v39, %v544_v40  ;;  %v547_v44 = vld [vmem:[%s10331_s14 + $0x680] sm:$0xff] }
  0x79   : > { %6610 = vmatprep.subr.bf16.mxu0 %v8977_v45  ;;  %6954 = vmatprep.subr.bf16.mxu1 %v8979_v46  ;;  %v551_v45 = vld [vmem:[%s10331_s14 + $0x6a0] sm:$0xff]  ;;  %v548_v46 = vld [vmem:[%s10331_s14 + $0x688] sm:$0xff] }
  0x7a   : > { %v9041_v50 = vcombine.high %v547_v44, %v551_v45  ;;  %v9040_v56 = vcombine.low %v547_v44, %v551_v45  ;;  %v9042_v57 = vcombine.low %v548_v46, %v552_v47  ;;  %v10503_v44 = vcombine.low %v10425_v34, %v10428_v35  ;;  %v608_v45 = vld [vmem:[%s10331_s14 + $0x868] sm:$0xff]  ;;  %v615_v34 = vld [vmem:[%s10331_s14 + $0x8a0] sm:$0xff] }
  0x7c   : > { %6611 = vmatpush1.bf16.msra.mxu0 %v8976_v51  ;;  %6955 = vmatpush1.bf16.msra.mxu1 %v8978_v52  ;;  %v9043_v51 = vcombine.high %v548_v46, %v552_v47  ;;  %v555_v52 = vld [vmem:[%s10331_s14 + $0x6c0] sm:$0xff]  ;;  %v10507_v46 = vld [vmem:[%s10333_s15 + $0x10] sm:$0xff] }
  0x7d   : > { %6612 = vmatprep.subr.bf16.mxu0 %v8985_v53  ;;  %6956 = vmatprep.subr.bf16.mxu1 %v8987_v54  ;;  %v559_v53 = vld [vmem:[%s10331_s14 + $0x6e0] sm:$0xff]  ;;  %v556_v54 = vld [vmem:[%s10331_s14 + $0x6c8] sm:$0xff]  ;;  %v10510_v47 = vld [vmem:[%s10333_s15 + $0x50] sm:$0xff] }
  0x7e   : > { %v9049_v58 = vcombine.high %v555_v52, %v559_v53  ;;  %v9048_v0 = vcombine.low %v555_v52, %v559_v53  ;;  %v9050_v1 = vcombine.low %v556_v54, %v560_v55  ;;  %v611_v52 = vld [vmem:[%s10331_s14 + $0x880] sm:$0xff]  ;;  %v10516_v35 = vcombine.high %v10507_v46, %v10510_v47  ;;  %v612_v53 = vld [vmem:[%s10331_s14 + $0x888] sm:$0xff] }
  0x80   : > { %6613 = vmatpush1.bf16.msra.mxu0 %v8984_v59  ;;  %6957 = vmatpush1.bf16.msra.mxu1 %v8986_v60  ;;  %v9051_v59 = vcombine.high %v556_v54, %v560_v55  ;;  %v563_v60 = vld [vmem:[%s10331_s14 + $0x700] sm:$0xff]  ;;  %v616_v54 = vld [vmem:[%s10331_s14 + $0x8a8] sm:$0xff] }
  0x81   : > { %6614 = vmatprep.subr.bf16.mxu0 %v8993_v61  ;;  %6958 = vmatprep.subr.bf16.mxu1 %v8995_v62  ;;  %v567_v61 = vld [vmem:[%s10331_s14 + $0x720] sm:$0xff]  ;;  %v564_v62 = vld [vmem:[%s10331_s14 + $0x708] sm:$0xff] }
  0x82   : > { %v9057_v2 = vcombine.high %v563_v60, %v567_v61  ;;  %v9056_v10 = vcombine.low %v563_v60, %v567_v61  ;;  %v9058_v12 = vcombine.low %v564_v62, %v568_v63  ;;  %v623_v60 = vld [vmem:[%s10331_s14 + $0x8e0] sm:$0xff]  ;;  %v620_v61 = vld [vmem:[%s10331_s14 + $0x8c8] sm:$0xff] }
  0x84   : > { %6615 = vmatpush1.bf16.msra.mxu0 %v8992_v3  ;;  %6959 = vmatpush1.bf16.msra.mxu1 %v8994_v4  ;;  %v9059_v3 = vcombine.high %v564_v62, %v568_v63  ;;  %v571_v4 = vld [vmem:[%s10331_s14 + $0x740] sm:$0xff]  ;;  %v624_v62 = vld [vmem:[%s10331_s14 + $0x8e8] sm:$0xff]  ;;  %v9104_v63 = vcombine.low %v611_v52, %v615_v34 }
  0x85   : > { %6616 = vmatprep.subr.bf16.mxu0 %v9001_v5  ;;  %6960 = vmatprep.subr.bf16.mxu1 %v9003_v8  ;;  %v575_v5 = vld [vmem:[%s10331_s14 + $0x760] sm:$0xff]  ;;  %v572_v8 = vld [vmem:[%s10331_s14 + $0x748] sm:$0xff] }
  0x86   : > { %v9065_v13 = vcombine.high %v571_v4, %v575_v5  ;;  %v9064_v19 = vcombine.low %v571_v4, %v575_v5  ;;  %v9066_v20 = vcombine.low %v572_v8, %v576_v9  ;;  %v631_v4 = vld [vmem:[%s10331_s14 + $0x920] sm:$0xff]  ;;  %v628_v5 = vld [vmem:[%s10331_s14 + $0x908] sm:$0xff] }
  0x88   : > { %6617 = vmatpush1.bf16.msra.mxu0 %v9000_v14  ;;  %6961 = vmatpush1.bf16.msra.mxu1 %v9002_v15  ;;  %v9067_v14 = vcombine.high %v572_v8, %v576_v9  ;;  %v579_v15 = vld [vmem:[%s10331_s14 + $0x780] sm:$0xff]  ;;  %v632_v8 = vld [vmem:[%s10331_s14 + $0x928] sm:$0xff] }
  0x89   : > { %6618 = vmatprep.subr.bf16.mxu0 %v9009_v16  ;;  %6962 = vmatprep.subr.bf16.mxu1 %v9011_v17  ;;  %v583_v16 = vld [vmem:[%s10331_s14 + $0x7a0] sm:$0xff]  ;;  %v580_v17 = vld [vmem:[%s10331_s14 + $0x788] sm:$0xff] }
  0x8a   : > { %v9073_v21 = vcombine.high %v579_v15, %v583_v16  ;;  %v9072_v27 = vcombine.low %v579_v15, %v583_v16  ;;  %v9074_v28 = vcombine.low %v580_v17, %v584_v18  ;;  %v639_v15 = vld [vmem:[%s10331_s14 + $0x960] sm:$0xff]  ;;  %v636_v16 = vld [vmem:[%s10331_s14 + $0x948] sm:$0xff] }
  0x8c   : > { %6619 = vmatpush1.bf16.msra.mxu0 %v9008_v22  ;;  %6963 = vmatpush1.bf16.msra.mxu1 %v9010_v23  ;;  %v9075_v22 = vcombine.high %v580_v17, %v584_v18  ;;  %v587_v23 = vld [vmem:[%s10331_s14 + $0x7c0] sm:$0xff]  ;;  %v640_v17 = vld [vmem:[%s10331_s14 + $0x968] sm:$0xff] }
  0x8d   : > { %6620 = vmatprep.subr.bf16.mxu0 %v9017_v24  ;;  %6964 = vmatprep.subr.bf16.mxu1 %v9019_v25  ;;  %v591_v24 = vld [vmem:[%s10331_s14 + $0x7e0] sm:$0xff]  ;;  %v588_v25 = vld [vmem:[%s10331_s14 + $0x7c8] sm:$0xff] }
  0x8e   : > { %v9081_v29 = vcombine.high %v587_v23, %v591_v24  ;;  %v9080_v38 = vcombine.low %v587_v23, %v591_v24  ;;  %v9082_v39 = vcombine.low %v588_v25, %v592_v26  ;;  %v647_v23 = vld [vmem:[%s10331_s14 + $0x9a0] sm:$0xff]  ;;  %v644_v24 = vld [vmem:[%s10331_s14 + $0x988] sm:$0xff] }
  0x90   : > { %6621 = vmatpush1.bf16.msra.mxu0 %v9016_v30  ;;  %6965 = vmatpush1.bf16.msra.mxu1 %v9018_v31  ;;  %v9083_v30 = vcombine.high %v588_v25, %v592_v26  ;;  %v595_v31 = vld [vmem:[%s10331_s14 + $0x800] sm:$0xff]  ;;  %v648_v25 = vld [vmem:[%s10331_s14 + $0x9a8] sm:$0xff] }
  0x91   : > { %6622 = vmatprep.subr.bf16.mxu0 %v9025_v33  ;;  %6966 = vmatprep.subr.bf16.mxu1 %v9027_v36  ;;  %v599_v33 = vld [vmem:[%s10331_s14 + $0x820] sm:$0xff]  ;;  %v596_v36 = vld [vmem:[%s10331_s14 + $0x808] sm:$0xff] }
  0x92   : > { %v9089_v40 = vcombine.high %v595_v31, %v599_v33 }
  0x94   : > { %6623 = vmatpush1.bf16.msra.mxu0 %v9024_v6  ;;  %6967 = vmatpush1.bf16.msra.mxu1 %v9026_v41  ;;  %v9091_v6 = vcombine.high %v596_v36, %v600_v37  ;;  %v603_v41 = vld [vmem:[%s10331_s14 + $0x840] sm:$0xff] }
  0x95   : > { %6624 = vmatprep.subr.bf16.mxu0 %v9033_v42  ;;  %6968 = vmatprep.subr.bf16.mxu1 %v9035_v43  ;;  %v607_v42 = vld [vmem:[%s10331_s14 + $0x860] sm:$0xff]  ;;  %v604_v43 = vld [vmem:[%s10331_s14 + $0x848] sm:$0xff] }
  0x96   : > { %v9096_v55 = vcombine.low %v603_v41, %v607_v42 }
  0x98   : > { %6625 = vmatpush1.bf16.msra.mxu0 %v9032_v48  ;;  %6969 = vmatpush1.bf16.msra.mxu1 %v9034_v49  ;;  %v9088_v48 = vcombine.low %v595_v31, %v599_v33  ;;  %v9090_v49 = vcombine.low %v596_v36, %v600_v37  ;;  %v655_v31 = vld [vmem:[%s10331_s14 + $0x9e0] sm:$0xff]  ;;  %v652_v33 = vld [vmem:[%s10331_s14 + $0x9c8] sm:$0xff] }
  0x99   : > { %6626 = vmatprep.subr.bf16.mxu0 %v9041_v50  ;;  %6970 = vmatprep.subr.bf16.mxu1 %v9043_v51  ;;  %v9097_v50 = vcombine.high %v603_v41, %v607_v42  ;;  %v9099_v51 = vcombine.high %v604_v43, %v608_v45  ;;  %v656_v36 = vld [vmem:[%s10331_s14 + $0x9e8] sm:$0xff]  ;;  %v663_v41 = vld [vmem:[%s10331_s14 + $0xa20] sm:$0xff] }
  0x9a   : > { %v660_v42 = vld [vmem:[%s10331_s14 + $0xa08] sm:$0xff] }
  0x9c   : > { %6627 = vmatpush1.bf16.msra.mxu0 %v9040_v56  ;;  %6971 = vmatpush1.bf16.msra.mxu1 %v9042_v57  ;;  %v9098_v56 = vcombine.low %v604_v43, %v608_v45  ;;  %v9105_v57 = vcombine.high %v611_v52, %v615_v34  ;;  %v664_v43 = vld [vmem:[%s10331_s14 + $0xa28] sm:$0xff]  ;;  %v671_v52 = vld [vmem:[%s10331_s14 + $0xa60] sm:$0xff] }
  0x9d   : > { %6628 = vmatprep.subr.bf16.mxu0 %v9049_v58  ;;  %6972 = vmatprep.subr.bf16.mxu1 %v9051_v59  ;;  %v9107_v58 = vcombine.high %v612_v53, %v616_v54  ;;  %v619_v59 = vld [vmem:[%s10331_s14 + $0x8c0] sm:$0xff]  ;;  %v668_v34 = vld [vmem:[%s10331_s14 + $0xa48] sm:$0xff] }
  0x9e   : > { %v9112_v9 = vcombine.low %v619_v59, %v623_v60 }
  0xa0   : > { %6629 = vmatpush1.bf16.msra.mxu0 %v9048_v0  ;;  %6973 = vmatpush1.bf16.msra.mxu1 %v9050_v1  ;;  %v9106_v0 = vcombine.low %v612_v53, %v616_v54  ;;  %v9113_v1 = vcombine.high %v619_v59, %v623_v60  ;;  %v672_v53 = vld [vmem:[%s10331_s14 + $0xa68] sm:$0xff]  ;;  %v679_v59 = vld [vmem:[%s10331_s14 + $0xaa0] sm:$0xff] }
  0xa1   : > { %6630 = vmatprep.subr.bf16.mxu0 %v9057_v2  ;;  %6974 = vmatprep.subr.bf16.mxu1 %v9059_v3  ;;  %v9115_v2 = vcombine.high %v620_v61, %v624_v62  ;;  %v627_v3 = vld [vmem:[%s10331_s14 + $0x900] sm:$0xff]  ;;  %v676_v60 = vld [vmem:[%s10331_s14 + $0xa88] sm:$0xff] }
  0xa2   : > { %v9120_v18 = vcombine.low %v627_v3, %v631_v4 }
  0xa4   : > { %6631 = vmatpush1.bf16.msra.mxu0 %v9056_v10  ;;  %6975 = vmatpush1.bf16.msra.mxu1 %v9058_v12  ;;  %v9114_v10 = vcombine.low %v620_v61, %v624_v62  ;;  %v9121_v12 = vcombine.high %v627_v3, %v631_v4  ;;  %v680_v61 = vld [vmem:[%s10331_s14 + $0xaa8] sm:$0xff]  ;;  %v687_v3 = vld [vmem:[%s10331_s14 + $0xae0] sm:$0xff] }
  0xa5   : > { %6632 = vmatprep.subr.bf16.mxu0 %v9065_v13  ;;  %6976 = vmatprep.subr.bf16.mxu1 %v9067_v14  ;;  %v9123_v13 = vcombine.high %v628_v5, %v632_v8  ;;  %v635_v14 = vld [vmem:[%s10331_s14 + $0x940] sm:$0xff]  ;;  %v684_v4 = vld [vmem:[%s10331_s14 + $0xac8] sm:$0xff] }
  0xa6   : > { %v9128_v26 = vcombine.low %v635_v14, %v639_v15 }
  0xa8   : > { %6633 = vmatpush1.bf16.msra.mxu0 %v9064_v19  ;;  %6977 = vmatpush1.bf16.msra.mxu1 %v9066_v20  ;;  %v9122_v19 = vcombine.low %v628_v5, %v632_v8  ;;  %v9129_v20 = vcombine.high %v635_v14, %v639_v15  ;;  %v688_v5 = vld [vmem:[%s10331_s14 + $0xae8] sm:$0xff]  ;;  %v695_v14 = vld [vmem:[%s10331_s14 + $0xb20] sm:$0xff] }
  0xa9   : > { %6634 = vmatprep.subr.bf16.mxu0 %v9073_v21  ;;  %6978 = vmatprep.subr.bf16.mxu1 %v9075_v22  ;;  %v9131_v21 = vcombine.high %v636_v16, %v640_v17  ;;  %v643_v22 = vld [vmem:[%s10331_s14 + $0x980] sm:$0xff]  ;;  %v692_v15 = vld [vmem:[%s10331_s14 + $0xb08] sm:$0xff] }
  0xaa   : > { %v9136_v37 = vcombine.low %v643_v22, %v647_v23 }
  0xac   : > { %6635 = vmatpush1.bf16.msra.mxu0 %v9072_v27  ;;  %6979 = vmatpush1.bf16.msra.mxu1 %v9074_v28  ;;  %v9130_v27 = vcombine.low %v636_v16, %v640_v17  ;;  %v9137_v28 = vcombine.high %v643_v22, %v647_v23  ;;  %v696_v16 = vld [vmem:[%s10331_s14 + $0xb28] sm:$0xff]  ;;  %v703_v22 = vld [vmem:[%s10331_s14 + $0xb60] sm:$0xff] }
  0xad   : > { %6636 = vmatprep.subr.bf16.mxu0 %v9081_v29  ;;  %6980 = vmatprep.subr.bf16.mxu1 %v9083_v30  ;;  %v9139_v29 = vcombine.high %v644_v24, %v648_v25  ;;  %v651_v30 = vld [vmem:[%s10331_s14 + $0x9c0] sm:$0xff]  ;;  %v700_v23 = vld [vmem:[%s10331_s14 + $0xb48] sm:$0xff] }
  0xae   : > { %v9144_v45 = vcombine.low %v651_v30, %v655_v31 }
  0xb0   : > { %6637 = vmatpush1.bf16.msra.mxu0 %v9080_v38  ;;  %6981 = vmatpush1.bf16.msra.mxu1 %v9082_v39  ;;  %v9138_v38 = vcombine.low %v644_v24, %v648_v25  ;;  %v9145_v39 = vcombine.high %v651_v30, %v655_v31  ;;  %v704_v24 = vld [vmem:[%s10331_s14 + $0xb68] sm:$0xff]  ;;  %v711_v30 = vld [vmem:[%s10331_s14 + $0xba0] sm:$0xff] }
  0xb1   : > { %6649 = vmatprep.subr.bf16.mxu0 %v9089_v40  ;;  %6993 = vmatprep.subr.bf16.mxu1 %v9091_v6  ;;  %v9147_v40 = vcombine.high %v652_v33, %v656_v36  ;;  %v659_v6 = vld [vmem:[%s10331_s14 + $0xa00] sm:$0xff]  ;;  %v708_v31 = vld [vmem:[%s10331_s14 + $0xb88] sm:$0xff] }
  0xb2   : > { %v9152_v54 = vcombine.low %v659_v6, %v663_v41 }
  0xb3   : > { %6639 = vmatmul.mubr.bf16.vlgmr.msra.gmra.mrb[0].mxu0 %v10503_v44  ;;  %6983 = vmatmul.mubr.bf16.vlgmr.msra.gmra.mrb[0].mxu1 %v10503_v44 }
  0xb4   : > { %6650 = vmatpush1.bf16.msra.mxu0 %v9088_v48  ;;  %6994 = vmatpush1.bf16.msra.mxu1 %v9090_v49  ;;  %v9146_v48 = vcombine.low %v652_v33, %v656_v36  ;;  %v9153_v49 = vcombine.high %v659_v6, %v663_v41  ;;  %v712_v33 = vld [vmem:[%s10331_s14 + $0xba8] sm:$0xff]  ;;  %v719_v6 = vld [vmem:[%s10331_s14 + $0xbe0] sm:$0xff] }
  0xb5   : > { %6651 = vmatprep.subr.bf16.mxu0 %v9097_v50  ;;  %6995 = vmatprep.subr.bf16.mxu1 %v9099_v51  ;;  %v9155_v50 = vcombine.high %v660_v42, %v664_v43  ;;  %v667_v51 = vld [vmem:[%s10331_s14 + $0xa40] sm:$0xff]  ;;  %v716_v41 = vld [vmem:[%s10331_s14 + $0xbc8] sm:$0xff] }
  0xb6   : > { %6681 = vmatprep.mubr.bf16.mxu0 %v10516_v35  ;;  %7025 = vmatprep.mubr.bf16.mxu1 %v10516_v35  ;;  %v9160_v62 = vcombine.low %v667_v51, %v671_v52 }
  0xb8   : > { %6652 = vmatpush1.bf16.msra.mxu0 %v9096_v55  ;;  %6996 = vmatpush1.bf16.msra.mxu1 %v9098_v56  ;;  %v9154_v55 = vcombine.low %v660_v42, %v664_v43  ;;  %v9161_v56 = vcombine.high %v667_v51, %v671_v52  ;;  %v720_v42 = vld [vmem:[%s10331_s14 + $0xbe8] sm:$0xff]  ;;  %v727_v51 = vld [vmem:[%s10331_s14 + $0xc20] sm:$0xff] }
  0xb9   : > { %6653 = vmatprep.subr.bf16.mxu0 %v9105_v57  ;;  %6997 = vmatprep.subr.bf16.mxu1 %v9107_v58  ;;  %v9163_v57 = vcombine.high %v668_v34, %v672_v53  ;;  %v675_v58 = vld [vmem:[%s10331_s14 + $0xa80] sm:$0xff]  ;;  %v724_v52 = vld [vmem:[%s10331_s14 + $0xc08] sm:$0xff] }
  0xba   : > { %v9168_v8 = vcombine.low %v675_v58, %v679_v59 }
  0xbc   : > { %6654 = vmatpush1.bf16.msra.mxu0 %v9104_v63  ;;  %6998 = vmatpush1.bf16.msra.mxu1 %v9106_v0  ;;  %v9162_v63 = vcombine.low %v668_v34, %v672_v53  ;;  %v9169_v0 = vcombine.high %v675_v58, %v679_v59  ;;  %v728_v34 = vld [vmem:[%s10331_s14 + $0xc28] sm:$0xff]  ;;  %v735_v58 = vld [vmem:[%s10331_s14 + $0xc60] sm:$0xff] }
  0xbd   : > { %6655 = vmatprep.subr.bf16.mxu0 %v9113_v1  ;;  %6999 = vmatprep.subr.bf16.mxu1 %v9115_v2  ;;  %v9171_v1 = vcombine.high %v676_v60, %v680_v61  ;;  %v683_v2 = vld [vmem:[%s10331_s14 + $0xac0] sm:$0xff]  ;;  %v732_v59 = vld [vmem:[%s10331_s14 + $0xc48] sm:$0xff] }
  0xbe   : > { %v9176_v17 = vcombine.low %v683_v2, %v687_v3 }
  0xc0   : > { %6656 = vmatpush1.bf16.msra.mxu0 %v9112_v9  ;;  %7000 = vmatpush1.bf16.msra.mxu1 %v9114_v10  ;;  %v9170_v9 = vcombine.low %v676_v60, %v680_v61  ;;  %v9177_v10 = vcombine.high %v683_v2, %v687_v3  ;;  %v10585_v60 = vcombine.low %v10507_v46, %v10510_v47  ;;  %v736_v61 = vld [vmem:[%s10331_s14 + $0xc68] sm:$0xff]  ;;  %v743_v46 = vld [vmem:[%s10331_s14 + $0xca0] sm:$0xff] }
  0xc1   : > { %6657 = vmatprep.subr.bf16.mxu0 %v9121_v12  ;;  %7001 = vmatprep.subr.bf16.mxu1 %v9123_v13  ;;  %v9179_v12 = vcombine.high %v684_v4, %v688_v5  ;;  %v691_v13 = vld [vmem:[%s10331_s14 + $0xb00] sm:$0xff]  ;;  %v9227_v3 = vcombine.high %v732_v59, %v736_v61 }
  0xc2   : > { %v9184_v25 = vcombine.low %v691_v13, %v695_v14 }
  0xc4   : > { %6658 = vmatpush1.bf16.msra.mxu0 %v9120_v18  ;;  %7002 = vmatpush1.bf16.msra.mxu1 %v9122_v19  ;;  %v9178_v18 = vcombine.low %v684_v4, %v688_v5  ;;  %v9185_v19 = vcombine.high %v691_v13, %v695_v14  ;;  %v739_v4 = vld [vmem:[%s10331_s14 + $0xc80] sm:$0xff]  ;;  %v740_v5 = vld [vmem:[%s10331_s14 + $0xc88] sm:$0xff] }
  0xc5   : > { %6659 = vmatprep.subr.bf16.mxu0 %v9129_v20  ;;  %7003 = vmatprep.subr.bf16.mxu1 %v9131_v21  ;;  %v9187_v20 = vcombine.high %v692_v15, %v696_v16  ;;  %v699_v21 = vld [vmem:[%s10331_s14 + $0xb40] sm:$0xff] }
  0xc6   : > { %v9192_v36 = vcombine.low %v699_v21, %v703_v22  ;;  %v747_v14 = vld [vmem:[%s10331_s14 + $0xcc0] sm:$0xff] }
  0xc8   : > { %6660 = vmatpush1.bf16.msra.mxu0 %v9128_v26  ;;  %7004 = vmatpush1.bf16.msra.mxu1 %v9130_v27  ;;  %v9186_v26 = vcombine.low %v692_v15, %v696_v16  ;;  %v9193_v27 = vcombine.high %v699_v21, %v703_v22  ;;  %v751_v15 = vld [vmem:[%s10331_s14 + $0xce0] sm:$0xff]  ;;  %v748_v16 = vld [vmem:[%s10331_s14 + $0xcc8] sm:$0xff] }
  0xc9   : > { %6661 = vmatprep.subr.bf16.mxu0 %v9137_v28  ;;  %7005 = vmatprep.subr.bf16.mxu1 %v9139_v29  ;;  %v9195_v28 = vcombine.high %v700_v23, %v704_v24  ;;  %v707_v29 = vld [vmem:[%s10331_s14 + $0xb80] sm:$0xff] }
  0xca   : > { %v9200_v43 = vcombine.low %v707_v29, %v711_v30  ;;  %v755_v22 = vld [vmem:[%s10331_s14 + $0xd00] sm:$0xff] }
  0xcc   : > { %6662 = vmatpush1.bf16.msra.mxu0 %v9136_v37  ;;  %7006 = vmatpush1.bf16.msra.mxu1 %v9138_v38  ;;  %v9194_v37 = vcombine.low %v700_v23, %v704_v24  ;;  %v9201_v38 = vcombine.high %v707_v29, %v711_v30  ;;  %v759_v23 = vld [vmem:[%s10331_s14 + $0xd20] sm:$0xff]  ;;  %v756_v24 = vld [vmem:[%s10331_s14 + $0xd08] sm:$0xff] }
  0xcd   : > { %6663 = vmatprep.subr.bf16.mxu0 %v9145_v39  ;;  %7007 = vmatprep.subr.bf16.mxu1 %v9147_v40  ;;  %v9203_v39 = vcombine.high %v708_v31, %v712_v33  ;;  %v715_v40 = vld [vmem:[%s10331_s14 + $0xbc0] sm:$0xff] }
  0xce   : > { %v9208_v53 = vcombine.low %v715_v40, %v719_v6  ;;  %v763_v30 = vld [vmem:[%s10331_s14 + $0xd40] sm:$0xff] }
  0xd0   : > { %6664 = vmatpush1.bf16.msra.mxu0 %v9144_v45  ;;  %7008 = vmatpush1.bf16.msra.mxu1 %v9146_v48  ;;  %v9202_v45 = vcombine.low %v708_v31, %v712_v33  ;;  %v9209_v48 = vcombine.high %v715_v40, %v719_v6  ;;  %v767_v31 = vld [vmem:[%s10331_s14 + $0xd60] sm:$0xff]  ;;  %v764_v33 = vld [vmem:[%s10331_s14 + $0xd48] sm:$0xff] }
  0xd1   : > { %6665 = vmatprep.subr.bf16.mxu0 %v9153_v49  ;;  %7009 = vmatprep.subr.bf16.mxu1 %v9155_v50  ;;  %v9211_v49 = vcombine.high %v716_v41, %v720_v42  ;;  %v723_v50 = vld [vmem:[%s10331_s14 + $0xc00] sm:$0xff] }
  0xd2   : > { %v771_v6 = vld [vmem:[%s10331_s14 + $0xd80] sm:$0xff] }
  0xd4   : > { %6666 = vmatpush1.bf16.msra.mxu0 %v9152_v54  ;;  %7010 = vmatpush1.bf16.msra.mxu1 %v9154_v55  ;;  %v9210_v54 = vcombine.low %v716_v41, %v720_v42  ;;  %v9217_v55 = vcombine.high %v723_v50, %v727_v51  ;;  %v775_v41 = vld [vmem:[%s10331_s14 + $0xda0] sm:$0xff]  ;;  %v772_v42 = vld [vmem:[%s10331_s14 + $0xd88] sm:$0xff] }
  0xd5   : > { %6667 = vmatprep.subr.bf16.mxu0 %v9161_v56  ;;  %7011 = vmatprep.subr.bf16.mxu1 %v9163_v57  ;;  %v9219_v56 = vcombine.high %v724_v52, %v728_v34  ;;  %v731_v57 = vld [vmem:[%s10331_s14 + $0xc40] sm:$0xff] }
  0xd6   : > { %v9225_v2 = vcombine.high %v731_v57, %v735_v58 }
  0xd8   : > { %6668 = vmatpush1.bf16.msra.mxu0 %v9160_v62  ;;  %7012 = vmatpush1.bf16.msra.mxu1 %v9162_v63  ;;  %v10589_v62 = vld [vmem:[%s10333_s15 + $0x18] sm:$0xff] }
  0xd9   : > { %6669 = vmatprep.subr.bf16.mxu0 %v9169_v0  ;;  %7013 = vmatprep.subr.bf16.mxu1 %v9171_v1  ;;  %v10592_v63 = vld [vmem:[%s10333_s15 + $0x58] sm:$0xff]  ;;  %v9216_v0 = vcombine.low %v723_v50, %v727_v51  ;;  %v9218_v1 = vcombine.low %v724_v52, %v728_v34  ;;  %v779_v51 = vld [vmem:[%s10331_s14 + $0xdc0] sm:$0xff]  ;;  %v780_v34 = vld [vmem:[%s10331_s14 + $0xdc8] sm:$0xff] }
  0xda   : > { %v10598_v47 = vcombine.high %v10589_v62, %v10592_v63  ;;  %v783_v52 = vld [vmem:[%s10331_s14 + $0xde0] sm:$0xff] }
  0xdc   : > { %6670 = vmatpush1.bf16.msra.mxu0 %v9168_v8  ;;  %7014 = vmatpush1.bf16.msra.mxu1 %v9170_v9  ;;  %v744_v8 = vld [vmem:[%s10331_s14 + $0xca8] sm:$0xff]  ;;  %v9224_v9 = vcombine.low %v731_v57, %v735_v58  ;;  %v787_v58 = vld [vmem:[%s10331_s14 + $0xe00] sm:$0xff] }
  0xdd   : > { %6671 = vmatprep.subr.bf16.mxu0 %v9177_v10  ;;  %7015 = vmatprep.subr.bf16.mxu1 %v9179_v12  ;;  %v9226_v10 = vcombine.low %v732_v59, %v736_v61  ;;  %v9233_v12 = vcombine.high %v739_v4, %v743_v46  ;;  %v9235_v13 = vcombine.high %v740_v5, %v744_v8  ;;  %v791_v59 = vld [vmem:[%s10331_s14 + $0xe20] sm:$0xff]  ;;  %v788_v61 = vld [vmem:[%s10331_s14 + $0xe08] sm:$0xff] }
  0xe0   : > { %6672 = vmatpush1.bf16.msra.mxu0 %v9176_v17  ;;  %7016 = vmatpush1.bf16.msra.mxu1 %v9178_v18  ;;  %v752_v17 = vld [vmem:[%s10331_s14 + $0xce8] sm:$0xff]  ;;  %v9232_v18 = vcombine.low %v739_v4, %v743_v46  ;;  %v795_v46 = vld [vmem:[%s10331_s14 + $0xe40] sm:$0xff] }
  0xe1   : > { %6673 = vmatprep.subr.bf16.mxu0 %v9185_v19  ;;  %7017 = vmatprep.subr.bf16.mxu1 %v9187_v20  ;;  %v9234_v19 = vcombine.low %v740_v5, %v744_v8  ;;  %v9241_v20 = vcombine.high %v747_v14, %v751_v15  ;;  %v9243_v21 = vcombine.high %v748_v16, %v752_v17  ;;  %v799_v5 = vld [vmem:[%s10331_s14 + $0xe60] sm:$0xff]  ;;  %v796_v8 = vld [vmem:[%s10331_s14 + $0xe48] sm:$0xff] }
  0xe4   : > { %6674 = vmatpush1.bf16.msra.mxu0 %v9184_v25  ;;  %7018 = vmatpush1.bf16.msra.mxu1 %v9186_v26  ;;  %v760_v25 = vld [vmem:[%s10331_s14 + $0xd28] sm:$0xff]  ;;  %v9240_v26 = vcombine.low %v747_v14, %v751_v15  ;;  %v803_v15 = vld [vmem:[%s10331_s14 + $0xe80] sm:$0xff] }
  0xe5   : > { %6675 = vmatprep.subr.bf16.mxu0 %v9193_v27  ;;  %7019 = vmatprep.subr.bf16.mxu1 %v9195_v28  ;;  %v9242_v27 = vcombine.low %v748_v16, %v752_v17  ;;  %v9249_v28 = vcombine.high %v755_v22, %v759_v23  ;;  %v9251_v29 = vcombine.high %v756_v24, %v760_v25  ;;  %v807_v16 = vld [vmem:[%s10331_s14 + $0xea0] sm:$0xff]  ;;  %v804_v17 = vld [vmem:[%s10331_s14 + $0xe88] sm:$0xff] }
  0xe8   : > { %6676 = vmatpush1.bf16.msra.mxu0 %v9192_v36  ;;  %7020 = vmatpush1.bf16.msra.mxu1 %v9194_v37  ;;  %v768_v36 = vld [vmem:[%s10331_s14 + $0xd68] sm:$0xff]  ;;  %v9248_v37 = vcombine.low %v755_v22, %v759_v23  ;;  %v811_v23 = vld [vmem:[%s10331_s14 + $0xec0] sm:$0xff] }
  0xe9   : > { %6677 = vmatprep.subr.bf16.mxu0 %v9201_v38  ;;  %7021 = vmatprep.subr.bf16.mxu1 %v9203_v39  ;;  %v9250_v38 = vcombine.low %v756_v24, %v760_v25  ;;  %v9257_v39 = vcombine.high %v763_v30, %v767_v31  ;;  %v9259_v40 = vcombine.high %v764_v33, %v768_v36  ;;  %v815_v24 = vld [vmem:[%s10331_s14 + $0xee0] sm:$0xff]  ;;  %v812_v25 = vld [vmem:[%s10331_s14 + $0xec8] sm:$0xff] }
  0xec   : > { %6678 = vmatpush1.bf16.msra.mxu0 %v9200_v43  ;;  %7022 = vmatpush1.bf16.msra.mxu1 %v9202_v45  ;;  %v776_v43 = vld [vmem:[%s10331_s14 + $0xda8] sm:$0xff]  ;;  %v9256_v45 = vcombine.low %v763_v30, %v767_v31  ;;  %v819_v31 = vld [vmem:[%s10331_s14 + $0xf00] sm:$0xff] }
  0xed   : > { %6679 = vmatprep.subr.bf16.mxu0 %v9209_v48  ;;  %7023 = vmatprep.subr.bf16.mxu1 %v9211_v49  ;;  %v9258_v48 = vcombine.low %v764_v33, %v768_v36  ;;  %v9265_v49 = vcombine.high %v771_v6, %v775_v41  ;;  %v9267_v50 = vcombine.high %v772_v42, %v776_v43  ;;  %v823_v33 = vld [vmem:[%s10331_s14 + $0xf20] sm:$0xff]  ;;  %v820_v36 = vld [vmem:[%s10331_s14 + $0xf08] sm:$0xff] }
  0xf0   : > { %6680 = vmatpush1.bf16.msra.mxu0 %v9208_v53  ;;  %7024 = vmatpush1.bf16.msra.mxu1 %v9210_v54  ;;  %v784_v53 = vld [vmem:[%s10331_s14 + $0xde8] sm:$0xff]  ;;  %v9264_v54 = vcombine.low %v771_v6, %v775_v41  ;;  %v827_v41 = vld [vmem:[%s10331_s14 + $0xf40] sm:$0xff] }
  0xf1   : > { %6692 = vmatprep.subr.bf16.mxu0 %v9217_v55  ;;  %7036 = vmatprep.subr.bf16.mxu1 %v9219_v56  ;;  %v9266_v55 = vcombine.low %v772_v42, %v776_v43  ;;  %v9273_v56 = vcombine.high %v779_v51, %v783_v52  ;;  %v9275_v57 = vcombine.high %v780_v34, %v784_v53  ;;  %v831_v42 = vld [vmem:[%s10331_s14 + $0xf60] sm:$0xff]  ;;  %v828_v43 = vld [vmem:[%s10331_s14 + $0xf48] sm:$0xff] }
  0xf3   : > { %6682 = vmatmul.mubr.bf16.vlgmr.msra.gmra.mrb[0].mxu0 %v10585_v60  ;;  %7026 = vmatmul.mubr.bf16.vlgmr.msra.gmra.mrb[0].mxu1 %v10585_v60 }
  0xf4   : > { %6693 = vmatpush1.bf16.msra.mxu0 %v9216_v0  ;;  %7037 = vmatpush1.bf16.msra.mxu1 %v9218_v1  ;;  %v792_v0 = vld [vmem:[%s10331_s14 + $0xe28] sm:$0xff]  ;;  %v9272_v1 = vcombine.low %v779_v51, %v783_v52  ;;  %v835_v52 = vld [vmem:[%s10331_s14 + $0xf80] sm:$0xff] }
  0xf5   : > { %6694 = vmatprep.subr.bf16.mxu0 %v9225_v2  ;;  %7038 = vmatprep.subr.bf16.mxu1 %v9227_v3  ;;  %v9274_v2 = vcombine.low %v780_v34, %v784_v53  ;;  %v9281_v3 = vcombine.high %v787_v58, %v791_v59  ;;  %v9283_v4 = vcombine.high %v788_v61, %v792_v0  ;;  %v839_v34 = vld [vmem:[%s10331_s14 + $0xfa0] sm:$0xff]  ;;  %v836_v53 = vld [vmem:[%s10331_s14 + $0xf88] sm:$0xff] }
  0xf6   : > { %6724 = vmatprep.mubr.bf16.mxu0 %v10598_v47  ;;  %7068 = vmatprep.mubr.bf16.mxu1 %v10598_v47 }
  0xf8   : > { %6695 = vmatpush1.bf16.msra.mxu0 %v9224_v9  ;;  %7039 = vmatpush1.bf16.msra.mxu1 %v9226_v10  ;;  %v800_v9 = vld [vmem:[%s10331_s14 + $0xe68] sm:$0xff]  ;;  %v9280_v10 = vcombine.low %v787_v58, %v791_v59  ;;  %v843_v59 = vld [vmem:[%s10331_s14 + $0xfc0] sm:$0xff] }
  0xf9   : > { %6696 = vmatprep.subr.bf16.mxu0 %v9233_v12  ;;  %7040 = vmatprep.subr.bf16.mxu1 %v9235_v13  ;;  %v9282_v12 = vcombine.low %v788_v61, %v792_v0  ;;  %v9289_v13 = vcombine.high %v795_v46, %v799_v5  ;;  %v9291_v14 = vcombine.high %v796_v8, %v800_v9  ;;  %v847_v61 = vld [vmem:[%s10331_s14 + $0xfe0] sm:$0xff]  ;;  %v844_v0 = vld [vmem:[%s10331_s14 + $0xfc8] sm:$0xff] }
  0xfc   : > { %6697 = vmatpush1.bf16.msra.mxu0 %v9232_v18  ;;  %7041 = vmatpush1.bf16.msra.mxu1 %v9234_v19  ;;  %v808_v18 = vld [vmem:[%s10331_s14 + $0xea8] sm:$0xff]  ;;  %v9288_v19 = vcombine.low %v795_v46, %v799_v5  ;;  %v851_v5 = vld [vmem:[%s10331_s14 + $0x1000] sm:$0xff] }
  0xfd   : > { %6698 = vmatprep.subr.bf16.mxu0 %v9241_v20  ;;  %7042 = vmatprep.subr.bf16.mxu1 %v9243_v21  ;;  %v9290_v20 = vcombine.low %v796_v8, %v800_v9  ;;  %v9297_v21 = vcombine.high %v803_v15, %v807_v16  ;;  %v9299_v22 = vcombine.high %v804_v17, %v808_v18  ;;  %v855_v8 = vld [vmem:[%s10331_s14 + $0x1020] sm:$0xff]  ;;  %v852_v9 = vld [vmem:[%s10331_s14 + $0x1008] sm:$0xff] }
 0x100   : > { %6699 = vmatpush1.bf16.msra.mxu0 %v9240_v26  ;;  %7043 = vmatpush1.bf16.msra.mxu1 %v9242_v27  ;;  %v816_v26 = vld [vmem:[%s10331_s14 + $0xee8] sm:$0xff]  ;;  %v9296_v27 = vcombine.low %v803_v15, %v807_v16  ;;  %v859_v16 = vld [vmem:[%s10331_s14 + $0x1040] sm:$0xff] }
 0x101   : > { %6700 = vmatprep.subr.bf16.mxu0 %v9249_v28  ;;  %7044 = vmatprep.subr.bf16.mxu1 %v9251_v29  ;;  %v9298_v28 = vcombine.low %v804_v17, %v808_v18  ;;  %v9305_v29 = vcombine.high %v811_v23, %v815_v24  ;;  %v9307_v30 = vcombine.high %v812_v25, %v816_v26  ;;  %v863_v17 = vld [vmem:[%s10331_s14 + $0x1060] sm:$0xff]  ;;  %v860_v18 = vld [vmem:[%s10331_s14 + $0x1048] sm:$0xff] }
 0x104   : > { %6701 = vmatpush1.bf16.msra.mxu0 %v9248_v37  ;;  %7045 = vmatpush1.bf16.msra.mxu1 %v9250_v38  ;;  %v824_v37 = vld [vmem:[%s10331_s14 + $0xf28] sm:$0xff]  ;;  %v9304_v38 = vcombine.low %v811_v23, %v815_v24  ;;  %v9344_v23 = vcombine.low %v851_v5, %v855_v8 }
 0x105   : > { %6702 = vmatprep.subr.bf16.mxu0 %v9257_v39  ;;  %7046 = vmatprep.subr.bf16.mxu1 %v9259_v40  ;;  %v9306_v39 = vcombine.low %v812_v25, %v816_v26  ;;  %v9313_v40 = vcombine.high %v819_v31, %v823_v33  ;;  %v9315_v6 = vcombine.high %v820_v36, %v824_v37 }
 0x106   : > { %v9353_v25 = vcombine.high %v859_v16, %v863_v17 }
 0x108   : > { %6703 = vmatpush1.bf16.msra.mxu0 %v9256_v45  ;;  %7047 = vmatpush1.bf16.msra.mxu1 %v9258_v48  ;;  %v832_v45 = vld [vmem:[%s10331_s14 + $0xf68] sm:$0xff]  ;;  %v9312_v48 = vcombine.low %v819_v31, %v823_v33 }
 0x109   : > { %6704 = vmatprep.subr.bf16.mxu0 %v9265_v49  ;;  %7048 = vmatprep.subr.bf16.mxu1 %v9267_v50  ;;  %v9314_v49 = vcombine.low %v820_v36, %v824_v37  ;;  %v9321_v50 = vcombine.high %v827_v41, %v831_v42  ;;  %v9323_v51 = vcombine.high %v828_v43, %v832_v45  ;;  %v875_v37 = vld [vmem:[%s10331_s14 + $0x10c0] sm:$0xff] }
 0x10c   : > { %6705 = vmatpush1.bf16.msra.mxu0 %v9264_v54  ;;  %7049 = vmatpush1.bf16.msra.mxu1 %v9266_v55  ;;  %v840_v54 = vld [vmem:[%s10331_s14 + $0xfa8] sm:$0xff]  ;;  %v9320_v55 = vcombine.low %v827_v41, %v831_v42 }
 0x10d   : > { %6706 = vmatprep.subr.bf16.mxu0 %v9273_v56  ;;  %7050 = vmatprep.subr.bf16.mxu1 %v9275_v57  ;;  %v9322_v56 = vcombine.low %v828_v43, %v832_v45  ;;  %v9329_v57 = vcombine.high %v835_v52, %v839_v34  ;;  %v9331_v58 = vcombine.high %v836_v53, %v840_v54  ;;  %v883_v45 = vld [vmem:[%s10331_s14 + $0x1100] sm:$0xff] }
 0x110   : > { %6707 = vmatpush1.bf16.msra.mxu0 %v9272_v1  ;;  %7051 = vmatpush1.bf16.msra.mxu1 %v9274_v2  ;;  %v848_v1 = vld [vmem:[%s10331_s14 + $0xfe8] sm:$0xff]  ;;  %v9328_v2 = vcombine.low %v835_v52, %v839_v34 }
 0x111   : > { %6708 = vmatprep.subr.bf16.mxu0 %v9281_v3  ;;  %7052 = vmatprep.subr.bf16.mxu1 %v9283_v4  ;;  %v9330_v3 = vcombine.low %v836_v53, %v840_v54  ;;  %v9337_v4 = vcombine.high %v843_v59, %v847_v61  ;;  %v9339_v46 = vcombine.high %v844_v0, %v848_v1  ;;  %v891_v54 = vld [vmem:[%s10331_s14 + $0x1140] sm:$0xff] }
 0x114   : > { %6709 = vmatpush1.bf16.msra.mxu0 %v9280_v10  ;;  %7053 = vmatpush1.bf16.msra.mxu1 %v9282_v12  ;;  %v856_v10 = vld [vmem:[%s10331_s14 + $0x1028] sm:$0xff]  ;;  %v9336_v12 = vcombine.low %v843_v59, %v847_v61 }
 0x115   : > { %6710 = vmatprep.subr.bf16.mxu0 %v9289_v13  ;;  %7054 = vmatprep.subr.bf16.mxu1 %v9291_v14  ;;  %v9338_v13 = vcombine.low %v844_v0, %v848_v1  ;;  %v9345_v14 = vcombine.high %v851_v5, %v855_v8  ;;  %v9347_v15 = vcombine.high %v852_v9, %v856_v10  ;;  %v899_v1 = vld [vmem:[%s10331_s14 + $0x1180] sm:$0xff] }
 0x116   : > { %v9346_v24 = vcombine.low %v852_v9, %v856_v10  ;;  %v907_v10 = vld [vmem:[%s10331_s14 + $0x11c0] sm:$0xff] }
 0x118   : > { %6711 = vmatpush1.bf16.msra.mxu0 %v9288_v19  ;;  %7055 = vmatpush1.bf16.msra.mxu1 %v9290_v20  ;;  %v10667_v19 = vcombine.low %v10589_v62, %v10592_v63  ;;  %v864_v20 = vld [vmem:[%s10331_s14 + $0x1068] sm:$0xff]  ;;  %v871_v62 = vld [vmem:[%s10331_s14 + $0x10a0] sm:$0xff] }
 0x119   : > { %6712 = vmatprep.subr.bf16.mxu0 %v9297_v21  ;;  %7056 = vmatprep.subr.bf16.mxu1 %v9299_v22  ;;  %v10671_v21 = vld [vmem:[%s10333_s15 + $0x20] sm:$0xff]  ;;  %v9355_v26 = vcombine.high %v860_v18, %v864_v20  ;;  %v9354_v31 = vcombine.low %v860_v18, %v864_v20 }
 0x11a   : > { %v10674_v22 = vld [vmem:[%s10333_s15 + $0x60] sm:$0xff] }
 0x11b   : > { %v10680_v63 = vcombine.high %v10671_v21, %v10674_v22  ;;  %v915_v20 = vld [vmem:[%s10331_s14 + $0x1200] sm:$0xff] }
 0x11c   : > { %6713 = vmatpush1.bf16.msra.mxu0 %v9296_v27  ;;  %7057 = vmatpush1.bf16.msra.mxu1 %v9298_v28  ;;  %v867_v27 = vld [vmem:[%s10331_s14 + $0x1080] sm:$0xff]  ;;  %v868_v28 = vld [vmem:[%s10331_s14 + $0x1088] sm:$0xff] }
 0x11d   : > { %6714 = vmatprep.subr.bf16.mxu0 %v9305_v29  ;;  %7058 = vmatprep.subr.bf16.mxu1 %v9307_v30  ;;  %v872_v29 = vld [vmem:[%s10331_s14 + $0x10a8] sm:$0xff]  ;;  %v9352_v30 = vcombine.low %v859_v16, %v863_v17  ;;  %v9361_v33 = vcombine.high %v867_v27, %v871_v62 }
 0x11e   : > { %v9363_v36 = vcombine.high %v868_v28, %v872_v29  ;;  %v9362_v41 = vcombine.low %v868_v28, %v872_v29  ;;  %v923_v29 = vld [vmem:[%s10331_s14 + $0x1240] sm:$0xff] }
 0x120   : > { %6715 = vmatpush1.bf16.msra.mxu0 %v9304_v38  ;;  %7059 = vmatpush1.bf16.msra.mxu1 %v9306_v39  ;;  %v879_v38 = vld [vmem:[%s10331_s14 + $0x10e0] sm:$0xff]  ;;  %v876_v39 = vld [vmem:[%s10331_s14 + $0x10c8] sm:$0xff] }
 0x121   : > { %6716 = vmatprep.subr.bf16.mxu0 %v9313_v40  ;;  %7060 = vmatprep.subr.bf16.mxu1 %v9315_v6  ;;  %v880_v40 = vld [vmem:[%s10331_s14 + $0x10e8] sm:$0xff]  ;;  %v9360_v6 = vcombine.low %v867_v27, %v871_v62  ;;  %v9369_v42 = vcombine.high %v875_v37, %v879_v38 }
 0x122   : > { %v9371_v43 = vcombine.high %v876_v39, %v880_v40  ;;  %v9370_v52 = vcombine.low %v876_v39, %v880_v40  ;;  %v931_v40 = vld [vmem:[%s10331_s14 + $0x1280] sm:$0xff] }
 0x124   : > { %6717 = vmatpush1.bf16.msra.mxu0 %v9312_v48  ;;  %7061 = vmatpush1.bf16.msra.mxu1 %v9314_v49  ;;  %v887_v48 = vld [vmem:[%s10331_s14 + $0x1120] sm:$0xff]  ;;  %v884_v49 = vld [vmem:[%s10331_s14 + $0x1108] sm:$0xff] }
 0x125   : > { %6718 = vmatprep.subr.bf16.mxu0 %v9321_v50  ;;  %7062 = vmatprep.subr.bf16.mxu1 %v9323_v51  ;;  %v888_v50 = vld [vmem:[%s10331_s14 + $0x1128] sm:$0xff]  ;;  %v9368_v51 = vcombine.low %v875_v37, %v879_v38  ;;  %v9377_v34 = vcombine.high %v883_v45, %v887_v48 }
 0x126   : > { %v9379_v53 = vcombine.high %v884_v49, %v888_v50  ;;  %v9378_v59 = vcombine.low %v884_v49, %v888_v50  ;;  %v939_v50 = vld [vmem:[%s10331_s14 + $0x12c0] sm:$0xff] }
 0x128   : > { %6719 = vmatpush1.bf16.msra.mxu0 %v9320_v55  ;;  %7063 = vmatpush1.bf16.msra.mxu1 %v9322_v56  ;;  %v895_v55 = vld [vmem:[%s10331_s14 + $0x1160] sm:$0xff]  ;;  %v892_v56 = vld [vmem:[%s10331_s14 + $0x1148] sm:$0xff] }
 0x129   : > { %6720 = vmatprep.subr.bf16.mxu0 %v9329_v57  ;;  %7064 = vmatprep.subr.bf16.mxu1 %v9331_v58  ;;  %v896_v57 = vld [vmem:[%s10331_s14 + $0x1168] sm:$0xff]  ;;  %v9376_v58 = vcombine.low %v883_v45, %v887_v48  ;;  %v9385_v61 = vcombine.high %v891_v54, %v895_v55 }
 0x12a   : > { %v9387_v0 = vcombine.high %v892_v56, %v896_v57  ;;  %v9386_v5 = vcombine.low %v892_v56, %v896_v57  ;;  %v947_v57 = vld [vmem:[%s10331_s14 + $0x1300] sm:$0xff] }
 0x12c   : > { %6721 = vmatpush1.bf16.msra.mxu0 %v9328_v2  ;;  %7065 = vmatpush1.bf16.msra.mxu1 %v9330_v3  ;;  %v903_v2 = vld [vmem:[%s10331_s14 + $0x11a0] sm:$0xff]  ;;  %v900_v3 = vld [vmem:[%s10331_s14 + $0x1188] sm:$0xff] }
 0x12d   : > { %6722 = vmatprep.subr.bf16.mxu0 %v9337_v4  ;;  %7066 = vmatprep.subr.bf16.mxu1 %v9339_v46  ;;  %v904_v4 = vld [vmem:[%s10331_s14 + $0x11a8] sm:$0xff]  ;;  %v9384_v46 = vcombine.low %v891_v54, %v895_v55  ;;  %v9393_v8 = vcombine.high %v899_v1, %v903_v2 }
 0x12e   : > { %v9395_v9 = vcombine.high %v900_v3, %v904_v4  ;;  %v9394_v16 = vcombine.low %v900_v3, %v904_v4  ;;  %v955_v4 = vld [vmem:[%s10331_s14 + $0x1340] sm:$0xff] }
 0x130   : > { %6723 = vmatpush1.bf16.msra.mxu0 %v9336_v12  ;;  %7067 = vmatpush1.bf16.msra.mxu1 %v9338_v13  ;;  %v911_v12 = vld [vmem:[%s10331_s14 + $0x11e0] sm:$0xff]  ;;  %v908_v13 = vld [vmem:[%s10331_s14 + $0x11c8] sm:$0xff] }
 0x131   : > { %6735 = vmatprep.subr.bf16.mxu0 %v9345_v14  ;;  %7079 = vmatprep.subr.bf16.mxu1 %v9347_v15  ;;  %v912_v14 = vld [vmem:[%s10331_s14 + $0x11e8] sm:$0xff]  ;;  %v9392_v15 = vcombine.low %v899_v1, %v903_v2  ;;  %v9401_v17 = vcombine.high %v907_v10, %v911_v12 }
 0x132   : > { %v9403_v18 = vcombine.high %v908_v13, %v912_v14  ;;  %v9402_v27 = vcombine.low %v908_v13, %v912_v14  ;;  %v963_v14 = vld [vmem:[%s10331_s14 + $0x1380] sm:$0xff] }
 0x133   : > { %6725 = vmatmul.mubr.bf16.vlgmr.msra.gmra.mrb[0].mxu0 %v10667_v19  ;;  %7069 = vmatmul.mubr.bf16.vlgmr.msra.gmra.mrb[0].mxu1 %v10667_v19 }
 0x134   : > { %6736 = vmatpush1.bf16.msra.mxu0 %v9344_v23  ;;  %7080 = vmatpush1.bf16.msra.mxu1 %v9346_v24  ;;  %v919_v23 = vld [vmem:[%s10331_s14 + $0x1220] sm:$0xff]  ;;  %v916_v24 = vld [vmem:[%s10331_s14 + $0x1208] sm:$0xff] }
 0x135   : > { %6737 = vmatprep.subr.bf16.mxu0 %v9353_v25  ;;  %7081 = vmatprep.subr.bf16.mxu1 %v9355_v26  ;;  %v920_v25 = vld [vmem:[%s10331_s14 + $0x1228] sm:$0xff]  ;;  %v9400_v26 = vcombine.low %v907_v10, %v911_v12  ;;  %v9409_v62 = vcombine.high %v915_v20, %v919_v23 }
 0x136   : > { %6767 = vmatprep.mubr.bf16.mxu0 %v10680_v63  ;;  %7111 = vmatprep.mubr.bf16.mxu1 %v10680_v63  ;;  %v9411_v28 = vcombine.high %v916_v24, %v920_v25  ;;  %v9410_v37 = vcombine.low %v916_v24, %v920_v25  ;;  %v971_v25 = vld [vmem:[%s10331_s14 + $0x13c0] sm:$0xff] }
 0x138   : > { %6738 = vmatpush1.bf16.msra.mxu0 %v9352_v30  ;;  %7082 = vmatpush1.bf16.msra.mxu1 %v9354_v31  ;;  %v927_v30 = vld [vmem:[%s10331_s14 + $0x1260] sm:$0xff]  ;;  %v924_v31 = vld [vmem:[%s10331_s14 + $0x1248] sm:$0xff] }
 0x139   : > { %6739 = vmatprep.subr.bf16.mxu0 %v9361_v33  ;;  %7083 = vmatprep.subr.bf16.mxu1 %v9363_v36  ;;  %v928_v33 = vld [vmem:[%s10331_s14 + $0x1268] sm:$0xff]  ;;  %v9408_v36 = vcombine.low %v915_v20, %v919_v23  ;;  %v9417_v38 = vcombine.high %v923_v29, %v927_v30 }
 0x13a   : > { %v9419_v39 = vcombine.high %v924_v31, %v928_v33  ;;  %v9418_v45 = vcombine.low %v924_v31, %v928_v33  ;;  %v979_v33 = vld [vmem:[%s10331_s14 + $0x1400] sm:$0xff] }
 0x13c   : > { %6740 = vmatpush1.bf16.msra.mxu0 %v9360_v6  ;;  %7084 = vmatpush1.bf16.msra.mxu1 %v9362_v41  ;;  %v935_v6 = vld [vmem:[%s10331_s14 + $0x12a0] sm:$0xff]  ;;  %v932_v41 = vld [vmem:[%s10331_s14 + $0x1288] sm:$0xff] }
 0x13d   : > { %6741 = vmatprep.subr.bf16.mxu0 %v9369_v42  ;;  %7085 = vmatprep.subr.bf16.mxu1 %v9371_v43  ;;  %v936_v42 = vld [vmem:[%s10331_s14 + $0x12a8] sm:$0xff]  ;;  %v9416_v43 = vcombine.low %v923_v29, %v927_v30  ;;  %v9425_v48 = vcombine.high %v931_v40, %v935_v6 }
 0x13e   : > { %v9427_v49 = vcombine.high %v932_v41, %v936_v42  ;;  %v9426_v54 = vcombine.low %v932_v41, %v936_v42  ;;  %v987_v42 = vld [vmem:[%s10331_s14 + $0x1440] sm:$0xff] }
 0x140   : > { %6742 = vmatpush1.bf16.msra.mxu0 %v9368_v51  ;;  %7086 = vmatpush1.bf16.msra.mxu1 %v9370_v52  ;;  %v943_v51 = vld [vmem:[%s10331_s14 + $0x12e0] sm:$0xff]  ;;  %v940_v52 = vld [vmem:[%s10331_s14 + $0x12c8] sm:$0xff] }
 0x141   : > { %6743 = vmatprep.subr.bf16.mxu0 %v9377_v34  ;;  %7087 = vmatprep.subr.bf16.mxu1 %v9379_v53  ;;  %v944_v34 = vld [vmem:[%s10331_s14 + $0x12e8] sm:$0xff]  ;;  %v9424_v53 = vcombine.low %v931_v40, %v935_v6  ;;  %v9433_v55 = vcombine.high %v939_v50, %v943_v51 }
 0x142   : > { %v9435_v56 = vcombine.high %v940_v52, %v944_v34  ;;  %v9434_v1 = vcombine.low %v940_v52, %v944_v34 }
 0x144   : > { %6744 = vmatpush1.bf16.msra.mxu0 %v9376_v58  ;;  %7088 = vmatpush1.bf16.msra.mxu1 %v9378_v59  ;;  %v951_v58 = vld [vmem:[%s10331_s14 + $0x1320] sm:$0xff]  ;;  %v948_v59 = vld [vmem:[%s10331_s14 + $0x1308] sm:$0xff] }
 0x145   : > { %6745 = vmatprep.subr.bf16.mxu0 %v9385_v61  ;;  %7089 = vmatprep.subr.bf16.mxu1 %v9387_v0  ;;  %v952_v61 = vld [vmem:[%s10331_s14 + $0x1328] sm:$0xff]  ;;  %v9432_v0 = vcombine.low %v939_v50, %v943_v51  ;;  %v9441_v2 = vcombine.high %v947_v57, %v951_v58 }
 0x146   : > { %v9443_v3 = vcombine.high %v948_v59, %v952_v61  ;;  %v9442_v10 = vcombine.low %v948_v59, %v952_v61  ;;  %v10753_v50 = vld [vmem:[%s10333_s15 + $0x28] sm:$0xff] }
 0x147   : > { %v10756_v51 = vld [vmem:[%s10333_s15 + $0x68] sm:$0xff] }
 0x148   : > { %6746 = vmatpush1.bf16.msra.mxu0 %v9384_v46  ;;  %7090 = vmatpush1.bf16.msra.mxu1 %v9386_v5  ;;  %v959_v46 = vld [vmem:[%s10331_s14 + $0x1360] sm:$0xff]  ;;  %v956_v5 = vld [vmem:[%s10331_s14 + $0x1348] sm:$0xff] }
 0x149   : > { %6747 = vmatprep.subr.bf16.mxu0 %v9393_v8  ;;  %7091 = vmatprep.subr.bf16.mxu1 %v9395_v9  ;;  %v960_v8 = vld [vmem:[%s10331_s14 + $0x1368] sm:$0xff]  ;;  %v9440_v9 = vcombine.low %v947_v57, %v951_v58  ;;  %v9449_v12 = vcombine.high %v955_v4, %v959_v46 }
 0x14a   : > { %v9451_v13 = vcombine.high %v956_v5, %v960_v8  ;;  %v9450_v20 = vcombine.low %v956_v5, %v960_v8  ;;  %v1000_v57 = vld [vmem:[%s10331_s14 + $0x14a8] sm:$0xff] }
 0x14c   : > { %6748 = vmatpush1.bf16.msra.mxu0 %v9392_v15  ;;  %7092 = vmatpush1.bf16.msra.mxu1 %v9394_v16  ;;  %v967_v15 = vld [vmem:[%s10331_s14 + $0x13a0] sm:$0xff]  ;;  %v964_v16 = vld [vmem:[%s10331_s14 + $0x1388] sm:$0xff] }
 0x14d   : > { %6749 = vmatprep.subr.bf16.mxu0 %v9401_v17  ;;  %7093 = vmatprep.subr.bf16.mxu1 %v9403_v18  ;;  %v968_v17 = vld [vmem:[%s10331_s14 + $0x13a8] sm:$0xff]  ;;  %v9448_v18 = vcombine.low %v955_v4, %v959_v46  ;;  %v9457_v23 = vcombine.high %v963_v14, %v967_v15 }
 0x14e   : > { %v9459_v24 = vcombine.high %v964_v16, %v968_v17  ;;  %v9458_v29 = vcombine.low %v964_v16, %v968_v17  ;;  %v1008_v4 = vld [vmem:[%s10331_s14 + $0x14e8] sm:$0xff] }
 0x150   : > { %6750 = vmatpush1.bf16.msra.mxu0 %v9400_v26  ;;  %7094 = vmatpush1.bf16.msra.mxu1 %v9402_v27  ;;  %v975_v26 = vld [vmem:[%s10331_s14 + $0x13e0] sm:$0xff]  ;;  %v972_v27 = vld [vmem:[%s10331_s14 + $0x13c8] sm:$0xff] }
 0x151   : > { %6751 = vmatprep.subr.bf16.mxu0 %v9409_v62  ;;  %7095 = vmatprep.subr.bf16.mxu1 %v9411_v28  ;;  %v976_v62 = vld [vmem:[%s10331_s14 + $0x13e8] sm:$0xff]  ;;  %v9456_v28 = vcombine.low %v963_v14, %v967_v15  ;;  %v9465_v30 = vcombine.high %v971_v25, %v975_v26 }
 0x152   : > { %v9467_v31 = vcombine.high %v972_v27, %v976_v62  ;;  %v9466_v40 = vcombine.low %v972_v27, %v976_v62  ;;  %v1016_v14 = vld [vmem:[%s10331_s14 + $0x1528] sm:$0xff] }
 0x154   : > { %6752 = vmatpush1.bf16.msra.mxu0 %v9408_v36  ;;  %7096 = vmatpush1.bf16.msra.mxu1 %v9410_v37  ;;  %v983_v36 = vld [vmem:[%s10331_s14 + $0x1420] sm:$0xff]  ;;  %v980_v37 = vld [vmem:[%s10331_s14 + $0x1408] sm:$0xff] }
 0x155   : > { %6753 = vmatprep.subr.bf16.mxu0 %v9417_v38  ;;  %7097 = vmatprep.subr.bf16.mxu1 %v9419_v39  ;;  %v984_v38 = vld [vmem:[%s10331_s14 + $0x1428] sm:$0xff]  ;;  %v9464_v39 = vcombine.low %v971_v25, %v975_v26  ;;  %v9473_v6 = vcombine.high %v979_v33, %v983_v36  ;;  %v9472_v52 = vcombine.low %v979_v33, %v983_v36 }
 0x156   : > { %v9475_v41 = vcombine.high %v980_v37, %v984_v38  ;;  %v9474_v34 = vcombine.low %v980_v37, %v984_v38  ;;  %v1024_v25 = vld [vmem:[%s10331_s14 + $0x1568] sm:$0xff] }
 0x157   : > { %v1032_v33 = vld [vmem:[%s10331_s14 + $0x15a8] sm:$0xff] }
 0x158   : > { %6754 = vmatpush1.bf16.msra.mxu0 %v9416_v43  ;;  %7098 = vmatpush1.bf16.msra.mxu1 %v9418_v45  ;;  %v991_v43 = vld [vmem:[%s10331_s14 + $0x1460] sm:$0xff]  ;;  %v988_v45 = vld [vmem:[%s10331_s14 + $0x1448] sm:$0xff] }
 0x159   : > { %6755 = vmatprep.subr.bf16.mxu0 %v9425_v48  ;;  %7099 = vmatprep.subr.bf16.mxu1 %v9427_v49  ;;  %v10749_v48 = vcombine.low %v10671_v21, %v10674_v22  ;;  %v992_v49 = vld [vmem:[%s10331_s14 + $0x1468] sm:$0xff]  ;;  %v999_v21 = vld [vmem:[%s10331_s14 + $0x14a0] sm:$0xff]  ;;  %v10762_v22 = vcombine.high %v10753_v50, %v10756_v51  ;;  %v9480_v58 = vcombine.low %v987_v42, %v991_v43 }
 0x15a   : > { %v9482_v59 = vcombine.low %v988_v45, %v992_v49 }
 0x15c   : > { %6756 = vmatpush1.bf16.msra.mxu0 %v9424_v53  ;;  %7100 = vmatpush1.bf16.msra.mxu1 %v9426_v54  ;;  %v9481_v53 = vcombine.high %v987_v42, %v991_v43  ;;  %v9483_v54 = vcombine.high %v988_v45, %v992_v49  ;;  %v1040_v42 = vld [vmem:[%s10331_s14 + $0x15e8] sm:$0xff] }
 0x15d   : > { %6757 = vmatprep.subr.bf16.mxu0 %v9433_v55  ;;  %7101 = vmatprep.subr.bf16.mxu1 %v9435_v56  ;;  %v995_v55 = vld [vmem:[%s10331_s14 + $0x1480] sm:$0xff]  ;;  %v996_v56 = vld [vmem:[%s10331_s14 + $0x1488] sm:$0xff] }
 0x15e   : > { %v9489_v61 = vcombine.high %v995_v55, %v999_v21  ;;  %v9488_v46 = vcombine.low %v995_v55, %v999_v21  ;;  %v9490_v5 = vcombine.low %v996_v56, %v1000_v57  ;;  %v1048_v55 = vld [vmem:[%s10331_s14 + $0x1628] sm:$0xff] }
 0x160   : > { %6758 = vmatpush1.bf16.msra.mxu0 %v9432_v0  ;;  %7102 = vmatpush1.bf16.msra.mxu1 %v9434_v1  ;;  %v9491_v0 = vcombine.high %v996_v56, %v1000_v57  ;;  %v1003_v1 = vld [vmem:[%s10331_s14 + $0x14c0] sm:$0xff] }
 0x161   : > { %6759 = vmatprep.subr.bf16.mxu0 %v9441_v2  ;;  %7103 = vmatprep.subr.bf16.mxu1 %v9443_v3  ;;  %v1007_v2 = vld [vmem:[%s10331_s14 + $0x14e0] sm:$0xff]  ;;  %v1004_v3 = vld [vmem:[%s10331_s14 + $0x14c8] sm:$0xff] }
 0x162   : > { %v9497_v8 = vcombine.high %v1003_v1, %v1007_v2  ;;  %v9496_v15 = vcombine.low %v1003_v1, %v1007_v2  ;;  %v9498_v16 = vcombine.low %v1004_v3, %v1008_v4  ;;  %v1056_v1 = vld [vmem:[%s10331_s14 + $0x1668] sm:$0xff] }
 0x164   : > { %6760 = vmatpush1.bf16.msra.mxu0 %v9440_v9  ;;  %7104 = vmatpush1.bf16.msra.mxu1 %v9442_v10  ;;  %v9499_v9 = vcombine.high %v1004_v3, %v1008_v4  ;;  %v1011_v10 = vld [vmem:[%s10331_s14 + $0x1500] sm:$0xff] }
 0x165   : > { %6761 = vmatprep.subr.bf16.mxu0 %v9449_v12  ;;  %7105 = vmatprep.subr.bf16.mxu1 %v9451_v13  ;;  %v1015_v12 = vld [vmem:[%s10331_s14 + $0x1520] sm:$0xff]  ;;  %v1012_v13 = vld [vmem:[%s10331_s14 + $0x1508] sm:$0xff] }
 0x166   : > { %v9505_v17 = vcombine.high %v1011_v10, %v1015_v12  ;;  %v9504_v26 = vcombine.low %v1011_v10, %v1015_v12  ;;  %v9506_v27 = vcombine.low %v1012_v13, %v1016_v14  ;;  %v1064_v10 = vld [vmem:[%s10331_s14 + $0x16a8] sm:$0xff] }
 0x168   : > { %6762 = vmatpush1.bf16.msra.mxu0 %v9448_v18  ;;  %7106 = vmatpush1.bf16.msra.mxu1 %v9450_v20  ;;  %v9507_v18 = vcombine.high %v1012_v13, %v1016_v14  ;;  %v1019_v20 = vld [vmem:[%s10331_s14 + $0x1540] sm:$0xff] }
 0x169   : > { %6763 = vmatprep.subr.bf16.mxu0 %v9457_v23  ;;  %7107 = vmatprep.subr.bf16.mxu1 %v9459_v24  ;;  %v1023_v23 = vld [vmem:[%s10331_s14 + $0x1560] sm:$0xff]  ;;  %v1020_v24 = vld [vmem:[%s10331_s14 + $0x1548] sm:$0xff] }
 0x16a   : > { %v9513_v62 = vcombine.high %v1019_v20, %v1023_v23  ;;  %v9512_v36 = vcombine.low %v1019_v20, %v1023_v23  ;;  %v9514_v37 = vcombine.low %v1020_v24, %v1024_v25  ;;  %v1072_v20 = vld [vmem:[%s10331_s14 + $0x16e8] sm:$0xff] }
 0x16c   : > { %6764 = vmatpush1.bf16.msra.mxu0 %v9456_v28  ;;  %7108 = vmatpush1.bf16.msra.mxu1 %v9458_v29  ;;  %v9515_v28 = vcombine.high %v1020_v24, %v1024_v25  ;;  %v1027_v29 = vld [vmem:[%s10331_s14 + $0x1580] sm:$0xff] }
 0x16d   : > { %6765 = vmatprep.subr.bf16.mxu0 %v9465_v30  ;;  %7109 = vmatprep.subr.bf16.mxu1 %v9467_v31  ;;  %v1031_v30 = vld [vmem:[%s10331_s14 + $0x15a0] sm:$0xff]  ;;  %v1028_v31 = vld [vmem:[%s10331_s14 + $0x1588] sm:$0xff] }
 0x16e   : > { %v9521_v38 = vcombine.high %v1027_v29, %v1031_v30  ;;  %v9520_v43 = vcombine.low %v1027_v29, %v1031_v30  ;;  %v9522_v45 = vcombine.low %v1028_v31, %v1032_v33  ;;  %v1080_v29 = vld [vmem:[%s10331_s14 + $0x1728] sm:$0xff] }
 0x170   : > { %6766 = vmatpush1.bf16.msra.mxu0 %v9464_v39  ;;  %7110 = vmatpush1.bf16.msra.mxu1 %v9466_v40  ;;  %v9523_v39 = vcombine.high %v1028_v31, %v1032_v33  ;;  %v1035_v40 = vld [vmem:[%s10331_s14 + $0x15c0] sm:$0xff] }
 0x171   : > { %6778 = vmatprep.subr.bf16.mxu0 %v9473_v6  ;;  %7122 = vmatprep.subr.bf16.mxu1 %v9475_v41  ;;  %v1039_v6 = vld [vmem:[%s10331_s14 + $0x15e0] sm:$0xff]  ;;  %v1036_v41 = vld [vmem:[%s10331_s14 + $0x15c8] sm:$0xff] }
 0x172   : > { %v9529_v49 = vcombine.high %v1035_v40, %v1039_v6  ;;  %v9528_v21 = vcombine.low %v1035_v40, %v1039_v6  ;;  %v9530_v56 = vcombine.low %v1036_v41, %v1040_v42  ;;  %v1088_v40 = vld [vmem:[%s10331_s14 + $0x1768] sm:$0xff] }
 0x173   : > { %6768 = vmatmul.mubr.bf16.vlgmr.msra.gmra.mrb[0].mxu0 %v10749_v48  ;;  %7112 = vmatmul.mubr.bf16.vlgmr.msra.gmra.mrb[0].mxu1 %v10749_v48 }
 0x174   : > { %6779 = vmatpush1.bf16.msra.mxu0 %v9472_v52  ;;  %7123 = vmatpush1.bf16.msra.mxu1 %v9474_v34  ;;  %v9531_v52 = vcombine.high %v1036_v41, %v1040_v42  ;;  %v1043_v34 = vld [vmem:[%s10331_s14 + $0x1600] sm:$0xff] }
 0x175   : > { %6780 = vmatprep.subr.bf16.mxu0 %v9481_v53  ;;  %7124 = vmatprep.subr.bf16.mxu1 %v9483_v54  ;;  %v1047_v53 = vld [vmem:[%s10331_s14 + $0x1620] sm:$0xff]  ;;  %v1044_v54 = vld [vmem:[%s10331_s14 + $0x1608] sm:$0xff] }
 0x176   : > { %6810 = vmatprep.mubr.bf16.mxu0 %v10762_v22  ;;  %7154 = vmatprep.mubr.bf16.mxu1 %v10762_v22  ;;  %v9537_v57 = vcombine.high %v1043_v34, %v1047_v53  ;;  %v9536_v2 = vcombine.low %v1043_v34, %v1047_v53  ;;  %v9538_v3 = vcombine.low %v1044_v54, %v1048_v55  ;;  %v1096_v34 = vld [vmem:[%s10331_s14 + $0x17a8] sm:$0xff] }
 0x178   : > { %6781 = vmatpush1.bf16.msra.mxu0 %v9480_v58  ;;  %7125 = vmatpush1.bf16.msra.mxu1 %v9482_v59  ;;  %v9539_v58 = vcombine.high %v1044_v54, %v1048_v55  ;;  %v1051_v59 = vld [vmem:[%s10331_s14 + $0x1640] sm:$0xff] }
 0x179   : > { %6782 = vmatprep.subr.bf16.mxu0 %v9489_v61  ;;  %7126 = vmatprep.subr.bf16.mxu1 %v9491_v0  ;;  %v1055_v61 = vld [vmem:[%s10331_s14 + $0x1660] sm:$0xff]  ;;  %v1052_v0 = vld [vmem:[%s10331_s14 + $0x1648] sm:$0xff] }
 0x17a   : > { %v9545_v4 = vcombine.high %v1051_v59, %v1055_v61  ;;  %v9544_v12 = vcombine.low %v1051_v59, %v1055_v61  ;;  %v9546_v13 = vcombine.low %v1052_v0, %v1056_v1  ;;  %v1104_v59 = vld [vmem:[%s10331_s14 + $0x17e8] sm:$0xff] }
 0x17c   : > { %6783 = vmatpush1.bf16.msra.mxu0 %v9488_v46  ;;  %7127 = vmatpush1.bf16.msra.mxu1 %v9490_v5  ;;  %v9547_v46 = vcombine.high %v1052_v0, %v1056_v1  ;;  %v1059_v5 = vld [vmem:[%s10331_s14 + $0x1680] sm:$0xff] }
 0x17d   : > { %6784 = vmatprep.subr.bf16.mxu0 %v9497_v8  ;;  %7128 = vmatprep.subr.bf16.mxu1 %v9499_v9  ;;  %v1063_v8 = vld [vmem:[%s10331_s14 + $0x16a0] sm:$0xff]  ;;  %v1060_v9 = vld [vmem:[%s10331_s14 + $0x1688] sm:$0xff] }
 0x17e   : > { %v9553_v14 = vcombine.high %v1059_v5, %v1063_v8  ;;  %v9552_v23 = vcombine.low %v1059_v5, %v1063_v8  ;;  %v9554_v24 = vcombine.low %v1060_v9, %v1064_v10  ;;  %v1112_v5 = vld [vmem:[%s10331_s14 + $0x1828] sm:$0xff] }
 0x180   : > { %6785 = vmatpush1.bf16.msra.mxu0 %v9496_v15  ;;  %7129 = vmatpush1.bf16.msra.mxu1 %v9498_v16  ;;  %v9555_v15 = vcombine.high %v1060_v9, %v1064_v10  ;;  %v1067_v16 = vld [vmem:[%s10331_s14 + $0x16c0] sm:$0xff] }
 0x181   : > { %6786 = vmatprep.subr.bf16.mxu0 %v9505_v17  ;;  %7130 = vmatprep.subr.bf16.mxu1 %v9507_v18  ;;  %v1071_v17 = vld [vmem:[%s10331_s14 + $0x16e0] sm:$0xff]  ;;  %v1068_v18 = vld [vmem:[%s10331_s14 + $0x16c8] sm:$0xff] }
 0x182   : > { %v9561_v25 = vcombine.high %v1067_v16, %v1071_v17  ;;  %v9560_v30 = vcombine.low %v1067_v16, %v1071_v17  ;;  %v9562_v31 = vcombine.low %v1068_v18, %v1072_v20  ;;  %v10831_v16 = vcombine.low %v10753_v50, %v10756_v51  ;;  %v1120_v17 = vld [vmem:[%s10331_s14 + $0x1868] sm:$0xff]  ;;  %v1127_v50 = vld [vmem:[%s10331_s14 + $0x18a0] sm:$0xff] }
 0x184   : > { %6787 = vmatpush1.bf16.msra.mxu0 %v9504_v26  ;;  %7131 = vmatpush1.bf16.msra.mxu1 %v9506_v27  ;;  %v9563_v26 = vcombine.high %v1068_v18, %v1072_v20  ;;  %v1075_v27 = vld [vmem:[%s10331_s14 + $0x1700] sm:$0xff]  ;;  %v10835_v18 = vld [vmem:[%s10333_s15 + $0x30] sm:$0xff] }
 0x185   : > { %6788 = vmatprep.subr.bf16.mxu0 %v9513_v62  ;;  %7132 = vmatprep.subr.bf16.mxu1 %v9515_v28  ;;  %v1079_v62 = vld [vmem:[%s10331_s14 + $0x1720] sm:$0xff]  ;;  %v1076_v28 = vld [vmem:[%s10331_s14 + $0x1708] sm:$0xff]  ;;  %v10838_v20 = vld [vmem:[%s10333_s15 + $0x70] sm:$0xff] }
 0x186   : > { %v9569_v33 = vcombine.high %v1075_v27, %v1079_v62  ;;  %v9568_v6 = vcombine.low %v1075_v27, %v1079_v62  ;;  %v9570_v41 = vcombine.low %v1076_v28, %v1080_v29  ;;  %v1123_v27 = vld [vmem:[%s10331_s14 + $0x1880] sm:$0xff]  ;;  %v10844_v51 = vcombine.high %v10835_v18, %v10838_v20  ;;  %v1124_v62 = vld [vmem:[%s10331_s14 + $0x1888] sm:$0xff] }
 0x188   : > { %6789 = vmatpush1.bf16.msra.mxu0 %v9512_v36  ;;  %7133 = vmatpush1.bf16.msra.mxu1 %v9514_v37  ;;  %v9571_v36 = vcombine.high %v1076_v28, %v1080_v29  ;;  %v1083_v37 = vld [vmem:[%s10331_s14 + $0x1740] sm:$0xff]  ;;  %v1128_v28 = vld [vmem:[%s10331_s14 + $0x18a8] sm:$0xff] }
 0x189   : > { %6790 = vmatprep.subr.bf16.mxu0 %v9521_v38  ;;  %7134 = vmatprep.subr.bf16.mxu1 %v9523_v39  ;;  %v1087_v38 = vld [vmem:[%s10331_s14 + $0x1760] sm:$0xff]  ;;  %v1084_v39 = vld [vmem:[%s10331_s14 + $0x1748] sm:$0xff] }
 0x18a   : > { %v9577_v42 = vcombine.high %v1083_v37, %v1087_v38  ;;  %v9576_v53 = vcombine.low %v1083_v37, %v1087_v38  ;;  %v9578_v54 = vcombine.low %v1084_v39, %v1088_v40  ;;  %v1135_v37 = vld [vmem:[%s10331_s14 + $0x18e0] sm:$0xff]  ;;  %v1132_v38 = vld [vmem:[%s10331_s14 + $0x18c8] sm:$0xff] }
 0x18c   : > { %6791 = vmatpush1.bf16.msra.mxu0 %v9520_v43  ;;  %7135 = vmatpush1.bf16.msra.mxu1 %v9522_v45  ;;  %v9579_v43 = vcombine.high %v1084_v39, %v1088_v40  ;;  %v1091_v45 = vld [vmem:[%s10331_s14 + $0x1780] sm:$0xff]  ;;  %v1136_v39 = vld [vmem:[%s10331_s14 + $0x18e8] sm:$0xff]  ;;  %v9616_v40 = vcombine.low %v1123_v27, %v1127_v50 }
 0x18d   : > { %6792 = vmatprep.subr.bf16.mxu0 %v9529_v49  ;;  %7136 = vmatprep.subr.bf16.mxu1 %v9531_v52  ;;  %v1095_v49 = vld [vmem:[%s10331_s14 + $0x17a0] sm:$0xff]  ;;  %v1092_v52 = vld [vmem:[%s10331_s14 + $0x1788] sm:$0xff] }
 0x18e   : > { %v9585_v55 = vcombine.high %v1091_v45, %v1095_v49  ;;  %v9584_v61 = vcombine.low %v1091_v45, %v1095_v49  ;;  %v9586_v0 = vcombine.low %v1092_v52, %v1096_v34  ;;  %v1143_v45 = vld [vmem:[%s10331_s14 + $0x1920] sm:$0xff]  ;;  %v1140_v49 = vld [vmem:[%s10331_s14 + $0x1908] sm:$0xff] }
 0x190   : > { %6793 = vmatpush1.bf16.msra.mxu0 %v9528_v21  ;;  %7137 = vmatpush1.bf16.msra.mxu1 %v9530_v56  ;;  %v9587_v21 = vcombine.high %v1092_v52, %v1096_v34  ;;  %v1099_v56 = vld [vmem:[%s10331_s14 + $0x17c0] sm:$0xff]  ;;  %v1144_v52 = vld [vmem:[%s10331_s14 + $0x1928] sm:$0xff] }
 0x191   : > { %6794 = vmatprep.subr.bf16.mxu0 %v9537_v57  ;;  %7138 = vmatprep.subr.bf16.mxu1 %v9539_v58  ;;  %v1103_v57 = vld [vmem:[%s10331_s14 + $0x17e0] sm:$0xff]  ;;  %v1100_v58 = vld [vmem:[%s10331_s14 + $0x17c8] sm:$0xff] }
 0x192   : > { %v9593_v1 = vcombine.high %v1099_v56, %v1103_v57  ;;  %v9592_v8 = vcombine.low %v1099_v56, %v1103_v57  ;;  %v9594_v9 = vcombine.low %v1100_v58, %v1104_v59  ;;  %v1151_v56 = vld [vmem:[%s10331_s14 + $0x1960] sm:$0xff]  ;;  %v1148_v57 = vld [vmem:[%s10331_s14 + $0x1948] sm:$0xff] }
 0x194   : > { %6795 = vmatpush1.bf16.msra.mxu0 %v9536_v2  ;;  %7139 = vmatpush1.bf16.msra.mxu1 %v9538_v3  ;;  %v9595_v2 = vcombine.high %v1100_v58, %v1104_v59  ;;  %v1107_v3 = vld [vmem:[%s10331_s14 + $0x1800] sm:$0xff]  ;;  %v1152_v58 = vld [vmem:[%s10331_s14 + $0x1968] sm:$0xff] }
 0x195   : > { %6796 = vmatprep.subr.bf16.mxu0 %v9545_v4  ;;  %7140 = vmatprep.subr.bf16.mxu1 %v9547_v46  ;;  %v1111_v4 = vld [vmem:[%s10331_s14 + $0x1820] sm:$0xff]  ;;  %v1108_v46 = vld [vmem:[%s10331_s14 + $0x1808] sm:$0xff] }
 0x196   : > { %v9601_v10 = vcombine.high %v1107_v3, %v1111_v4 }
 0x198   : > { %6797 = vmatpush1.bf16.msra.mxu0 %v9544_v12  ;;  %7141 = vmatpush1.bf16.msra.mxu1 %v9546_v13  ;;  %v9603_v12 = vcombine.high %v1108_v46, %v1112_v5  ;;  %v1115_v13 = vld [vmem:[%s10331_s14 + $0x1840] sm:$0xff] }
 0x199   : > { %6798 = vmatprep.subr.bf16.mxu0 %v9553_v14  ;;  %7142 = vmatprep.subr.bf16.mxu1 %v9555_v15  ;;  %v1119_v14 = vld [vmem:[%s10331_s14 + $0x1860] sm:$0xff]  ;;  %v1116_v15 = vld [vmem:[%s10331_s14 + $0x1848] sm:$0xff] }
 0x19a   : > { %v9608_v29 = vcombine.low %v1115_v13, %v1119_v14 }
 0x19c   : > { %6799 = vmatpush1.bf16.msra.mxu0 %v9552_v23  ;;  %7143 = vmatpush1.bf16.msra.mxu1 %v9554_v24  ;;  %v9600_v23 = vcombine.low %v1107_v3, %v1111_v4  ;;  %v9602_v24 = vcombine.low %v1108_v46, %v1112_v5  ;;  %v1159_v3 = vld [vmem:[%s10331_s14 + $0x19a0] sm:$0xff]  ;;  %v1156_v4 = vld [vmem:[%s10331_s14 + $0x1988] sm:$0xff] }
 0x19d   : > { %6800 = vmatprep.subr.bf16.mxu0 %v9561_v25  ;;  %7144 = vmatprep.subr.bf16.mxu1 %v9563_v26  ;;  %v9609_v25 = vcombine.high %v1115_v13, %v1119_v14  ;;  %v9611_v26 = vcombine.high %v1116_v15, %v1120_v17  ;;  %v1160_v46 = vld [vmem:[%s10331_s14 + $0x19a8] sm:$0xff]  ;;  %v1167_v13 = vld [vmem:[%s10331_s14 + $0x19e0] sm:$0xff] }
 0x19e   : > { %v1164_v14 = vld [vmem:[%s10331_s14 + $0x19c8] sm:$0xff] }
 0x1a0   : > { %6801 = vmatpush1.bf16.msra.mxu0 %v9560_v30  ;;  %7145 = vmatpush1.bf16.msra.mxu1 %v9562_v31  ;;  %v9610_v30 = vcombine.low %v1116_v15, %v1120_v17  ;;  %v9617_v31 = vcombine.high %v1123_v27, %v1127_v50  ;;  %v1168_v15 = vld [vmem:[%s10331_s14 + $0x19e8] sm:$0xff]  ;;  %v1175_v27 = vld [vmem:[%s10331_s14 + $0x1a20] sm:$0xff] }
 0x1a1   : > { %6802 = vmatprep.subr.bf16.mxu0 %v9569_v33  ;;  %7146 = vmatprep.subr.bf16.mxu1 %v9571_v36  ;;  %v9619_v33 = vcombine.high %v1124_v62, %v1128_v28  ;;  %v1131_v36 = vld [vmem:[%s10331_s14 + $0x18c0] sm:$0xff]  ;;  %v1172_v50 = vld [vmem:[%s10331_s14 + $0x1a08] sm:$0xff] }
 0x1a2   : > { %v9624_v34 = vcombine.low %v1131_v36, %v1135_v37 }
 0x1a4   : > { %6803 = vmatpush1.bf16.msra.mxu0 %v9568_v6  ;;  %7147 = vmatpush1.bf16.msra.mxu1 %v9570_v41  ;;  %v9618_v6 = vcombine.low %v1124_v62, %v1128_v28  ;;  %v9625_v41 = vcombine.high %v1131_v36, %v1135_v37  ;;  %v1176_v62 = vld [vmem:[%s10331_s14 + $0x1a28] sm:$0xff]  ;;  %v1183_v36 = vld [vmem:[%s10331_s14 + $0x1a60] sm:$0xff] }
 0x1a5   : > { %6804 = vmatprep.subr.bf16.mxu0 %v9577_v42  ;;  %7148 = vmatprep.subr.bf16.mxu1 %v9579_v43  ;;  %v9627_v42 = vcombine.high %v1132_v38, %v1136_v39  ;;  %v1139_v43 = vld [vmem:[%s10331_s14 + $0x1900] sm:$0xff]  ;;  %v1180_v37 = vld [vmem:[%s10331_s14 + $0x1a48] sm:$0xff] }
 0x1a6   : > { %v9632_v59 = vcombine.low %v1139_v43, %v1143_v45 }
 0x1a8   : > { %6805 = vmatpush1.bf16.msra.mxu0 %v9576_v53  ;;  %7149 = vmatpush1.bf16.msra.mxu1 %v9578_v54  ;;  %v9626_v53 = vcombine.low %v1132_v38, %v1136_v39  ;;  %v9633_v54 = vcombine.high %v1139_v43, %v1143_v45  ;;  %v1184_v38 = vld [vmem:[%s10331_s14 + $0x1a68] sm:$0xff]  ;;  %v1191_v43 = vld [vmem:[%s10331_s14 + $0x1aa0] sm:$0xff] }
 0x1a9   : > { %6806 = vmatprep.subr.bf16.mxu0 %v9585_v55  ;;  %7150 = vmatprep.subr.bf16.mxu1 %v9587_v21  ;;  %v9635_v55 = vcombine.high %v1140_v49, %v1144_v52  ;;  %v1147_v21 = vld [vmem:[%s10331_s14 + $0x1940] sm:$0xff]  ;;  %v1188_v45 = vld [vmem:[%s10331_s14 + $0x1a88] sm:$0xff] }
 0x1aa   : > { %v9640_v5 = vcombine.low %v1147_v21, %v1151_v56 }
 0x1ac   : > { %6807 = vmatpush1.bf16.msra.mxu0 %v9584_v61  ;;  %7151 = vmatpush1.bf16.msra.mxu1 %v9586_v0  ;;  %v9634_v61 = vcombine.low %v1140_v49, %v1144_v52  ;;  %v9641_v0 = vcombine.high %v1147_v21, %v1151_v56  ;;  %v1192_v49 = vld [vmem:[%s10331_s14 + $0x1aa8] sm:$0xff]  ;;  %v1199_v21 = vld [vmem:[%s10331_s14 + $0x1ae0] sm:$0xff] }
 0x1ad   : > { %6808 = vmatprep.subr.bf16.mxu0 %v9593_v1  ;;  %7152 = vmatprep.subr.bf16.mxu1 %v9595_v2  ;;  %v9643_v1 = vcombine.high %v1148_v57, %v1152_v58  ;;  %v1155_v2 = vld [vmem:[%s10331_s14 + $0x1980] sm:$0xff]  ;;  %v1196_v56 = vld [vmem:[%s10331_s14 + $0x1ac8] sm:$0xff] }
 0x1ae   : > { %v9648_v17 = vcombine.low %v1155_v2, %v1159_v3 }
 0x1b0   : > { %6809 = vmatpush1.bf16.msra.mxu0 %v9592_v8  ;;  %7153 = vmatpush1.bf16.msra.mxu1 %v9594_v9  ;;  %v9642_v8 = vcombine.low %v1148_v57, %v1152_v58  ;;  %v9649_v9 = vcombine.high %v1155_v2, %v1159_v3  ;;  %v1200_v57 = vld [vmem:[%s10331_s14 + $0x1ae8] sm:$0xff]  ;;  %v1207_v2 = vld [vmem:[%s10331_s14 + $0x1b20] sm:$0xff] }
 0x1b1   : > { %6821 = vmatprep.subr.bf16.mxu0 %v9601_v10  ;;  %7165 = vmatprep.subr.bf16.mxu1 %v9603_v12  ;;  %v9651_v10 = vcombine.high %v1156_v4, %v1160_v46  ;;  %v1163_v12 = vld [vmem:[%s10331_s14 + $0x19c0] sm:$0xff]  ;;  %v1204_v3 = vld [vmem:[%s10331_s14 + $0x1b08] sm:$0xff] }
 0x1b2   : > { %v9656_v28 = vcombine.low %v1163_v12, %v1167_v13 }
 0x1b3   : > { %6811 = vmatmul.mubr.bf16.vlgmr.msra.gmra.mrb[0].mxu0 %v10831_v16  ;;  %7155 = vmatmul.mubr.bf16.vlgmr.msra.gmra.mrb[0].mxu1 %v10831_v16 }
 0x1b4   : > { %6822 = vmatpush1.bf16.msra.mxu0 %v9600_v23  ;;  %7166 = vmatpush1.bf16.msra.mxu1 %v9602_v24  ;;  %v9650_v23 = vcombine.low %v1156_v4, %v1160_v46  ;;  %v9657_v24 = vcombine.high %v1163_v12, %v1167_v13  ;;  %v1208_v4 = vld [vmem:[%s10331_s14 + $0x1b28] sm:$0xff]  ;;  %v1215_v12 = vld [vmem:[%s10331_s14 + $0x1b60] sm:$0xff] }
 0x1b5   : > { %6823 = vmatprep.subr.bf16.mxu0 %v9609_v25  ;;  %7167 = vmatprep.subr.bf16.mxu1 %v9611_v26  ;;  %v9659_v25 = vcombine.high %v1164_v14, %v1168_v15  ;;  %v1171_v26 = vld [vmem:[%s10331_s14 + $0x1a00] sm:$0xff]  ;;  %v1212_v13 = vld [vmem:[%s10331_s14 + $0x1b48] sm:$0xff] }
 0x1b6   : > { %6853 = vmatprep.mubr.bf16.mxu0 %v10844_v51  ;;  %7197 = vmatprep.mubr.bf16.mxu1 %v10844_v51  ;;  %v9664_v39 = vcombine.low %v1171_v26, %v1175_v27 }
 0x1b8   : > { %6824 = vmatpush1.bf16.msra.mxu0 %v9608_v29  ;;  %7168 = vmatpush1.bf16.msra.mxu1 %v9610_v30  ;;  %v9658_v29 = vcombine.low %v1164_v14, %v1168_v15  ;;  %v9665_v30 = vcombine.high %v1171_v26, %v1175_v27  ;;  %v1216_v14 = vld [vmem:[%s10331_s14 + $0x1b68] sm:$0xff]  ;;  %v1223_v26 = vld [vmem:[%s10331_s14 + $0x1ba0] sm:$0xff] }
 0x1b9   : > { %6825 = vmatprep.subr.bf16.mxu0 %v9617_v31  ;;  %7169 = vmatprep.subr.bf16.mxu1 %v9619_v33  ;;  %v9667_v31 = vcombine.high %v1172_v50, %v1176_v62  ;;  %v1179_v33 = vld [vmem:[%s10331_s14 + $0x1a40] sm:$0xff]  ;;  %v1220_v27 = vld [vmem:[%s10331_s14 + $0x1b88] sm:$0xff] }
 0x1ba   : > { %v9672_v52 = vcombine.low %v1179_v33, %v1183_v36 }
 0x1bc   : > { %6826 = vmatpush1.bf16.msra.mxu0 %v9616_v40  ;;  %7170 = vmatpush1.bf16.msra.mxu1 %v9618_v6  ;;  %v9666_v40 = vcombine.low %v1172_v50, %v1176_v62  ;;  %v9673_v6 = vcombine.high %v1179_v33, %v1183_v36  ;;  %v1224_v50 = vld [vmem:[%s10331_s14 + $0x1ba8] sm:$0xff]  ;;  %v1231_v33 = vld [vmem:[%s10331_s14 + $0x1be0] sm:$0xff] }
 0x1bd   : > { %6827 = vmatprep.subr.bf16.mxu0 %v9625_v41  ;;  %7171 = vmatprep.subr.bf16.mxu1 %v9627_v42  ;;  %v9675_v41 = vcombine.high %v1180_v37, %v1184_v38  ;;  %v1187_v42 = vld [vmem:[%s10331_s14 + $0x1a80] sm:$0xff]  ;;  %v1228_v36 = vld [vmem:[%s10331_s14 + $0x1bc8] sm:$0xff] }
 0x1be   : > { %v9680_v58 = vcombine.low %v1187_v42, %v1191_v43 }
 0x1c0   : > { %6828 = vmatpush1.bf16.msra.mxu0 %v9624_v34  ;;  %7172 = vmatpush1.bf16.msra.mxu1 %v9626_v53  ;;  %v9674_v34 = vcombine.low %v1180_v37, %v1184_v38  ;;  %v9681_v53 = vcombine.high %v1187_v42, %v1191_v43  ;;  %v1232_v37 = vld [vmem:[%s10331_s14 + $0x1be8] sm:$0xff]  ;;  %v1239_v42 = vld [vmem:[%s10331_s14 + $0x1c20] sm:$0xff] }
 0x1c1   : > { %6829 = vmatprep.subr.bf16.mxu0 %v9633_v54  ;;  %7173 = vmatprep.subr.bf16.mxu1 %v9635_v55  ;;  %v9683_v54 = vcombine.high %v1188_v45, %v1192_v49  ;;  %v1195_v55 = vld [vmem:[%s10331_s14 + $0x1ac0] sm:$0xff]  ;;  %v1236_v43 = vld [vmem:[%s10331_s14 + $0x1c08] sm:$0xff] }
 0x1c2   : > { %v9688_v46 = vcombine.low %v1195_v55, %v1199_v21 }
 0x1c4   : > { %6830 = vmatpush1.bf16.msra.mxu0 %v9632_v59  ;;  %7174 = vmatpush1.bf16.msra.mxu1 %v9634_v61  ;;  %v9682_v59 = vcombine.low %v1188_v45, %v1192_v49  ;;  %v9689_v61 = vcombine.high %v1195_v55, %v1199_v21  ;;  %v1240_v45 = vld [vmem:[%s10331_s14 + $0x1c28] sm:$0xff]  ;;  %v1247_v55 = vld [vmem:[%s10331_s14 + $0x1c60] sm:$0xff] }
 0x1c5   : > { %6831 = vmatprep.subr.bf16.mxu0 %v9641_v0  ;;  %7175 = vmatprep.subr.bf16.mxu1 %v9643_v1  ;;  %v9691_v0 = vcombine.high %v1196_v56, %v1200_v57  ;;  %v1203_v1 = vld [vmem:[%s10331_s14 + $0x1b00] sm:$0xff]  ;;  %v1244_v21 = vld [vmem:[%s10331_s14 + $0x1c48] sm:$0xff] }
 0x1c6   : > { %v9696_v15 = vcombine.low %v1203_v1, %v1207_v2 }
 0x1c8   : > { %6832 = vmatpush1.bf16.msra.mxu0 %v9640_v5  ;;  %7176 = vmatpush1.bf16.msra.mxu1 %v9642_v8  ;;  %v9690_v5 = vcombine.low %v1196_v56, %v1200_v57  ;;  %v9697_v8 = vcombine.high %v1203_v1, %v1207_v2  ;;  %v10913_v56 = vcombine.low %v10835_v18, %v10838_v20  ;;  %v1248_v57 = vld [vmem:[%s10331_s14 + $0x1c68] sm:$0xff]  ;;  %v1255_v18 = vld [vmem:[%s10331_s14 + $0x1ca0] sm:$0xff] }
 0x1c9   : > { %6833 = vmatprep.subr.bf16.mxu0 %v9649_v9  ;;  %7177 = vmatprep.subr.bf16.mxu1 %v9651_v10  ;;  %v9699_v9 = vcombine.high %v1204_v3, %v1208_v4  ;;  %v1211_v10 = vld [vmem:[%s10331_s14 + $0x1b40] sm:$0xff]  ;;  %v9739_v2 = vcombine.high %v1244_v21, %v1248_v57 }
 0x1ca   : > { %v9704_v62 = vcombine.low %v1211_v10, %v1215_v12 }
 0x1cc   : > { %6834 = vmatpush1.bf16.msra.mxu0 %v9648_v17  ;;  %7178 = vmatpush1.bf16.msra.mxu1 %v9650_v23  ;;  %v9698_v17 = vcombine.low %v1204_v3, %v1208_v4  ;;  %v9705_v23 = vcombine.high %v1211_v10, %v1215_v12  ;;  %v1251_v3 = vld [vmem:[%s10331_s14 + $0x1c80] sm:$0xff]  ;;  %v1252_v4 = vld [vmem:[%s10331_s14 + $0x1c88] sm:$0xff] }
 0x1cd   : > { %6835 = vmatprep.subr.bf16.mxu0 %v9657_v24  ;;  %7179 = vmatprep.subr.bf16.mxu1 %v9659_v25  ;;  %v9707_v24 = vcombine.high %v1212_v13, %v1216_v14  ;;  %v1219_v25 = vld [vmem:[%s10331_s14 + $0x1b80] sm:$0xff] }
 0x1ce   : > { %v9712_v38 = vcombine.low %v1219_v25, %v1223_v26  ;;  %v1259_v12 = vld [vmem:[%s10331_s14 + $0x1cc0] sm:$0xff] }
 0x1d0   : > { %6836 = vmatpush1.bf16.msra.mxu0 %v9656_v28  ;;  %7180 = vmatpush1.bf16.msra.mxu1 %v9658_v29  ;;  %v9706_v28 = vcombine.low %v1212_v13, %v1216_v14  ;;  %v9713_v29 = vcombine.high %v1219_v25, %v1223_v26  ;;  %v1263_v13 = vld [vmem:[%s10331_s14 + $0x1ce0] sm:$0xff]  ;;  %v1260_v14 = vld [vmem:[%s10331_s14 + $0x1cc8] sm:$0xff] }
 0x1d1   : > { %6837 = vmatprep.subr.bf16.mxu0 %v9665_v30  ;;  %7181 = vmatprep.subr.bf16.mxu1 %v9667_v31  ;;  %v9715_v30 = vcombine.high %v1220_v27, %v1224_v50  ;;  %v1227_v31 = vld [vmem:[%s10331_s14 + $0x1bc0] sm:$0xff] }
 0x1d2   : > { %v9720_v49 = vcombine.low %v1227_v31, %v1231_v33  ;;  %v1267_v26 = vld [vmem:[%s10331_s14 + $0x1d00] sm:$0xff] }
 0x1d4   : > { %6838 = vmatpush1.bf16.msra.mxu0 %v9664_v39  ;;  %7182 = vmatpush1.bf16.msra.mxu1 %v9666_v40  ;;  %v9714_v39 = vcombine.low %v1220_v27, %v1224_v50  ;;  %v9721_v40 = vcombine.high %v1227_v31, %v1231_v33  ;;  %v1271_v27 = vld [vmem:[%s10331_s14 + $0x1d20] sm:$0xff]  ;;  %v1268_v50 = vld [vmem:[%s10331_s14 + $0x1d08] sm:$0xff] }
 0x1d5   : > { %6839 = vmatprep.subr.bf16.mxu0 %v9673_v6  ;;  %7183 = vmatprep.subr.bf16.mxu1 %v9675_v41  ;;  %v9723_v6 = vcombine.high %v1228_v36, %v1232_v37  ;;  %v1235_v41 = vld [vmem:[%s10331_s14 + $0x1c00] sm:$0xff] }
 0x1d6   : > { %v1275_v33 = vld [vmem:[%s10331_s14 + $0x1d40] sm:$0xff] }
 0x1d8   : > { %6840 = vmatpush1.bf16.msra.mxu0 %v9672_v52  ;;  %7184 = vmatpush1.bf16.msra.mxu1 %v9674_v34  ;;  %v9722_v52 = vcombine.low %v1228_v36, %v1232_v37  ;;  %v9729_v34 = vcombine.high %v1235_v41, %v1239_v42  ;;  %v1279_v36 = vld [vmem:[%s10331_s14 + $0x1d60] sm:$0xff]  ;;  %v1276_v37 = vld [vmem:[%s10331_s14 + $0x1d48] sm:$0xff] }
 0x1d9   : > { %6841 = vmatprep.subr.bf16.mxu0 %v9681_v53  ;;  %7185 = vmatprep.subr.bf16.mxu1 %v9683_v54  ;;  %v9731_v53 = vcombine.high %v1236_v43, %v1240_v45  ;;  %v1243_v54 = vld [vmem:[%s10331_s14 + $0x1c40] sm:$0xff] }
 0x1da   : > { %v9737_v1 = vcombine.high %v1243_v54, %v1247_v55 }
 0x1dc   : > { %6842 = vmatpush1.bf16.msra.mxu0 %v9680_v58  ;;  %7186 = vmatpush1.bf16.msra.mxu1 %v9682_v59  ;;  %v10917_v58 = vld [vmem:[%s10333_s15 + $0x38] sm:$0xff] }
 0x1dd   : > { %6843 = vmatprep.subr.bf16.mxu0 %v9689_v61  ;;  %7187 = vmatprep.subr.bf16.mxu1 %v9691_v0  ;;  %v10920_v59 = vld [vmem:[%s10333_s15 + $0x78] sm:$0xff]  ;;  %v9728_v61 = vcombine.low %v1235_v41, %v1239_v42  ;;  %v9730_v0 = vcombine.low %v1236_v43, %v1240_v45  ;;  %v1283_v42 = vld [vmem:[%s10331_s14 + $0x1d80] sm:$0xff]  ;;  %v1284_v45 = vld [vmem:[%s10331_s14 + $0x1d88] sm:$0xff] }
 0x1de   : > { %v10926_v20 = vcombine.high %v10917_v58, %v10920_v59  ;;  %v1287_v43 = vld [vmem:[%s10331_s14 + $0x1da0] sm:$0xff] }
 0x1e0   : > { %6844 = vmatpush1.bf16.msra.mxu0 %v9688_v46  ;;  %7188 = vmatpush1.bf16.msra.mxu1 %v9690_v5  ;;  %v1256_v46 = vld [vmem:[%s10331_s14 + $0x1ca8] sm:$0xff]  ;;  %v9736_v5 = vcombine.low %v1243_v54, %v1247_v55  ;;  %v1291_v55 = vld [vmem:[%s10331_s14 + $0x1dc0] sm:$0xff] }
 0x1e1   : > { %6845 = vmatprep.subr.bf16.mxu0 %v9697_v8  ;;  %7189 = vmatprep.subr.bf16.mxu1 %v9699_v9  ;;  %v9738_v8 = vcombine.low %v1244_v21, %v1248_v57  ;;  %v9745_v9 = vcombine.high %v1251_v3, %v1255_v18  ;;  %v9747_v10 = vcombine.high %v1252_v4, %v1256_v46  ;;  %v1295_v21 = vld [vmem:[%s10331_s14 + $0x1de0] sm:$0xff]  ;;  %v1292_v57 = vld [vmem:[%s10331_s14 + $0x1dc8] sm:$0xff] }
 0x1e4   : > { %6846 = vmatpush1.bf16.msra.mxu0 %v9696_v15  ;;  %7190 = vmatpush1.bf16.msra.mxu1 %v9698_v17  ;;  %v1264_v15 = vld [vmem:[%s10331_s14 + $0x1ce8] sm:$0xff]  ;;  %v9744_v17 = vcombine.low %v1251_v3, %v1255_v18  ;;  %v1299_v18 = vld [vmem:[%s10331_s14 + $0x1e00] sm:$0xff] }
 0x1e5   : > { %6847 = vmatprep.subr.bf16.mxu0 %v9705_v23  ;;  %7191 = vmatprep.subr.bf16.mxu1 %v9707_v24  ;;  %v9746_v23 = vcombine.low %v1252_v4, %v1256_v46  ;;  %v9753_v24 = vcombine.high %v1259_v12, %v1263_v13  ;;  %v9755_v25 = vcombine.high %v1260_v14, %v1264_v15  ;;  %v1303_v4 = vld [vmem:[%s10331_s14 + $0x1e20] sm:$0xff]  ;;  %v1300_v46 = vld [vmem:[%s10331_s14 + $0x1e08] sm:$0xff] }
 0x1e8   : > { %6848 = vmatpush1.bf16.msra.mxu0 %v9704_v62  ;;  %7192 = vmatpush1.bf16.msra.mxu1 %v9706_v28  ;;  %v1272_v62 = vld [vmem:[%s10331_s14 + $0x1d28] sm:$0xff]  ;;  %v9752_v28 = vcombine.low %v1259_v12, %v1263_v13  ;;  %v1307_v13 = vld [vmem:[%s10331_s14 + $0x1e40] sm:$0xff] }
 0x1e9   : > { %6849 = vmatprep.subr.bf16.mxu0 %v9713_v29  ;;  %7193 = vmatprep.subr.bf16.mxu1 %v9715_v30  ;;  %v9754_v29 = vcombine.low %v1260_v14, %v1264_v15  ;;  %v9761_v30 = vcombine.high %v1267_v26, %v1271_v27  ;;  %v9763_v31 = vcombine.high %v1268_v50, %v1272_v62  ;;  %v1311_v14 = vld [vmem:[%s10331_s14 + $0x1e60] sm:$0xff]  ;;  %v1308_v15 = vld [vmem:[%s10331_s14 + $0x1e48] sm:$0xff] }
 0x1ec   : > { %6850 = vmatpush1.bf16.msra.mxu0 %v9712_v38  ;;  %7194 = vmatpush1.bf16.msra.mxu1 %v9714_v39  ;;  %v1280_v38 = vld [vmem:[%s10331_s14 + $0x1d68] sm:$0xff]  ;;  %v9760_v39 = vcombine.low %v1267_v26, %v1271_v27  ;;  %v1315_v27 = vld [vmem:[%s10331_s14 + $0x1e80] sm:$0xff] }
 0x1ed   : > { %6851 = vmatprep.subr.bf16.mxu0 %v9721_v40  ;;  %7195 = vmatprep.subr.bf16.mxu1 %v9723_v6  ;;  %v9762_v40 = vcombine.low %v1268_v50, %v1272_v62  ;;  %v9769_v6 = vcombine.high %v1275_v33, %v1279_v36  ;;  %v9771_v41 = vcombine.high %v1276_v37, %v1280_v38  ;;  %v1319_v50 = vld [vmem:[%s10331_s14 + $0x1ea0] sm:$0xff]  ;;  %v1316_v62 = vld [vmem:[%s10331_s14 + $0x1e88] sm:$0xff] }
 0x1f0   : > { %6852 = vmatpush1.bf16.msra.mxu0 %v9720_v49  ;;  %7196 = vmatpush1.bf16.msra.mxu1 %v9722_v52  ;;  %v1288_v49 = vld [vmem:[%s10331_s14 + $0x1da8] sm:$0xff]  ;;  %v9768_v52 = vcombine.low %v1275_v33, %v1279_v36  ;;  %v1323_v36 = vld [vmem:[%s10331_s14 + $0x1ec0] sm:$0xff] }
 0x1f1   : > { %6864 = vmatprep.subr.bf16.mxu0 %v9729_v34  ;;  %7208 = vmatprep.subr.bf16.mxu1 %v9731_v53  ;;  %v9770_v34 = vcombine.low %v1276_v37, %v1280_v38  ;;  %v9777_v53 = vcombine.high %v1283_v42, %v1287_v43  ;;  %v9779_v54 = vcombine.high %v1284_v45, %v1288_v49  ;;  %v1327_v37 = vld [vmem:[%s10331_s14 + $0x1ee0] sm:$0xff]  ;;  %v1324_v38 = vld [vmem:[%s10331_s14 + $0x1ec8] sm:$0xff] }
 0x1f3   : > { %6854 = vmatmul.mubr.bf16.vlgmr.msra.gmra.mrb[0].mxu0 %v10913_v56  ;;  %7198 = vmatmul.mubr.bf16.vlgmr.msra.gmra.mrb[0].mxu1 %v10913_v56 }
 0x1f4   : > { %6865 = vmatpush1.bf16.msra.mxu0 %v9728_v61  ;;  %7209 = vmatpush1.bf16.msra.mxu1 %v9730_v0  ;;  %v1296_v61 = vld [vmem:[%s10331_s14 + $0x1de8] sm:$0xff]  ;;  %v9776_v0 = vcombine.low %v1283_v42, %v1287_v43  ;;  %v1331_v43 = vld [vmem:[%s10331_s14 + $0x1f00] sm:$0xff] }
 0x1f5   : > { %6866 = vmatprep.subr.bf16.mxu0 %v9737_v1  ;;  %7210 = vmatprep.subr.bf16.mxu1 %v9739_v2  ;;  %v9778_v1 = vcombine.low %v1284_v45, %v1288_v49  ;;  %v9785_v2 = vcombine.high %v1291_v55, %v1295_v21  ;;  %v9787_v3 = vcombine.high %v1292_v57, %v1296_v61  ;;  %v1335_v45 = vld [vmem:[%s10331_s14 + $0x1f20] sm:$0xff]  ;;  %v1332_v49 = vld [vmem:[%s10331_s14 + $0x1f08] sm:$0xff] }
 0x1f6   : > { %6896 = vmatprep.mubr.bf16.mxu0 %v10926_v20  ;;  %7240 = vmatprep.mubr.bf16.mxu1 %v10926_v20 }
 0x1f8   : > { %6867 = vmatpush1.bf16.msra.mxu0 %v9736_v5  ;;  %7211 = vmatpush1.bf16.msra.mxu1 %v9738_v8  ;;  %v1304_v5 = vld [vmem:[%s10331_s14 + $0x1e28] sm:$0xff]  ;;  %v9784_v8 = vcombine.low %v1291_v55, %v1295_v21  ;;  %v1339_v21 = vld [vmem:[%s10331_s14 + $0x1f40] sm:$0xff] }
 0x1f9   : > { %6868 = vmatprep.subr.bf16.mxu0 %v9745_v9  ;;  %7212 = vmatprep.subr.bf16.mxu1 %v9747_v10  ;;  %v9786_v9 = vcombine.low %v1292_v57, %v1296_v61  ;;  %v9793_v10 = vcombine.high %v1299_v18, %v1303_v4  ;;  %v9795_v12 = vcombine.high %v1300_v46, %v1304_v5  ;;  %v1343_v57 = vld [vmem:[%s10331_s14 + $0x1f60] sm:$0xff]  ;;  %v1340_v61 = vld [vmem:[%s10331_s14 + $0x1f48] sm:$0xff] }
 0x1fc   : > { %6869 = vmatpush1.bf16.msra.mxu0 %v9744_v17  ;;  %7213 = vmatpush1.bf16.msra.mxu1 %v9746_v23  ;;  %v1312_v17 = vld [vmem:[%s10331_s14 + $0x1e68] sm:$0xff]  ;;  %v9792_v23 = vcombine.low %v1299_v18, %v1303_v4  ;;  %v1347_v4 = vld [vmem:[%s10331_s14 + $0x1f80] sm:$0xff] }
 0x1fd   : > { %6870 = vmatprep.subr.bf16.mxu0 %v9753_v24  ;;  %7214 = vmatprep.subr.bf16.mxu1 %v9755_v25  ;;  %v9794_v24 = vcombine.low %v1300_v46, %v1304_v5  ;;  %v9801_v25 = vcombine.high %v1307_v13, %v1311_v14  ;;  %v9803_v26 = vcombine.high %v1308_v15, %v1312_v17  ;;  %v1351_v46 = vld [vmem:[%s10331_s14 + $0x1fa0] sm:$0xff]  ;;  %v1348_v5 = vld [vmem:[%s10331_s14 + $0x1f88] sm:$0xff] }
 0x200   : > { %6871 = vmatpush1.bf16.msra.mxu0 %v9752_v28  ;;  %7215 = vmatpush1.bf16.msra.mxu1 %v9754_v29  ;;  %v1320_v28 = vld [vmem:[%s10331_s14 + $0x1ea8] sm:$0xff]  ;;  %v9800_v29 = vcombine.low %v1307_v13, %v1311_v14  ;;  %v1355_v14 = vld [vmem:[%s10331_s14 + $0x1fc0] sm:$0xff] }
 0x201   : > { %6872 = vmatprep.subr.bf16.mxu0 %v9761_v30  ;;  %7216 = vmatprep.subr.bf16.mxu1 %v9763_v31  ;;  %v9802_v30 = vcombine.low %v1308_v15, %v1312_v17  ;;  %v9809_v31 = vcombine.high %v1315_v27, %v1319_v50  ;;  %v9811_v33 = vcombine.high %v1316_v62, %v1320_v28  ;;  %v1359_v15 = vld [vmem:[%s10331_s14 + $0x1fe0] sm:$0xff]  ;;  %v1356_v17 = vld [vmem:[%s10331_s14 + $0x1fc8] sm:$0xff] }
 0x204   : > { %6873 = vmatpush1.bf16.msra.mxu0 %v9760_v39  ;;  %7217 = vmatpush1.bf16.msra.mxu1 %v9762_v40  ;;  %v1328_v39 = vld [vmem:[%s10331_s14 + $0x1ee8] sm:$0xff]  ;;  %v9808_v40 = vcombine.low %v1315_v27, %v1319_v50  ;;  %v341_v50 = vld [vmem:[%s10331_s14 + $0x10] sm:$0xff] }
 0x205   : > { %6874 = vmatprep.subr.bf16.mxu0 %v9769_v6  ;;  %7218 = vmatprep.subr.bf16.mxu1 %v9771_v41  ;;  %v9810_v6 = vcombine.low %v1316_v62, %v1320_v28  ;;  %v9817_v41 = vcombine.high %v1323_v36, %v1327_v37  ;;  %v9819_v42 = vcombine.high %v1324_v38, %v1328_v39  ;;  %v345_v62 = vld [vmem:[%s10331_s14 + $0x30] sm:$0xff]  ;;  %v342_v28 = vld [vmem:[%s10331_s14 + $0x18] sm:$0xff] }
 0x208   : > { %6875 = vmatpush1.bf16.msra.mxu0 %v9768_v52  ;;  %7219 = vmatpush1.bf16.msra.mxu1 %v9770_v34  ;;  %v1336_v52 = vld [vmem:[%s10331_s14 + $0x1f28] sm:$0xff]  ;;  %v9816_v34 = vcombine.low %v1323_v36, %v1327_v37  ;;  %v349_v37 = vld [vmem:[%s10331_s14 + $0x50] sm:$0xff] }
 0x209   : > { %6876 = vmatprep.subr.bf16.mxu0 %v9777_v53  ;;  %7220 = vmatprep.subr.bf16.mxu1 %v9779_v54  ;;  %v9818_v53 = vcombine.low %v1324_v38, %v1328_v39  ;;  %v9825_v54 = vcombine.high %v1331_v43, %v1335_v45  ;;  %v9827_v55 = vcombine.high %v1332_v49, %v1336_v52  ;;  %v353_v38 = vld [vmem:[%s10331_s14 + $0x70] sm:$0xff] }
 0x20a   : > { %v10994_v39 = vcombine.low %v10917_v58, %v10920_v59  ;;  %v358_v58 = vld [vmem:[%s10331_s14 + $0x98] sm:$0xff] }
 0x20b   : > { %v362_v59 = vld [vmem:[%s10331_s14 + $0xb8] sm:$0xff] }
 0x20c   : > { %6877 = vmatpush1.bf16.msra.mxu0 %v9776_v0  ;;  %7221 = vmatpush1.bf16.msra.mxu1 %v9778_v1  ;;  %v1344_v0 = vld [vmem:[%s10331_s14 + $0x1f68] sm:$0xff]  ;;  %v9824_v1 = vcombine.low %v1331_v43, %v1335_v45  ;;  %v8845_v43 = vcombine.high %v349_v37, %v353_v38 }
 0x20d   : > { %6878 = vmatprep.subr.bf16.mxu0 %v9785_v2  ;;  %7222 = vmatprep.subr.bf16.mxu1 %v9787_v3  ;;  %v9826_v2 = vcombine.low %v1332_v49, %v1336_v52  ;;  %v9833_v3 = vcombine.high %v1339_v21, %v1343_v57  ;;  %v9835_v18 = vcombine.high %v1340_v61, %v1344_v0  ;;  %v357_v49 = vld [vmem:[%s10331_s14 + $0x90] sm:$0xff] }
 0x20e   : > { %v361_v52 = vld [vmem:[%s10331_s14 + $0xb0] sm:$0xff] }
 0x210   : > { %6879 = vmatpush1.bf16.msra.mxu0 %v9784_v8  ;;  %7223 = vmatpush1.bf16.msra.mxu1 %v9786_v9  ;;  %v1352_v8 = vld [vmem:[%s10331_s14 + $0x1fa8] sm:$0xff]  ;;  %v9832_v9 = vcombine.low %v1339_v21, %v1343_v57  ;;  %v365_v21 = vld [vmem:[%s10331_s14 + $0xd0] sm:$0xff] }
 0x211   : > { %6880 = vmatprep.subr.bf16.mxu0 %v9793_v10  ;;  %7224 = vmatprep.subr.bf16.mxu1 %v9795_v12  ;;  %v9834_v10 = vcombine.low %v1340_v61, %v1344_v0  ;;  %v9841_v12 = vcombine.high %v1347_v4, %v1351_v46  ;;  %v9843_v13 = vcombine.high %v1348_v5, %v1352_v8  ;;  %v369_v57 = vld [vmem:[%s10331_s14 + $0xf0] sm:$0xff]  ;;  %v366_v61 = vld [vmem:[%s10331_s14 + $0xd8] sm:$0xff] }
 0x212   : > { %v370_v0 = vld [vmem:[%s10331_s14 + $0xf8] sm:$0xff] }
 0x214   : > { %6881 = vmatpush1.bf16.msra.mxu0 %v9792_v23  ;;  %7225 = vmatpush1.bf16.msra.mxu1 %v9794_v24  ;;  %v1360_v23 = vld [vmem:[%s10331_s14 + $0x1fe8] sm:$0xff]  ;;  %v9840_v24 = vcombine.low %v1347_v4, %v1351_v46  ;;  %v373_v4 = vld [vmem:[%s10331_s14 + $0x110] sm:$0xff] }
 0x215   : > { %6882 = vmatprep.subr.bf16.mxu0 %v9801_v25  ;;  %7226 = vmatprep.subr.bf16.mxu1 %v9803_v26  ;;  %v9842_v25 = vcombine.low %v1348_v5, %v1352_v8  ;;  %v9849_v26 = vcombine.high %v1355_v14, %v1359_v15  ;;  %v9851_v27 = vcombine.high %v1356_v17, %v1360_v23  ;;  %v377_v46 = vld [vmem:[%s10331_s14 + $0x130] sm:$0xff]  ;;  %v374_v5 = vld [vmem:[%s10331_s14 + $0x118] sm:$0xff] }
 0x216   : > { %v378_v8 = vld [vmem:[%s10331_s14 + $0x138] sm:$0xff] }
 0x218   : > { %6883 = vmatpush1.bf16.msra.mxu0 %v9800_v29  ;;  %7227 = vmatpush1.bf16.msra.mxu1 %v9802_v30  ;;  %v346_v29 = vld [vmem:[%s10331_s14 + $0x38] sm:$0xff]  ;;  %v9848_v30 = vcombine.low %v1355_v14, %v1359_v15  ;;  %v385_v14 = vld [vmem:[%s10331_s14 + $0x170] sm:$0xff] }
 0x219   : > { %6884 = vmatprep.subr.bf16.mxu0 %v9809_v31  ;;  %7228 = vmatprep.subr.bf16.mxu1 %v9811_v33  ;;  %v9850_v31 = vcombine.low %v1356_v17, %v1360_v23  ;;  %v8837_v33 = vcombine.high %v341_v50, %v345_v62  ;;  %v8839_v36 = vcombine.high %v342_v28, %v346_v29  ;;  %v382_v15 = vld [vmem:[%s10331_s14 + $0x158] sm:$0xff] }
 0x21a   : > { %v386_v17 = vld [vmem:[%s10331_s14 + $0x178] sm:$0xff]  ;;  %v8868_v23 = vcombine.low %v373_v4, %v377_v46 }
 0x21c   : > { %6885 = vmatpush1.bf16.msra.mxu0 %v9808_v40  ;;  %7229 = vmatpush1.bf16.msra.mxu1 %v9810_v6  ;;  %v350_v40 = vld [vmem:[%s10331_s14 + $0x58] sm:$0xff] }
 0x21d   : > { %6886 = vmatprep.subr.bf16.mxu0 %v9817_v41  ;;  %7230 = vmatprep.subr.bf16.mxu1 %v9819_v42  ;;  %v354_v6 = vld [vmem:[%s10331_s14 + $0x78] sm:$0xff]  ;;  %v8836_v41 = vcombine.low %v341_v50, %v345_v62  ;;  %v8838_v42 = vcombine.low %v342_v28, %v346_v29  ;;  %v393_v50 = vld [vmem:[%s10331_s14 + $0x1b0] sm:$0xff] }
 0x21e   : > { %v8847_v45 = vcombine.high %v350_v40, %v354_v6  ;;  %v390_v62 = vld [vmem:[%s10331_s14 + $0x198] sm:$0xff] }
 0x21f   : > { %v394_v28 = vld [vmem:[%s10331_s14 + $0x1b8] sm:$0xff] }
 0x220   : > { %6887 = vmatpush1.bf16.msra.mxu0 %v9816_v34  ;;  %7231 = vmatpush1.bf16.msra.mxu1 %v9818_v53  ;;  %v8844_v34 = vcombine.low %v349_v37, %v353_v38  ;;  %v8846_v53 = vcombine.low %v350_v40, %v354_v6  ;;  %v401_v37 = vld [vmem:[%s10331_s14 + $0x1f0] sm:$0xff]  ;;  %v398_v38 = vld [vmem:[%s10331_s14 + $0x1d8] sm:$0xff] }
 0x221   : > { %6888 = vmatprep.subr.bf16.mxu0 %v9825_v54  ;;  %7232 = vmatprep.subr.bf16.mxu1 %v9827_v55  ;;  %v8853_v54 = vcombine.high %v357_v49, %v361_v52  ;;  %v8855_v55 = vcombine.high %v358_v58, %v362_v59  ;;  %v402_v40 = vld [vmem:[%s10331_s14 + $0x1f8] sm:$0xff] }
 0x224   : > { %6889 = vmatpush1.bf16.msra.mxu0 %v9824_v1  ;;  %7233 = vmatpush1.bf16.msra.mxu1 %v9826_v2  ;;  %v8852_v1 = vcombine.low %v357_v49, %v361_v52  ;;  %v8854_v2 = vcombine.low %v358_v58, %v362_v59  ;;  %v409_v49 = vld [vmem:[%s10331_s14 + $0x230] sm:$0xff]  ;;  %v406_v52 = vld [vmem:[%s10331_s14 + $0x218] sm:$0xff] }
 0x225   : > { %6890 = vmatprep.subr.bf16.mxu0 %v9833_v3  ;;  %7234 = vmatprep.subr.bf16.mxu1 %v9835_v18  ;;  %v8861_v3 = vcombine.high %v365_v21, %v369_v57  ;;  %v8863_v18 = vcombine.high %v366_v61, %v370_v0  ;;  %v410_v58 = vld [vmem:[%s10331_s14 + $0x238] sm:$0xff] }
 0x228   : > { %6891 = vmatpush1.bf16.msra.mxu0 %v9832_v9  ;;  %7235 = vmatpush1.bf16.msra.mxu1 %v9834_v10  ;;  %v8860_v9 = vcombine.low %v365_v21, %v369_v57  ;;  %v8869_v10 = vcombine.high %v373_v4, %v377_v46  ;;  %v417_v21 = vld [vmem:[%s10331_s14 + $0x270] sm:$0xff]  ;;  %v414_v57 = vld [vmem:[%s10331_s14 + $0x258] sm:$0xff] }
 0x229   : > { %6892 = vmatprep.subr.bf16.mxu0 %v9841_v12  ;;  %7236 = vmatprep.subr.bf16.mxu1 %v9843_v13  ;;  %v8871_v12 = vcombine.high %v374_v5, %v378_v8  ;;  %v381_v13 = vld [vmem:[%s10331_s14 + $0x150] sm:$0xff]  ;;  %v422_v46 = vld [vmem:[%s10331_s14 + $0x298] sm:$0xff] }
 0x22a   : > { %v8876_v29 = vcombine.low %v381_v13, %v385_v14  ;;  %v425_v4 = vld [vmem:[%s10331_s14 + $0x2b0] sm:$0xff] }
 0x22c   : > { %6893 = vmatpush1.bf16.msra.mxu0 %v9840_v24  ;;  %7237 = vmatpush1.bf16.msra.mxu1 %v9842_v25  ;;  %v8870_v24 = vcombine.low %v374_v5, %v378_v8  ;;  %v8877_v25 = vcombine.high %v381_v13, %v385_v14  ;;  %v426_v5 = vld [vmem:[%s10331_s14 + $0x2b8] sm:$0xff]  ;;  %v433_v13 = vld [vmem:[%s10331_s14 + $0x2f0] sm:$0xff] }
 0x22d   : > { %6894 = vmatprep.subr.bf16.mxu0 %v9849_v26  ;;  %7238 = vmatprep.subr.bf16.mxu1 %v9851_v27  ;;  %v8879_v26 = vcombine.high %v382_v15, %v386_v17  ;;  %v389_v27 = vld [vmem:[%s10331_s14 + $0x190] sm:$0xff]  ;;  %v430_v14 = vld [vmem:[%s10331_s14 + $0x2d8] sm:$0xff] }
 0x22e   : > { %v8884_v6 = vcombine.low %v389_v27, %v393_v50 }
 0x230   : > { %6895 = vmatpush1.bf16.msra.mxu0 %v9848_v30  ;;  %7239 = vmatpush1.bf16.msra.mxu1 %v9850_v31  ;;  %v8878_v30 = vcombine.low %v382_v15, %v386_v17  ;;  %v8885_v31 = vcombine.high %v389_v27, %v393_v50  ;;  %v434_v15 = vld [vmem:[%s10331_s14 + $0x2f8] sm:$0xff]  ;;  %v441_v27 = vld [vmem:[%s10331_s14 + $0x330] sm:$0xff] }
 0x231   : > { %7251 = vmatprep.subr.bf16.mxu0 %v8837_v33  ;;  %7595 = vmatprep.subr.bf16.mxu1 %v8839_v36  ;;  %v8887_v33 = vcombine.high %v390_v62, %v394_v28  ;;  %v397_v36 = vld [vmem:[%s10331_s14 + $0x1d0] sm:$0xff]  ;;  %v438_v50 = vld [vmem:[%s10331_s14 + $0x318] sm:$0xff] }
 0x232   : > { %v8892_v59 = vcombine.low %v397_v36, %v401_v37 }
 0x233   : > { %6897 = vmatmul.mubr.bf16.vlgmr.msra.gmra.mrb[0].mxu0 %v10994_v39  ;;  %7241 = vmatmul.mubr.bf16.vlgmr.msra.gmra.mrb[0].mxu1 %v10994_v39 }
 0x234   : > { %7252 = vmatpush1.bf16.msra.mxu0 %v8836_v41  ;;  %7596 = vmatpush1.bf16.msra.mxu1 %v8838_v42  ;;  %v8886_v41 = vcombine.low %v390_v62, %v394_v28  ;;  %v8893_v42 = vcombine.high %v397_v36, %v401_v37  ;;  %v442_v62 = vld [vmem:[%s10331_s14 + $0x338] sm:$0xff]  ;;  %v449_v36 = vld [vmem:[%s10331_s14 + $0x370] sm:$0xff] }
 0x235   : > { %7253 = vmatprep.subr.bf16.mxu0 %v8845_v43  ;;  %7597 = vmatprep.subr.bf16.mxu1 %v8847_v45  ;;  %v8895_v43 = vcombine.high %v398_v38, %v402_v40  ;;  %v405_v45 = vld [vmem:[%s10331_s14 + $0x210] sm:$0xff]  ;;  %v446_v37 = vld [vmem:[%s10331_s14 + $0x358] sm:$0xff] }
 0x236   : > { %7283 = vmatprep.mubr.bf16.mxu0 %v10374_v11  ;;  %7627 = vmatprep.mubr.bf16.mxu1 %v10374_v11  ;;  %v8862_v11 = vcombine.low %v366_v61, %v370_v0  ;;  %v418_v61 = vld [vmem:[%s10331_s14 + $0x278] sm:$0xff]  ;;  %v8900_v0 = vcombine.low %v405_v45, %v409_v49 }
 0x238   : > { %7254 = vmatpush1.bf16.msra.mxu0 %v8844_v34  ;;  %7598 = vmatpush1.bf16.msra.mxu1 %v8846_v53  ;;  %v8894_v34 = vcombine.low %v398_v38, %v402_v40  ;;  %v8901_v53 = vcombine.high %v405_v45, %v409_v49  ;;  %v450_v38 = vld [vmem:[%s10331_s14 + $0x378] sm:$0xff]  ;;  %v457_v45 = vld [vmem:[%s10331_s14 + $0x3b0] sm:$0xff] }
 0x239   : > { %7255 = vmatprep.subr.bf16.mxu0 %v8853_v54  ;;  %7599 = vmatprep.subr.bf16.mxu1 %v8855_v55  ;;  %v8903_v54 = vcombine.high %v406_v52, %v410_v58  ;;  %v413_v55 = vld [vmem:[%s10331_s14 + $0x250] sm:$0xff]  ;;  %v454_v49 = vld [vmem:[%s10331_s14 + $0x398] sm:$0xff] }
 0x23a   : > { %v8908_v8 = vcombine.low %v413_v55, %v417_v21 }
 0x23c   : > { %7256 = vmatpush1.bf16.msra.mxu0 %v8852_v1  ;;  %7600 = vmatpush1.bf16.msra.mxu1 %v8854_v2  ;;  %v8902_v1 = vcombine.low %v406_v52, %v410_v58  ;;  %v8909_v2 = vcombine.high %v413_v55, %v417_v21  ;;  %v458_v52 = vld [vmem:[%s10331_s14 + $0x3b8] sm:$0xff]  ;;  %v465_v55 = vld [vmem:[%s10331_s14 + $0x3f0] sm:$0xff] }
 0x23d   : > { %7257 = vmatprep.subr.bf16.mxu0 %v8861_v3  ;;  %7601 = vmatprep.subr.bf16.mxu1 %v8863_v18  ;;  %v8911_v3 = vcombine.high %v414_v57, %v418_v61  ;;  %v421_v18 = vld [vmem:[%s10331_s14 + $0x290] sm:$0xff]  ;;  %v462_v21 = vld [vmem:[%s10331_s14 + $0x3d8] sm:$0xff] }
 0x23e   : > { %v8916_v17 = vcombine.low %v421_v18, %v425_v4 }
 0x240   : > { %7258 = vmatpush1.bf16.msra.mxu0 %v8860_v9  ;;  %7602 = vmatpush1.bf16.msra.mxu1 %v8862_v11  ;;  %v8910_v9 = vcombine.low %v414_v57, %v418_v61  ;;  %v8917_v11 = vcombine.high %v421_v18, %v425_v4  ;;  %v466_v57 = vld [vmem:[%s10331_s14 + $0x3f8] sm:$0xff]  ;;  %v473_v18 = vld [vmem:[%s10331_s14 + $0x430] sm:$0xff] }
 0x241   : > { %7259 = vmatprep.subr.bf16.mxu0 %v8869_v10  ;;  %7603 = vmatprep.subr.bf16.mxu1 %v8871_v12  ;;  %v8919_v10 = vcombine.high %v422_v46, %v426_v5  ;;  %v429_v12 = vld [vmem:[%s10331_s14 + $0x2d0] sm:$0xff]  ;;  %v470_v4 = vld [vmem:[%s10331_s14 + $0x418] sm:$0xff] }
 0x242   : > { %v8924_v28 = vcombine.low %v429_v12, %v433_v13 }
 0x244   : > { %7260 = vmatpush1.bf16.msra.mxu0 %v8868_v23  ;;  %7604 = vmatpush1.bf16.msra.mxu1 %v8870_v24  ;;  %v8918_v23 = vcombine.low %v422_v46, %v426_v5  ;;  %v8925_v24 = vcombine.high %v429_v12, %v433_v13  ;;  %v474_v46 = vld [vmem:[%s10331_s14 + $0x438] sm:$0xff]  ;;  %v481_v12 = vld [vmem:[%s10331_s14 + $0x470] sm:$0xff] }
 0x245   : > { %7261 = vmatprep.subr.bf16.mxu0 %v8877_v25  ;;  %7605 = vmatprep.subr.bf16.mxu1 %v8879_v26  ;;  %v8927_v25 = vcombine.high %v430_v14, %v434_v15  ;;  %v437_v26 = vld [vmem:[%s10331_s14 + $0x310] sm:$0xff]  ;;  %v478_v13 = vld [vmem:[%s10331_s14 + $0x458] sm:$0xff] }
 0x246   : > { %v8932_v40 = vcombine.low %v437_v26, %v441_v27 }
 0x248   : > { %7262 = vmatpush1.bf16.msra.mxu0 %v8876_v29  ;;  %7606 = vmatpush1.bf16.msra.mxu1 %v8878_v30  ;;  %v8926_v29 = vcombine.low %v430_v14, %v434_v15  ;;  %v8933_v30 = vcombine.high %v437_v26, %v441_v27  ;;  %v482_v14 = vld [vmem:[%s10331_s14 + $0x478] sm:$0xff]  ;;  %v489_v26 = vld [vmem:[%s10331_s14 + $0x4b0] sm:$0xff] }
 0x249   : > { %7263 = vmatprep.subr.bf16.mxu0 %v8885_v31  ;;  %7607 = vmatprep.subr.bf16.mxu1 %v8887_v33  ;;  %v8935_v31 = vcombine.high %v438_v50, %v442_v62  ;;  %v445_v33 = vld [vmem:[%s10331_s14 + $0x350] sm:$0xff]  ;;  %v486_v27 = vld [vmem:[%s10331_s14 + $0x498] sm:$0xff] }
 0x24a   : > { %v8940_v58 = vcombine.low %v445_v33, %v449_v36 }
 0x24c   : > { %7264 = vmatpush1.bf16.msra.mxu0 %v8884_v6  ;;  %7608 = vmatpush1.bf16.msra.mxu1 %v8886_v41  ;;  %v8934_v6 = vcombine.low %v438_v50, %v442_v62  ;;  %v8941_v41 = vcombine.high %v445_v33, %v449_v36  ;;  %v490_v50 = vld [vmem:[%s10331_s14 + $0x4b8] sm:$0xff]  ;;  %v497_v33 = vld [vmem:[%s10331_s14 + $0x4f0] sm:$0xff] }
 0x24d   : > { %7265 = vmatprep.subr.bf16.mxu0 %v8893_v42  ;;  %7609 = vmatprep.subr.bf16.mxu1 %v8895_v43  ;;  %v8943_v42 = vcombine.high %v446_v37, %v450_v38  ;;  %v453_v43 = vld [vmem:[%s10331_s14 + $0x390] sm:$0xff]  ;;  %v494_v36 = vld [vmem:[%s10331_s14 + $0x4d8] sm:$0xff] }
 0x24e   : > { %v8948_v61 = vcombine.low %v453_v43, %v457_v45 }
 0x250   : > { %7266 = vmatpush1.bf16.msra.mxu0 %v8892_v59  ;;  %7610 = vmatpush1.bf16.msra.mxu1 %v8894_v34  ;;  %v8942_v59 = vcombine.low %v446_v37, %v450_v38  ;;  %v8949_v34 = vcombine.high %v453_v43, %v457_v45  ;;  %v498_v37 = vld [vmem:[%s10331_s14 + $0x4f8] sm:$0xff]  ;;  %v8982_v38 = vcombine.low %v486_v27, %v490_v50 }
 0x251   : > { %7267 = vmatprep.subr.bf16.mxu0 %v8901_v53  ;;  %7611 = vmatprep.subr.bf16.mxu1 %v8903_v54  ;;  %v8951_v53 = vcombine.high %v454_v49, %v458_v52  ;;  %v461_v54 = vld [vmem:[%s10331_s14 + $0x3d0] sm:$0xff]  ;;  %v502_v43 = vld [vmem:[%s10331_s14 + $0x518] sm:$0xff] }
 0x252   : > { %v8956_v5 = vcombine.low %v461_v54, %v465_v55  ;;  %v506_v45 = vld [vmem:[%s10331_s14 + $0x538] sm:$0xff] }
 0x254   : > { %7268 = vmatpush1.bf16.msra.mxu0 %v8900_v0  ;;  %7612 = vmatpush1.bf16.msra.mxu1 %v8902_v1  ;;  %v8950_v0 = vcombine.low %v454_v49, %v458_v52  ;;  %v8957_v1 = vcombine.high %v461_v54, %v465_v55  ;;  %v514_v54 = vld [vmem:[%s10331_s14 + $0x578] sm:$0xff] }
 0x255   : > { %7269 = vmatprep.subr.bf16.mxu0 %v8909_v2  ;;  %7613 = vmatprep.subr.bf16.mxu1 %v8911_v3  ;;  %v8959_v2 = vcombine.high %v462_v21, %v466_v57  ;;  %v469_v3 = vld [vmem:[%s10331_s14 + $0x410] sm:$0xff] }
 0x256   : > { %v8964_v15 = vcombine.low %v469_v3, %v473_v18 }
 0x258   : > { %7270 = vmatpush1.bf16.msra.mxu0 %v8908_v8  ;;  %7614 = vmatpush1.bf16.msra.mxu1 %v8910_v9  ;;  %v8958_v8 = vcombine.low %v462_v21, %v466_v57  ;;  %v8965_v9 = vcombine.high %v469_v3, %v473_v18  ;;  %v8998_v21 = vcombine.low %v502_v43, %v506_v45  ;;  %v522_v3 = vld [vmem:[%s10331_s14 + $0x5b8] sm:$0xff] }
 0x259   : > { %7271 = vmatprep.subr.bf16.mxu0 %v8917_v11  ;;  %7615 = vmatprep.subr.bf16.mxu1 %v8919_v10  ;;  %v8967_v11 = vcombine.high %v470_v4, %v474_v46  ;;  %v477_v10 = vld [vmem:[%s10331_s14 + $0x450] sm:$0xff] }
 0x25a   : > { %v8972_v62 = vcombine.low %v477_v10, %v481_v12 }
 0x25c   : > { %7272 = vmatpush1.bf16.msra.mxu0 %v8916_v17  ;;  %7616 = vmatpush1.bf16.msra.mxu1 %v8918_v23  ;;  %v8966_v17 = vcombine.low %v470_v4, %v474_v46  ;;  %v8973_v23 = vcombine.high %v477_v10, %v481_v12  ;;  %v530_v10 = vld [vmem:[%s10331_s14 + $0x5f8] sm:$0xff] }
 0x25d   : > { %7273 = vmatprep.subr.bf16.mxu0 %v8925_v24  ;;  %7617 = vmatprep.subr.bf16.mxu1 %v8927_v25  ;;  %v8975_v24 = vcombine.high %v478_v13, %v482_v14  ;;  %v485_v25 = vld [vmem:[%s10331_s14 + $0x490] sm:$0xff] }
 0x260   : > { %7274 = vmatpush1.bf16.msra.mxu0 %v8924_v28  ;;  %7618 = vmatpush1.bf16.msra.mxu1 %v8926_v29  ;;  %v8974_v28 = vcombine.low %v478_v13, %v482_v14  ;;  %v8981_v29 = vcombine.high %v485_v25, %v489_v26 }
 0x261   : > { %7275 = vmatprep.subr.bf16.mxu0 %v8933_v30  ;;  %7619 = vmatprep.subr.bf16.mxu1 %v8935_v31  ;;  %v8983_v30 = vcombine.high %v486_v27, %v490_v50  ;;  %v493_v31 = vld [vmem:[%s10331_s14 + $0x4d0] sm:$0xff] }
 0x262   : > { %v8988_v49 = vcombine.low %v493_v31, %v497_v33 }
 0x264   : > { %7276 = vmatpush1.bf16.msra.mxu0 %v8932_v40  ;;  %7620 = vmatpush1.bf16.msra.mxu1 %v8934_v6  ;;  %v8989_v40 = vcombine.high %v493_v31, %v497_v33  ;;  %v8991_v6 = vcombine.high %v494_v36, %v498_v37  ;;  %v546_v31 = vld [vmem:[%s10331_s14 + $0x678] sm:$0xff] }
 0x265   : > { %7277 = vmatprep.subr.bf16.mxu0 %v8941_v41  ;;  %7621 = vmatprep.subr.bf16.mxu1 %v8943_v42  ;;  %v501_v41 = vld [vmem:[%s10331_s14 + $0x510] sm:$0xff] }
 0x266   : > { %v505_v42 = vld [vmem:[%s10331_s14 + $0x530] sm:$0xff] }
 0x267   : > { %v8997_v52 = vcombine.high %v501_v41, %v505_v42  ;;  %v8996_v55 = vcombine.low %v501_v41, %v505_v42  ;;  %v554_v41 = vld [vmem:[%s10331_s14 + $0x6b8] sm:$0xff] }
 0x268   : > { %7278 = vmatpush1.bf16.msra.mxu0 %v8940_v58  ;;  %7622 = vmatpush1.bf16.msra.mxu1 %v8942_v59  ;;  %v8999_v58 = vcombine.high %v502_v43, %v506_v45  ;;  %v509_v59 = vld [vmem:[%s10331_s14 + $0x550] sm:$0xff] }
 0x269   : > { %7279 = vmatprep.subr.bf16.mxu0 %v8949_v34  ;;  %7623 = vmatprep.subr.bf16.mxu1 %v8951_v53  ;;  %v513_v34 = vld [vmem:[%s10331_s14 + $0x570] sm:$0xff]  ;;  %v510_v53 = vld [vmem:[%s10331_s14 + $0x558] sm:$0xff] }
 0x26a   : > { %v9005_v57 = vcombine.high %v509_v59, %v513_v34  ;;  %v9004_v18 = vcombine.low %v509_v59, %v513_v34  ;;  %v9006_v4 = vcombine.low %v510_v53, %v514_v54  ;;  %v562_v59 = vld [vmem:[%s10331_s14 + $0x6f8] sm:$0xff] }
 0x26c   : > { %7280 = vmatpush1.bf16.msra.mxu0 %v8948_v61  ;;  %7624 = vmatpush1.bf16.msra.mxu1 %v8950_v0  ;;  %v9007_v61 = vcombine.high %v510_v53, %v514_v54  ;;  %v517_v0 = vld [vmem:[%s10331_s14 + $0x590] sm:$0xff] }
 0x26d   : > { %7281 = vmatprep.subr.bf16.mxu0 %v8957_v1  ;;  %7625 = vmatprep.subr.bf16.mxu1 %v8959_v2  ;;  %v521_v1 = vld [vmem:[%s10331_s14 + $0x5b0] sm:$0xff]  ;;  %v518_v2 = vld [vmem:[%s10331_s14 + $0x598] sm:$0xff] }
 0x26e   : > { %v9013_v46 = vcombine.high %v517_v0, %v521_v1  ;;  %v9012_v12 = vcombine.low %v517_v0, %v521_v1  ;;  %v9014_v13 = vcombine.low %v518_v2, %v522_v3  ;;  %v570_v0 = vld [vmem:[%s10331_s14 + $0x738] sm:$0xff] }
 0x270   : > { %7282 = vmatpush1.bf16.msra.mxu0 %v8956_v5  ;;  %7626 = vmatpush1.bf16.msra.mxu1 %v8958_v8  ;;  %v9015_v5 = vcombine.high %v518_v2, %v522_v3  ;;  %v525_v8 = vld [vmem:[%s10331_s14 + $0x5d0] sm:$0xff] }
 0x271   : > { %7294 = vmatprep.subr.bf16.mxu0 %v8965_v9  ;;  %7638 = vmatprep.subr.bf16.mxu1 %v8967_v11  ;;  %v529_v9 = vld [vmem:[%s10331_s14 + $0x5f0] sm:$0xff]  ;;  %v526_v11 = vld [vmem:[%s10331_s14 + $0x5d8] sm:$0xff] }
 0x272   : > { %v9021_v14 = vcombine.high %v525_v8, %v529_v9  ;;  %v9022_v27 = vcombine.low %v526_v11, %v530_v10 }
 0x273   : > { %7284 = vmatmul.mubr.bf16.vlgmr.msra.gmra.mrb[4].mxu0 %v10421_v32  ;;  %7628 = vmatmul.mubr.bf16.vlgmr.msra.gmra.mrb[4].mxu1 %v10421_v32  ;;  %v8980_v32 = vcombine.low %v485_v25, %v489_v26  ;;  %v538_v25 = vld [vmem:[%s10331_s14 + $0x638] sm:$0xff]  ;;  %v9020_v26 = vcombine.low %v525_v8, %v529_v9 }
 0x274   : > { %7295 = vmatpush1.bf16.msra.mxu0 %v8964_v15  ;;  %7639 = vmatpush1.bf16.msra.mxu1 %v8966_v17  ;;  %v9023_v15 = vcombine.high %v526_v11, %v530_v10  ;;  %v533_v17 = vld [vmem:[%s10331_s14 + $0x610] sm:$0xff]  ;;  %v578_v8 = vld [vmem:[%s10331_s14 + $0x778] sm:$0xff] }
 0x275   : > { %7296 = vmatprep.subr.bf16.mxu0 %v8973_v23  ;;  %7640 = vmatprep.subr.bf16.mxu1 %v8975_v24  ;;  %v537_v23 = vld [vmem:[%s10331_s14 + $0x630] sm:$0xff]  ;;  %v534_v24 = vld [vmem:[%s10331_s14 + $0x618] sm:$0xff] }
 0x276   : > { %7326 = vmatprep.mubr.bf16.mxu0 %v10434_v7  ;;  %7670 = vmatprep.mubr.bf16.mxu1 %v10434_v7  ;;  %v8990_v7 = vcombine.low %v494_v36, %v498_v37  ;;  %v9029_v50 = vcombine.high %v533_v17, %v537_v23  ;;  %v9028_v33 = vcombine.low %v533_v17, %v537_v23  ;;  %v586_v17 = vld [vmem:[%s10331_s14 + $0x7b8] sm:$0xff] }
 0x277   : > { %v9030_v36 = vcombine.low %v534_v24, %v538_v25 }
 0x278   : > { %7297 = vmatpush1.bf16.msra.mxu0 %v8972_v62  ;;  %7641 = vmatpush1.bf16.msra.mxu1 %v8974_v28  ;;  %v9031_v62 = vcombine.high %v534_v24, %v538_v25  ;;  %v541_v28 = vld [vmem:[%s10331_s14 + $0x650] sm:$0xff] }
 0x279   : > { %7298 = vmatprep.subr.bf16.mxu0 %v8981_v29  ;;  %7642 = vmatprep.subr.bf16.mxu1 %v8983_v30  ;;  %v545_v29 = vld [vmem:[%s10331_s14 + $0x670] sm:$0xff]  ;;  %v542_v30 = vld [vmem:[%s10331_s14 + $0x658] sm:$0xff] }
 0x27a   : > { %v9037_v37 = vcombine.high %v541_v28, %v545_v29  ;;  %v9036_v42 = vcombine.low %v541_v28, %v545_v29  ;;  %v9038_v43 = vcombine.low %v542_v30, %v546_v31  ;;  %v594_v28 = vld [vmem:[%s10331_s14 + $0x7f8] sm:$0xff] }
 0x27c   : > { %7299 = vmatpush1.bf16.msra.mxu0 %v8980_v32  ;;  %7643 = vmatpush1.bf16.msra.mxu1 %v8982_v38  ;;  %v9039_v32 = vcombine.high %v542_v30, %v546_v31  ;;  %v549_v38 = vld [vmem:[%s10331_s14 + $0x690] sm:$0xff] }
 0x27d   : > { %7300 = vmatprep.subr.bf16.mxu0 %v8989_v40  ;;  %7644 = vmatprep.subr.bf16.mxu1 %v8991_v6  ;;  %v553_v40 = vld [vmem:[%s10331_s14 + $0x6b0] sm:$0xff]  ;;  %v550_v6 = vld [vmem:[%s10331_s14 + $0x698] sm:$0xff] }
 0x27e   : > { %v9045_v45 = vcombine.high %v549_v38, %v553_v40  ;;  %v9044_v34 = vcombine.low %v549_v38, %v553_v40  ;;  %v9046_v53 = vcombine.low %v550_v6, %v554_v41  ;;  %v602_v38 = vld [vmem:[%s10331_s14 + $0x838] sm:$0xff] }
 0x280   : > { %7301 = vmatpush1.bf16.msra.mxu0 %v8988_v49  ;;  %7645 = vmatpush1.bf16.msra.mxu1 %v8990_v7  ;;  %v9047_v49 = vcombine.high %v550_v6, %v554_v41  ;;  %v557_v7 = vld [vmem:[%s10331_s14 + $0x6d0] sm:$0xff] }
 0x281   : > { %7302 = vmatprep.subr.bf16.mxu0 %v8997_v52  ;;  %7646 = vmatprep.subr.bf16.mxu1 %v8999_v58  ;;  %v561_v52 = vld [vmem:[%s10331_s14 + $0x6f0] sm:$0xff]  ;;  %v558_v58 = vld [vmem:[%s10331_s14 + $0x6d8] sm:$0xff] }
 0x282   : > { %v9053_v54 = vcombine.high %v557_v7, %v561_v52  ;;  %v9052_v1 = vcombine.low %v557_v7, %v561_v52  ;;  %v9054_v2 = vcombine.low %v558_v58, %v562_v59  ;;  %v610_v7 = vld [vmem:[%s10331_s14 + $0x878] sm:$0xff] }
 0x284   : > { %7303 = vmatpush1.bf16.msra.mxu0 %v8996_v55  ;;  %7647 = vmatpush1.bf16.msra.mxu1 %v8998_v21  ;;  %v9055_v55 = vcombine.high %v558_v58, %v562_v59  ;;  %v565_v21 = vld [vmem:[%s10331_s14 + $0x710] sm:$0xff] }
 0x285   : > { %7304 = vmatprep.subr.bf16.mxu0 %v9005_v57  ;;  %7648 = vmatprep.subr.bf16.mxu1 %v9007_v61  ;;  %v569_v57 = vld [vmem:[%s10331_s14 + $0x730] sm:$0xff]  ;;  %v566_v61 = vld [vmem:[%s10331_s14 + $0x718] sm:$0xff] }
 0x286   : > { %v9061_v3 = vcombine.high %v565_v21, %v569_v57  ;;  %v9060_v9 = vcombine.low %v565_v21, %v569_v57  ;;  %v9062_v11 = vcombine.low %v566_v61, %v570_v0  ;;  %v618_v21 = vld [vmem:[%s10331_s14 + $0x8b8] sm:$0xff] }
 0x288   : > { %7305 = vmatpush1.bf16.msra.mxu0 %v9004_v18  ;;  %7649 = vmatpush1.bf16.msra.mxu1 %v9006_v4  ;;  %v9063_v18 = vcombine.high %v566_v61, %v570_v0  ;;  %v573_v4 = vld [vmem:[%s10331_s14 + $0x750] sm:$0xff] }
 0x289   : > { %7306 = vmatprep.subr.bf16.mxu0 %v9013_v46  ;;  %7650 = vmatprep.subr.bf16.mxu1 %v9015_v5  ;;  %v577_v46 = vld [vmem:[%s10331_s14 + $0x770] sm:$0xff]  ;;  %v574_v5 = vld [vmem:[%s10331_s14 + $0x758] sm:$0xff] }
 0x28a   : > { %v9069_v10 = vcombine.high %v573_v4, %v577_v46  ;;  %v9068_v23 = vcombine.low %v573_v4, %v577_v46  ;;  %v9070_v24 = vcombine.low %v574_v5, %v578_v8  ;;  %v626_v4 = vld [vmem:[%s10331_s14 + $0x8f8] sm:$0xff] }
 0x28c   : > { %7307 = vmatpush1.bf16.msra.mxu0 %v9012_v12  ;;  %7651 = vmatpush1.bf16.msra.mxu1 %v9014_v13  ;;  %v9071_v12 = vcombine.high %v574_v5, %v578_v8  ;;  %v581_v13 = vld [vmem:[%s10331_s14 + $0x790] sm:$0xff] }
 0x28d   : > { %7308 = vmatprep.subr.bf16.mxu0 %v9021_v14  ;;  %7652 = vmatprep.subr.bf16.mxu1 %v9023_v15  ;;  %v585_v14 = vld [vmem:[%s10331_s14 + $0x7b0] sm:$0xff]  ;;  %v582_v15 = vld [vmem:[%s10331_s14 + $0x798] sm:$0xff] }
 0x28e   : > { %v9077_v25 = vcombine.high %v581_v13, %v585_v14  ;;  %v9076_v29 = vcombine.low %v581_v13, %v585_v14  ;;  %v9078_v30 = vcombine.low %v582_v15, %v586_v17 }
 0x290   : > { %7309 = vmatpush1.bf16.msra.mxu0 %v9020_v26  ;;  %7653 = vmatpush1.bf16.msra.mxu1 %v9022_v27  ;;  %v9079_v26 = vcombine.high %v582_v15, %v586_v17  ;;  %v589_v27 = vld [vmem:[%s10331_s14 + $0x7d0] sm:$0xff] }
 0x291   : > { %7310 = vmatprep.subr.bf16.mxu0 %v9029_v50  ;;  %7654 = vmatprep.subr.bf16.mxu1 %v9031_v62  ;;  %v593_v50 = vld [vmem:[%s10331_s14 + $0x7f0] sm:$0xff]  ;;  %v590_v62 = vld [vmem:[%s10331_s14 + $0x7d8] sm:$0xff] }
 0x292   : > { %v9085_v31 = vcombine.high %v589_v27, %v593_v50  ;;  %v9084_v40 = vcombine.low %v589_v27, %v593_v50  ;;  %v9086_v6 = vcombine.low %v590_v62, %v594_v28  ;;  %v637_v17 = vld [vmem:[%s10331_s14 + $0x950] sm:$0xff] }
 0x294   : > { %7311 = vmatpush1.bf16.msra.mxu0 %v9028_v33  ;;  %7655 = vmatpush1.bf16.msra.mxu1 %v9030_v36  ;;  %v9087_v33 = vcombine.high %v590_v62, %v594_v28  ;;  %v597_v36 = vld [vmem:[%s10331_s14 + $0x810] sm:$0xff] }
 0x295   : > { %7312 = vmatprep.subr.bf16.mxu0 %v9037_v37  ;;  %7656 = vmatprep.subr.bf16.mxu1 %v9039_v32  ;;  %v601_v37 = vld [vmem:[%s10331_s14 + $0x830] sm:$0xff]  ;;  %v598_v32 = vld [vmem:[%s10331_s14 + $0x818] sm:$0xff] }
 0x296   : > { %v9093_v41 = vcombine.high %v597_v36, %v601_v37  ;;  %v9092_v52 = vcombine.low %v597_v36, %v601_v37  ;;  %v9094_v58 = vcombine.low %v598_v32, %v602_v38  ;;  %v645_v28 = vld [vmem:[%s10331_s14 + $0x990] sm:$0xff] }
 0x298   : > { %7313 = vmatpush1.bf16.msra.mxu0 %v9036_v42  ;;  %7657 = vmatpush1.bf16.msra.mxu1 %v9038_v43  ;;  %v9095_v42 = vcombine.high %v598_v32, %v602_v38  ;;  %v605_v43 = vld [vmem:[%s10331_s14 + $0x850] sm:$0xff] }
 0x299   : > { %7314 = vmatprep.subr.bf16.mxu0 %v9045_v45  ;;  %7658 = vmatprep.subr.bf16.mxu1 %v9047_v49  ;;  %v609_v45 = vld [vmem:[%s10331_s14 + $0x870] sm:$0xff]  ;;  %v606_v49 = vld [vmem:[%s10331_s14 + $0x858] sm:$0xff] }
 0x29a   : > { %v9101_v59 = vcombine.high %v605_v43, %v609_v45  ;;  %v9100_v57 = vcombine.low %v605_v43, %v609_v45  ;;  %v9102_v61 = vcombine.low %v606_v49, %v610_v7  ;;  %v653_v38 = vld [vmem:[%s10331_s14 + $0x9d0] sm:$0xff] }
 0x29c   : > { %7315 = vmatpush1.bf16.msra.mxu0 %v9044_v34  ;;  %7659 = vmatpush1.bf16.msra.mxu1 %v9046_v53  ;;  %v9103_v34 = vcombine.high %v606_v49, %v610_v7  ;;  %v613_v53 = vld [vmem:[%s10331_s14 + $0x890] sm:$0xff] }
 0x29d   : > { %7316 = vmatprep.subr.bf16.mxu0 %v9053_v54  ;;  %7660 = vmatprep.subr.bf16.mxu1 %v9055_v55  ;;  %v617_v54 = vld [vmem:[%s10331_s14 + $0x8b0] sm:$0xff]  ;;  %v614_v55 = vld [vmem:[%s10331_s14 + $0x898] sm:$0xff] }
 0x29e   : > { %v9109_v0 = vcombine.high %v613_v53, %v617_v54  ;;  %v9110_v46 = vcombine.low %v614_v55, %v618_v21  ;;  %v661_v7 = vld [vmem:[%s10331_s14 + $0xa10] sm:$0xff] }
 0x2a0   : > { %7317 = vmatpush1.bf16.msra.mxu0 %v9052_v1  ;;  %7661 = vmatpush1.bf16.msra.mxu1 %v9054_v2  ;;  %v9111_v1 = vcombine.high %v614_v55, %v618_v21  ;;  %v621_v2 = vld [vmem:[%s10331_s14 + $0x8d0] sm:$0xff] }
 0x2a1   : > { %7318 = vmatprep.subr.bf16.mxu0 %v9061_v3  ;;  %7662 = vmatprep.subr.bf16.mxu1 %v9063_v18  ;;  %v625_v3 = vld [vmem:[%s10331_s14 + $0x8f0] sm:$0xff]  ;;  %v622_v18 = vld [vmem:[%s10331_s14 + $0x8d8] sm:$0xff] }
 0x2a2   : > { %v9117_v5 = vcombine.high %v621_v2, %v625_v3  ;;  %v9119_v8 = vcombine.high %v622_v18, %v626_v4  ;;  %v9116_v13 = vcombine.low %v621_v2, %v625_v3  ;;  %v669_v21 = vld [vmem:[%s10331_s14 + $0xa50] sm:$0xff] }
 0x2a4   : > { %7319 = vmatpush1.bf16.msra.mxu0 %v9060_v9  ;;  %7663 = vmatpush1.bf16.msra.mxu1 %v9062_v11  ;;  %v629_v9 = vld [vmem:[%s10331_s14 + $0x910] sm:$0xff] }
 0x2a5   : > { %7320 = vmatprep.subr.bf16.mxu0 %v9069_v10  ;;  %7664 = vmatprep.subr.bf16.mxu1 %v9071_v12  ;;  %v633_v11 = vld [vmem:[%s10331_s14 + $0x930] sm:$0xff]  ;;  %v630_v10 = vld [vmem:[%s10331_s14 + $0x918] sm:$0xff] }
 0x2a6   : > { %v634_v12 = vld [vmem:[%s10331_s14 + $0x938] sm:$0xff]  ;;  %v9125_v14 = vcombine.high %v629_v9, %v633_v11 }
 0x2a7   : > { %v9127_v15 = vcombine.high %v630_v10, %v634_v12  ;;  %v9126_v27 = vcombine.low %v630_v10, %v634_v12  ;;  %v685_v12 = vld [vmem:[%s10331_s14 + $0xad0] sm:$0xff] }
 0x2a8   : > { %7321 = vmatpush1.bf16.msra.mxu0 %v9068_v23  ;;  %7665 = vmatpush1.bf16.msra.mxu1 %v9070_v24  ;;  %v641_v23 = vld [vmem:[%s10331_s14 + $0x970] sm:$0xff]  ;;  %v638_v24 = vld [vmem:[%s10331_s14 + $0x958] sm:$0xff] }
 0x2a9   : > { %7322 = vmatprep.subr.bf16.mxu0 %v9077_v25  ;;  %7666 = vmatprep.subr.bf16.mxu1 %v9079_v26  ;;  %v642_v25 = vld [vmem:[%s10331_s14 + $0x978] sm:$0xff]  ;;  %v9124_v26 = vcombine.low %v629_v9, %v633_v11  ;;  %v9133_v50 = vcombine.high %v637_v17, %v641_v23 }
 0x2aa   : > { %v9135_v62 = vcombine.high %v638_v24, %v642_v25  ;;  %v9134_v36 = vcombine.low %v638_v24, %v642_v25  ;;  %v693_v25 = vld [vmem:[%s10331_s14 + $0xb10] sm:$0xff] }
 0x2ac   : > { %7323 = vmatpush1.bf16.msra.mxu0 %v9076_v29  ;;  %7667 = vmatpush1.bf16.msra.mxu1 %v9078_v30  ;;  %v649_v29 = vld [vmem:[%s10331_s14 + $0x9b0] sm:$0xff]  ;;  %v646_v30 = vld [vmem:[%s10331_s14 + $0x998] sm:$0xff] }
 0x2ad   : > { %7324 = vmatprep.subr.bf16.mxu0 %v9085_v31  ;;  %7668 = vmatprep.subr.bf16.mxu1 %v9087_v33  ;;  %v650_v31 = vld [vmem:[%s10331_s14 + $0x9b8] sm:$0xff]  ;;  %v9132_v33 = vcombine.low %v637_v17, %v641_v23  ;;  %v9141_v37 = vcombine.high %v645_v28, %v649_v29 }
 0x2ae   : > { %v9143_v32 = vcombine.high %v646_v30, %v650_v31  ;;  %v9142_v43 = vcombine.low %v646_v30, %v650_v31  ;;  %v701_v31 = vld [vmem:[%s10331_s14 + $0xb50] sm:$0xff] }
 0x2b0   : > { %7325 = vmatpush1.bf16.msra.mxu0 %v9084_v40  ;;  %7669 = vmatpush1.bf16.msra.mxu1 %v9086_v6  ;;  %v657_v40 = vld [vmem:[%s10331_s14 + $0x9f0] sm:$0xff]  ;;  %v654_v6 = vld [vmem:[%s10331_s14 + $0x9d8] sm:$0xff] }
 0x2b1   : > { %7337 = vmatprep.subr.bf16.mxu0 %v9093_v41  ;;  %7681 = vmatprep.subr.bf16.mxu1 %v9095_v42  ;;  %v658_v41 = vld [vmem:[%s10331_s14 + $0x9f8] sm:$0xff]  ;;  %v9140_v42 = vcombine.low %v645_v28, %v649_v29  ;;  %v9149_v45 = vcombine.high %v653_v38, %v657_v40 }
 0x2b2   : > { %v9151_v49 = vcombine.high %v654_v6, %v658_v41 }
 0x2b3   : > { %7327 = vmatmul.mubr.bf16.vlgmr.msra.gmra.mrb[4].mxu0 %v10503_v44  ;;  %7671 = vmatmul.mubr.bf16.vlgmr.msra.gmra.mrb[4].mxu1 %v10503_v44  ;;  %v9108_v44 = vcombine.low %v613_v53, %v617_v54  ;;  %v9150_v53 = vcombine.low %v654_v6, %v658_v41  ;;  %v709_v41 = vld [vmem:[%s10331_s14 + $0xb90] sm:$0xff] }
 0x2b4   : > { %7338 = vmatpush1.bf16.msra.mxu0 %v9092_v52  ;;  %7682 = vmatpush1.bf16.msra.mxu1 %v9094_v58  ;;  %v665_v52 = vld [vmem:[%s10331_s14 + $0xa30] sm:$0xff]  ;;  %v662_v58 = vld [vmem:[%s10331_s14 + $0xa18] sm:$0xff] }
 0x2b5   : > { %7339 = vmatprep.subr.bf16.mxu0 %v9101_v59  ;;  %7683 = vmatprep.subr.bf16.mxu1 %v9103_v34  ;;  %v666_v59 = vld [vmem:[%s10331_s14 + $0xa38] sm:$0xff]  ;;  %v9148_v34 = vcombine.low %v653_v38, %v657_v40  ;;  %v9157_v54 = vcombine.high %v661_v7, %v665_v52 }
 0x2b6   : > { %7369 = vmatprep.mubr.bf16.mxu0 %v10516_v35  ;;  %7713 = vmatprep.mubr.bf16.mxu1 %v10516_v35  ;;  %v9118_v35 = vcombine.low %v622_v18, %v626_v4  ;;  %v9159_v55 = vcombine.high %v662_v58, %v666_v59  ;;  %v9158_v2 = vcombine.low %v662_v58, %v666_v59  ;;  %v677_v4 = vld [vmem:[%s10331_s14 + $0xa90] sm:$0xff] }
 0x2b7   : > { %v717_v59 = vld [vmem:[%s10331_s14 + $0xbd0] sm:$0xff] }
 0x2b8   : > { %7340 = vmatpush1.bf16.msra.mxu0 %v9100_v57  ;;  %7684 = vmatpush1.bf16.msra.mxu1 %v9102_v61  ;;  %v673_v57 = vld [vmem:[%s10331_s14 + $0xa70] sm:$0xff]  ;;  %v670_v61 = vld [vmem:[%s10331_s14 + $0xa58] sm:$0xff] }
 0x2b9   : > { %7341 = vmatprep.subr.bf16.mxu0 %v9109_v0  ;;  %7685 = vmatprep.subr.bf16.mxu1 %v9111_v1  ;;  %v674_v0 = vld [vmem:[%s10331_s14 + $0xa78] sm:$0xff]  ;;  %v9156_v1 = vcombine.low %v661_v7, %v665_v52  ;;  %v9165_v3 = vcombine.high %v669_v21, %v673_v57 }
 0x2ba   : > { %v9167_v18 = vcombine.high %v670_v61, %v674_v0  ;;  %v9166_v9 = vcombine.low %v670_v61, %v674_v0  ;;  %v725_v0 = vld [vmem:[%s10331_s14 + $0xc10] sm:$0xff] }
 0x2bc   : > { %7342 = vmatpush1.bf16.msra.mxu0 %v9108_v44  ;;  %7686 = vmatpush1.bf16.msra.mxu1 %v9110_v46  ;;  %v681_v44 = vld [vmem:[%s10331_s14 + $0xab0] sm:$0xff]  ;;  %v678_v46 = vld [vmem:[%s10331_s14 + $0xa98] sm:$0xff] }
 0x2bd   : > { %7343 = vmatprep.subr.bf16.mxu0 %v9117_v5  ;;  %7687 = vmatprep.subr.bf16.mxu1 %v9119_v8  ;;  %v682_v5 = vld [vmem:[%s10331_s14 + $0xab8] sm:$0xff]  ;;  %v9164_v8 = vcombine.low %v669_v21, %v673_v57  ;;  %v9173_v11 = vcombine.high %v677_v4, %v681_v44 }
 0x2be   : > { %v9175_v10 = vcombine.high %v678_v46, %v682_v5  ;;  %v9174_v17 = vcombine.low %v678_v46, %v682_v5  ;;  %v733_v5 = vld [vmem:[%s10331_s14 + $0xc50] sm:$0xff] }
 0x2c0   : > { %7344 = vmatpush1.bf16.msra.mxu0 %v9116_v13  ;;  %7688 = vmatpush1.bf16.msra.mxu1 %v9118_v35  ;;  %v689_v13 = vld [vmem:[%s10331_s14 + $0xaf0] sm:$0xff]  ;;  %v686_v35 = vld [vmem:[%s10331_s14 + $0xad8] sm:$0xff] }
 0x2c1   : > { %7345 = vmatprep.subr.bf16.mxu0 %v9125_v14  ;;  %7689 = vmatprep.subr.bf16.mxu1 %v9127_v15  ;;  %v690_v14 = vld [vmem:[%s10331_s14 + $0xaf8] sm:$0xff]  ;;  %v9172_v15 = vcombine.low %v677_v4, %v681_v44  ;;  %v9181_v23 = vcombine.high %v685_v12, %v689_v13 }
 0x2c2   : > { %v9183_v24 = vcombine.high %v686_v35, %v690_v14  ;;  %v9182_v28 = vcombine.low %v686_v35, %v690_v14  ;;  %v741_v14 = vld [vmem:[%s10331_s14 + $0xc90] sm:$0xff] }
 0x2c4   : > { %7346 = vmatpush1.bf16.msra.mxu0 %v9124_v26  ;;  %7690 = vmatpush1.bf16.msra.mxu1 %v9126_v27  ;;  %v697_v26 = vld [vmem:[%s10331_s14 + $0xb30] sm:$0xff]  ;;  %v694_v27 = vld [vmem:[%s10331_s14 + $0xb18] sm:$0xff] }
 0x2c5   : > { %7347 = vmatprep.subr.bf16.mxu0 %v9133_v50  ;;  %7691 = vmatprep.subr.bf16.mxu1 %v9135_v62  ;;  %v698_v50 = vld [vmem:[%s10331_s14 + $0xb38] sm:$0xff]  ;;  %v9180_v62 = vcombine.low %v685_v12, %v689_v13  ;;  %v9189_v29 = vcombine.high %v693_v25, %v697_v26 }
 0x2c6   : > { %v9191_v30 = vcombine.high %v694_v27, %v698_v50  ;;  %v9190_v38 = vcombine.low %v694_v27, %v698_v50  ;;  %v749_v50 = vld [vmem:[%s10331_s14 + $0xcd0] sm:$0xff] }
 0x2c8   : > { %7348 = vmatpush1.bf16.msra.mxu0 %v9132_v33  ;;  %7692 = vmatpush1.bf16.msra.mxu1 %v9134_v36  ;;  %v705_v33 = vld [vmem:[%s10331_s14 + $0xb70] sm:$0xff]  ;;  %v702_v36 = vld [vmem:[%s10331_s14 + $0xb58] sm:$0xff] }
 0x2c9   : > { %7349 = vmatprep.subr.bf16.mxu0 %v9141_v37  ;;  %7693 = vmatprep.subr.bf16.mxu1 %v9143_v32  ;;  %v706_v37 = vld [vmem:[%s10331_s14 + $0xb78] sm:$0xff]  ;;  %v9188_v32 = vcombine.low %v693_v25, %v697_v26  ;;  %v9197_v40 = vcombine.high %v701_v31, %v705_v33 }
 0x2ca   : > { %v9199_v6 = vcombine.high %v702_v36, %v706_v37  ;;  %v9198_v7 = vcombine.low %v702_v36, %v706_v37  ;;  %v757_v36 = vld [vmem:[%s10331_s14 + $0xd10] sm:$0xff] }
 0x2cb   : > { %v761_v37 = vld [vmem:[%s10331_s14 + $0xd30] sm:$0xff] }
 0x2cc   : > { %7350 = vmatpush1.bf16.msra.mxu0 %v9140_v42  ;;  %7694 = vmatpush1.bf16.msra.mxu1 %v9142_v43  ;;  %v713_v42 = vld [vmem:[%s10331_s14 + $0xbb0] sm:$0xff]  ;;  %v710_v43 = vld [vmem:[%s10331_s14 + $0xb98] sm:$0xff] }
 0x2cd   : > { %7351 = vmatprep.subr.bf16.mxu0 %v9149_v45  ;;  %7695 = vmatprep.subr.bf16.mxu1 %v9151_v49  ;;  %v714_v45 = vld [vmem:[%s10331_s14 + $0xbb8] sm:$0xff]  ;;  %v9196_v49 = vcombine.low %v701_v31, %v705_v33  ;;  %v9205_v52 = vcombine.high %v709_v41, %v713_v42 }
 0x2ce   : > { %v9207_v58 = vcombine.high %v710_v43, %v714_v45  ;;  %v9206_v21 = vcombine.low %v710_v43, %v714_v45  ;;  %v769_v43 = vld [vmem:[%s10331_s14 + $0xd70] sm:$0xff]  ;;  %v766_v45 = vld [vmem:[%s10331_s14 + $0xd58] sm:$0xff] }
 0x2d0   : > { %7352 = vmatpush1.bf16.msra.mxu0 %v9148_v34  ;;  %7696 = vmatpush1.bf16.msra.mxu1 %v9150_v53  ;;  %v721_v34 = vld [vmem:[%s10331_s14 + $0xbf0] sm:$0xff]  ;;  %v718_v53 = vld [vmem:[%s10331_s14 + $0xbd8] sm:$0xff] }
 0x2d1   : > { %7353 = vmatprep.subr.bf16.mxu0 %v9157_v54  ;;  %7697 = vmatprep.subr.bf16.mxu1 %v9159_v55  ;;  %v722_v54 = vld [vmem:[%s10331_s14 + $0xbf8] sm:$0xff]  ;;  %v9204_v55 = vcombine.low %v709_v41, %v713_v42  ;;  %v9213_v57 = vcombine.high %v717_v59, %v721_v34  ;;  %v765_v42 = vld [vmem:[%s10331_s14 + $0xd50] sm:$0xff] }
 0x2d2   : > { %v9215_v61 = vcombine.high %v718_v53, %v722_v54  ;;  %v9214_v4 = vcombine.low %v718_v53, %v722_v54  ;;  %v777_v53 = vld [vmem:[%s10331_s14 + $0xdb0] sm:$0xff]  ;;  %v774_v54 = vld [vmem:[%s10331_s14 + $0xd98] sm:$0xff] }
 0x2d4   : > { %7354 = vmatpush1.bf16.msra.mxu0 %v9156_v1  ;;  %7698 = vmatpush1.bf16.msra.mxu1 %v9158_v2  ;;  %v729_v1 = vld [vmem:[%s10331_s14 + $0xc30] sm:$0xff]  ;;  %v726_v2 = vld [vmem:[%s10331_s14 + $0xc18] sm:$0xff] }
 0x2d5   : > { %7355 = vmatprep.subr.bf16.mxu0 %v9165_v3  ;;  %7699 = vmatprep.subr.bf16.mxu1 %v9167_v18  ;;  %v730_v3 = vld [vmem:[%s10331_s14 + $0xc38] sm:$0xff]  ;;  %v9212_v18 = vcombine.low %v717_v59, %v721_v34  ;;  %v9221_v44 = vcombine.high %v725_v0, %v729_v1  ;;  %v773_v34 = vld [vmem:[%s10331_s14 + $0xd90] sm:$0xff] }
 0x2d6   : > { %v9223_v46 = vcombine.high %v726_v2, %v730_v3  ;;  %v9222_v12 = vcombine.low %v726_v2, %v730_v3  ;;  %v315_v3 = vld [vmem:[#allocation2 + $0x40] sm:$0xff] }
 0x2d8   : > { %7356 = vmatpush1.bf16.msra.mxu0 %v9164_v8  ;;  %7700 = vmatpush1.bf16.msra.mxu1 %v9166_v9  ;;  %v737_v8 = vld [vmem:[%s10331_s14 + $0xc70] sm:$0xff]  ;;  %v734_v9 = vld [vmem:[%s10331_s14 + $0xc58] sm:$0xff] }
 0x2d9   : > { %7357 = vmatprep.subr.bf16.mxu0 %v9173_v11  ;;  %7701 = vmatprep.subr.bf16.mxu1 %v9175_v10  ;;  %v738_v11 = vld [vmem:[%s10331_s14 + $0xc78] sm:$0xff]  ;;  %v9220_v10 = vcombine.low %v725_v0, %v729_v1  ;;  %v9229_v13 = vcombine.high %v733_v5, %v737_v8  ;;  %v308_v0 = vld [vmem:[#allocation2 + $0x8] sm:$0xff] }
 0x2da   : > { %v9231_v35 = vcombine.high %v734_v9, %v738_v11  ;;  %v9230_v25 = vcombine.low %v734_v9, %v738_v11  ;;  %v310_v1 = vld [vmem:[#allocation2 + $0x18] sm:$0xff] }
 0x2dc   : > { %7358 = vmatpush1.bf16.msra.mxu0 %v9172_v15  ;;  %7702 = vmatpush1.bf16.msra.mxu1 %v9174_v17  ;;  %v745_v15 = vld [vmem:[%s10331_s14 + $0xcb0] sm:$0xff]  ;;  %v742_v17 = vld [vmem:[%s10331_s14 + $0xc98] sm:$0xff] }
 0x2dd   : > { %7359 = vmatprep.subr.bf16.mxu0 %v9181_v23  ;;  %7703 = vmatprep.subr.bf16.mxu1 %v9183_v24  ;;  %v746_v23 = vld [vmem:[%s10331_s14 + $0xcb8] sm:$0xff]  ;;  %v9228_v24 = vcombine.low %v733_v5, %v737_v8  ;;  %v9237_v26 = vcombine.high %v741_v14, %v745_v15  ;;  %v781_v5 = vld [vmem:[%s10331_s14 + $0xdd0] sm:$0xff] }
 0x2de   : > { %v9239_v27 = vcombine.high %v742_v17, %v746_v23  ;;  %v785_v8 = vld [vmem:[%s10331_s14 + $0xdf0] sm:$0xff] }
 0x2e0   : > { %7360 = vmatpush1.bf16.msra.mxu0 %v9180_v62  ;;  %7704 = vmatpush1.bf16.msra.mxu1 %v9182_v28  ;;  %v753_v62 = vld [vmem:[%s10331_s14 + $0xcf0] sm:$0xff]  ;;  %v750_v28 = vld [vmem:[%s10331_s14 + $0xcd8] sm:$0xff] }
 0x2e1   : > { %7361 = vmatprep.subr.bf16.mxu0 %v9189_v29  ;;  %7705 = vmatprep.subr.bf16.mxu1 %v9191_v30  ;;  %v754_v29 = vld [vmem:[%s10331_s14 + $0xcf8] sm:$0xff]  ;;  %v9238_v30 = vcombine.low %v742_v17, %v746_v23  ;;  %v9245_v31 = vcombine.high %v749_v50, %v753_v62 }
 0x2e2   : > { %v9247_v33 = vcombine.high %v750_v28, %v754_v29 }
 0x2e4   : > { %7362 = vmatpush1.bf16.msra.mxu0 %v9188_v32  ;;  %7706 = vmatpush1.bf16.msra.mxu1 %v9190_v38  ;;  %v758_v32 = vld [vmem:[%s10331_s14 + $0xd18] sm:$0xff] }
 0x2e5   : > { %7363 = vmatprep.subr.bf16.mxu0 %v9197_v40  ;;  %7707 = vmatprep.subr.bf16.mxu1 %v9199_v6  ;;  %v762_v38 = vld [vmem:[%s10331_s14 + $0xd38] sm:$0xff]  ;;  %v9244_v40 = vcombine.low %v749_v50, %v753_v62  ;;  %v9253_v6 = vcombine.high %v757_v36, %v761_v37 }
 0x2e6   : > { %v9255_v41 = vcombine.high %v758_v32, %v762_v38 }
 0x2e8   : > { %7364 = vmatpush1.bf16.msra.mxu0 %v9196_v49  ;;  %7708 = vmatpush1.bf16.msra.mxu1 %v9198_v7  ;;  %v770_v49 = vld [vmem:[%s10331_s14 + $0xd78] sm:$0xff]  ;;  %v9252_v7 = vcombine.low %v757_v36, %v761_v37  ;;  %v789_v36 = vld [vmem:[%s10331_s14 + $0xe10] sm:$0xff] }
 0x2e9   : > { %7365 = vmatprep.subr.bf16.mxu0 %v9205_v52  ;;  %7709 = vmatprep.subr.bf16.mxu1 %v9207_v58  ;;  %v9254_v52 = vcombine.low %v758_v32, %v762_v38  ;;  %v9261_v58 = vcombine.high %v765_v42, %v769_v43  ;;  %v9263_v59 = vcombine.high %v766_v45, %v770_v49  ;;  %v793_v37 = vld [vmem:[%s10331_s14 + $0xe30] sm:$0xff]  ;;  %v790_v38 = vld [vmem:[%s10331_s14 + $0xe18] sm:$0xff] }
 0x2ea   : > { %v9262_v2 = vcombine.low %v766_v45, %v770_v49  ;;  %v801_v45 = vld [vmem:[%s10331_s14 + $0xe70] sm:$0xff]  ;;  %v798_v49 = vld [vmem:[%s10331_s14 + $0xe58] sm:$0xff] }
 0x2ec   : > { %7366 = vmatpush1.bf16.msra.mxu0 %v9204_v55  ;;  %7710 = vmatpush1.bf16.msra.mxu1 %v9206_v21  ;;  %v778_v55 = vld [vmem:[%s10331_s14 + $0xdb8] sm:$0xff]  ;;  %v307_v21 = vld [vmem:[#allocation2] sm:$0xff] }
 0x2ed   : > { %7367 = vmatprep.subr.bf16.mxu0 %v9213_v57  ;;  %7711 = vmatprep.subr.bf16.mxu1 %v9215_v61  ;;  %v309_v57 = vld [vmem:[#allocation2 + $0x10] sm:$0xff]  ;;  %v9260_v61 = vcombine.low %v765_v42, %v769_v43 }
 0x2ee   : > { %v797_v43 = vld [vmem:[%s10331_s14 + $0xe50] sm:$0xff] }
 0x2f0   : > { %7368 = vmatpush1.bf16.msra.mxu0 %v9212_v18  ;;  %7712 = vmatpush1.bf16.msra.mxu1 %v9214_v4  ;;  %v9269_v18 = vcombine.high %v773_v34, %v777_v53 }
 0x2f1   : > { %7380 = vmatprep.subr.bf16.mxu0 %v9221_v44  ;;  %7724 = vmatprep.subr.bf16.mxu1 %v9223_v46  ;;  %v317_v44 = vld [vmem:[#allocation2 + $0x50] sm:$0xff]  ;;  %v9271_v46 = vcombine.high %v774_v54, %v778_v55 }
 0x2f3   : > { %7370 = vmatmul.mubr.bf16.vlgmr.msra.gmra.mrb[4].mxu0 %v10585_v60  ;;  %7714 = vmatmul.mubr.bf16.vlgmr.msra.gmra.mrb[4].mxu1 %v10585_v60  ;;  %v9236_v60 = vcombine.low %v741_v14, %v745_v15 }
 0x2f4   : > { %7381 = vmatpush1.bf16.msra.mxu0 %v9220_v10  ;;  %7725 = vmatpush1.bf16.msra.mxu1 %v9222_v12  ;;  %v316_v12 = vld [vmem:[#allocation2 + $0x48] sm:$0xff] }
 0x2f5   : > { %7382 = vmatprep.subr.bf16.mxu0 %v9229_v13  ;;  %7726 = vmatprep.subr.bf16.mxu1 %v9231_v35  ;;  %v782_v13 = vld [vmem:[%s10331_s14 + $0xdd8] sm:$0xff] }
 0x2f6   : > { %7412 = vmatprep.mubr.bf16.mxu0 %v10598_v47  ;;  %7756 = vmatprep.mubr.bf16.mxu1 %v10598_v47  ;;  %v9246_v47 = vcombine.low %v750_v28, %v754_v29  ;;  %v786_v35 = vld [vmem:[%s10331_s14 + $0xdf8] sm:$0xff]  ;;  %v9277_v29 = vcombine.high %v781_v5, %v785_v8 }
 0x2f8   : > { %7383 = vmatpush1.bf16.msra.mxu0 %v9228_v24  ;;  %7727 = vmatpush1.bf16.msra.mxu1 %v9230_v25  ;;  %v318_v24 = vld [vmem:[#allocation2 + $0x58] sm:$0xff]  ;;  %v9268_v25 = vcombine.low %v773_v34, %v777_v53  ;;  %v805_v53 = vld [vmem:[%s10331_s14 + $0xe90] sm:$0xff] }
 0x2f9   : > { %7384 = vmatprep.subr.bf16.mxu0 %v9237_v26  ;;  %7728 = vmatprep.subr.bf16.mxu1 %v9239_v27  ;;  %v9270_v26 = vcombine.low %v774_v54, %v778_v55  ;;  %v809_v54 = vld [vmem:[%s10331_s14 + $0xeb0] sm:$0xff]  ;;  %v806_v55 = vld [vmem:[%s10331_s14 + $0xe98] sm:$0xff] }
 0x2fc   : > { %7385 = vmatpush1.bf16.msra.mxu0 %v9236_v60  ;;  %7729 = vmatpush1.bf16.msra.mxu1 %v9238_v30 }
 0x2fd   : > { %7386 = vmatprep.subr.bf16.mxu0 %v9245_v31  ;;  %7730 = vmatprep.subr.bf16.mxu1 %v9247_v33  ;;  %v9279_v33 = vcombine.high %v782_v13, %v786_v35 }
 0x300   : > { %7387 = vmatpush1.bf16.msra.mxu0 %v9244_v40  ;;  %7731 = vmatpush1.bf16.msra.mxu1 %v9246_v47  ;;  %v794_v40 = vld [vmem:[%s10331_s14 + $0xe38] sm:$0xff]  ;;  %v9276_v47 = vcombine.low %v781_v5, %v785_v8 }
 0x301   : > { %7388 = vmatprep.subr.bf16.mxu0 %v9253_v6  ;;  %7732 = vmatprep.subr.bf16.mxu1 %v9255_v41  ;;  %v9278_v6 = vcombine.low %v782_v13, %v786_v35  ;;  %v9285_v41 = vcombine.high %v789_v36, %v793_v37  ;;  %v9287_v42 = vcombine.high %v790_v38, %v794_v40 }
 0x304   : > { %7389 = vmatpush1.bf16.msra.mxu0 %v9252_v7  ;;  %7733 = vmatpush1.bf16.msra.mxu1 %v9254_v52  ;;  %v802_v7 = vld [vmem:[%s10331_s14 + $0xe78] sm:$0xff]  ;;  %v9284_v52 = vcombine.low %v789_v36, %v793_v37 }
 0x305   : > { %7390 = vmatprep.subr.bf16.mxu0 %v9261_v58  ;;  %7734 = vmatprep.subr.bf16.mxu1 %v9263_v59  ;;  %v9286_v58 = vcombine.low %v790_v38, %v794_v40  ;;  %v9293_v59 = vcombine.high %v797_v43, %v801_v45  ;;  %v9295_v34 = vcombine.high %v798_v49, %v802_v7  ;;  %v849_v38 = vld [vmem:[%s10331_s14 + $0xff0] sm:$0xff]  ;;  %v846_v40 = vld [vmem:[%s10331_s14 + $0xfd8] sm:$0xff] }
 0x306   : > { %v6898_v4 = vpop.f32.mrb[0].mxu0  ;;  %v7242_v11 = vpop.f32.mrb[0].mxu1 }
 0x307   : > { %v7939_v9 = vadd.f32 %v6898_v4, %v307_v21  ;;  %v6900_v10 = vpop.f32.mrb[1].mxu0  ;;  %v7941_v14 = vadd.f32 %v7242_v11, %v309_v57  ;;  %v7244_v17 = vpop.f32.mrb[1].mxu1  ;;  %v810_v21 = vld [vmem:[%s10331_s14 + $0xeb8] sm:$0xff]  ;;  %v9292_v57 = vcombine.low %v797_v43, %v801_v45  ;;  %v825_v11 = vld [vmem:[%s10331_s14 + $0xf30] sm:$0xff] }
 0x308   : > { %v7940_v15 = vadd.f32 %v6900_v10, %v308_v0  ;;  %v6902_v23 = vpop.f32.mrb[2].mxu0  ;;  %7391 = vmatpush1.bf16.msra.mxu0 %v9260_v61  ;;  %v7942_v27 = vadd.f32 %v7244_v17, %v310_v1  ;;  %v7246_v62 = vpop.f32.mrb[2].mxu1  ;;  %7735 = vmatpush1.bf16.msra.mxu1 %v9262_v2  ;;  %v9294_v61 = vcombine.low %v798_v49, %v802_v7  ;;  %v813_v2 = vld [vmem:[%s10331_s14 + $0xed0] sm:$0xff]  ;;  %v818_v4 = vld [vmem:[%s10331_s14 + $0xef8] sm:$0xff] }
 0x309   : > { %7955 = vst [vmem:[#allocation2] sm:$0xff] %v7939_v9  ;;  %v7947_v50 = vadd.f32 %v6902_v23, %v315_v3  ;;  %v6904_v28 = vpop.f32.mrb[3].mxu0  ;;  %7392 = vmatprep.subr.bf16.mxu0 %v9269_v18  ;;  %7957 = vst [vmem:[#allocation2 + $0x10] sm:$0xff] %v7941_v14  ;;  %v7949_v60 = vadd.f32 %v7246_v62, %v317_v44  ;;  %v7248_v31 = vpop.f32.mrb[3].mxu1  ;;  %7736 = vmatprep.subr.bf16.mxu1 %v9271_v46  ;;  %v817_v3 = vld [vmem:[%s10331_s14 + $0xef0] sm:$0xff]  ;;  %v814_v18 = vld [vmem:[%s10331_s14 + $0xed8] sm:$0xff] }
 0x30a   : > { %7956 = vst [vmem:[#allocation2 + $0x8] sm:$0xff] %v7940_v15  ;;  %v7948_v30 = vadd.f32 %v6904_v28, %v316_v12  ;;  %7958 = vst [vmem:[#allocation2 + $0x18] sm:$0xff] %v7942_v27  ;;  %v7950_v32 = vadd.f32 %v7248_v31, %v318_v24  ;;  %v9301_v0 = vcombine.high %v805_v53, %v809_v54  ;;  %v821_v9 = vld [vmem:[%s10331_s14 + $0xf10] sm:$0xff]  ;;  %v822_v10 = vld [vmem:[%s10331_s14 + $0xf18] sm:$0xff] }
 0x30b   : > { %7963 = vst [vmem:[#allocation2 + $0x40] sm:$0xff] %v7947_v50  ;;  %7965 = vst [vmem:[#allocation2 + $0x50] sm:$0xff] %v7949_v60  ;;  %v9303_v1 = vcombine.high %v806_v55, %v810_v21  ;;  %v9300_v44 = vcombine.low %v805_v53, %v809_v54  ;;  %v9302_v46 = vcombine.low %v806_v55, %v810_v21  ;;  %v826_v12 = vld [vmem:[%s10331_s14 + $0xf38] sm:$0xff]  ;;  %v829_v17 = vld [vmem:[%s10331_s14 + $0xf50] sm:$0xff] }
 0x30c   : > { %7964 = vst [vmem:[#allocation2 + $0x48] sm:$0xff] %v7948_v30  ;;  %7393 = vmatpush1.bf16.msra.mxu0 %v9268_v25  ;;  %7966 = vst [vmem:[#allocation2 + $0x58] sm:$0xff] %v7950_v32  ;;  %7737 = vmatpush1.bf16.msra.mxu1 %v9270_v26  ;;  %v9309_v5 = vcombine.high %v813_v2, %v817_v3  ;;  %v9311_v8 = vcombine.high %v814_v18, %v818_v4  ;;  %v833_v23 = vld [vmem:[%s10331_s14 + $0xf70] sm:$0xff]  ;;  %v830_v24 = vld [vmem:[%s10331_s14 + $0xf58] sm:$0xff] }
 0x30d   : > { %7394 = vmatprep.subr.bf16.mxu0 %v9277_v29  ;;  %7738 = vmatprep.subr.bf16.mxu1 %v9279_v33  ;;  %v9308_v13 = vcombine.low %v813_v2, %v817_v3  ;;  %v9310_v35 = vcombine.low %v814_v18, %v818_v4  ;;  %v9317_v14 = vcombine.high %v821_v9, %v825_v11  ;;  %v834_v25 = vld [vmem:[%s10331_s14 + $0xf78] sm:$0xff]  ;;  %v837_v28 = vld [vmem:[%s10331_s14 + $0xf90] sm:$0xff] }
 0x30e   : > { %v9319_v15 = vcombine.high %v822_v10, %v826_v12  ;;  %v9316_v26 = vcombine.low %v821_v9, %v825_v11  ;;  %v9318_v27 = vcombine.low %v822_v10, %v826_v12  ;;  %v9325_v50 = vcombine.high %v829_v17, %v833_v23  ;;  %v841_v29 = vld [vmem:[%s10331_s14 + $0xfb0] sm:$0xff]  ;;  %v838_v60 = vld [vmem:[%s10331_s14 + $0xf98] sm:$0xff] }
 0x30f   : > { %v9327_v62 = vcombine.high %v830_v24, %v834_v25  ;;  %v842_v30 = vld [vmem:[%s10331_s14 + $0xfb8] sm:$0xff]  ;;  %v9324_v31 = vcombine.low %v829_v17, %v833_v23  ;;  %v9326_v33 = vcombine.low %v830_v24, %v834_v25  ;;  %v9333_v36 = vcombine.high %v837_v28, %v841_v29  ;;  %v845_v32 = vld [vmem:[%s10331_s14 + $0xfd0] sm:$0xff] }
 0x310   : > { %7395 = vmatpush1.bf16.msra.mxu0 %v9276_v47  ;;  %7739 = vmatpush1.bf16.msra.mxu1 %v9278_v6  ;;  %v9335_v37 = vcombine.high %v838_v60, %v842_v30  ;;  %v850_v47 = vld [vmem:[%s10331_s14 + $0xff8] sm:$0xff]  ;;  %v9332_v6 = vcombine.low %v837_v28, %v841_v29  ;;  %v853_v45 = vld [vmem:[%s10331_s14 + $0x1010] sm:$0xff] }
 0x311   : > { %7396 = vmatprep.subr.bf16.mxu0 %v9285_v41  ;;  %7740 = vmatprep.subr.bf16.mxu1 %v9287_v42  ;;  %v9334_v41 = vcombine.low %v838_v60, %v842_v30  ;;  %v9341_v42 = vcombine.high %v845_v32, %v849_v38  ;;  %v9343_v43 = vcombine.high %v846_v40, %v850_v47  ;;  %v857_v49 = vld [vmem:[%s10331_s14 + $0x1030] sm:$0xff]  ;;  %v854_v7 = vld [vmem:[%s10331_s14 + $0x1018] sm:$0xff] }
 0x312   : > { %v861_v54 = vld [vmem:[%s10331_s14 + $0x1050] sm:$0xff]  ;;  %v862_v21 = vld [vmem:[%s10331_s14 + $0x1058] sm:$0xff] }
 0x313   : > { %v865_v55 = vld [vmem:[%s10331_s14 + $0x1070] sm:$0xff]  ;;  %v870_v4 = vld [vmem:[%s10331_s14 + $0x1098] sm:$0xff] }
 0x314   : > { %7397 = vmatpush1.bf16.msra.mxu0 %v9284_v52  ;;  %7741 = vmatpush1.bf16.msra.mxu1 %v9286_v58  ;;  %v858_v52 = vld [vmem:[%s10331_s14 + $0x1038] sm:$0xff]  ;;  %v9340_v58 = vcombine.low %v845_v32, %v849_v38  ;;  %v869_v3 = vld [vmem:[%s10331_s14 + $0x1090] sm:$0xff] }
 0x315   : > { %7398 = vmatprep.subr.bf16.mxu0 %v9293_v59  ;;  %7742 = vmatprep.subr.bf16.mxu1 %v9295_v34  ;;  %v9342_v59 = vcombine.low %v846_v40, %v850_v47  ;;  %v9349_v34 = vcombine.high %v853_v45, %v857_v49  ;;  %v9351_v53 = vcombine.high %v854_v7, %v858_v52  ;;  %v873_v18 = vld [vmem:[%s10331_s14 + $0x10b0] sm:$0xff]  ;;  %v878_v12 = vld [vmem:[%s10331_s14 + $0x10d8] sm:$0xff] }
 0x316   : > { %v877_v11 = vld [vmem:[%s10331_s14 + $0x10d0] sm:$0xff]  ;;  %v886_v24 = vld [vmem:[%s10331_s14 + $0x1118] sm:$0xff] }
 0x317   : > { %v881_v10 = vld [vmem:[%s10331_s14 + $0x10f0] sm:$0xff]  ;;  %v890_v25 = vld [vmem:[%s10331_s14 + $0x1138] sm:$0xff] }
 0x318   : > { %7399 = vmatpush1.bf16.msra.mxu0 %v9292_v57  ;;  %7743 = vmatpush1.bf16.msra.mxu1 %v9294_v61  ;;  %v866_v57 = vld [vmem:[%s10331_s14 + $0x1078] sm:$0xff]  ;;  %v9348_v61 = vcombine.low %v853_v45, %v857_v49  ;;  %v885_v17 = vld [vmem:[%s10331_s14 + $0x1110] sm:$0xff] }
 0x319   : > { %7400 = vmatprep.subr.bf16.mxu0 %v9301_v0  ;;  %7744 = vmatprep.subr.bf16.mxu1 %v9303_v1  ;;  %v9350_v0 = vcombine.low %v854_v7, %v858_v52  ;;  %v9357_v1 = vcombine.high %v861_v54, %v865_v55  ;;  %v9359_v2 = vcombine.high %v862_v21, %v866_v57  ;;  %v889_v23 = vld [vmem:[%s10331_s14 + $0x1130] sm:$0xff]  ;;  %v894_v29 = vld [vmem:[%s10331_s14 + $0x1158] sm:$0xff] }
 0x31a   : > { %v897_v28 = vld [vmem:[%s10331_s14 + $0x1170] sm:$0xff]  ;;  %v898_v60 = vld [vmem:[%s10331_s14 + $0x1178] sm:$0xff]  ;;  %v9380_v30 = vcombine.low %v885_v17, %v889_v23 }
 0x31b   : > { %v905_v32 = vld [vmem:[%s10331_s14 + $0x11b0] sm:$0xff]  ;;  %v902_v38 = vld [vmem:[%s10331_s14 + $0x1198] sm:$0xff] }
 0x31c   : > { %7401 = vmatpush1.bf16.msra.mxu0 %v9300_v44  ;;  %7745 = vmatpush1.bf16.msra.mxu1 %v9302_v46  ;;  %v874_v44 = vld [vmem:[%s10331_s14 + $0x10b8] sm:$0xff]  ;;  %v9356_v46 = vcombine.low %v861_v54, %v865_v55  ;;  %v913_v45 = vld [vmem:[%s10331_s14 + $0x11f0] sm:$0xff] }
 0x31d   : > { %7402 = vmatprep.subr.bf16.mxu0 %v9309_v5  ;;  %7746 = vmatprep.subr.bf16.mxu1 %v9311_v8  ;;  %v9358_v5 = vcombine.low %v862_v21, %v866_v57  ;;  %v9365_v8 = vcombine.high %v869_v3, %v873_v18  ;;  %v9367_v9 = vcombine.high %v870_v4, %v874_v44  ;;  %v906_v40 = vld [vmem:[%s10331_s14 + $0x11b8] sm:$0xff]  ;;  %v921_v54 = vld [vmem:[%s10331_s14 + $0x1230] sm:$0xff] }
 0x31e   : > { %v910_v49 = vld [vmem:[%s10331_s14 + $0x11d8] sm:$0xff] }
 0x31f   : > { %v914_v7 = vld [vmem:[%s10331_s14 + $0x11f8] sm:$0xff] }
 0x320   : > { %7403 = vmatpush1.bf16.msra.mxu0 %v9308_v13  ;;  %7747 = vmatpush1.bf16.msra.mxu1 %v9310_v35  ;;  %v882_v13 = vld [vmem:[%s10331_s14 + $0x10f8] sm:$0xff]  ;;  %v9366_v35 = vcombine.low %v870_v4, %v874_v44 }
 0x321   : > { %7404 = vmatprep.subr.bf16.mxu0 %v9317_v14  ;;  %7748 = vmatprep.subr.bf16.mxu1 %v9319_v15  ;;  %v9373_v14 = vcombine.high %v877_v11, %v881_v10  ;;  %v9375_v15 = vcombine.high %v878_v12, %v882_v13  ;;  %v918_v55 = vld [vmem:[%s10331_s14 + $0x1218] sm:$0xff] }
 0x322   : > { %v922_v21 = vld [vmem:[%s10331_s14 + $0x1238] sm:$0xff] }
 0x323   : > { %v930_v4 = vld [vmem:[%s10331_s14 + $0x1278] sm:$0xff] }
 0x324   : > { %7405 = vmatpush1.bf16.msra.mxu0 %v9316_v26  ;;  %7749 = vmatpush1.bf16.msra.mxu1 %v9318_v27  ;;  %v9372_v26 = vcombine.low %v877_v11, %v881_v10  ;;  %v9381_v27 = vcombine.high %v885_v17, %v889_v23  ;;  %v937_v11 = vld [vmem:[%s10331_s14 + $0x12b0] sm:$0xff]  ;;  %v934_v10 = vld [vmem:[%s10331_s14 + $0x1298] sm:$0xff] }
 0x325   : > { %7406 = vmatprep.subr.bf16.mxu0 %v9325_v50  ;;  %7750 = vmatprep.subr.bf16.mxu1 %v9327_v62  ;;  %v9383_v50 = vcombine.high %v886_v24, %v890_v25  ;;  %v893_v62 = vld [vmem:[%s10331_s14 + $0x1150] sm:$0xff]  ;;  %v942_v23 = vld [vmem:[%s10331_s14 + $0x12d8] sm:$0xff] }
 0x326   : > { %v9388_v47 = vcombine.low %v893_v62, %v897_v28  ;;  %v945_v17 = vld [vmem:[%s10331_s14 + $0x12f0] sm:$0xff] }
 0x328   : > { %7407 = vmatpush1.bf16.msra.mxu0 %v9324_v31  ;;  %7751 = vmatpush1.bf16.msra.mxu1 %v9326_v33  ;;  %v9382_v31 = vcombine.low %v886_v24, %v890_v25  ;;  %v9389_v33 = vcombine.high %v893_v62, %v897_v28  ;;  %v946_v24 = vld [vmem:[%s10331_s14 + $0x12f8] sm:$0xff]  ;;  %v953_v62 = vld [vmem:[%s10331_s14 + $0x1330] sm:$0xff] }
 0x329   : > { %7408 = vmatprep.subr.bf16.mxu0 %v9333_v36  ;;  %7752 = vmatprep.subr.bf16.mxu1 %v9335_v37  ;;  %v9391_v36 = vcombine.high %v894_v29, %v898_v60  ;;  %v901_v37 = vld [vmem:[%s10331_s14 + $0x1190] sm:$0xff]  ;;  %v950_v28 = vld [vmem:[%s10331_s14 + $0x1318] sm:$0xff] }
 0x32a   : > { %v9396_v52 = vcombine.low %v901_v37, %v905_v32 }
 0x32c   : > { %7409 = vmatpush1.bf16.msra.mxu0 %v9332_v6  ;;  %7753 = vmatpush1.bf16.msra.mxu1 %v9334_v41  ;;  %v9390_v6 = vcombine.low %v894_v29, %v898_v60  ;;  %v9397_v41 = vcombine.high %v901_v37, %v905_v32  ;;  %v954_v29 = vld [vmem:[%s10331_s14 + $0x1338] sm:$0xff]  ;;  %v961_v37 = vld [vmem:[%s10331_s14 + $0x1370] sm:$0xff] }
 0x32d   : > { %7410 = vmatprep.subr.bf16.mxu0 %v9341_v42  ;;  %7754 = vmatprep.subr.bf16.mxu1 %v9343_v43  ;;  %v9399_v42 = vcombine.high %v902_v38, %v906_v40  ;;  %v909_v43 = vld [vmem:[%s10331_s14 + $0x11d0] sm:$0xff]  ;;  %v958_v32 = vld [vmem:[%s10331_s14 + $0x1358] sm:$0xff] }
 0x32e   : > { %v9404_v57 = vcombine.low %v909_v43, %v913_v45 }
 0x330   : > { %7411 = vmatpush1.bf16.msra.mxu0 %v9340_v58  ;;  %7755 = vmatpush1.bf16.msra.mxu1 %v9342_v59  ;;  %v9398_v58 = vcombine.low %v902_v38, %v906_v40  ;;  %v9405_v59 = vcombine.high %v909_v43, %v913_v45  ;;  %v962_v38 = vld [vmem:[%s10331_s14 + $0x1378] sm:$0xff]  ;;  %v969_v43 = vld [vmem:[%s10331_s14 + $0x13b0] sm:$0xff] }
 0x331   : > { %7423 = vmatprep.subr.bf16.mxu0 %v9349_v34  ;;  %7767 = vmatprep.subr.bf16.mxu1 %v9351_v53  ;;  %v9407_v34 = vcombine.high %v910_v49, %v914_v7  ;;  %v917_v53 = vld [vmem:[%s10331_s14 + $0x1210] sm:$0xff]  ;;  %v966_v45 = vld [vmem:[%s10331_s14 + $0x1398] sm:$0xff] }
 0x332   : > { %v9412_v44 = vcombine.low %v917_v53, %v921_v54 }
 0x333   : > { %7413 = vmatmul.mubr.bf16.vlgmr.msra.gmra.mrb[4].mxu0 %v10667_v19  ;;  %7757 = vmatmul.mubr.bf16.vlgmr.msra.gmra.mrb[4].mxu1 %v10667_v19  ;;  %v9364_v19 = vcombine.low %v869_v3, %v873_v18  ;;  %v929_v3 = vld [vmem:[%s10331_s14 + $0x1270] sm:$0xff]  ;;  %v926_v18 = vld [vmem:[%s10331_s14 + $0x1258] sm:$0xff] }
 0x334   : > { %7424 = vmatpush1.bf16.msra.mxu0 %v9348_v61  ;;  %7768 = vmatpush1.bf16.msra.mxu1 %v9350_v0  ;;  %v9406_v61 = vcombine.low %v910_v49, %v914_v7  ;;  %v9413_v0 = vcombine.high %v917_v53, %v921_v54  ;;  %v970_v49 = vld [vmem:[%s10331_s14 + $0x13b8] sm:$0xff]  ;;  %v977_v53 = vld [vmem:[%s10331_s14 + $0x13f0] sm:$0xff] }
 0x335   : > { %7425 = vmatprep.subr.bf16.mxu0 %v9357_v1  ;;  %7769 = vmatprep.subr.bf16.mxu1 %v9359_v2  ;;  %v9415_v1 = vcombine.high %v918_v55, %v922_v21  ;;  %v925_v2 = vld [vmem:[%s10331_s14 + $0x1250] sm:$0xff]  ;;  %v974_v54 = vld [vmem:[%s10331_s14 + $0x13d8] sm:$0xff] }
 0x336   : > { %7455 = vmatprep.mubr.bf16.mxu0 %v10680_v63  ;;  %7799 = vmatprep.mubr.bf16.mxu1 %v10680_v63  ;;  %v9374_v63 = vcombine.low %v878_v12, %v882_v13  ;;  %v938_v12 = vld [vmem:[%s10331_s14 + $0x12b8] sm:$0xff]  ;;  %v9420_v13 = vcombine.low %v925_v2, %v929_v3 }
 0x338   : > { %7426 = vmatpush1.bf16.msra.mxu0 %v9356_v46  ;;  %7770 = vmatpush1.bf16.msra.mxu1 %v9358_v5  ;;  %v9414_v46 = vcombine.low %v918_v55, %v922_v21  ;;  %v9421_v5 = vcombine.high %v925_v2, %v929_v3  ;;  %v978_v55 = vld [vmem:[%s10331_s14 + $0x13f8] sm:$0xff]  ;;  %v985_v2 = vld [vmem:[%s10331_s14 + $0x1430] sm:$0xff] }
 0x339   : > { %7427 = vmatprep.subr.bf16.mxu0 %v9365_v8  ;;  %7771 = vmatprep.subr.bf16.mxu1 %v9367_v9  ;;  %v9423_v8 = vcombine.high %v926_v18, %v930_v4  ;;  %v933_v9 = vld [vmem:[%s10331_s14 + $0x1290] sm:$0xff]  ;;  %v982_v3 = vld [vmem:[%s10331_s14 + $0x1418] sm:$0xff] }
 0x33a   : > { %v9428_v25 = vcombine.low %v933_v9, %v937_v11 }
 0x33c   : > { %7428 = vmatpush1.bf16.msra.mxu0 %v9364_v19  ;;  %7772 = vmatpush1.bf16.msra.mxu1 %v9366_v35  ;;  %v9422_v19 = vcombine.low %v926_v18, %v930_v4  ;;  %v9429_v35 = vcombine.high %v933_v9, %v937_v11  ;;  %v986_v18 = vld [vmem:[%s10331_s14 + $0x1438] sm:$0xff]  ;;  %v993_v9 = vld [vmem:[%s10331_s14 + $0x1470] sm:$0xff] }
 0x33d   : > { %7429 = vmatprep.subr.bf16.mxu0 %v9373_v14  ;;  %7773 = vmatprep.subr.bf16.mxu1 %v9375_v15  ;;  %v9431_v14 = vcombine.high %v934_v10, %v938_v12  ;;  %v941_v15 = vld [vmem:[%s10331_s14 + $0x12d0] sm:$0xff]  ;;  %v990_v11 = vld [vmem:[%s10331_s14 + $0x1458] sm:$0xff] }
 0x33e   : > { %v9436_v60 = vcombine.low %v941_v15, %v945_v17 }
 0x340   : > { %7430 = vmatpush1.bf16.msra.mxu0 %v9372_v26  ;;  %7774 = vmatpush1.bf16.msra.mxu1 %v9374_v63  ;;  %v9430_v26 = vcombine.low %v934_v10, %v938_v12  ;;  %v9437_v63 = vcombine.high %v941_v15, %v945_v17  ;;  %v994_v10 = vld [vmem:[%s10331_s14 + $0x1478] sm:$0xff]  ;;  %v1001_v15 = vld [vmem:[%s10331_s14 + $0x14b0] sm:$0xff] }
 0x341   : > { %7431 = vmatprep.subr.bf16.mxu0 %v9381_v27  ;;  %7775 = vmatprep.subr.bf16.mxu1 %v9383_v50  ;;  %v9439_v27 = vcombine.high %v942_v23, %v946_v24  ;;  %v949_v50 = vld [vmem:[%s10331_s14 + $0x1310] sm:$0xff]  ;;  %v998_v17 = vld [vmem:[%s10331_s14 + $0x1498] sm:$0xff] }
 0x342   : > { %v9444_v40 = vcombine.low %v949_v50, %v953_v62 }
 0x344   : > { %7432 = vmatpush1.bf16.msra.mxu0 %v9380_v30  ;;  %7776 = vmatpush1.bf16.msra.mxu1 %v9382_v31  ;;  %v9438_v30 = vcombine.low %v942_v23, %v946_v24  ;;  %v9445_v31 = vcombine.high %v949_v50, %v953_v62  ;;  %v1002_v23 = vld [vmem:[%s10331_s14 + $0x14b8] sm:$0xff]  ;;  %v1009_v50 = vld [vmem:[%s10331_s14 + $0x14f0] sm:$0xff] }
 0x345   : > { %7433 = vmatprep.subr.bf16.mxu0 %v9389_v33  ;;  %7777 = vmatprep.subr.bf16.mxu1 %v9391_v36  ;;  %v9447_v33 = vcombine.high %v950_v28, %v954_v29  ;;  %v957_v36 = vld [vmem:[%s10331_s14 + $0x1350] sm:$0xff]  ;;  %v1006_v62 = vld [vmem:[%s10331_s14 + $0x14d8] sm:$0xff] }
 0x346   : > { %v9452_v7 = vcombine.low %v957_v36, %v961_v37 }
 0x348   : > { %7434 = vmatpush1.bf16.msra.mxu0 %v9388_v47  ;;  %7778 = vmatpush1.bf16.msra.mxu1 %v9390_v6  ;;  %v9446_v47 = vcombine.low %v950_v28, %v954_v29  ;;  %v9453_v6 = vcombine.high %v957_v36, %v961_v37  ;;  %v1010_v28 = vld [vmem:[%s10331_s14 + $0x14f8] sm:$0xff]  ;;  %v9494_v29 = vcombine.low %v998_v17, %v1002_v23 }
 0x349   : > { %7435 = vmatprep.subr.bf16.mxu0 %v9397_v41  ;;  %7779 = vmatprep.subr.bf16.mxu1 %v9399_v42  ;;  %v9455_v41 = vcombine.high %v958_v32, %v962_v38  ;;  %v965_v42 = vld [vmem:[%s10331_s14 + $0x1390] sm:$0xff]  ;;  %v1014_v36 = vld [vmem:[%s10331_s14 + $0x1518] sm:$0xff] }
 0x34a   : > { %v9460_v21 = vcombine.low %v965_v42, %v969_v43  ;;  %v1018_v37 = vld [vmem:[%s10331_s14 + $0x1538] sm:$0xff] }
 0x34c   : > { %7436 = vmatpush1.bf16.msra.mxu0 %v9396_v52  ;;  %7780 = vmatpush1.bf16.msra.mxu1 %v9398_v58  ;;  %v9454_v52 = vcombine.low %v958_v32, %v962_v38  ;;  %v9461_v58 = vcombine.high %v965_v42, %v969_v43  ;;  %v1026_v42 = vld [vmem:[%s10331_s14 + $0x1578] sm:$0xff] }
 0x34d   : > { %7437 = vmatprep.subr.bf16.mxu0 %v9405_v59  ;;  %7781 = vmatprep.subr.bf16.mxu1 %v9407_v34  ;;  %v9463_v59 = vcombine.high %v966_v45, %v970_v49  ;;  %v973_v34 = vld [vmem:[%s10331_s14 + $0x13d0] sm:$0xff] }
 0x34e   : > { %v9468_v4 = vcombine.low %v973_v34, %v977_v53 }
 0x350   : > { %7438 = vmatpush1.bf16.msra.mxu0 %v9404_v57  ;;  %7782 = vmatpush1.bf16.msra.mxu1 %v9406_v61  ;;  %v9462_v57 = vcombine.low %v966_v45, %v970_v49  ;;  %v9469_v61 = vcombine.high %v973_v34, %v977_v53  ;;  %v9510_v45 = vcombine.low %v1014_v36, %v1018_v37  ;;  %v1034_v34 = vld [vmem:[%s10331_s14 + $0x15b8] sm:$0xff] }
 0x351   : > { %7439 = vmatprep.subr.bf16.mxu0 %v9413_v0  ;;  %7783 = vmatprep.subr.bf16.mxu1 %v9415_v1  ;;  %v9471_v0 = vcombine.high %v974_v54, %v978_v55  ;;  %v981_v1 = vld [vmem:[%s10331_s14 + $0x1410] sm:$0xff] }
 0x352   : > { %v9476_v12 = vcombine.low %v981_v1, %v985_v2 }
 0x354   : > { %7440 = vmatpush1.bf16.msra.mxu0 %v9412_v44  ;;  %7784 = vmatpush1.bf16.msra.mxu1 %v9414_v46  ;;  %v9470_v44 = vcombine.low %v974_v54, %v978_v55  ;;  %v9477_v46 = vcombine.high %v981_v1, %v985_v2  ;;  %v1042_v1 = vld [vmem:[%s10331_s14 + $0x15f8] sm:$0xff] }
 0x355   : > { %7441 = vmatprep.subr.bf16.mxu0 %v9421_v5  ;;  %7785 = vmatprep.subr.bf16.mxu1 %v9423_v8  ;;  %v9479_v5 = vcombine.high %v982_v3, %v986_v18  ;;  %v989_v8 = vld [vmem:[%s10331_s14 + $0x1450] sm:$0xff] }
 0x356   : > { %v9484_v24 = vcombine.low %v989_v8, %v993_v9 }
 0x358   : > { %7442 = vmatpush1.bf16.msra.mxu0 %v9420_v13  ;;  %7786 = vmatpush1.bf16.msra.mxu1 %v9422_v19  ;;  %v9478_v13 = vcombine.low %v982_v3, %v986_v18  ;;  %v9485_v19 = vcombine.high %v989_v8, %v993_v9  ;;  %v1050_v8 = vld [vmem:[%s10331_s14 + $0x1638] sm:$0xff] }
 0x359   : > { %7443 = vmatprep.subr.bf16.mxu0 %v9429_v35  ;;  %7787 = vmatprep.subr.bf16.mxu1 %v9431_v14  ;;  %v9487_v35 = vcombine.high %v990_v11, %v994_v10  ;;  %v997_v14 = vld [vmem:[%s10331_s14 + $0x1490] sm:$0xff] }
 0x35c   : > { %7444 = vmatpush1.bf16.msra.mxu0 %v9428_v25  ;;  %7788 = vmatpush1.bf16.msra.mxu1 %v9430_v26  ;;  %v9486_v25 = vcombine.low %v990_v11, %v994_v10  ;;  %v9493_v26 = vcombine.high %v997_v14, %v1001_v15 }
 0x35d   : > { %7445 = vmatprep.subr.bf16.mxu0 %v9437_v63  ;;  %7789 = vmatprep.subr.bf16.mxu1 %v9439_v27  ;;  %v9495_v63 = vcombine.high %v998_v17, %v1002_v23  ;;  %v1005_v27 = vld [vmem:[%s10331_s14 + $0x14d0] sm:$0xff] }
 0x35e   : > { %v9500_v32 = vcombine.low %v1005_v27, %v1009_v50 }
 0x360   : > { %7446 = vmatpush1.bf16.msra.mxu0 %v9436_v60  ;;  %7790 = vmatpush1.bf16.msra.mxu1 %v9438_v30  ;;  %v9501_v60 = vcombine.high %v1005_v27, %v1009_v50  ;;  %v9503_v30 = vcombine.high %v1006_v62, %v1010_v28  ;;  %v1066_v27 = vld [vmem:[%s10331_s14 + $0x16b8] sm:$0xff] }
 0x361   : > { %7447 = vmatprep.subr.bf16.mxu0 %v9445_v31  ;;  %7791 = vmatprep.subr.bf16.mxu1 %v9447_v33  ;;  %v1013_v31 = vld [vmem:[%s10331_s14 + $0x1510] sm:$0xff] }
 0x362   : > { %v1017_v33 = vld [vmem:[%s10331_s14 + $0x1530] sm:$0xff] }
 0x363   : > { %v9509_v38 = vcombine.high %v1013_v31, %v1017_v33  ;;  %v9508_v43 = vcombine.low %v1013_v31, %v1017_v33  ;;  %v1074_v31 = vld [vmem:[%s10331_s14 + $0x16f8] sm:$0xff] }
 0x364   : > { %7448 = vmatpush1.bf16.msra.mxu0 %v9444_v40  ;;  %7792 = vmatpush1.bf16.msra.mxu1 %v9446_v47  ;;  %v9511_v40 = vcombine.high %v1014_v36, %v1018_v37  ;;  %v1021_v47 = vld [vmem:[%s10331_s14 + $0x1550] sm:$0xff] }
 0x365   : > { %7449 = vmatprep.subr.bf16.mxu0 %v9453_v6  ;;  %7793 = vmatprep.subr.bf16.mxu1 %v9455_v41  ;;  %v1025_v6 = vld [vmem:[%s10331_s14 + $0x1570] sm:$0xff]  ;;  %v1022_v41 = vld [vmem:[%s10331_s14 + $0x1558] sm:$0xff] }
 0x366   : > { %v9517_v49 = vcombine.high %v1021_v47, %v1025_v6  ;;  %v9516_v53 = vcombine.low %v1021_v47, %v1025_v6  ;;  %v9518_v54 = vcombine.low %v1022_v41, %v1026_v42  ;;  %v1082_v47 = vld [vmem:[%s10331_s14 + $0x1738] sm:$0xff] }
 0x368   : > { %7450 = vmatpush1.bf16.msra.mxu0 %v9452_v7  ;;  %7794 = vmatpush1.bf16.msra.mxu1 %v9454_v52  ;;  %v9519_v7 = vcombine.high %v1022_v41, %v1026_v42  ;;  %v1029_v52 = vld [vmem:[%s10331_s14 + $0x1590] sm:$0xff] }
 0x369   : > { %7451 = vmatprep.subr.bf16.mxu0 %v9461_v58  ;;  %7795 = vmatprep.subr.bf16.mxu1 %v9463_v59  ;;  %v1033_v58 = vld [vmem:[%s10331_s14 + $0x15b0] sm:$0xff]  ;;  %v1030_v59 = vld [vmem:[%s10331_s14 + $0x1598] sm:$0xff] }
 0x36a   : > { %v9525_v55 = vcombine.high %v1029_v52, %v1033_v58  ;;  %v9524_v2 = vcombine.low %v1029_v52, %v1033_v58  ;;  %v9526_v3 = vcombine.low %v1030_v59, %v1034_v34  ;;  %v1090_v52 = vld [vmem:[%s10331_s14 + $0x1778] sm:$0xff] }
 0x36c   : > { %7452 = vmatpush1.bf16.msra.mxu0 %v9460_v21  ;;  %7796 = vmatpush1.bf16.msra.mxu1 %v9462_v57  ;;  %v9527_v21 = vcombine.high %v1030_v59, %v1034_v34  ;;  %v1037_v57 = vld [vmem:[%s10331_s14 + $0x15d0] sm:$0xff] }
 0x36d   : > { %7453 = vmatprep.subr.bf16.mxu0 %v9469_v61  ;;  %7797 = vmatprep.subr.bf16.mxu1 %v9471_v0  ;;  %v1041_v61 = vld [vmem:[%s10331_s14 + $0x15f0] sm:$0xff]  ;;  %v1038_v0 = vld [vmem:[%s10331_s14 + $0x15d8] sm:$0xff] }
 0x36e   : > { %v9533_v18 = vcombine.high %v1037_v57, %v1041_v61  ;;  %v9532_v9 = vcombine.low %v1037_v57, %v1041_v61  ;;  %v9534_v11 = vcombine.low %v1038_v0, %v1042_v1  ;;  %v1098_v57 = vld [vmem:[%s10331_s14 + $0x17b8] sm:$0xff] }
 0x370   : > { %7454 = vmatpush1.bf16.msra.mxu0 %v9468_v4  ;;  %7798 = vmatpush1.bf16.msra.mxu1 %v9470_v44  ;;  %v9535_v4 = vcombine.high %v1038_v0, %v1042_v1  ;;  %v1045_v44 = vld [vmem:[%s10331_s14 + $0x1610] sm:$0xff] }
 0x371   : > { %7466 = vmatprep.subr.bf16.mxu0 %v9477_v46  ;;  %7810 = vmatprep.subr.bf16.mxu1 %v9479_v5  ;;  %v1049_v46 = vld [vmem:[%s10331_s14 + $0x1630] sm:$0xff]  ;;  %v1046_v5 = vld [vmem:[%s10331_s14 + $0x1618] sm:$0xff] }
 0x372   : > { %v9541_v10 = vcombine.high %v1045_v44, %v1049_v46  ;;  %v9542_v17 = vcombine.low %v1046_v5, %v1050_v8 }
 0x373   : > { %7456 = vmatmul.mubr.bf16.vlgmr.msra.gmra.mrb[4].mxu0 %v10749_v48  ;;  %7800 = vmatmul.mubr.bf16.vlgmr.msra.gmra.mrb[4].mxu1 %v10749_v48  ;;  %v9492_v48 = vcombine.low %v997_v14, %v1001_v15  ;;  %v1058_v14 = vld [vmem:[%s10331_s14 + $0x1678] sm:$0xff]  ;;  %v9540_v15 = vcombine.low %v1045_v44, %v1049_v46 }
 0x374   : > { %7467 = vmatpush1.bf16.msra.mxu0 %v9476_v12  ;;  %7811 = vmatpush1.bf16.msra.mxu1 %v9478_v13  ;;  %v9543_v12 = vcombine.high %v1046_v5, %v1050_v8  ;;  %v1053_v13 = vld [vmem:[%s10331_s14 + $0x1650] sm:$0xff]  ;;  %v1106_v44 = vld [vmem:[%s10331_s14 + $0x17f8] sm:$0xff] }
 0x375   : > { %7468 = vmatprep.subr.bf16.mxu0 %v9485_v19  ;;  %7812 = vmatprep.subr.bf16.mxu1 %v9487_v35  ;;  %v1057_v19 = vld [vmem:[%s10331_s14 + $0x1670] sm:$0xff]  ;;  %v1054_v35 = vld [vmem:[%s10331_s14 + $0x1658] sm:$0xff] }
 0x376   : > { %7498 = vmatprep.mubr.bf16.mxu0 %v10762_v22  ;;  %7842 = vmatprep.mubr.bf16.mxu1 %v10762_v22  ;;  %v9502_v22 = vcombine.low %v1006_v62, %v1010_v28  ;;  %v9549_v23 = vcombine.high %v1053_v13, %v1057_v19  ;;  %v9548_v50 = vcombine.low %v1053_v13, %v1057_v19  ;;  %v1114_v13 = vld [vmem:[%s10331_s14 + $0x1838] sm:$0xff] }
 0x377   : > { %v9550_v62 = vcombine.low %v1054_v35, %v1058_v14 }
 0x378   : > { %7469 = vmatpush1.bf16.msra.mxu0 %v9484_v24  ;;  %7813 = vmatpush1.bf16.msra.mxu1 %v9486_v25  ;;  %v9551_v24 = vcombine.high %v1054_v35, %v1058_v14  ;;  %v1061_v25 = vld [vmem:[%s10331_s14 + $0x1690] sm:$0xff] }
 0x379   : > { %7470 = vmatprep.subr.bf16.mxu0 %v9493_v26  ;;  %7814 = vmatprep.subr.bf16.mxu1 %v9495_v63  ;;  %v1065_v26 = vld [vmem:[%s10331_s14 + $0x16b0] sm:$0xff]  ;;  %v1062_v63 = vld [vmem:[%s10331_s14 + $0x1698] sm:$0xff] }
 0x37a   : > { %v9557_v28 = vcombine.high %v1061_v25, %v1065_v26  ;;  %v9556_v33 = vcombine.low %v1061_v25, %v1065_v26  ;;  %v9558_v36 = vcombine.low %v1062_v63, %v1066_v27  ;;  %v1122_v25 = vld [vmem:[%s10331_s14 + $0x1878] sm:$0xff] }
 0x37c   : > { %7471 = vmatpush1.bf16.msra.mxu0 %v9492_v48  ;;  %7815 = vmatpush1.bf16.msra.mxu1 %v9494_v29  ;;  %v9559_v48 = vcombine.high %v1062_v63, %v1066_v27  ;;  %v1069_v29 = vld [vmem:[%s10331_s14 + $0x16d0] sm:$0xff] }
 0x37d   : > { %7472 = vmatprep.subr.bf16.mxu0 %v9501_v60  ;;  %7816 = vmatprep.subr.bf16.mxu1 %v9503_v30  ;;  %v1073_v60 = vld [vmem:[%s10331_s14 + $0x16f0] sm:$0xff]  ;;  %v1070_v30 = vld [vmem:[%s10331_s14 + $0x16d8] sm:$0xff] }
 0x37e   : > { %v9565_v37 = vcombine.high %v1069_v29, %v1073_v60  ;;  %v9564_v6 = vcombine.low %v1069_v29, %v1073_v60  ;;  %v9566_v41 = vcombine.low %v1070_v30, %v1074_v31  ;;  %v1130_v29 = vld [vmem:[%s10331_s14 + $0x18b8] sm:$0xff] }
 0x380   : > { %7473 = vmatpush1.bf16.msra.mxu0 %v9500_v32  ;;  %7817 = vmatpush1.bf16.msra.mxu1 %v9502_v22  ;;  %v9567_v32 = vcombine.high %v1070_v30, %v1074_v31  ;;  %v1077_v22 = vld [vmem:[%s10331_s14 + $0x1710] sm:$0xff] }
 0x381   : > { %7474 = vmatprep.subr.bf16.mxu0 %v9509_v38  ;;  %7818 = vmatprep.subr.bf16.mxu1 %v9511_v40  ;;  %v1081_v38 = vld [vmem:[%s10331_s14 + $0x1730] sm:$0xff]  ;;  %v1078_v40 = vld [vmem:[%s10331_s14 + $0x1718] sm:$0xff] }
 0x382   : > { %v9573_v42 = vcombine.high %v1077_v22, %v1081_v38  ;;  %v9572_v58 = vcombine.low %v1077_v22, %v1081_v38  ;;  %v9574_v59 = vcombine.low %v1078_v40, %v1082_v47  ;;  %v1138_v22 = vld [vmem:[%s10331_s14 + $0x18f8] sm:$0xff] }
 0x384   : > { %7475 = vmatpush1.bf16.msra.mxu0 %v9508_v43  ;;  %7819 = vmatpush1.bf16.msra.mxu1 %v9510_v45  ;;  %v9575_v43 = vcombine.high %v1078_v40, %v1082_v47  ;;  %v1085_v45 = vld [vmem:[%s10331_s14 + $0x1750] sm:$0xff] }
 0x385   : > { %7476 = vmatprep.subr.bf16.mxu0 %v9517_v49  ;;  %7820 = vmatprep.subr.bf16.mxu1 %v9519_v7  ;;  %v1089_v49 = vld [vmem:[%s10331_s14 + $0x1770] sm:$0xff]  ;;  %v1086_v7 = vld [vmem:[%s10331_s14 + $0x1758] sm:$0xff] }
 0x386   : > { %v9581_v34 = vcombine.high %v1085_v45, %v1089_v49  ;;  %v9580_v61 = vcombine.low %v1085_v45, %v1089_v49  ;;  %v9582_v0 = vcombine.low %v1086_v7, %v1090_v52 }
 0x388   : > { %7477 = vmatpush1.bf16.msra.mxu0 %v9516_v53  ;;  %7821 = vmatpush1.bf16.msra.mxu1 %v9518_v54  ;;  %v9583_v53 = vcombine.high %v1086_v7, %v1090_v52  ;;  %v1093_v54 = vld [vmem:[%s10331_s14 + $0x1790] sm:$0xff] }
 0x389   : > { %7478 = vmatprep.subr.bf16.mxu0 %v9525_v55  ;;  %7822 = vmatprep.subr.bf16.mxu1 %v9527_v21  ;;  %v1097_v55 = vld [vmem:[%s10331_s14 + $0x17b0] sm:$0xff]  ;;  %v1094_v21 = vld [vmem:[%s10331_s14 + $0x1798] sm:$0xff] }
 0x38a   : > { %v9589_v1 = vcombine.high %v1093_v54, %v1097_v55  ;;  %v9588_v46 = vcombine.low %v1093_v54, %v1097_v55  ;;  %v9590_v5 = vcombine.low %v1094_v21, %v1098_v57  ;;  %v1149_v52 = vld [vmem:[%s10331_s14 + $0x1950] sm:$0xff] }
 0x38c   : > { %7479 = vmatpush1.bf16.msra.mxu0 %v9524_v2  ;;  %7823 = vmatpush1.bf16.msra.mxu1 %v9526_v3  ;;  %v9591_v2 = vcombine.high %v1094_v21, %v1098_v57  ;;  %v1101_v3 = vld [vmem:[%s10331_s14 + $0x17d0] sm:$0xff] }
 0x38d   : > { %7480 = vmatprep.subr.bf16.mxu0 %v9533_v18  ;;  %7824 = vmatprep.subr.bf16.mxu1 %v9535_v4  ;;  %v1105_v18 = vld [vmem:[%s10331_s14 + $0x17f0] sm:$0xff]  ;;  %v1102_v4 = vld [vmem:[%s10331_s14 + $0x17d8] sm:$0xff] }
 0x38e   : > { %v9597_v8 = vcombine.high %v1101_v3, %v1105_v18  ;;  %v9596_v19 = vcombine.low %v1101_v3, %v1105_v18  ;;  %v9598_v35 = vcombine.low %v1102_v4, %v1106_v44  ;;  %v1157_v57 = vld [vmem:[%s10331_s14 + $0x1990] sm:$0xff] }
 0x390   : > { %7481 = vmatpush1.bf16.msra.mxu0 %v9532_v9  ;;  %7825 = vmatpush1.bf16.msra.mxu1 %v9534_v11  ;;  %v9599_v9 = vcombine.high %v1102_v4, %v1106_v44  ;;  %v1109_v11 = vld [vmem:[%s10331_s14 + $0x1810] sm:$0xff] }
 0x391   : > { %7482 = vmatprep.subr.bf16.mxu0 %v9541_v10  ;;  %7826 = vmatprep.subr.bf16.mxu1 %v9543_v12  ;;  %v1113_v10 = vld [vmem:[%s10331_s14 + $0x1830] sm:$0xff]  ;;  %v1110_v12 = vld [vmem:[%s10331_s14 + $0x1818] sm:$0xff] }
 0x392   : > { %v9605_v14 = vcombine.high %v1109_v11, %v1113_v10  ;;  %v9604_v26 = vcombine.low %v1109_v11, %v1113_v10  ;;  %v9606_v63 = vcombine.low %v1110_v12, %v1114_v13  ;;  %v1165_v44 = vld [vmem:[%s10331_s14 + $0x19d0] sm:$0xff] }
 0x394   : > { %7483 = vmatpush1.bf16.msra.mxu0 %v9540_v15  ;;  %7827 = vmatpush1.bf16.msra.mxu1 %v9542_v17  ;;  %v9607_v15 = vcombine.high %v1110_v12, %v1114_v13  ;;  %v1117_v17 = vld [vmem:[%s10331_s14 + $0x1850] sm:$0xff] }
 0x395   : > { %7484 = vmatprep.subr.bf16.mxu0 %v9549_v23  ;;  %7828 = vmatprep.subr.bf16.mxu1 %v9551_v24  ;;  %v1121_v23 = vld [vmem:[%s10331_s14 + $0x1870] sm:$0xff]  ;;  %v1118_v24 = vld [vmem:[%s10331_s14 + $0x1858] sm:$0xff] }
 0x396   : > { %v9613_v27 = vcombine.high %v1117_v17, %v1121_v23  ;;  %v9612_v60 = vcombine.low %v1117_v17, %v1121_v23  ;;  %v9614_v30 = vcombine.low %v1118_v24, %v1122_v25  ;;  %v1173_v13 = vld [vmem:[%s10331_s14 + $0x1a10] sm:$0xff] }
 0x398   : > { %7485 = vmatpush1.bf16.msra.mxu0 %v9548_v50  ;;  %7829 = vmatpush1.bf16.msra.mxu1 %v9550_v62  ;;  %v9615_v50 = vcombine.high %v1118_v24, %v1122_v25  ;;  %v1125_v62 = vld [vmem:[%s10331_s14 + $0x1890] sm:$0xff] }
 0x399   : > { %7486 = vmatprep.subr.bf16.mxu0 %v9557_v28  ;;  %7830 = vmatprep.subr.bf16.mxu1 %v9559_v48  ;;  %v1129_v28 = vld [vmem:[%s10331_s14 + $0x18b0] sm:$0xff]  ;;  %v1126_v48 = vld [vmem:[%s10331_s14 + $0x1898] sm:$0xff] }
 0x39a   : > { %v9621_v31 = vcombine.high %v1125_v62, %v1129_v28  ;;  %v9622_v38 = vcombine.low %v1126_v48, %v1130_v29  ;;  %v1181_v25 = vld [vmem:[%s10331_s14 + $0x1a50] sm:$0xff] }
 0x39c   : > { %7487 = vmatpush1.bf16.msra.mxu0 %v9556_v33  ;;  %7831 = vmatpush1.bf16.msra.mxu1 %v9558_v36  ;;  %v9623_v33 = vcombine.high %v1126_v48, %v1130_v29  ;;  %v1133_v36 = vld [vmem:[%s10331_s14 + $0x18d0] sm:$0xff] }
 0x39d   : > { %7488 = vmatprep.subr.bf16.mxu0 %v9565_v37  ;;  %7832 = vmatprep.subr.bf16.mxu1 %v9567_v32  ;;  %v1137_v37 = vld [vmem:[%s10331_s14 + $0x18f0] sm:$0xff]  ;;  %v1134_v32 = vld [vmem:[%s10331_s14 + $0x18d8] sm:$0xff] }
 0x39e   : > { %v9629_v40 = vcombine.high %v1133_v36, %v1137_v37  ;;  %v9631_v47 = vcombine.high %v1134_v32, %v1138_v22  ;;  %v9628_v45 = vcombine.low %v1133_v36, %v1137_v37  ;;  %v1189_v29 = vld [vmem:[%s10331_s14 + $0x1a90] sm:$0xff] }
 0x3a0   : > { %7489 = vmatpush1.bf16.msra.mxu0 %v9564_v6  ;;  %7833 = vmatpush1.bf16.msra.mxu1 %v9566_v41  ;;  %v1141_v6 = vld [vmem:[%s10331_s14 + $0x1910] sm:$0xff] }
 0x3a1   : > { %7490 = vmatprep.subr.bf16.mxu0 %v9573_v42  ;;  %7834 = vmatprep.subr.bf16.mxu1 %v9575_v43  ;;  %v1145_v41 = vld [vmem:[%s10331_s14 + $0x1930] sm:$0xff]  ;;  %v1142_v42 = vld [vmem:[%s10331_s14 + $0x1918] sm:$0xff] }
 0x3a2   : > { %v1146_v43 = vld [vmem:[%s10331_s14 + $0x1938] sm:$0xff]  ;;  %v9637_v49 = vcombine.high %v1141_v6, %v1145_v41 }
 0x3a3   : > { %v9639_v7 = vcombine.high %v1142_v42, %v1146_v43  ;;  %v9638_v54 = vcombine.low %v1142_v42, %v1146_v43  ;;  %v1205_v43 = vld [vmem:[%s10331_s14 + $0x1b10] sm:$0xff] }
 0x3a4   : > { %7491 = vmatpush1.bf16.msra.mxu0 %v9572_v58  ;;  %7835 = vmatpush1.bf16.msra.mxu1 %v9574_v59  ;;  %v1153_v58 = vld [vmem:[%s10331_s14 + $0x1970] sm:$0xff]  ;;  %v1150_v59 = vld [vmem:[%s10331_s14 + $0x1958] sm:$0xff] }
 0x3a5   : > { %7492 = vmatprep.subr.bf16.mxu0 %v9581_v34  ;;  %7836 = vmatprep.subr.bf16.mxu1 %v9583_v53  ;;  %v1154_v34 = vld [vmem:[%s10331_s14 + $0x1978] sm:$0xff]  ;;  %v9636_v53 = vcombine.low %v1141_v6, %v1145_v41  ;;  %v9645_v55 = vcombine.high %v1149_v52, %v1153_v58 }
 0x3a6   : > { %v9647_v21 = vcombine.high %v1150_v59, %v1154_v34  ;;  %v9646_v3 = vcombine.low %v1150_v59, %v1154_v34  ;;  %v1213_v34 = vld [vmem:[%s10331_s14 + $0x1b50] sm:$0xff] }
 0x3a8   : > { %7493 = vmatpush1.bf16.msra.mxu0 %v9580_v61  ;;  %7837 = vmatpush1.bf16.msra.mxu1 %v9582_v0  ;;  %v1161_v61 = vld [vmem:[%s10331_s14 + $0x19b0] sm:$0xff]  ;;  %v1158_v0 = vld [vmem:[%s10331_s14 + $0x1998] sm:$0xff] }
 0x3a9   : > { %7494 = vmatprep.subr.bf16.mxu0 %v9589_v1  ;;  %7838 = vmatprep.subr.bf16.mxu1 %v9591_v2  ;;  %v1162_v1 = vld [vmem:[%s10331_s14 + $0x19b8] sm:$0xff]  ;;  %v9644_v2 = vcombine.low %v1149_v52, %v1153_v58  ;;  %v9653_v18 = vcombine.high %v1157_v57, %v1161_v61 }
 0x3aa   : > { %v9655_v4 = vcombine.high %v1158_v0, %v1162_v1  ;;  %v9654_v11 = vcombine.low %v1158_v0, %v1162_v1  ;;  %v1221_v1 = vld [vmem:[%s10331_s14 + $0x1b90] sm:$0xff] }
 0x3ac   : > { %7495 = vmatpush1.bf16.msra.mxu0 %v9588_v46  ;;  %7839 = vmatpush1.bf16.msra.mxu1 %v9590_v5  ;;  %v1169_v46 = vld [vmem:[%s10331_s14 + $0x19f0] sm:$0xff]  ;;  %v1166_v5 = vld [vmem:[%s10331_s14 + $0x19d8] sm:$0xff] }
 0x3ad   : > { %7496 = vmatprep.subr.bf16.mxu0 %v9597_v8  ;;  %7840 = vmatprep.subr.bf16.mxu1 %v9599_v9  ;;  %v1170_v8 = vld [vmem:[%s10331_s14 + $0x19f8] sm:$0xff]  ;;  %v9652_v9 = vcombine.low %v1157_v57, %v1161_v61  ;;  %v9661_v10 = vcombine.high %v1165_v44, %v1169_v46 }
 0x3ae   : > { %v9663_v12 = vcombine.high %v1166_v5, %v1170_v8  ;;  %v9662_v17 = vcombine.low %v1166_v5, %v1170_v8  ;;  %v1229_v8 = vld [vmem:[%s10331_s14 + $0x1bd0] sm:$0xff] }
 0x3b0   : > { %7497 = vmatpush1.bf16.msra.mxu0 %v9596_v19  ;;  %7841 = vmatpush1.bf16.msra.mxu1 %v9598_v35  ;;  %v1177_v19 = vld [vmem:[%s10331_s14 + $0x1a30] sm:$0xff]  ;;  %v1174_v35 = vld [vmem:[%s10331_s14 + $0x1a18] sm:$0xff] }
 0x3b1   : > { %7509 = vmatprep.subr.bf16.mxu0 %v9605_v14  ;;  %7853 = vmatprep.subr.bf16.mxu1 %v9607_v15  ;;  %v1178_v14 = vld [vmem:[%s10331_s14 + $0x1a38] sm:$0xff]  ;;  %v9660_v15 = vcombine.low %v1165_v44, %v1169_v46  ;;  %v9669_v23 = vcombine.high %v1173_v13, %v1177_v19 }
 0x3b2   : > { %v9671_v24 = vcombine.high %v1174_v35, %v1178_v14 }
 0x3b3   : > { %7499 = vmatmul.mubr.bf16.vlgmr.msra.gmra.mrb[4].mxu0 %v10831_v16  ;;  %7843 = vmatmul.mubr.bf16.vlgmr.msra.gmra.mrb[4].mxu1 %v10831_v16  ;;  %v9620_v16 = vcombine.low %v1125_v62, %v1129_v28  ;;  %v9670_v62 = vcombine.low %v1174_v35, %v1178_v14  ;;  %v1237_v14 = vld [vmem:[%s10331_s14 + $0x1c10] sm:$0xff] }
 0x3b4   : > { %7510 = vmatpush1.bf16.msra.mxu0 %v9604_v26  ;;  %7854 = vmatpush1.bf16.msra.mxu1 %v9606_v63  ;;  %v1185_v26 = vld [vmem:[%s10331_s14 + $0x1a70] sm:$0xff]  ;;  %v1182_v63 = vld [vmem:[%s10331_s14 + $0x1a58] sm:$0xff] }
 0x3b5   : > { %7511 = vmatprep.subr.bf16.mxu0 %v9613_v27  ;;  %7855 = vmatprep.subr.bf16.mxu1 %v9615_v50  ;;  %v1186_v27 = vld [vmem:[%s10331_s14 + $0x1a78] sm:$0xff]  ;;  %v9668_v50 = vcombine.low %v1173_v13, %v1177_v19  ;;  %v9677_v28 = vcombine.high %v1181_v25, %v1185_v26 }
 0x3b6   : > { %7541 = vmatprep.mubr.bf16.mxu0 %v10844_v51  ;;  %7885 = vmatprep.mubr.bf16.mxu1 %v10844_v51  ;;  %v9630_v51 = vcombine.low %v1134_v32, %v1138_v22  ;;  %v9679_v48 = vcombine.high %v1182_v63, %v1186_v27  ;;  %v9678_v36 = vcombine.low %v1182_v63, %v1186_v27  ;;  %v1197_v22 = vld [vmem:[%s10331_s14 + $0x1ad0] sm:$0xff] }
 0x3b7   : > { %v1245_v27 = vld [vmem:[%s10331_s14 + $0x1c50] sm:$0xff] }
 0x3b8   : > { %7512 = vmatpush1.bf16.msra.mxu0 %v9612_v60  ;;  %7856 = vmatpush1.bf16.msra.mxu1 %v9614_v30  ;;  %v1193_v60 = vld [vmem:[%s10331_s14 + $0x1ab0] sm:$0xff]  ;;  %v1190_v30 = vld [vmem:[%s10331_s14 + $0x1a98] sm:$0xff] }
 0x3b9   : > { %7513 = vmatprep.subr.bf16.mxu0 %v9621_v31  ;;  %7857 = vmatprep.subr.bf16.mxu1 %v9623_v33  ;;  %v1194_v31 = vld [vmem:[%s10331_s14 + $0x1ab8] sm:$0xff]  ;;  %v9676_v33 = vcombine.low %v1181_v25, %v1185_v26  ;;  %v9685_v37 = vcombine.high %v1189_v29, %v1193_v60 }
 0x3ba   : > { %v9687_v32 = vcombine.high %v1190_v30, %v1194_v31  ;;  %v9686_v6 = vcombine.low %v1190_v30, %v1194_v31  ;;  %v1253_v31 = vld [vmem:[%s10331_s14 + $0x1c90] sm:$0xff] }
 0x3bc   : > { %7514 = vmatpush1.bf16.msra.mxu0 %v9620_v16  ;;  %7858 = vmatpush1.bf16.msra.mxu1 %v9622_v38  ;;  %v1201_v16 = vld [vmem:[%s10331_s14 + $0x1af0] sm:$0xff]  ;;  %v1198_v38 = vld [vmem:[%s10331_s14 + $0x1ad8] sm:$0xff] }
 0x3bd   : > { %7515 = vmatprep.subr.bf16.mxu0 %v9629_v40  ;;  %7859 = vmatprep.subr.bf16.mxu1 %v9631_v47  ;;  %v1202_v40 = vld [vmem:[%s10331_s14 + $0x1af8] sm:$0xff]  ;;  %v9684_v47 = vcombine.low %v1189_v29, %v1193_v60  ;;  %v9693_v41 = vcombine.high %v1197_v22, %v1201_v16 }
 0x3be   : > { %v9695_v42 = vcombine.high %v1198_v38, %v1202_v40  ;;  %v9694_v52 = vcombine.low %v1198_v38, %v1202_v40  ;;  %v1261_v40 = vld [vmem:[%s10331_s14 + $0x1cd0] sm:$0xff] }
 0x3c0   : > { %7516 = vmatpush1.bf16.msra.mxu0 %v9628_v45  ;;  %7860 = vmatpush1.bf16.msra.mxu1 %v9630_v51  ;;  %v1209_v45 = vld [vmem:[%s10331_s14 + $0x1b30] sm:$0xff]  ;;  %v1206_v51 = vld [vmem:[%s10331_s14 + $0x1b18] sm:$0xff] }
 0x3c1   : > { %7517 = vmatprep.subr.bf16.mxu0 %v9637_v49  ;;  %7861 = vmatprep.subr.bf16.mxu1 %v9639_v7  ;;  %v1210_v49 = vld [vmem:[%s10331_s14 + $0x1b38] sm:$0xff]  ;;  %v9692_v7 = vcombine.low %v1197_v22, %v1201_v16  ;;  %v9701_v58 = vcombine.high %v1205_v43, %v1209_v45 }
 0x3c2   : > { %v9703_v59 = vcombine.high %v1206_v51, %v1210_v49  ;;  %v9702_v57 = vcombine.low %v1206_v51, %v1210_v49  ;;  %v1269_v51 = vld [vmem:[%s10331_s14 + $0x1d10] sm:$0xff] }
 0x3c3   : > { %v1273_v49 = vld [vmem:[%s10331_s14 + $0x1d30] sm:$0xff] }
 0x3c4   : > { %7518 = vmatpush1.bf16.msra.mxu0 %v9636_v53  ;;  %7862 = vmatpush1.bf16.msra.mxu1 %v9638_v54  ;;  %v1217_v53 = vld [vmem:[%s10331_s14 + $0x1b70] sm:$0xff]  ;;  %v1214_v54 = vld [vmem:[%s10331_s14 + $0x1b58] sm:$0xff] }
 0x3c5   : > { %7519 = vmatprep.subr.bf16.mxu0 %v9645_v55  ;;  %7863 = vmatprep.subr.bf16.mxu1 %v9647_v21  ;;  %v1218_v55 = vld [vmem:[%s10331_s14 + $0x1b78] sm:$0xff]  ;;  %v9700_v21 = vcombine.low %v1205_v43, %v1209_v45  ;;  %v9709_v61 = vcombine.high %v1213_v34, %v1217_v53 }
 0x3c6   : > { %v9711_v0 = vcombine.high %v1214_v54, %v1218_v55  ;;  %v9710_v44 = vcombine.low %v1214_v54, %v1218_v55  ;;  %v1281_v54 = vld [vmem:[%s10331_s14 + $0x1d70] sm:$0xff]  ;;  %v1278_v55 = vld [vmem:[%s10331_s14 + $0x1d58] sm:$0xff] }
 0x3c8   : > { %7520 = vmatpush1.bf16.msra.mxu0 %v9644_v2  ;;  %7864 = vmatpush1.bf16.msra.mxu1 %v9646_v3  ;;  %v1225_v2 = vld [vmem:[%s10331_s14 + $0x1bb0] sm:$0xff]  ;;  %v1222_v3 = vld [vmem:[%s10331_s14 + $0x1b98] sm:$0xff] }
 0x3c9   : > { %7521 = vmatprep.subr.bf16.mxu0 %v9653_v18  ;;  %7865 = vmatprep.subr.bf16.mxu1 %v9655_v4  ;;  %v1226_v18 = vld [vmem:[%s10331_s14 + $0x1bb8] sm:$0xff]  ;;  %v9708_v4 = vcombine.low %v1213_v34, %v1217_v53  ;;  %v9717_v46 = vcombine.high %v1221_v1, %v1225_v2  ;;  %v1277_v53 = vld [vmem:[%s10331_s14 + $0x1d50] sm:$0xff] }
 0x3ca   : > { %v9719_v5 = vcombine.high %v1222_v3, %v1226_v18  ;;  %v9718_v13 = vcombine.low %v1222_v3, %v1226_v18  ;;  %v1289_v3 = vld [vmem:[%s10331_s14 + $0x1db0] sm:$0xff]  ;;  %v1286_v18 = vld [vmem:[%s10331_s14 + $0x1d98] sm:$0xff] }
 0x3cc   : > { %7522 = vmatpush1.bf16.msra.mxu0 %v9652_v9  ;;  %7866 = vmatpush1.bf16.msra.mxu1 %v9654_v11  ;;  %v1233_v9 = vld [vmem:[%s10331_s14 + $0x1bf0] sm:$0xff]  ;;  %v1230_v11 = vld [vmem:[%s10331_s14 + $0x1bd8] sm:$0xff] }
 0x3cd   : > { %7523 = vmatprep.subr.bf16.mxu0 %v9661_v10  ;;  %7867 = vmatprep.subr.bf16.mxu1 %v9663_v12  ;;  %v1234_v10 = vld [vmem:[%s10331_s14 + $0x1bf8] sm:$0xff]  ;;  %v9716_v12 = vcombine.low %v1221_v1, %v1225_v2  ;;  %v9725_v19 = vcombine.high %v1229_v8, %v1233_v9  ;;  %v1285_v2 = vld [vmem:[%s10331_s14 + $0x1d90] sm:$0xff] }
 0x3ce   : > { %v9727_v35 = vcombine.high %v1230_v11, %v1234_v10  ;;  %v9726_v25 = vcombine.low %v1230_v11, %v1234_v10  ;;  %v1297_v11 = vld [vmem:[%s10331_s14 + $0x1df0] sm:$0xff]  ;;  %v1294_v10 = vld [vmem:[%s10331_s14 + $0x1dd8] sm:$0xff] }
 0x3d0   : > { %7524 = vmatpush1.bf16.msra.mxu0 %v9660_v15  ;;  %7868 = vmatpush1.bf16.msra.mxu1 %v9662_v17  ;;  %v1241_v15 = vld [vmem:[%s10331_s14 + $0x1c30] sm:$0xff]  ;;  %v1238_v17 = vld [vmem:[%s10331_s14 + $0x1c18] sm:$0xff] }
 0x3d1   : > { %7525 = vmatprep.subr.bf16.mxu0 %v9669_v23  ;;  %7869 = vmatprep.subr.bf16.mxu1 %v9671_v24  ;;  %v1242_v23 = vld [vmem:[%s10331_s14 + $0x1c38] sm:$0xff]  ;;  %v9724_v24 = vcombine.low %v1229_v8, %v1233_v9  ;;  %v9733_v26 = vcombine.high %v1237_v14, %v1241_v15  ;;  %v1293_v9 = vld [vmem:[%s10331_s14 + $0x1dd0] sm:$0xff] }
 0x3d2   : > { %v9735_v63 = vcombine.high %v1238_v17, %v1242_v23  ;;  %v9734_v29 = vcombine.low %v1238_v17, %v1242_v23  ;;  %v1305_v17 = vld [vmem:[%s10331_s14 + $0x1e30] sm:$0xff]  ;;  %v1302_v23 = vld [vmem:[%s10331_s14 + $0x1e18] sm:$0xff] }
 0x3d4   : > { %7526 = vmatpush1.bf16.msra.mxu0 %v9668_v50  ;;  %7870 = vmatpush1.bf16.msra.mxu1 %v9670_v62  ;;  %v1249_v50 = vld [vmem:[%s10331_s14 + $0x1c70] sm:$0xff]  ;;  %v1246_v62 = vld [vmem:[%s10331_s14 + $0x1c58] sm:$0xff] }
 0x3d5   : > { %7527 = vmatprep.subr.bf16.mxu0 %v9677_v28  ;;  %7871 = vmatprep.subr.bf16.mxu1 %v9679_v48  ;;  %v1250_v28 = vld [vmem:[%s10331_s14 + $0x1c78] sm:$0xff]  ;;  %v9732_v48 = vcombine.low %v1237_v14, %v1241_v15  ;;  %v9741_v60 = vcombine.high %v1245_v27, %v1249_v50  ;;  %v1301_v15 = vld [vmem:[%s10331_s14 + $0x1e10] sm:$0xff] }
 0x3d6   : > { %v9743_v30 = vcombine.high %v1246_v62, %v1250_v28  ;;  %v9742_v22 = vcombine.low %v1246_v62, %v1250_v28  ;;  %v1313_v62 = vld [vmem:[%s10331_s14 + $0x1e70] sm:$0xff]  ;;  %v1310_v28 = vld [vmem:[%s10331_s14 + $0x1e58] sm:$0xff] }
 0x3d8   : > { %7528 = vmatpush1.bf16.msra.mxu0 %v9676_v33  ;;  %7872 = vmatpush1.bf16.msra.mxu1 %v9678_v36  ;;  %v1257_v33 = vld [vmem:[%s10331_s14 + $0x1cb0] sm:$0xff]  ;;  %v1254_v36 = vld [vmem:[%s10331_s14 + $0x1c98] sm:$0xff] }
 0x3d9   : > { %7529 = vmatprep.subr.bf16.mxu0 %v9685_v37  ;;  %7873 = vmatprep.subr.bf16.mxu1 %v9687_v32  ;;  %v1258_v37 = vld [vmem:[%s10331_s14 + $0x1cb8] sm:$0xff]  ;;  %v9740_v32 = vcombine.low %v1245_v27, %v1249_v50  ;;  %v9749_v16 = vcombine.high %v1253_v31, %v1257_v33  ;;  %v1309_v50 = vld [vmem:[%s10331_s14 + $0x1e50] sm:$0xff] }
 0x3da   : > { %v9751_v38 = vcombine.high %v1254_v36, %v1258_v37 }
 0x3dc   : > { %7530 = vmatpush1.bf16.msra.mxu0 %v9684_v47  ;;  %7874 = vmatpush1.bf16.msra.mxu1 %v9686_v6  ;;  %v1265_v47 = vld [vmem:[%s10331_s14 + $0x1cf0] sm:$0xff]  ;;  %v1262_v6 = vld [vmem:[%s10331_s14 + $0x1cd8] sm:$0xff] }
 0x3dd   : > { %7531 = vmatprep.subr.bf16.mxu0 %v9693_v41  ;;  %7875 = vmatprep.subr.bf16.mxu1 %v9695_v42  ;;  %v1266_v41 = vld [vmem:[%s10331_s14 + $0x1cf8] sm:$0xff]  ;;  %v9750_v42 = vcombine.low %v1254_v36, %v1258_v37  ;;  %v9757_v43 = vcombine.high %v1261_v40, %v1265_v47  ;;  %v1321_v36 = vld [vmem:[%s10331_s14 + $0x1eb0] sm:$0xff] }
 0x3de   : > { %v9759_v45 = vcombine.high %v1262_v6, %v1266_v41  ;;  %v1318_v37 = vld [vmem:[%s10331_s14 + $0x1e98] sm:$0xff] }
 0x3e0   : > { %7532 = vmatpush1.bf16.msra.mxu0 %v9692_v7  ;;  %7876 = vmatpush1.bf16.msra.mxu1 %v9694_v52  ;;  %v1270_v7 = vld [vmem:[%s10331_s14 + $0x1d18] sm:$0xff] }
 0x3e1   : > { %7533 = vmatprep.subr.bf16.mxu0 %v9701_v58  ;;  %7877 = vmatprep.subr.bf16.mxu1 %v9703_v59  ;;  %v1274_v52 = vld [vmem:[%s10331_s14 + $0x1d38] sm:$0xff]  ;;  %v9756_v58 = vcombine.low %v1261_v40, %v1265_v47  ;;  %v9765_v59 = vcombine.high %v1269_v51, %v1273_v49  ;;  %v1325_v47 = vld [vmem:[%s10331_s14 + $0x1ed0] sm:$0xff] }
 0x3e2   : > { %v9767_v34 = vcombine.high %v1270_v7, %v1274_v52 }
 0x3e4   : > { %7534 = vmatpush1.bf16.msra.mxu0 %v9700_v21  ;;  %7878 = vmatpush1.bf16.msra.mxu1 %v9702_v57  ;;  %v1282_v21 = vld [vmem:[%s10331_s14 + $0x1d78] sm:$0xff]  ;;  %v9764_v57 = vcombine.low %v1269_v51, %v1273_v49  ;;  %v1333_v49 = vld [vmem:[%s10331_s14 + $0x1f10] sm:$0xff] }
 0x3e5   : > { %7535 = vmatprep.subr.bf16.mxu0 %v9709_v61  ;;  %7879 = vmatprep.subr.bf16.mxu1 %v9711_v0  ;;  %v9766_v61 = vcombine.low %v1270_v7, %v1274_v52  ;;  %v9773_v0 = vcombine.high %v1277_v53, %v1281_v54  ;;  %v9775_v1 = vcombine.high %v1278_v55, %v1282_v21  ;;  %v1337_v7 = vld [vmem:[%s10331_s14 + $0x1f30] sm:$0xff]  ;;  %v1334_v52 = vld [vmem:[%s10331_s14 + $0x1f18] sm:$0xff] }
 0x3e8   : > { %7536 = vmatpush1.bf16.msra.mxu0 %v9708_v4  ;;  %7880 = vmatpush1.bf16.msra.mxu1 %v9710_v44  ;;  %v1290_v4 = vld [vmem:[%s10331_s14 + $0x1db8] sm:$0xff]  ;;  %v9772_v44 = vcombine.low %v1277_v53, %v1281_v54  ;;  %v1341_v54 = vld [vmem:[%s10331_s14 + $0x1f50] sm:$0xff] }
 0x3e9   : > { %7537 = vmatprep.subr.bf16.mxu0 %v9717_v46  ;;  %7881 = vmatprep.subr.bf16.mxu1 %v9719_v5  ;;  %v9774_v46 = vcombine.low %v1278_v55, %v1282_v21  ;;  %v9781_v5 = vcombine.high %v1285_v2, %v1289_v3  ;;  %v9783_v8 = vcombine.high %v1286_v18, %v1290_v4  ;;  %v1345_v55 = vld [vmem:[%s10331_s14 + $0x1f70] sm:$0xff]  ;;  %v1342_v21 = vld [vmem:[%s10331_s14 + $0x1f58] sm:$0xff] }
 0x3ec   : > { %7538 = vmatpush1.bf16.msra.mxu0 %v9716_v12  ;;  %7882 = vmatpush1.bf16.msra.mxu1 %v9718_v13  ;;  %v1298_v12 = vld [vmem:[%s10331_s14 + $0x1df8] sm:$0xff]  ;;  %v9780_v13 = vcombine.low %v1285_v2, %v1289_v3  ;;  %v1349_v3 = vld [vmem:[%s10331_s14 + $0x1f90] sm:$0xff] }
 0x3ed   : > { %7539 = vmatprep.subr.bf16.mxu0 %v9725_v19  ;;  %7883 = vmatprep.subr.bf16.mxu1 %v9727_v35  ;;  %v9782_v19 = vcombine.low %v1286_v18, %v1290_v4  ;;  %v9789_v35 = vcombine.high %v1293_v9, %v1297_v11  ;;  %v9791_v14 = vcombine.high %v1294_v10, %v1298_v12  ;;  %v1353_v18 = vld [vmem:[%s10331_s14 + $0x1fb0] sm:$0xff]  ;;  %v1350_v4 = vld [vmem:[%s10331_s14 + $0x1f98] sm:$0xff] }
 0x3f0   : > { %7540 = vmatpush1.bf16.msra.mxu0 %v9724_v24  ;;  %7884 = vmatpush1.bf16.msra.mxu1 %v9726_v25  ;;  %v1306_v24 = vld [vmem:[%s10331_s14 + $0x1e38] sm:$0xff]  ;;  %v9788_v25 = vcombine.low %v1293_v9, %v1297_v11  ;;  %v1357_v11 = vld [vmem:[%s10331_s14 + $0x1fd0] sm:$0xff] }
 0x3f1   : > { %7552 = vmatprep.subr.bf16.mxu0 %v9733_v26  ;;  %7896 = vmatprep.subr.bf16.mxu1 %v9735_v63  ;;  %v9790_v26 = vcombine.low %v1294_v10, %v1298_v12  ;;  %v9797_v63 = vcombine.high %v1301_v15, %v1305_v17  ;;  %v9799_v27 = vcombine.high %v1302_v23, %v1306_v24  ;;  %v1361_v10 = vld [vmem:[%s10331_s14 + $0x1ff0] sm:$0xff]  ;;  %v1358_v12 = vld [vmem:[%s10331_s14 + $0x1fd8] sm:$0xff] }
 0x3f3   : > { %7542 = vmatmul.mubr.bf16.vlgmr.msra.gmra.mrb[4].mxu0 %v10913_v56  ;;  %7886 = vmatmul.mubr.bf16.vlgmr.msra.gmra.mrb[4].mxu1 %v10913_v56  ;;  %v9748_v56 = vcombine.low %v1253_v31, %v1257_v33  ;;  %v1317_v33 = vld [vmem:[%s10331_s14 + $0x1e90] sm:$0xff] }
 0x3f4   : > { %7553 = vmatpush1.bf16.msra.mxu0 %v9732_v48  ;;  %7897 = vmatpush1.bf16.msra.mxu1 %v9734_v29  ;;  %v1314_v48 = vld [vmem:[%s10331_s14 + $0x1e78] sm:$0xff]  ;;  %v9796_v29 = vcombine.low %v1301_v15, %v1305_v17  ;;  %v9852_v17 = vcombine.low %v1357_v11, %v1361_v10 }
 0x3f5   : > { %7554 = vmatprep.subr.bf16.mxu0 %v9741_v60  ;;  %7898 = vmatprep.subr.bf16.mxu1 %v9743_v30  ;;  %v9798_v60 = vcombine.low %v1302_v23, %v1306_v24  ;;  %v9805_v30 = vcombine.high %v1309_v50, %v1313_v62  ;;  %v9807_v31 = vcombine.high %v1310_v28, %v1314_v48  ;;  %v311_v24 = vld [vmem:[#allocation2 + $0x20] sm:$0xff] }
 0x3f6   : > { %7584 = vmatprep.mubr.bf16.mxu0 %v10926_v20  ;;  %7928 = vmatprep.mubr.bf16.mxu1 %v10926_v20  ;;  %v9758_v20 = vcombine.low %v1262_v6, %v1266_v41  ;;  %v1329_v6 = vld [vmem:[%s10331_s14 + $0x1ef0] sm:$0xff]  ;;  %v1326_v41 = vld [vmem:[%s10331_s14 + $0x1ed8] sm:$0xff] }
 0x3f8   : > { %7555 = vmatpush1.bf16.msra.mxu0 %v9740_v32  ;;  %7899 = vmatpush1.bf16.msra.mxu1 %v9742_v22  ;;  %v1322_v32 = vld [vmem:[%s10331_s14 + $0x1eb8] sm:$0xff]  ;;  %v9804_v22 = vcombine.low %v1309_v50, %v1313_v62  ;;  %v319_v50 = vld [vmem:[#allocation2 + $0x60] sm:$0xff] }
 0x3f9   : > { %7556 = vmatprep.subr.bf16.mxu0 %v9749_v16  ;;  %7900 = vmatprep.subr.bf16.mxu1 %v9751_v38  ;;  %v9806_v16 = vcombine.low %v1310_v28, %v1314_v48  ;;  %v9813_v38 = vcombine.high %v1317_v33, %v1321_v36  ;;  %v9815_v40 = vcombine.high %v1318_v37, %v1322_v32 }
 0x3fc   : > { %7557 = vmatpush1.bf16.msra.mxu0 %v9748_v56  ;;  %7901 = vmatpush1.bf16.msra.mxu1 %v9750_v42  ;;  %v1330_v56 = vld [vmem:[%s10331_s14 + $0x1ef8] sm:$0xff]  ;;  %v9812_v42 = vcombine.low %v1317_v33, %v1321_v36 }
 0x3fd   : > { %7558 = vmatprep.subr.bf16.mxu0 %v9757_v43  ;;  %7902 = vmatprep.subr.bf16.mxu1 %v9759_v45  ;;  %v9814_v43 = vcombine.low %v1318_v37, %v1322_v32  ;;  %v9821_v45 = vcombine.high %v1325_v47, %v1329_v6  ;;  %v9823_v51 = vcombine.high %v1326_v41, %v1330_v56  ;;  %v322_v37 = vld [vmem:[#allocation2 + $0x78] sm:$0xff] }
 0x400   : > { %7559 = vmatpush1.bf16.msra.mxu0 %v9756_v58  ;;  %7903 = vmatpush1.bf16.msra.mxu1 %v9758_v20  ;;  %v1338_v58 = vld [vmem:[%s10331_s14 + $0x1f38] sm:$0xff]  ;;  %v9820_v20 = vcombine.low %v1325_v47, %v1329_v6 }
 0x401   : > { %7560 = vmatprep.subr.bf16.mxu0 %v9765_v59  ;;  %7904 = vmatprep.subr.bf16.mxu1 %v9767_v34  ;;  %v9822_v59 = vcombine.low %v1326_v41, %v1330_v56  ;;  %v9829_v34 = vcombine.high %v1333_v49, %v1337_v7  ;;  %v9831_v53 = vcombine.high %v1334_v52, %v1338_v58  ;;  %v10151_v41 = vld [vmem:[%s11774_s3 + $0x40] sm:$0xff] (!%p9856_p10)  }
 0x402   : > { %v10152_v56 = vld [vmem:[%s11774_s3 + $0xc0] sm:$0xff] (!%p9856_p10)  }
 0x404   : > { %7561 = vmatpush1.bf16.msra.mxu0 %v9764_v57  ;;  %7905 = vmatpush1.bf16.msra.mxu1 %v9766_v61  ;;  %v1346_v57 = vld [vmem:[%s10331_s14 + $0x1f78] sm:$0xff]  ;;  %v9828_v61 = vcombine.low %v1333_v49, %v1337_v7  ;;  %v10157_v49 = vld [vmem:[%s11774_s3 + $0x8] sm:$0xff] (!%p9856_p10)  }
 0x405   : > { %7562 = vmatprep.subr.bf16.mxu0 %v9773_v0  ;;  %7906 = vmatprep.subr.bf16.mxu1 %v9775_v1  ;;  %v9830_v0 = vcombine.low %v1334_v52, %v1338_v58  ;;  %v9837_v1 = vcombine.high %v1341_v54, %v1345_v55  ;;  %v9839_v2 = vcombine.high %v1342_v21, %v1346_v57  ;;  %v10158_v7 = vld [vmem:[%s11774_s3 + $0x88] sm:$0xff] (!%p9856_p10)   ;;  %v10159_v52 = vld [vmem:[%s11774_s3 + $0x50] sm:$0xff] (!%p9856_p10)  }
 0x406   : > { %v10160_v58 = vld [vmem:[%s11774_s3 + $0xd0] sm:$0xff] (!%p9856_p10)  }
 0x408   : > { %7563 = vmatpush1.bf16.msra.mxu0 %v9772_v44  ;;  %7907 = vmatpush1.bf16.msra.mxu1 %v9774_v46  ;;  %v1354_v44 = vld [vmem:[%s10331_s14 + $0x1fb8] sm:$0xff]  ;;  %v9836_v46 = vcombine.low %v1341_v54, %v1345_v55 }
 0x409   : > { %7564 = vmatprep.subr.bf16.mxu0 %v9781_v5  ;;  %7908 = vmatprep.subr.bf16.mxu1 %v9783_v8  ;;  %v9838_v5 = vcombine.low %v1342_v21, %v1346_v57  ;;  %v9845_v8 = vcombine.high %v1349_v3, %v1353_v18  ;;  %v9847_v9 = vcombine.high %v1350_v4, %v1354_v44  ;;  %v10165_v54 = vld [vmem:[%s11774_s3 + $0x18] sm:$0xff] (!%p9856_p10)   ;;  %v10167_v21 = vld [vmem:[%s11774_s3 + $0x60] sm:$0xff] (!%p9856_p10)  }
 0x40a   : > { %v10166_v55 = vld [vmem:[%s11774_s3 + $0x98] sm:$0xff] (!%p9856_p10)   ;;  %v10168_v57 = vld [vmem:[%s11774_s3 + $0xe0] sm:$0xff] (!%p9856_p10)  }
 0x40c   : > { %7565 = vmatpush1.bf16.msra.mxu0 %v9780_v13  ;;  %7909 = vmatpush1.bf16.msra.mxu1 %v9782_v19  ;;  %v1362_v13 = vld [vmem:[%s10331_s14 + $0x1ff8] sm:$0xff]  ;;  %v9844_v19 = vcombine.low %v1349_v3, %v1353_v18  ;;  %v10172_v3 = vld [vmem:[%s11774_s3 + $0xe8] sm:$0xff] (!%p9856_p10)  }
 0x40d   : > { %7566 = vmatprep.subr.bf16.mxu0 %v9789_v35  ;;  %7910 = vmatprep.subr.bf16.mxu1 %v9791_v14  ;;  %v9846_v35 = vcombine.low %v1350_v4, %v1354_v44  ;;  %v9853_v14 = vcombine.high %v1357_v11, %v1361_v10  ;;  %v9855_v15 = vcombine.high %v1358_v12, %v1362_v13  ;;  %v10173_v18 = vld [vmem:[%s11774_s3 + $0x28] sm:$0xff] (!%p9856_p10)   ;;  %v10178_v11 = vld [vmem:[%s11774_s3 + $0xb0] sm:$0xff] (!%p9856_p10)  }
 0x40e   : > { %v9854_v23 = vcombine.low %v1358_v12, %v1362_v13  ;;  %v10174_v44 = vld [vmem:[%s11774_s3 + $0xa8] sm:$0xff] (!%p9856_p10)   ;;  %v10179_v12 = vld [vmem:[%s11774_s3 + $0x78] sm:$0xff] (!%p9856_p10)  }
 0x410   : > { %7567 = vmatpush1.bf16.msra.mxu0 %v9788_v25  ;;  %7911 = vmatpush1.bf16.msra.mxu1 %v9790_v26  ;;  %v313_v25 = vld [vmem:[#allocation2 + $0x30] sm:$0xff]  ;;  %v312_v26 = vld [vmem:[#allocation2 + $0x28] sm:$0xff] }
 0x411   : > { %7568 = vmatprep.subr.bf16.mxu0 %v9797_v63  ;;  %7912 = vmatprep.subr.bf16.mxu1 %v9799_v27  ;;  %v314_v27 = vld [vmem:[#allocation2 + $0x38] sm:$0xff] }
 0x414   : > { %7569 = vmatpush1.bf16.msra.mxu0 %v9796_v29  ;;  %7913 = vmatpush1.bf16.msra.mxu1 %v9798_v60  ;;  %v321_v29 = vld [vmem:[#allocation2 + $0x70] sm:$0xff]  ;;  %v320_v60 = vld [vmem:[#allocation2 + $0x68] sm:$0xff] }
 0x415   : > { %7570 = vmatprep.subr.bf16.mxu0 %v9805_v30  ;;  %7914 = vmatprep.subr.bf16.mxu1 %v9807_v31 }
 0x418   : > { %7571 = vmatpush1.bf16.msra.mxu0 %v9804_v22  ;;  %7915 = vmatpush1.bf16.msra.mxu1 %v9806_v16 }
 0x419   : > { %7572 = vmatprep.subr.bf16.mxu0 %v9813_v38  ;;  %7916 = vmatprep.subr.bf16.mxu1 %v9815_v40 }
 0x41c   : > { %7573 = vmatpush1.bf16.msra.mxu0 %v9812_v42  ;;  %7917 = vmatpush1.bf16.msra.mxu1 %v9814_v43  ;;  %v10153_v42 = vld [vmem:[%s11774_s3] sm:$0xff] (!%p9856_p10)  }
 0x41d   : > { %7574 = vmatprep.subr.bf16.mxu0 %v9821_v45  ;;  %7918 = vmatprep.subr.bf16.mxu1 %v9823_v51  ;;  %v10154_v43 = vld [vmem:[%s11774_s3 + $0x80] sm:$0xff] (!%p9856_p10)   ;;  %v10155_v45 = vld [vmem:[%s11774_s3 + $0x48] sm:$0xff] (!%p9856_p10)  }
 0x41e   : > { %v10156_v51 = vld [vmem:[%s11774_s3 + $0xc8] sm:$0xff] (!%p9856_p10)  }
 0x420   : > { %7575 = vmatpush1.bf16.msra.mxu0 %v9820_v20  ;;  %7919 = vmatpush1.bf16.msra.mxu1 %v9822_v59  ;;  %v10161_v20 = vld [vmem:[%s11774_s3 + $0x10] sm:$0xff] (!%p9856_p10)  }
 0x421   : > { %7576 = vmatprep.subr.bf16.mxu0 %v9829_v34  ;;  %7920 = vmatprep.subr.bf16.mxu1 %v9831_v53  ;;  %v10162_v59 = vld [vmem:[%s11774_s3 + $0x90] sm:$0xff] (!%p9856_p10)   ;;  %v10163_v34 = vld [vmem:[%s11774_s3 + $0x58] sm:$0xff] (!%p9856_p10)  }
 0x422   : > { %v10164_v53 = vld [vmem:[%s11774_s3 + $0xd8] sm:$0xff] (!%p9856_p10)  }
 0x424   : > { %7577 = vmatpush1.bf16.msra.mxu0 %v9828_v61  ;;  %7921 = vmatpush1.bf16.msra.mxu1 %v9830_v0  ;;  %v10169_v61 = vld [vmem:[%s11774_s3 + $0x20] sm:$0xff] (!%p9856_p10)   ;;  %v7993_v0 = vlaneseq (!%p9856_p10) }
 0x425   : > { %7578 = vmatprep.subr.bf16.mxu0 %v9837_v1  ;;  %7922 = vmatprep.subr.bf16.mxu1 %v9839_v2  ;;  %v10170_v1 = vld [vmem:[%s11774_s3 + $0xa0] sm:$0xff] (!%p9856_p10)   ;;  %v10171_v2 = vld [vmem:[%s11774_s3 + $0x68] sm:$0xff] (!%p9856_p10)  }
 0x426   : > { %v11606_v4 = vshrl.u32 (!%p9856_p10), %v7993_v0, 7  ;;  %v10195_v0 = vld [vmem:[%s11774_s3 + $0x158] sm:$0xff] (!%p9856_p10)  }
 0x428   : > { %7579 = vmatpush1.bf16.msra.mxu0 %v9836_v46  ;;  %7923 = vmatpush1.bf16.msra.mxu1 %v9838_v5  ;;  %v10175_v46 = vld [vmem:[%s11774_s3 + $0x70] sm:$0xff] (!%p9856_p10)   ;;  %v8007_v10 = vsub.s32 (!%p9856_p10), 3, %v11606_v4  ;;  %v7995_v13 = vsub.s32 (!%p9856_p10), 0, %v11606_v4 }
 0x429   : > { %7580 = vmatprep.subr.bf16.mxu0 %v9845_v8  ;;  %7924 = vmatprep.subr.bf16.mxu1 %v9847_v9  ;;  %v10176_v5 = vld [vmem:[%s11774_s3 + $0xf0] sm:$0xff] (!%p9856_p10)   ;;  %v7999_v9 = vsub.s32 (!%p9856_p10), 1, %v11606_v4 }
 0x42a   : > { %v10177_v8 = vld [vmem:[%s11774_s3 + $0x30] sm:$0xff] (!%p9856_p10)  }
 0x42c   : > { %7581 = vmatpush1.bf16.msra.mxu0 %v9844_v19  ;;  %7925 = vmatpush1.bf16.msra.mxu1 %v9846_v35  ;;  %v10180_v19 = vld [vmem:[%s11774_s3 + $0xf8] sm:$0xff] (!%p9856_p10)   ;;  %v8003_v35 = vsub.s32 (!%p9856_p10), 2, %v11606_v4 }
 0x42d   : > { %7582 = vmatprep.subr.bf16.mxu0 %v9853_v14  ;;  %7926 = vmatprep.subr.bf16.mxu1 %v9855_v15  ;;  %v10181_v14 = vld [vmem:[%s11774_s3 + $0x38] sm:$0xff] (!%p9856_p10)  }
 0x42e   : > { %v10182_v15 = vld [vmem:[%s11774_s3 + $0xb8] sm:$0xff] (!%p9856_p10)  }
 0x430   : > { %7583 = vmatpush1.bf16.msra.mxu0 %v9852_v17  ;;  %7927 = vmatpush1.bf16.msra.mxu1 %v9854_v23  ;;  %v7976_v17 = vld [vmem:[#allocation2 + $0x8] sm:$0xff] (!%p9856_p10) }
 0x431   : > { %9926 = vmatprep.subr.bf16.mxu0 (!%p9856_p10), %v10151_v41  ;;  %9948 = vmatprep.subr.bf16.mxu1 (!%p9856_p10), %v10152_v56  ;;  %v7984_v23 = vld [vmem:[#allocation2 + $0x48] sm:$0xff] (!%p9856_p10) }
 0x433   : > { %7585 = vmatmul.mubr.bf16.vlgmr.msra.gmra.mrb[4].mxu0 %v10994_v39  ;;  %7929 = vmatmul.mubr.bf16.vlgmr.msra.gmra.mrb[4].mxu1 %v10994_v39 }
 0x434   : > { %9927 = vmatpush3.bf16.msra.mxu0 (!%p9856_p10), %v10153_v42  ;;  %9949 = vmatpush3.bf16.msra.mxu1 (!%p9856_p10), %v10154_v43 }
 0x435   : > { %9928 = vmatprep.subr.bf16.mxu0 (!%p9856_p10), %v10155_v45  ;;  %9950 = vmatprep.subr.bf16.mxu1 (!%p9856_p10), %v10156_v51 }
 0x438   : > { %9929 = vmatpush3.bf16.msra.mxu0 (!%p9856_p10), %v10157_v49  ;;  %9951 = vmatpush3.bf16.msra.mxu1 (!%p9856_p10), %v10158_v7  ;;  %v10185_v7 = vld [vmem:[%s11774_s3 + $0x100] sm:$0xff] (!%p9856_p10)  }
 0x439   : > { %9930 = vmatprep.subr.bf16.mxu0 (!%p9856_p10), %v10159_v52  ;;  %9952 = vmatprep.subr.bf16.mxu1 (!%p9856_p10), %v10160_v58 }
 0x43c   : > { %9931 = vmatpush3.bf16.msra.mxu0 (!%p9856_p10), %v10161_v20  ;;  %9953 = vmatpush3.bf16.msra.mxu1 (!%p9856_p10), %v10162_v59  ;;  %v10186_v20 = vld [vmem:[%s11774_s3 + $0x180] sm:$0xff] (!%p9856_p10)   ;;  %v10187_v59 = vld [vmem:[%s11774_s3 + $0x148] sm:$0xff] (!%p9856_p10)  }
 0x43d   : > { %9932 = vmatprep.subr.bf16.mxu0 (!%p9856_p10), %v10163_v34  ;;  %9954 = vmatprep.subr.bf16.mxu1 (!%p9856_p10), %v10164_v53  ;;  %v10188_v34 = vld [vmem:[%s11774_s3 + $0x1c8] sm:$0xff] (!%p9856_p10)  }
 0x43e   : > { %v10189_v53 = vld [vmem:[%s11774_s3 + $0x108] sm:$0xff] (!%p9856_p10)  }
 0x440   : > { %9933 = vmatpush3.bf16.msra.mxu0 (!%p9856_p10), %v10165_v54  ;;  %9955 = vmatpush3.bf16.msra.mxu1 (!%p9856_p10), %v10166_v55  ;;  %v10190_v54 = vld [vmem:[%s11774_s3 + $0x188] sm:$0xff] (!%p9856_p10)   ;;  %v10191_v55 = vld [vmem:[%s11774_s3 + $0x150] sm:$0xff] (!%p9856_p10)  }
 0x441   : > { %9934 = vmatprep.subr.bf16.mxu0 (!%p9856_p10), %v10167_v21  ;;  %9956 = vmatprep.subr.bf16.mxu1 (!%p9856_p10), %v10168_v57  ;;  %v10192_v21 = vld [vmem:[%s11774_s3 + $0x1d0] sm:$0xff] (!%p9856_p10)  }
 0x442   : > { %v10193_v57 = vld [vmem:[%s11774_s3 + $0x110] sm:$0xff] (!%p9856_p10)  }
 0x444   : > { %9935 = vmatpush3.bf16.msra.mxu0 (!%p9856_p10), %v10169_v61  ;;  %9957 = vmatpush3.bf16.msra.mxu1 (!%p9856_p10), %v10170_v1  ;;  %v10194_v61 = vld [vmem:[%s11774_s3 + $0x190] sm:$0xff] (!%p9856_p10)   ;;  %v10196_v1 = vld [vmem:[%s11774_s3 + $0x1d8] sm:$0xff] (!%p9856_p10)  }
 0x445   : > { %9936 = vmatprep.subr.bf16.mxu0 (!%p9856_p10), %v10171_v2  ;;  %9958 = vmatprep.subr.bf16.mxu1 (!%p9856_p10), %v10172_v3  ;;  %v10197_v2 = vld [vmem:[%s11774_s3 + $0x118] sm:$0xff] (!%p9856_p10)  }
 0x446   : > { %v10198_v3 = vld [vmem:[%s11774_s3 + $0x198] sm:$0xff] (!%p9856_p10)  }
 0x448   : > { %9937 = vmatpush3.bf16.msra.mxu0 (!%p9856_p10), %v10173_v18  ;;  %9959 = vmatpush3.bf16.msra.mxu1 (!%p9856_p10), %v10174_v44  ;;  %v10199_v18 = vld [vmem:[%s11774_s3 + $0x160] sm:$0xff] (!%p9856_p10)  }
 0x449   : > { %9938 = vmatprep.subr.bf16.mxu0 (!%p9856_p10), %v10175_v46  ;;  %9960 = vmatprep.subr.bf16.mxu1 (!%p9856_p10), %v10176_v5  ;;  %v10200_v44 = vld [vmem:[%s11774_s3 + $0x1e0] sm:$0xff] (!%p9856_p10)  }
 0x44a   : > { %v10201_v46 = vld [vmem:[%s11774_s3 + $0x120] sm:$0xff] (!%p9856_p10)  }
 0x44b   : > { %v10202_v5 = vld [vmem:[%s11774_s3 + $0x1a0] sm:$0xff] (!%p9856_p10)  }
 0x44c   : > { %9939 = vmatpush3.bf16.msra.mxu0 (!%p9856_p10), %v10177_v8  ;;  %9961 = vmatpush3.bf16.msra.mxu1 (!%p9856_p10), %v10178_v11  ;;  %v10203_v8 = vld [vmem:[%s11774_s3 + $0x168] sm:$0xff] (!%p9856_p10)  }
 0x44d   : > { %9940 = vmatprep.subr.bf16.mxu0 (!%p9856_p10), %v10179_v12  ;;  %9962 = vmatprep.subr.bf16.mxu1 (!%p9856_p10), %v10180_v19  ;;  %v10205_v11 = vld [vmem:[%s11774_s3 + $0x128] sm:$0xff] (!%p9856_p10)   ;;  %v8015_v12 = vsub.s32 (!%p9856_p10), 5, %v11606_v4  ;;  %v8023_v19 = vsub.s32 (!%p9856_p10), 7, %v11606_v4 }
 0x450   : > { %9941 = vmatpush3.bf16.msra.mxu0 (!%p9856_p10), %v10181_v14  ;;  %9963 = vmatpush3.bf16.msra.mxu1 (!%p9856_p10), %v10182_v15  ;;  %v8011_v14 = vsub.s32 (!%p9856_p10), 4, %v11606_v4  ;;  %v10209_v15 = vld [vmem:[%s11774_s3 + $0x130] sm:$0xff] (!%p9856_p10)  }
 0x506   : > { %v7586_v63 = vpop.f32.mrb[4].mxu0  ;;  %v7930_v28 = vpop.f32.mrb[4].mxu1  ;;  %7974 = sbr.rel (%p9856_p10) target bundleno = 1552 (0x610), region = 71 }
 0x507   : > { %v7943_v62 = vadd.f32 %v7586_v63, %v311_v24  ;;  %v7588_v48 = vpop.f32.mrb[5].mxu0  ;;  %v7945_v30 = vadd.f32 %v7930_v28, %v313_v25  ;;  %v7932_v33 = vpop.f32.mrb[5].mxu1  ;;  %v11642_v24 = vld [vmem:[%s11773_s2] sm:$0xff] (!%p9856_p10)  ;;  %v7986_v63 = vld [vmem:[#allocation2 + $0x58] sm:$0xff] (!%p9856_p10) }
 0x508   : > { %v7944_v31 = vadd.f32 %v7588_v48, %v312_v26  ;;  %v7590_v36 = vpop.f32.mrb[6].mxu0  ;;  %v7946_v32 = vadd.f32 %v7932_v33, %v314_v27  ;;  %v7934_v39 = vpop.f32.mrb[6].mxu1  ;;  %v8000_v25 = vrot.slane (!%p9856_p10), %v11642_v24, %v7999_v9  ;;  %v7978_v26 = vld [vmem:[#allocation2 + $0x18] sm:$0xff] (!%p9856_p10)  ;;  %v8008_v27 = vrot.slane (!%p9856_p10), %v11642_v24, %v8007_v10  ;;  %v7983_v48 = vld [vmem:[#allocation2 + $0x40] sm:$0xff] (!%p9856_p10)  ;;  %v10204_v9 = vld [vmem:[%s11774_s3 + $0x1e8] sm:$0xff] (!%p9856_p10)  }
 0x509   : > { %7959 = vst [vmem:[#allocation2 + $0x20] sm:$0xff] %v7943_v62  ;;  %v7951_v22 = vadd.f32 %v7590_v36, %v319_v50  ;;  %v7592_v16 = vpop.f32.mrb[7].mxu0  ;;  %7961 = vst [vmem:[#allocation2 + $0x30] sm:$0xff] %v7945_v30  ;;  %v7953_v38 = vadd.f32 %v7934_v39, %v321_v29  ;;  %v7936_v47 = vpop.f32.mrb[7].mxu1  ;;  %v7975_v50 = vld [vmem:[#allocation2] sm:$0xff] (!%p9856_p10)  ;;  %v7996_v62 = vrot.slane (!%p9856_p10), %v11642_v24, %v7995_v13  ;;  %v7977_v29 = vld [vmem:[#allocation2 + $0x10] sm:$0xff] (!%p9856_p10) }
 0x50a   : > { %7960 = vst [vmem:[#allocation2 + $0x28] sm:$0xff] %v7944_v31  ;;  %v7952_v40 = vadd.f32 %v7592_v16, %v320_v60  ;;  %7962 = vst [vmem:[#allocation2 + $0x38] sm:$0xff] %v7946_v32  ;;  %v7954_v6 = vadd.f32 %v7936_v47, %v322_v37  ;;  %v8004_v28 = vrot.slane (!%p9856_p10), %v11642_v24, %v8003_v35  ;;  %v7985_v60 = vld [vmem:[#allocation2 + $0x50] sm:$0xff] (!%p9856_p10)  ;;  %v10183_v37 = vld [vmem:[%s11774_s3 + $0x140] sm:$0xff] (!%p9856_p10)  }
 0x50b   : > { %7967 = vst [vmem:[#allocation2 + $0x60] sm:$0xff] %v7951_v22  ;;  %7969 = vst [vmem:[#allocation2 + $0x70] sm:$0xff] %v7953_v38  ;;  %v8034_v30 = vadd.f32 (!%p9856_p10), %v8000_v25, %v7976_v17  ;;  %v8042_v31 = vadd.f32 (!%p9856_p10), %v8000_v25, %v7984_v23  ;;  %v8036_v33 = vadd.f32 (!%p9856_p10), %v8008_v27, %v7978_v26  ;;  %v10184_v38 = vld [vmem:[%s11774_s3 + $0x1c0] sm:$0xff] (!%p9856_p10)   ;;  %9970 = vmatprep.subr.bf16.mxu0 (!%p9856_p10), %v10183_v37  ;;  %v10206_v10 = vld [vmem:[%s11774_s3 + $0x1a8] sm:$0xff] (!%p9856_p10)  }
 0x50c   : > { %7968 = vst [vmem:[#allocation2 + $0x68] sm:$0xff] %v7952_v40  ;;  %7970 = vst [vmem:[#allocation2 + $0x78] sm:$0xff] %v7954_v6  ;;  %v8044_v36 = vadd.f32 (!%p9856_p10), %v8008_v27, %v7986_v63  ;;  %v8033_v32 = vadd.f32 (!%p9856_p10), %v7996_v62, %v7975_v50  ;;  %v8041_v22 = vadd.f32 (!%p9856_p10), %v7996_v62, %v7983_v48  ;;  %9992 = vmatprep.subr.bf16.mxu1 (!%p9856_p10), %v10184_v38  ;;  %v10207_v13 = vld [vmem:[%s11774_s3 + $0x170] sm:$0xff] (!%p9856_p10)   ;;  %v10211_v25 = vld [vmem:[%s11774_s3 + $0x178] sm:$0xff] (!%p9856_p10)  }
 0x50d   : > { %v8035_v39 = vadd.f32 %v8004_v28, %v7977_v29  ;;  %v8043_v16 = vadd.f32 %v8004_v28, %v7985_v60  ;;  %v8050_v40 = vmax.f32 %v8034_v30, 0.0  ;;  %v8058_v47 = vmax.f32 %v8042_v31, 0.0  ;;  %v10208_v35 = vld [vmem:[%s11774_s3 + $0x1f0] sm:$0xff]   ;;  %v10212_v63 = vld [vmem:[%s11774_s3 + $0x1f8] sm:$0xff]  }
 0x50e   : > { %v8052_v6 = vmax.f32 %v8036_v33, 0.0  ;;  %v8060_v41 = vmax.f32 %v8044_v36, 0.0  ;;  %v8049_v56 = vmax.f32 %v8033_v32, 0.0  ;;  %v8057_v42 = vmax.f32 %v8041_v22, 0.0  ;;  %v10210_v23 = vld [vmem:[%s11774_s3 + $0x1b0] sm:$0xff]   ;;  %v10213_v50 = vld [vmem:[%s11774_s3 + $0x138] sm:$0xff]  }
 0x50f   : > { %v8051_v43 = vmax.f32 %v8035_v39, 0.0  ;;  %v8059_v45 = vmax.f32 %v8043_v16, 0.0  ;;  %v8066_v51 = vpack.c.bf16 %v8058_v47, %v8050_v40  ;;  %v8019_v17 = vsub.s32 6, %v11606_v4  ;;  %v10214_v28 = vld [vmem:[%s11774_s3 + $0x1b8] sm:$0xff]  }
 0x510   : > { %v8068_v49 = vpack.c.bf16 %v8060_v41, %v8052_v6  ;;  %v8065_v52 = vpack.c.bf16 %v8057_v42, %v8049_v56  ;;  %v8016_v26 = vrot.slane %v11642_v24, %v8015_v12  ;;  %v8024_v27 = vrot.slane %v11642_v24, %v8023_v19  ;;  %v7979_v36 = vld [vmem:[#allocation2 + $0x20] sm:$0xff]  ;;  %v7981_v16 = vld [vmem:[#allocation2 + $0x30] sm:$0xff] }
 0x511   : > { %v8067_v58 = vpack.c.bf16 %v8059_v45, %v8051_v43  ;;  %8624 = vmatprep.mubr.bf16.mxu0 %v8066_v51  ;;  %v8012_v4 = vrot.slane %v11642_v24, %v8011_v14  ;;  %v8020_v62 = vrot.slane %v11642_v24, %v8019_v17  ;;  %v7980_v48 = vld [vmem:[#allocation2 + $0x28] sm:$0xff]  ;;  %v7982_v31 = vld [vmem:[#allocation2 + $0x38] sm:$0xff] }
 0x512   : > { %8665 = vmatprep.mubr.bf16.mxu1 %v8068_v49  ;;  %8625 = vmatmul.mubr.bf16.vlgmr.msra.gmra.mrb[0].mxu0 %v8065_v52  ;;  %v8038_v60 = vadd.f32 %v8016_v26, %v7980_v48  ;;  %v8040_v37 = vadd.f32 %v8024_v27, %v7982_v31  ;;  %v7987_v22 = vld [vmem:[#allocation2 + $0x60] sm:$0xff]  ;;  %v7989_v38 = vld [vmem:[#allocation2 + $0x70] sm:$0xff] }
 0x513   : > { %8666 = vmatmul.mubr.bf16.vlgmr.msra.gmra.mrb[0].mxu1 %v8067_v58  ;;  %9971 = vmatpush3.bf16.msra.mxu0 %v10185_v7  ;;  %v7988_v29 = vld [vmem:[#allocation2 + $0x68] sm:$0xff]  ;;  %v7990_v33 = vld [vmem:[#allocation2 + $0x78] sm:$0xff]  ;;  %v8037_v39 = vadd.f32 %v8012_v4, %v7979_v36  ;;  %v8045_v47 = vadd.f32 %v8012_v4, %v7987_v22  ;;  %v8039_v6 = vadd.f32 %v8020_v62, %v7981_v16 }
 0x514   : > { %9993 = vmatpush3.bf16.msra.mxu1 %v10186_v20  ;;  %9972 = vmatprep.subr.bf16.mxu0 %v10187_v59  ;;  %v8046_v30 = vadd.f32 %v8016_v26, %v7988_v29  ;;  %v8048_v32 = vadd.f32 %v8024_v27, %v7990_v33  ;;  %v8054_v24 = vmax.f32 %v8038_v60, 0.0  ;;  %v8056_v41 = vmax.f32 %v8040_v37, 0.0 }
 0x515   : > { %9994 = vmatprep.subr.bf16.mxu1 %v10188_v34  ;;  %v8053_v42 = vmax.f32 %v8037_v39, 0.0  ;;  %v8047_v43 = vadd.f32 %v8020_v62, %v7989_v38  ;;  %v8061_v51 = vmax.f32 %v8045_v47, 0.0  ;;  %v8055_v49 = vmax.f32 %v8039_v6, 0.0 }
 0x516   : > { %v8062_v40 = vmax.f32 %v8046_v30, 0.0  ;;  %v8064_v56 = vmax.f32 %v8048_v32, 0.0 }
 0x517   : > { %9973 = vmatpush3.bf16.msra.mxu0 %v10189_v53  ;;  %v8063_v52 = vmax.f32 %v8047_v43, 0.0  ;;  %v8069_v58 = vpack.c.bf16 %v8061_v51, %v8053_v42  ;;  %v9857_v53 = vld [vmem:[%s11775_s4] ss:$0 sm:$0xff] }
 0x518   : > { %9995 = vmatpush3.bf16.msra.mxu1 %v10190_v54  ;;  %9974 = vmatprep.subr.bf16.mxu0 %v10191_v55  ;;  %v8070_v45 = vpack.c.bf16 %v8062_v40, %v8054_v24  ;;  %v8072_v7 = vpack.c.bf16 %v8064_v56, %v8056_v41 }
 0x519   : > { %9996 = vmatprep.subr.bf16.mxu1 %v10192_v21  ;;  %v8071_v20 = vpack.c.bf16 %v8063_v52, %v8055_v49 }
 0x51a   : > { %8706 = vmatprep.mubr.bf16.mxu0 %v8070_v45  ;;  %8747 = vmatprep.mubr.bf16.mxu1 %v8072_v7 }
 0x51b   : > { %9975 = vmatpush3.bf16.msra.mxu0 %v10193_v57 }
 0x51c   : > { %9997 = vmatpush3.bf16.msra.mxu1 %v10194_v61  ;;  %9976 = vmatprep.subr.bf16.mxu0 %v10195_v0 }
 0x51d   : > { %9998 = vmatprep.subr.bf16.mxu1 %v10196_v1 }
 0x51f   : > { %9977 = vmatpush3.bf16.msra.mxu0 %v10197_v2 }
 0x520   : > { %9999 = vmatpush3.bf16.msra.mxu1 %v10198_v3  ;;  %9978 = vmatprep.subr.bf16.mxu0 %v10199_v18 }
 0x521   : > { %10000 = vmatprep.subr.bf16.mxu1 %v10200_v44 }
 0x523   : > { %9979 = vmatpush3.bf16.msra.mxu0 %v10201_v46 }
 0x524   : > { %10001 = vmatpush3.bf16.msra.mxu1 %v10202_v5  ;;  %9980 = vmatprep.subr.bf16.mxu0 %v10203_v8 }
 0x525   : > { %10002 = vmatprep.subr.bf16.mxu1 %v10204_v9 }
 0x527   : > { %9981 = vmatpush3.bf16.msra.mxu0 %v10205_v11 }
 0x528   : > { %10003 = vmatpush3.bf16.msra.mxu1 %v10206_v10  ;;  %9982 = vmatprep.subr.bf16.mxu0 %v10207_v13 }
 0x529   : > { %10004 = vmatprep.subr.bf16.mxu1 %v10208_v35 }
 0x52b   : > { %9983 = vmatpush3.bf16.msra.mxu0 %v10209_v15 }
 0x52c   : > { %10005 = vmatpush3.bf16.msra.mxu1 %v10210_v23  ;;  %9984 = vmatprep.subr.bf16.mxu0 %v10211_v25 }
 0x52d   : > { %10006 = vmatprep.subr.bf16.mxu1 %v10212_v63 }
 0x52f   : > { %9985 = vmatpush3.bf16.msra.mxu0 %v10213_v50 }
 0x530   : > { %10007 = vmatpush3.bf16.msra.mxu1 %v10214_v28 }
 0x532   : > { %8707 = vmatmul.mubr.bf16.vlgmr.msra.gmra.mrb[4].mxu0 %v8069_v58 }
 0x533   : > { %8748 = vmatmul.mubr.bf16.vlgmr.msra.gmra.mrb[4].mxu1 %v8071_v20 }
 0x5e5   : > { %v9942_v59 = vpop.f32.mrb[0].mxu0 }
 0x5e6   : > { %v9964_v34 = vpop.f32.mrb[0].mxu1  ;;  %v9943_v54 = vpop.f32.mrb[1].mxu0 }
 0x5e7   : > { %v9965_v55 = vpop.f32.mrb[1].mxu1  ;;  %v9944_v21 = vadd.f32 %v9943_v54, %v9942_v59  ;;  %v9945_v61 = vpop.f32.mrb[2].mxu0 }
 0x5e8   : > { %v9966_v57 = vadd.f32 %v9965_v55, %v9964_v34  ;;  %v9967_v0 = vpop.f32.mrb[2].mxu1  ;;  %v9946_v1 = vpop.f32.mrb[3].mxu0 }
 0x5e9   : > { %v9968_v2 = vpop.f32.mrb[3].mxu1  ;;  %v8627_v3 = vadd.f32 %v9944_v21, %v9857_v53  ;;  %v9947_v18 = vadd.f32 %v9946_v1, %v9945_v61 }
 0x5ea   : > { %v9969_v44 = vadd.f32 %v9968_v2, %v9967_v0 }
 0x5eb   : > { %v8668_v46 = vadd.f32 %v9966_v57, %v8627_v3  ;;  %v8630_v5 = vadd.f32 %v9947_v18, %v9857_v53 }
 0x5ed   : > { %v8671_v8 = vadd.f32 %v9969_v44, %v8630_v5 }
 0x605   : > { %v9986_v9 = vpop.f32.mrb[4].mxu0 }
 0x606   : > { %v10008_v11 = vpop.f32.mrb[4].mxu1  ;;  %v9987_v10 = vpop.f32.mrb[5].mxu0 }
 0x607   : > { %v9988_v12 = vadd.f32 %v9987_v10, %v9986_v9  ;;  %v10009_v13 = vpop.f32.mrb[5].mxu1  ;;  %v9989_v19 = vpop.f32.mrb[6].mxu0 }
 0x608   : > { %v10010_v35 = vadd.f32 %v10009_v13, %v10008_v11  ;;  %v10011_v14 = vpop.f32.mrb[6].mxu1  ;;  %v9990_v15 = vpop.f32.mrb[7].mxu0 }
 0x609   : > { %v8709_v17 = vadd.f32 %v9988_v12, %v8668_v46  ;;  %v9991_v23 = vadd.f32 %v9990_v15, %v9989_v19  ;;  %v10012_v25 = vpop.f32.mrb[7].mxu1 }
 0x60a   : > { %v10013_v26 = vadd.f32 %v10012_v25, %v10011_v14 }
 0x60b   : > { %v8750_v63 = vadd.f32 %v10010_v35, %v8709_v17  ;;  %v8712_v27 = vadd.f32 %v9991_v23, %v8671_v8 }
 0x60d   : > { %8756 = vst [vmem:[%s11776_s5] sm:$0xff] %v8750_v63  ;;  %v8753_v4 = vadd.f32 %v10013_v26, %v8712_v27 }
 0x60f   : > { %8757 = vst [vmem:[%s11776_s5 + $0x8] sm:$0xff] %v8753_v4 }
 0x610 PF: > { %p12_p11 = scmp.ge.s32.totalorder %s10289_s22, 4   ;;  %s11777_s18 = smov %s10233_s19 }
 0x611   : > { %s11778_s19 = smov %s10298_s25  ;;  %s11779_s20 = smov %s10289_s22 }
 0x612   :  { %14 = sbr.rel (!%p12_p11) target bundleno = 2 (0x2), region = 105 }

</bundles_post_ra>
